<compile_context>
chip_gen: v6e
topology: v6e:2x2x1
jax: 0.10.0
libtpu: 0.0.40
codegen_flags: <defaults>
</compile_context>

<pallas_src>
import functools
import math

import jax
import jax.numpy as jnp
from jax import lax
from jax.experimental import pallas as pl
from jax.experimental.pallas import tpu as pltpu

_LANE = 128  # lane-dense output width (>= num_classes)


def _head_kernel(x_ref, w1_ref, b1_ref, w2_ref, b2_ref, o_ref, acc_ref, *,
                 H, W, C):
    """One image (one batch element) per grid step.

    x_ref  : (R, C)      bf16  flattened zero-padded image, R = (H+3)*(W+2)
    w1_ref : (9, C, C)   bf16  3x3 conv taps (kh*3+kw, in, out), BN scale folded
    b1_ref : (1, C)      f32   folded BN bias
    w2_ref : (C, 128)    bf16  1x1 conv weights, zero-padded to 128 lanes
    b2_ref : (1, 128)    f32   1x1 conv bias, zero-padded
    o_ref  : (L, 128)    f32   output rows, L = H*(W+2) (junk cols kept)
    acc_ref: (L, C)      f32   VMEM scratch accumulator
    """
    Wp = W + 2
    L = H * Wp

    # 3x3 conv as 9 row-shifted K=C MXU matmuls with f32 accumulation.
    # Tap (kh, kw) of the row-major flattened padded image is the contiguous
    # row window [kh*Wp + kw, kh*Wp + kw + L): no halo DMA, no reshapes.
    for kh in range(3):
        for kw in range(3):
            t = kh * 3 + kw
            start = kh * Wp + kw
            tap = x_ref[start:start + L, :]                       # (L, C) bf16
            part = jnp.dot(tap, w1_ref[t],
                           preferred_element_type=jnp.float32)    # (L, C) f32
            if t == 0:
                acc_ref[...] = part
            else:
                acc_ref[...] += part

    # Folded BatchNorm bias + ReLU.  Dropout(p=0.1) is identity in eval mode.
    # TODO(synk): training-mode dropout (stochastic mask via pltpu.prng_*) and
    # batch-statistics BatchNorm are not implemented.
    y = jnp.maximum(acc_ref[...] + b1_ref[...], 0.0).astype(jnp.bfloat16)

    # 1x1 conv + bias: bf16 MXU operands, f32 accumulation, lane-dense store.
    out = jnp.dot(y, w2_ref[...], preferred_element_type=jnp.float32)
    o_ref[...] = out + b2_ref[...]


def deeplabv3_head(x_nchw, w1_oihw, bn_scale, bn_bias, w2_oihw, b2):
    """DeepLabv3 head forward.  Input/output are NCHW (PyTorch convention)."""
    N, C, H, W = x_nchw.shape
    num_classes = w2_oihw.shape[0]
    assert num_classes <= _LANE

    Wp = W + 2
    L = H * Wp          # rows computed per image (incl. 2 junk cols per row)
    R = (H + 3) * Wp    # rows stored per image (1-px halo + 1 extra tail row)

    # NCHW -> NHWC, cast to bf16 BEFORE padding (halves wrapper HBM traffic),
    # then the 1-px halo (plus one extra bottom zero row so the last tap's
    # contiguous window stays in bounds).  ~1.1-1.3x expansion, not 9x.
    x_nhwc = jnp.transpose(x_nchw.astype(jnp.bfloat16), (0, 2, 3, 1))
    x_pad = jnp.pad(x_nhwc, ((0, 0), (1, 2), (1, 1), (0, 0)))
    x_flat = x_pad.reshape(N, R, C)          # collapses adjacent dims -> free

    # 3x3 weights: OIHW -> (kh, kw, in, out) -> (9, C, C); fold BN scale into
    # the output channels; bf16 MXU operands.
    w1_taps = jnp.transpose(w1_oihw, (2, 3, 1, 0)).reshape(9, C, C)
    w1_taps = (w1_taps * bn_scale[None, None, :]).astype(jnp.bfloat16)
    b1 = bn_bias.reshape(1, C).astype(jnp.float32)

    # 1x1 weights / bias, zero-padded to 128 lanes for full-lane stores.
    w2_io = jnp.transpose(w2_oihw.reshape(num_classes, C)).astype(jnp.bfloat16)
    w2_p = jnp.zeros((C, _LANE), jnp.bfloat16).at[:, :num_classes].set(w2_io)
    b2_p = jnp.zeros((1, _LANE), jnp.float32).at[0, :num_classes].set(
        b2.astype(jnp.float32))

    kernel = functools.partial(_head_kernel, H=H, W=W, C=C)
    out_rows = pl.pallas_call(
        kernel,
        out_shape=jax.ShapeDtypeStruct((N, L, _LANE), jnp.float32),
        grid_spec=pltpu.PrefetchScalarGridSpec(
            num_scalar_prefetch=0,
            grid=(N,),                       # one image per step; keep N even
            in_specs=[
                pl.BlockSpec((None, R, C), lambda n: (n, 0, 0)),
                pl.BlockSpec((9, C, C), lambda n: (0, 0, 0)),
                pl.BlockSpec((1, C), lambda n: (0, 0)),
                pl.BlockSpec((C, _LANE), lambda n: (0, 0)),
                pl.BlockSpec((1, _LANE), lambda n: (0, 0)),
            ],
            out_specs=pl.BlockSpec((None, L, _LANE), lambda n: (n, 0, 0)),
            scratch_shapes=[pltpu.VMEM((L, C), jnp.float32)],
        ),
        compiler_params=pltpu.CompilerParams(
            dimension_semantics=("parallel",),
            vmem_limit_bytes=32 * 1024 * 1024,
        ),
    )(x_flat, w1_taps, b1, w2_p, b2_p)

    # Drop junk columns / padded class lanes, NHWC -> NCHW to match PyTorch.
    out = out_rows.reshape(N, H, Wp, _LANE)[:, :, :W, :num_classes]
    return jnp.transpose(out, (0, 3, 1, 2))


def _reference(x_nchw, w1_oihw, bn_scale, bn_bias, w2_oihw, b2):
    """Pure-JAX reference (NCHW) with the same bf16-operand / f32-accum math."""
    w1_folded = (w1_oihw * bn_scale[:, None, None, None]).astype(jnp.bfloat16)
    y = lax.conv_general_dilated(
        x_nchw.astype(jnp.bfloat16), w1_folded, window_strides=(1, 1),
        padding="SAME", dimension_numbers=("NCHW", "OIHW", "NCHW"),
        preferred_element_type=jnp.float32)
    y = y + bn_bias[None, :, None, None]
    y = jnp.maximum(y, 0.0)
    z = lax.conv_general_dilated(
        y.astype(jnp.bfloat16), w2_oihw.astype(jnp.bfloat16),
        window_strides=(1, 1), padding="VALID",
        dimension_numbers=("NCHW", "OIHW", "NCHW"),
        preferred_element_type=jnp.float32)
    return z + b2[None, :, None, None]


if __name__ == "__main__":
    # Channels fixed at 256 by the module's Conv2d(256, ...); small batch /
    # spatial / num_classes.  N=2 -> even "parallel" grid.
    N, C, H, W = 2, 256, 16, 16
    num_classes = 8

    key = jax.random.PRNGKey(0)
    k_x, k_w1, k_w2, k_b2 = jax.random.split(key, 4)

    x = jax.random.normal(k_x, (N, C, H, W), jnp.float32)

    # kaiming_normal_ (fan_in, gain=sqrt(2)) for both convs.
    w1 = jax.random.normal(k_w1, (C, C, 3, 3), jnp.float32) * math.sqrt(
        2.0 / (C * 3 * 3))
    w2 = jax.random.normal(k_w2, (num_classes, C, 1, 1), jnp.float32) * math.sqrt(
        2.0 / C)
    # Conv2d default bias init: U(-1/sqrt(fan_in), 1/sqrt(fan_in)).
    b2 = jax.random.uniform(k_b2, (num_classes,), jnp.float32,
                            minval=-1.0 / math.sqrt(C),
                            maxval=1.0 / math.sqrt(C))

    # BatchNorm params at init: gamma=1, beta=0, running_mean=0, running_var=1.
    eps = 1e-5
    gamma = jnp.ones((C,), jnp.float32)
    beta = jnp.zeros((C,), jnp.float32)
    running_mean = jnp.zeros((C,), jnp.float32)
    running_var = jnp.ones((C,), jnp.float32)
    bn_scale = gamma / jnp.sqrt(running_var + eps)
    bn_bias = beta - running_mean * bn_scale

    out = jax.block_until_ready(
        deeplabv3_head(x, w1, bn_scale, bn_bias, w2, b2))
    ref = jax.block_until_ready(
        _reference(x, w1, bn_scale, bn_bias, w2, b2))

    assert out.shape == (N, num_classes, H, W), out.shape
    err = float(jnp.max(jnp.abs(out - ref)))
    assert jnp.allclose(out, ref, atol=5e-3, rtol=5e-3), err

    print("KERNEL_OK")
</pallas_src>

<mosaic_0001>
module attributes {stable_mosaic.version = 11 : i64} {
  func.func @_head_kernel(%arg0: i32, %arg1: memref<1x342x256xbf16, #tpu.memory_space<vmem>>, %arg2: memref<9x256x256xbf16, #tpu.memory_space<vmem>>, %arg3: memref<1x256xf32, #tpu.memory_space<vmem>>, %arg4: memref<256x128xbf16, #tpu.memory_space<vmem>>, %arg5: memref<1x128xf32, #tpu.memory_space<vmem>>, %arg6: memref<1x288x128xf32, #tpu.memory_space<vmem>>, %arg7: memref<288x256xf32, #tpu.memory_space<vmem>>) attributes {dimension_semantics = [#tpu.dimension_semantics<parallel>], iteration_bounds = array<i64: 2>, scalar_prefetch = 0 : i64, scratch_operands = 1 : i64, tpu.core_type = #tpu.core_type<tc>, window_params = [{transform_indices = @transform_0, window_bounds = array<i64: 1, 342, 256>}, {pipeline_mode = #tpu.pipeline_mode<synchronous>, transform_indices = @transform_1, window_bounds = array<i64: 9, 256, 256>}, {pipeline_mode = #tpu.pipeline_mode<synchronous>, transform_indices = @transform_2, window_bounds = array<i64: 1, 256>}, {pipeline_mode = #tpu.pipeline_mode<synchronous>, transform_indices = @transform_3, window_bounds = array<i64: 256, 128>}, {pipeline_mode = #tpu.pipeline_mode<synchronous>, transform_indices = @transform_4, window_bounds = array<i64: 1, 128>}, {transform_indices = @transform_5, window_bounds = array<i64: 1, 288, 128>}]} {
    %c0 = arith.constant 0 : index
    %c0_0 = arith.constant 0 : index
    %c0_1 = arith.constant 0 : index
    %0 = vector.load %arg1[%c0, %c0_0, %c0_1] : memref<1x342x256xbf16, #tpu.memory_space<vmem>>, vector<1x288x256xbf16>
    %1 = vector.shape_cast %0 : vector<1x288x256xbf16> to vector<288x256xbf16>
    %c0_2 = arith.constant 0 : index
    %c0_3 = arith.constant 0 : index
    %c0_4 = arith.constant 0 : index
    %2 = vector.load %arg2[%c0_2, %c0_3, %c0_4] : memref<9x256x256xbf16, #tpu.memory_space<vmem>>, vector<1x256x256xbf16>
    %3 = vector.shape_cast %2 : vector<1x256x256xbf16> to vector<256x256xbf16>
    %cst = arith.constant dense<0.000000e+00> : vector<288x256xf32>
    %4 = tpu.matmul %1, %3, %cst {dimension_numbers = #tpu.dot_dimension_numbers<[1], [0], [0], [1], [0, 0, 1, 1], [], []>} : vector<288x256xbf16>, vector<256x256xbf16>, vector<288x256xf32> -> vector<288x256xf32>
    %c0_5 = arith.constant 0 : index
    %c0_6 = arith.constant 0 : index
    %5 = vector.load %arg7[%c0_5, %c0_6] : memref<288x256xf32, #tpu.memory_space<vmem>>, vector<288x256xf32>
    tpu.vector_store %arg7[%c0_5, %c0_6], %4 {strides = array<i32>} : memref<288x256xf32, #tpu.memory_space<vmem>>, vector<288x256xf32>,
    %c0_7 = arith.constant 0 : index
    %c1 = arith.constant 1 : index
    %c0_8 = arith.constant 0 : index
    %6 = vector.load %arg1[%c0_7, %c1, %c0_8] : memref<1x342x256xbf16, #tpu.memory_space<vmem>>, vector<1x288x256xbf16>
    %7 = vector.shape_cast %6 : vector<1x288x256xbf16> to vector<288x256xbf16>
    %c1_9 = arith.constant 1 : index
    %c0_10 = arith.constant 0 : index
    %c0_11 = arith.constant 0 : index
    %8 = vector.load %arg2[%c1_9, %c0_10, %c0_11] : memref<9x256x256xbf16, #tpu.memory_space<vmem>>, vector<1x256x256xbf16>
    %9 = vector.shape_cast %8 : vector<1x256x256xbf16> to vector<256x256xbf16>
    %cst_12 = arith.constant dense<0.000000e+00> : vector<288x256xf32>
    %10 = tpu.matmul %7, %9, %cst_12 {dimension_numbers = #tpu.dot_dimension_numbers<[1], [0], [0], [1], [0, 0, 1, 1], [], []>} : vector<288x256xbf16>, vector<256x256xbf16>, vector<288x256xf32> -> vector<288x256xf32>
    %c0_13 = arith.constant 0 : index
    %c0_14 = arith.constant 0 : index
    %11 = vector.load %arg7[%c0_13, %c0_14] : memref<288x256xf32, #tpu.memory_space<vmem>>, vector<288x256xf32>
    %12 = arith.addf %11, %10 : vector<288x256xf32>
    %c0_15 = arith.constant 0 : index
    %c0_16 = arith.constant 0 : index
    %13 = vector.load %arg7[%c0_15, %c0_16] : memref<288x256xf32, #tpu.memory_space<vmem>>, vector<288x256xf32>
    tpu.vector_store %arg7[%c0_15, %c0_16], %12 {strides = array<i32>} : memref<288x256xf32, #tpu.memory_space<vmem>>, vector<288x256xf32>,
    %c0_17 = arith.constant 0 : index
    %c2 = arith.constant 2 : index
    %c0_18 = arith.constant 0 : index
    %14 = vector.load %arg1[%c0_17, %c2, %c0_18] : memref<1x342x256xbf16, #tpu.memory_space<vmem>>, vector<1x288x256xbf16>
    %15 = vector.shape_cast %14 : vector<1x288x256xbf16> to vector<288x256xbf16>
    %c2_19 = arith.constant 2 : index
    %c0_20 = arith.constant 0 : index
    %c0_21 = arith.constant 0 : index
    %16 = vector.load %arg2[%c2_19, %c0_20, %c0_21] : memref<9x256x256xbf16, #tpu.memory_space<vmem>>, vector<1x256x256xbf16>
    %17 = vector.shape_cast %16 : vector<1x256x256xbf16> to vector<256x256xbf16>
    %cst_22 = arith.constant dense<0.000000e+00> : vector<288x256xf32>
    %18 = tpu.matmul %15, %17, %cst_22 {dimension_numbers = #tpu.dot_dimension_numbers<[1], [0], [0], [1], [0, 0, 1, 1], [], []>} : vector<288x256xbf16>, vector<256x256xbf16>, vector<288x256xf32> -> vector<288x256xf32>
    %c0_23 = arith.constant 0 : index
    %c0_24 = arith.constant 0 : index
    %19 = vector.load %arg7[%c0_23, %c0_24] : memref<288x256xf32, #tpu.memory_space<vmem>>, vector<288x256xf32>
    %20 = arith.addf %19, %18 : vector<288x256xf32>
    %c0_25 = arith.constant 0 : index
    %c0_26 = arith.constant 0 : index
    %21 = vector.load %arg7[%c0_25, %c0_26] : memref<288x256xf32, #tpu.memory_space<vmem>>, vector<288x256xf32>
    tpu.vector_store %arg7[%c0_25, %c0_26], %20 {strides = array<i32>} : memref<288x256xf32, #tpu.memory_space<vmem>>, vector<288x256xf32>,
    %c0_27 = arith.constant 0 : index
    %c18 = arith.constant 18 : index
    %c0_28 = arith.constant 0 : index
    %22 = vector.load %arg1[%c0_27, %c18, %c0_28] : memref<1x342x256xbf16, #tpu.memory_space<vmem>>, vector<1x288x256xbf16>
    %23 = vector.shape_cast %22 : vector<1x288x256xbf16> to vector<288x256xbf16>
    %c3 = arith.constant 3 : index
    %c0_29 = arith.constant 0 : index
    %c0_30 = arith.constant 0 : index
    %24 = vector.load %arg2[%c3, %c0_29, %c0_30] : memref<9x256x256xbf16, #tpu.memory_space<vmem>>, vector<1x256x256xbf16>
    %25 = vector.shape_cast %24 : vector<1x256x256xbf16> to vector<256x256xbf16>
    %cst_31 = arith.constant dense<0.000000e+00> : vector<288x256xf32>
    %26 = tpu.matmul %23, %25, %cst_31 {dimension_numbers = #tpu.dot_dimension_numbers<[1], [0], [0], [1], [0, 0, 1, 1], [], []>} : vector<288x256xbf16>, vector<256x256xbf16>, vector<288x256xf32> -> vector<288x256xf32>
    %c0_32 = arith.constant 0 : index
    %c0_33 = arith.constant 0 : index
    %27 = vector.load %arg7[%c0_32, %c0_33] : memref<288x256xf32, #tpu.memory_space<vmem>>, vector<288x256xf32>
    %28 = arith.addf %27, %26 : vector<288x256xf32>
    %c0_34 = arith.constant 0 : index
    %c0_35 = arith.constant 0 : index
    %29 = vector.load %arg7[%c0_34, %c0_35] : memref<288x256xf32, #tpu.memory_space<vmem>>, vector<288x256xf32>
    tpu.vector_store %arg7[%c0_34, %c0_35], %28 {strides = array<i32>} : memref<288x256xf32, #tpu.memory_space<vmem>>, vector<288x256xf32>,
    %c0_36 = arith.constant 0 : index
    %c19 = arith.constant 19 : index
    %c0_37 = arith.constant 0 : index
    %30 = vector.load %arg1[%c0_36, %c19, %c0_37] : memref<1x342x256xbf16, #tpu.memory_space<vmem>>, vector<1x288x256xbf16>
    %31 = vector.shape_cast %30 : vector<1x288x256xbf16> to vector<288x256xbf16>
    %c4 = arith.constant 4 : index
    %c0_38 = arith.constant 0 : index
    %c0_39 = arith.constant 0 : index
    %32 = vector.load %arg2[%c4, %c0_38, %c0_39] : memref<9x256x256xbf16, #tpu.memory_space<vmem>>, vector<1x256x256xbf16>
    %33 = vector.shape_cast %32 : vector<1x256x256xbf16> to vector<256x256xbf16>
    %cst_40 = arith.constant dense<0.000000e+00> : vector<288x256xf32>
    %34 = tpu.matmul %31, %33, %cst_40 {dimension_numbers = #tpu.dot_dimension_numbers<[1], [0], [0], [1], [0, 0, 1, 1], [], []>} : vector<288x256xbf16>, vector<256x256xbf16>, vector<288x256xf32> -> vector<288x256xf32>
    %c0_41 = arith.constant 0 : index
    %c0_42 = arith.constant 0 : index
    %35 = vector.load %arg7[%c0_41, %c0_42] : memref<288x256xf32, #tpu.memory_space<vmem>>, vector<288x256xf32>
    %36 = arith.addf %35, %34 : vector<288x256xf32>
    %c0_43 = arith.constant 0 : index
    %c0_44 = arith.constant 0 : index
    %37 = vector.load %arg7[%c0_43, %c0_44] : memref<288x256xf32, #tpu.memory_space<vmem>>, vector<288x256xf32>
    tpu.vector_store %arg7[%c0_43, %c0_44], %36 {strides = array<i32>} : memref<288x256xf32, #tpu.memory_space<vmem>>, vector<288x256xf32>,
    %c0_45 = arith.constant 0 : index
    %c20 = arith.constant 20 : index
    %c0_46 = arith.constant 0 : index
    %38 = vector.load %arg1[%c0_45, %c20, %c0_46] : memref<1x342x256xbf16, #tpu.memory_space<vmem>>, vector<1x288x256xbf16>
    %39 = vector.shape_cast %38 : vector<1x288x256xbf16> to vector<288x256xbf16>
    %c5 = arith.constant 5 : index
    %c0_47 = arith.constant 0 : index
    %c0_48 = arith.constant 0 : index
    %40 = vector.load %arg2[%c5, %c0_47, %c0_48] : memref<9x256x256xbf16, #tpu.memory_space<vmem>>, vector<1x256x256xbf16>
    %41 = vector.shape_cast %40 : vector<1x256x256xbf16> to vector<256x256xbf16>
    %cst_49 = arith.constant dense<0.000000e+00> : vector<288x256xf32>
    %42 = tpu.matmul %39, %41, %cst_49 {dimension_numbers = #tpu.dot_dimension_numbers<[1], [0], [0], [1], [0, 0, 1, 1], [], []>} : vector<288x256xbf16>, vector<256x256xbf16>, vector<288x256xf32> -> vector<288x256xf32>
    %c0_50 = arith.constant 0 : index
    %c0_51 = arith.constant 0 : index
    %43 = vector.load %arg7[%c0_50, %c0_51] : memref<288x256xf32, #tpu.memory_space<vmem>>, vector<288x256xf32>
    %44 = arith.addf %43, %42 : vector<288x256xf32>
    %c0_52 = arith.constant 0 : index
    %c0_53 = arith.constant 0 : index
    %45 = vector.load %arg7[%c0_52, %c0_53] : memref<288x256xf32, #tpu.memory_space<vmem>>, vector<288x256xf32>
    tpu.vector_store %arg7[%c0_52, %c0_53], %44 {strides = array<i32>} : memref<288x256xf32, #tpu.memory_space<vmem>>, vector<288x256xf32>,
    %c0_54 = arith.constant 0 : index
    %c36 = arith.constant 36 : index
    %c0_55 = arith.constant 0 : index
    %46 = vector.load %arg1[%c0_54, %c36, %c0_55] : memref<1x342x256xbf16, #tpu.memory_space<vmem>>, vector<1x288x256xbf16>
    %47 = vector.shape_cast %46 : vector<1x288x256xbf16> to vector<288x256xbf16>
    %c6 = arith.constant 6 : index
    %c0_56 = arith.constant 0 : index
    %c0_57 = arith.constant 0 : index
    %48 = vector.load %arg2[%c6, %c0_56, %c0_57] : memref<9x256x256xbf16, #tpu.memory_space<vmem>>, vector<1x256x256xbf16>
    %49 = vector.shape_cast %48 : vector<1x256x256xbf16> to vector<256x256xbf16>
    %cst_58 = arith.constant dense<0.000000e+00> : vector<288x256xf32>
    %50 = tpu.matmul %47, %49, %cst_58 {dimension_numbers = #tpu.dot_dimension_numbers<[1], [0], [0], [1], [0, 0, 1, 1], [], []>} : vector<288x256xbf16>, vector<256x256xbf16>, vector<288x256xf32> -> vector<288x256xf32>
    %c0_59 = arith.constant 0 : index
    %c0_60 = arith.constant 0 : index
    %51 = vector.load %arg7[%c0_59, %c0_60] : memref<288x256xf32, #tpu.memory_space<vmem>>, vector<288x256xf32>
    %52 = arith.addf %51, %50 : vector<288x256xf32>
    %c0_61 = arith.constant 0 : index
    %c0_62 = arith.constant 0 : index
    %53 = vector.load %arg7[%c0_61, %c0_62] : memref<288x256xf32, #tpu.memory_space<vmem>>, vector<288x256xf32>
    tpu.vector_store %arg7[%c0_61, %c0_62], %52 {strides = array<i32>} : memref<288x256xf32, #tpu.memory_space<vmem>>, vector<288x256xf32>,
    %c0_63 = arith.constant 0 : index
    %c37 = arith.constant 37 : index
    %c0_64 = arith.constant 0 : index
    %54 = vector.load %arg1[%c0_63, %c37, %c0_64] : memref<1x342x256xbf16, #tpu.memory_space<vmem>>, vector<1x288x256xbf16>
    %55 = vector.shape_cast %54 : vector<1x288x256xbf16> to vector<288x256xbf16>
    %c7 = arith.constant 7 : index
    %c0_65 = arith.constant 0 : index
    %c0_66 = arith.constant 0 : index
    %56 = vector.load %arg2[%c7, %c0_65, %c0_66] : memref<9x256x256xbf16, #tpu.memory_space<vmem>>, vector<1x256x256xbf16>
    %57 = vector.shape_cast %56 : vector<1x256x256xbf16> to vector<256x256xbf16>
    %cst_67 = arith.constant dense<0.000000e+00> : vector<288x256xf32>
    %58 = tpu.matmul %55, %57, %cst_67 {dimension_numbers = #tpu.dot_dimension_numbers<[1], [0], [0], [1], [0, 0, 1, 1], [], []>} : vector<288x256xbf16>, vector<256x256xbf16>, vector<288x256xf32> -> vector<288x256xf32>
    %c0_68 = arith.constant 0 : index
    %c0_69 = arith.constant 0 : index
    %59 = vector.load %arg7[%c0_68, %c0_69] : memref<288x256xf32, #tpu.memory_space<vmem>>, vector<288x256xf32>
    %60 = arith.addf %59, %58 : vector<288x256xf32>
    %c0_70 = arith.constant 0 : index
    %c0_71 = arith.constant 0 : index
    %61 = vector.load %arg7[%c0_70, %c0_71] : memref<288x256xf32, #tpu.memory_space<vmem>>, vector<288x256xf32>
    tpu.vector_store %arg7[%c0_70, %c0_71], %60 {strides = array<i32>} : memref<288x256xf32, #tpu.memory_space<vmem>>, vector<288x256xf32>,
    %c0_72 = arith.constant 0 : index
    %c38 = arith.constant 38 : index
    %c0_73 = arith.constant 0 : index
    %62 = vector.load %arg1[%c0_72, %c38, %c0_73] : memref<1x342x256xbf16, #tpu.memory_space<vmem>>, vector<1x288x256xbf16>
    %63 = vector.shape_cast %62 : vector<1x288x256xbf16> to vector<288x256xbf16>
    %c8 = arith.constant 8 : index
    %c0_74 = arith.constant 0 : index
    %c0_75 = arith.constant 0 : index
    %64 = vector.load %arg2[%c8, %c0_74, %c0_75] : memref<9x256x256xbf16, #tpu.memory_space<vmem>>, vector<1x256x256xbf16>
    %65 = vector.shape_cast %64 : vector<1x256x256xbf16> to vector<256x256xbf16>
    %cst_76 = arith.constant dense<0.000000e+00> : vector<288x256xf32>
    %66 = tpu.matmul %63, %65, %cst_76 {dimension_numbers = #tpu.dot_dimension_numbers<[1], [0], [0], [1], [0, 0, 1, 1], [], []>} : vector<288x256xbf16>, vector<256x256xbf16>, vector<288x256xf32> -> vector<288x256xf32>
    %c0_77 = arith.constant 0 : index
    %c0_78 = arith.constant 0 : index
    %67 = vector.load %arg7[%c0_77, %c0_78] : memref<288x256xf32, #tpu.memory_space<vmem>>, vector<288x256xf32>
    %68 = arith.addf %67, %66 : vector<288x256xf32>
    %c0_79 = arith.constant 0 : index
    %c0_80 = arith.constant 0 : index
    %69 = vector.load %arg7[%c0_79, %c0_80] : memref<288x256xf32, #tpu.memory_space<vmem>>, vector<288x256xf32>
    tpu.vector_store %arg7[%c0_79, %c0_80], %68 {strides = array<i32>} : memref<288x256xf32, #tpu.memory_space<vmem>>, vector<288x256xf32>,
    %c0_81 = arith.constant 0 : index
    %c0_82 = arith.constant 0 : index
    %70 = vector.load %arg7[%c0_81, %c0_82] : memref<288x256xf32, #tpu.memory_space<vmem>>, vector<288x256xf32>
    %c0_83 = arith.constant 0 : index
    %c0_84 = arith.constant 0 : index
    %71 = vector.load %arg3[%c0_83, %c0_84] : memref<1x256xf32, #tpu.memory_space<vmem>>, vector<1x256xf32>
    %72 = vector.broadcast %71 : vector<1x256xf32> to vector<288x256xf32>
    %73 = arith.addf %70, %72 : vector<288x256xf32>
    %cst_85 = arith.constant 0.000000e+00 : f32
    %74 = vector.broadcast %cst_85 : f32 to vector<288x256xf32>
    %75 = arith.maximumf %73, %74 : vector<288x256xf32>
    %76 = arith.truncf %75 : vector<288x256xf32> to vector<288x256xbf16>
    %c0_86 = arith.constant 0 : index
    %c0_87 = arith.constant 0 : index
    %77 = vector.load %arg4[%c0_86, %c0_87] : memref<256x128xbf16, #tpu.memory_space<vmem>>, vector<256x128xbf16>
    %cst_88 = arith.constant dense<0.000000e+00> : vector<288x128xf32>
    %78 = tpu.matmul %76, %77, %cst_88 {dimension_numbers = #tpu.dot_dimension_numbers<[1], [0], [0], [1], [0, 0, 1, 1], [], []>} : vector<288x256xbf16>, vector<256x128xbf16>, vector<288x128xf32> -> vector<288x128xf32>
    %c0_89 = arith.constant 0 : index
    %c0_90 = arith.constant 0 : index
    %79 = vector.load %arg5[%c0_89, %c0_90] : memref<1x128xf32, #tpu.memory_space<vmem>>, vector<1x128xf32>
    %80 = vector.broadcast %79 : vector<1x128xf32> to vector<288x128xf32>
    %81 = arith.addf %78, %80 : vector<288x128xf32>
    %c0_91 = arith.constant 0 : index
    %c0_92 = arith.constant 0 : index
    %c0_93 = arith.constant 0 : index
    %82 = vector.load %arg6[%c0_91, %c0_92, %c0_93] : memref<1x288x128xf32, #tpu.memory_space<vmem>>, vector<1x288x128xf32>
    %83 = vector.shape_cast %82 : vector<1x288x128xf32> to vector<288x128xf32>
    %84 = vector.shape_cast %81 : vector<288x128xf32> to vector<1x288x128xf32>
    tpu.vector_store %arg6[%c0_91, %c0_92, %c0_93], %84 {strides = array<i32>} : memref<1x288x128xf32, #tpu.memory_space<vmem>>, vector<1x288x128xf32>,
    return
  }
  func.func @transform_0(%arg0: i32) -> (i32, i32, i32) {
    %c0_i32 = arith.constant 0 : i32
    %c0_i32_0 = arith.constant 0 : i32
    %c0_i32_1 = arith.constant 0 : i32
    return %arg0, %c0_i32, %c0_i32_0 : i32, i32, i32
  }
  func.func @transform_1(%arg0: i32) -> (i32, i32, i32) {
    %c0_i32 = arith.constant 0 : i32
    %c0_i32_0 = arith.constant 0 : i32
    %c0_i32_1 = arith.constant 0 : i32
    %c0_i32_2 = arith.constant 0 : i32
    return %c0_i32, %c0_i32_0, %c0_i32_1 : i32, i32, i32
  }
  func.func @transform_2(%arg0: i32) -> (i32, i32) {
    %c0_i32 = arith.constant 0 : i32
    %c0_i32_0 = arith.constant 0 : i32
    %c0_i32_1 = arith.constant 0 : i32
    return %c0_i32, %c0_i32_0 : i32, i32
  }
  func.func @transform_3(%arg0: i32) -> (i32, i32) {
    %c0_i32 = arith.constant 0 : i32
    %c0_i32_0 = arith.constant 0 : i32
    %c0_i32_1 = arith.constant 0 : i32
    return %c0_i32, %c0_i32_0 : i32, i32
  }
  func.func @transform_4(%arg0: i32) -> (i32, i32) {
    %c0_i32 = arith.constant 0 : i32
    %c0_i32_0 = arith.constant 0 : i32
    %c0_i32_1 = arith.constant 0 : i32
    return %c0_i32, %c0_i32_0 : i32, i32
  }
  func.func @transform_5(%arg0: i32) -> (i32, i32, i32) {
    %c0_i32 = arith.constant 0 : i32
    %c0_i32_0 = arith.constant 0 : i32
    %c0_i32_1 = arith.constant 0 : i32
    return %arg0, %c0_i32, %c0_i32_0 : i32, i32, i32
  }
}

</mosaic_0001>

<bundles_post_ra>
// kernel: tpu_custom_call.1
= control target key start
LH: loop header
LB: loop body
LE: loop exit
PB: predicated region body
PF: predicated region fallthrough
CT: control target
= control target key end

     0   :  { %10 = vsyncpa [#allocation4], 0  ;;  %s14197_s0 = inlined_call_operand.vmem [shape: bf16[2,342,256], index: 0, kind: input, shape index: {}]   ;;  %s14198_s1 = inlined_call_operand.hbm [shape: bf16[9,256,256], index: 1, kind: input, shape index: {}]   ;;  %s14199_s2 = inlined_call_operand.hbm [shape: f32[1,256], index: 2, kind: input, shape index: {}]   ;;  %s14200_s3 = inlined_call_operand.hbm [shape: bf16[256,128], index: 3, kind: input, shape index: {}]   ;;  %s14201_s4 = inlined_call_operand.hbm [shape: f32[1,128], index: 4, kind: input, shape index: {}]   ;;  %s14202_s5 = inlined_call_operand.hbm [shape: f32[2,288,128], index: 5, kind: output, shape index: {}]  }
   0x1   :  { %11 = vsyncpa [#allocation7], 0 }
   0x2   :  { %12 = vsyncpa [#allocation10], 0 }
   0x3   :  { %13 = vsyncpa [#allocation5], 0 }
   0x4   :  { %15 = vsyncpa [#allocation5 + $0x1], 0  ;;  %s11516_s18 = smov 0   ;;  %s11518_s19 = smov 0  }
   0x5   :  { %s11520_s20 = smov 0   ;;  %s11522_s21 = smov 0  }
   0x6 LB: > { %s11537_s22 = sadd.s32 4294967295, %s11472_s21   ;;  %s9805_s23 = sadd.s32 4294967294, %s11472_s21   ;;  %s11472_s21 = sphi %s11522_s21, %s14657_s21   ;;  %s11468_s20 = sphi %s11520_s20, %s14656_s20   ;;  %s11464_s19 = sphi %s11518_s19, %s14655_s19   ;;  %s11460_s18 = sphi %s11516_s18, %s14654_s18  }
   0x7   : > { %s11541_s24 = sadd.s32 1, %s11472_s21   ;;  %s138_s25 = sadd.s32 1, %s11468_s20 }
   0x8   : > { %s135_s26 = ssub.s32 %s11472_s21, %s11541_s24  ;;  %p148_p0 = scmp.ne.s32.totalorder %s11468_s20, %s11464_s19 }
   0x9   : > { %p136_p1 = scmp.eq.s32.totalorder %s135_s26, 0  ;;  %p149_p2 = scmp.eq.s32.totalorder %s11537_s22, 1 }
   0xa   : > { %p154_p3 = scmp.ne.s32.totalorder %s11464_s19, %s11460_s18  ;;  %p155_p4 = scmp.eq.s32.totalorder %s9805_s23, 1 }
   0xb   : > { %s11552_s27 = scalar_select %p136_p1, %s11468_s20, %s138_s25  }
   0xc   : > { %p11554_p5 = por %p149_p2, %p148_p0  ;;  %p11558_p6 = por %p155_p4, %p154_p3 }
   0xd   : > { %p9806_p7 = scmp.ge.s32.totalorder %s11472_s21, 1  ;;  %p162_p8 = scmp.lt.s32.totalorder %s11472_s21, 3 }
   0xe   : > { %s14220_s28 = scalar_select %p11554_p5, 1, 0 }
   0xf   : > { %s14221_s29 = scalar_select %p11558_p6, 1, 0 }
  0x10   : > { %p14203_p9 = scmp.eq.s32.totalorder %s11537_s22, 0  ;;  %p11565_p10 = pnand %p9806_p7, %p162_p8 }
  0x11   : > { %s11474_s6 = smov [#allocation6]   ;;  %s11475_s8 = smov [#allocation3]  }
  0x12   : > { %s14222_s30 = scalar_select %p11565_p10, 1, 0 }
  0x13   : > { %s188_s7 = sshll.u32 %s11474_s6, 4  ;;  %p10487_p11 = pneg %p11565_p10  ;;  %s189_s7 = int_to_ptr.vmem [resolvable:$true] %s188_s7 }
  0x14   : > { %s174_s9 = sshll.u32 %s11475_s8, 4  ;;  %s11476_s11 = smov [#allocation8]   ;;  %s175_s9 = int_to_ptr.vmem [resolvable:$true] %s174_s9 }
  0x15   : > { %p11573_p12 = pnand %p14203_p9, %p10487_p11  ;;  %s198_s12 = sshll.u32 %s11476_s11, 4  ;;  %s199_s12 = int_to_ptr.vmem [resolvable:$true] %s198_s12 }
  0x16   : > { %s11307_s13 = scalar_lea.vmem %s189_s7, 32  ;;  %p11315_p3 = scmp.lt.s32.totalorder %s189_s7, %s189_s7 }
  0x17   : > { %p11298_p13 = pneg %p11573_p12  ;;  %p11308_p0 = scmp.ne.s32.totalorder %s189_s7, %s11307_s13 }
  0x18   : > { %p11316_p4 = scmp.lt.s32.totalorder %s11307_s13, %s11307_s13 }
  0x19   : > { %p11310_p1 = pnand %p11308_p0, %p11298_p13 }
  0x1a   : > { %p11317_p7 = por %p11316_p4, %p11315_p3 }
  0x1b   : > { %p11311_p2 = pneg %p11310_p1 }
  0x1d   : > { %p11318_p8 = pnand %p11317_p7, %p11311_p2 }
  0x1f   : > { %11321 = shalt.err (!%p11318_p8)
}
  0x20   : > { %10493 = dma.hbm_to_vmem [thread:$0]  (!%p11573_p12), %s14199_s2, 32, %s189_s7, [#allocation7]  }
  0x21   : > { %s11333_s16 = scalar_lea.vmem %s175_s9, 36864  ;;  %p11341_p0 = scmp.lt.s32.totalorder %s175_s9, %s175_s9 }
  0x22   : > { %p11334_p11 = scmp.ne.s32.totalorder %s175_s9, %s11333_s16  ;;  %p11342_p1 = scmp.lt.s32.totalorder %s11333_s16, %s11333_s16 }
  0x24   : > { %p11336_p9 = pnand %p11334_p11, %p11298_p13  ;;  %p11343_p5 = por %p11342_p1, %p11341_p0 }
  0x26   : > { %p11337_p6 = pneg %p11336_p9 }
  0x28   : > { %p11344_p10 = pnand %p11343_p5, %p11337_p6 }
  0x2a   : > { %11347 = shalt.err (!%p11344_p10)
}
  0x2b   : > { %s11477_s17 = smov 128   ;;  %s11478_s23 = smov 8  }
  0x2c   : > { %10490 = dma.hbm_to_vmem [thread:$0]  (!%p11573_p12), %s14198_s1, 36864, %s175_s9, [#allocation4], %s11477_s17, %s11477_s17, %s11478_s23  }
  0x2d   : > { %s11359_s6 = scalar_lea.vmem %s199_s12, 2048  ;;  %p11367_p4 = scmp.lt.s32.totalorder %s199_s12, %s199_s12 }
  0x2e   : > { %p11360_p2 = scmp.ne.s32.totalorder %s199_s12, %s11359_s6  ;;  %p11368_p7 = scmp.lt.s32.totalorder %s11359_s6, %s11359_s6 }
  0x30   : > { %p11362_p9 = pnand %p11360_p2, %p11298_p13  ;;  %p11369_p5 = por %p11368_p7, %p11367_p4 }
  0x32   : > { %p11363_p3 = pneg %p11362_p9 }
  0x34   : > { %p11370_p6 = pnand %p11369_p5, %p11363_p3 }
  0x36   : > { %11373 = shalt.err (!%p11370_p6)
}
  0x37   : > { %s11479_s7 = smov 64   ;;  %s11480_s8 = smov 4  }
  0x38   : > { %10496 = dma.hbm_to_vmem [thread:$0]  (!%p11573_p12), %s14200_s3, 2048, %s199_s12, [#allocation7], %s11479_s7, %s11479_s7, %s11480_s8  }
  0x39   : > { %s11481_s9 = smov [#allocation9]  }
  0x3a   : > { %s212_s14 = sshll.u32 %s11481_s9, 4  ;;  %s213_s14 = int_to_ptr.vmem [resolvable:$true] %s212_s14 }
  0x3b   : > { %s11385_s15 = scalar_lea.vmem %s213_s14, 16  ;;  %s11392_s16 = scalar_lea.vmem %s213_s14, 32 }
  0x3c   : > { %p11386_p10 = scmp.ne.s32.totalorder %s213_s14, %s11385_s15  ;;  %p11393_p0 = scmp.lt.s32.totalorder %s213_s14, %s213_s14 }
  0x3d   : > { %p11394_p1 = scmp.lt.s32.totalorder %s11392_s16, %s11385_s15 }
  0x3e   : > { %p11388_p8 = pnand %p11386_p10, %p11298_p13 }
  0x3f   : > { %p11395_p2 = por %p11394_p1, %p11393_p0 }
  0x40   : > { %p11389_p11 = pneg %p11388_p8 }
  0x42   : > { %p11396_p9 = pnand %p11395_p2, %p11389_p11 }
  0x44   : > { %11399 = shalt.err (!%p11396_p9)
}
  0x45   : > { %10499 = dma.hbm_to_vmem [thread:$0]  (!%p11573_p12), %s14201_s4, 16, %s213_s14, [#allocation10]  }
  0x46   : > { %p14224_p3 = scmp.ne.s32.totalorder %s14222_s30, 0 }
  0x48   : > { %233 = sbr.rel (%p14224_p3) target bundleno = 1284 (0x504), region = 40 }
  0x4d   : > { %p14225_p4 = scmp.eq.s32.totalorder %s11537_s22, 0 }
  0x4f   : > { %11443 = dma.done.wait (%p14225_p4), [#allocation4], 36864   ;;  %p14226_p13 = pmov %p14225_p4 }
  0x50   : > { %p14227_p7 = pmov %p14225_p4 }
  0x51   : > { %11445 = vsyncadd (%p14226_p13), [#allocation4], 4294930432 }
  0x52   : > { %11447 = dma.done.wait (%p14227_p7), [#allocation7], 2080   ;;  %p14228_p5 = pmov %p14225_p4 }
  0x53   : > { %p14229_p6 = pmov %p14225_p4 }
  0x54   : > { %11449 = vsyncadd (%p14228_p5), [#allocation7], 4294965216 }
  0x55   : > { %11451 = dma.done.wait (%p14229_p6), [#allocation10], 16   ;;  %p14230_p12 = pmov %p14225_p4 }
  0x56   : > { %v10556_v0 = vld [vmem:[#allocation3 + $0x74] ss:$8 sps:$4 sm:$0xff]   ;;  %v10560_v2 = vld [vmem:[#allocation3 + $0x70] ss:$8 sps:$4 sm:$0xff]   ;;  %v10562_v4 = vld [vmem:[#allocation3 + $0x64] ss:$8 sps:$4 sm:$0xff]  }
  0x57   : > { %11453 = vsyncadd (%p14230_p12), [#allocation10], 4294967280  ;;  %v10558_v1 = vld [vmem:[#allocation3 + $0x174] ss:$8 sps:$4 sm:$0xff]   ;;  %687 = vmatprep.subr.bf16.mxu0 %v10556_v0  ;;  %v10561_v3 = vld [vmem:[#allocation3 + $0x170] ss:$8 sps:$4 sm:$0xff]  }
  0x58   : > { %1684 = vmatprep.subr.bf16.mxu1 %v10558_v1  ;;  %688 = vmatpush1.bf16.msra.mxu0 %v10560_v2  ;;  %v10564_v5 = vld [vmem:[#allocation3 + $0x164] ss:$8 sps:$4 sm:$0xff]   ;;  %v10566_v6 = vld [vmem:[#allocation3 + $0x60] ss:$8 sps:$4 sm:$0xff]   ;;  %v10568_v8 = vld [vmem:[#allocation3 + $0x54] ss:$8 sps:$4 sm:$0xff]  }
  0x59   : > { %1685 = vmatpush1.bf16.msra.mxu1 %v10561_v3  ;;  %689 = vmatprep.subr.bf16.mxu0 %v10562_v4  ;;  %v10567_v7 = vld [vmem:[#allocation3 + $0x160] ss:$8 sps:$4 sm:$0xff]   ;;  %v10570_v9 = vld [vmem:[#allocation3 + $0x154] ss:$8 sps:$4 sm:$0xff]   ;;  %v10572_v10 = vld [vmem:[#allocation3 + $0x50] ss:$8 sps:$4 sm:$0xff]  }
  0x5a   : > { %1686 = vmatprep.subr.bf16.mxu1 %v10564_v5  ;;  %v10573_v11 = vld [vmem:[#allocation3 + $0x150] ss:$8 sps:$4 sm:$0xff]   ;;  %v10574_v12 = vld [vmem:[#allocation3 + $0x44] ss:$8 sps:$4 sm:$0xff]   ;;  %v10578_v14 = vld [vmem:[#allocation3 + $0x40] ss:$8 sps:$4 sm:$0xff]  }
  0x5b   : > { %v10576_v13 = vld [vmem:[#allocation3 + $0x144] ss:$8 sps:$4 sm:$0xff]   ;;  %v10579_v15 = vld [vmem:[#allocation3 + $0x140] ss:$8 sps:$4 sm:$0xff]   ;;  %v10580_v16 = vld [vmem:[#allocation3 + $0x34] ss:$8 sps:$4 sm:$0xff]  }
  0x5c   : > { %690 = vmatpush1.bf16.msra.mxu0 %v10566_v6  ;;  %v10582_v17 = vld [vmem:[#allocation3 + $0x134] ss:$8 sps:$4 sm:$0xff]   ;;  %v10584_v18 = vld [vmem:[#allocation3 + $0x30] ss:$8 sps:$4 sm:$0xff]   ;;  %v10586_v20 = vld [vmem:[#allocation3 + $0x24] ss:$8 sps:$4 sm:$0xff]  }
  0x5d   : > { %1687 = vmatpush1.bf16.msra.mxu1 %v10567_v7  ;;  %691 = vmatprep.subr.bf16.mxu0 %v10568_v8  ;;  %v10585_v19 = vld [vmem:[#allocation3 + $0x130] ss:$8 sps:$4 sm:$0xff]   ;;  %v10588_v21 = vld [vmem:[#allocation3 + $0x124] ss:$8 sps:$4 sm:$0xff]   ;;  %v10590_v22 = vld [vmem:[#allocation3 + $0x20] ss:$8 sps:$4 sm:$0xff]  }
  0x5e   : > { %1688 = vmatprep.subr.bf16.mxu1 %v10570_v9  ;;  %v10591_v23 = vld [vmem:[#allocation3 + $0x120] ss:$8 sps:$4 sm:$0xff]   ;;  %v10592_v24 = vld [vmem:[#allocation3 + $0x14] ss:$8 sps:$4 sm:$0xff]   ;;  %v10596_v26 = vld [vmem:[#allocation3 + $0x10] ss:$8 sps:$4 sm:$0xff]  }
  0x5f   : > { %v10594_v25 = vld [vmem:[#allocation3 + $0x114] ss:$8 sps:$4 sm:$0xff]   ;;  %v10597_v27 = vld [vmem:[#allocation3 + $0x110] ss:$8 sps:$4 sm:$0xff]   ;;  %v10598_v28 = vld [vmem:[#allocation3 + $0x4] ss:$8 sps:$4 sm:$0xff]  }
  0x60   : > { %692 = vmatpush1.bf16.msra.mxu0 %v10572_v10  ;;  %v10600_v29 = vld [vmem:[#allocation3 + $0x104] ss:$8 sps:$4 sm:$0xff]   ;;  %v10602_v30 = vld [vmem:[#allocation3] ss:$8 sps:$4 sm:$0xff]   ;;  %v10604_v32 = vld [vmem:[#allocation3 + $0xf4] ss:$8 sps:$4 sm:$0xff]  }
  0x61   : > { %1689 = vmatpush1.bf16.msra.mxu1 %v10573_v11  ;;  %693 = vmatprep.subr.bf16.mxu0 %v10574_v12  ;;  %v10603_v31 = vld [vmem:[#allocation3 + $0x100] ss:$8 sps:$4 sm:$0xff]   ;;  %p273_p10 = scmp.lt.s32.totalorder %s11537_s22, 1  ;;  %v10606_v33 = vld [vmem:[#allocation3 + $0x1f4] ss:$8 sps:$4 sm:$0xff]   ;;  %vm2332_vm1 = vcmask 1046528  }
  0x62   : > { %1690 = vmatprep.subr.bf16.mxu1 %v10576_v13  ;;  %v10608_v34 = vld [vmem:[#allocation3 + $0xf0] ss:$8 sps:$4 sm:$0xff]   ;;  %v10610_v36 = vld [vmem:[#allocation3 + $0xe4] ss:$8 sps:$4 sm:$0xff]   ;;  %v10614_v38 = vld [vmem:[#allocation3 + $0xe0] ss:$8 sps:$4 sm:$0xff]  }
  0x63   : > { %v10609_v35 = vld [vmem:[#allocation3 + $0x1f0] ss:$8 sps:$4 sm:$0xff]   ;;  %s274_s30 = scalar_select %p273_p10, %s11537_s22, 1  ;;  %v10612_v37 = vld [vmem:[#allocation3 + $0x1e4] ss:$8 sps:$4 sm:$0xff]   ;;  %vm5354_vm3 = vcmask 1045504  }
  0x64   : > { %694 = vmatpush1.bf16.msra.mxu0 %v10578_v14  ;;  %v10615_v39 = vld [vmem:[#allocation3 + $0x1e0] ss:$8 sps:$4 sm:$0xff]   ;;  %v10616_v40 = vld [vmem:[#allocation3 + $0xd4] ss:$8 sps:$4 sm:$0xff]   ;;  %v10620_v42 = vld [vmem:[#allocation3 + $0xd0] ss:$8 sps:$4 sm:$0xff]  }
  0x65   : > { %1691 = vmatpush1.bf16.msra.mxu1 %v10579_v15  ;;  %695 = vmatprep.subr.bf16.mxu0 %v10580_v16  ;;  %s10467_s10 = smul.u32 344, %s274_s30  ;;  %v10618_v41 = vld [vmem:[#allocation3 + $0x1d4] ss:$8 sps:$4 sm:$0xff]   ;;  %v10621_v43 = vld [vmem:[#allocation3 + $0x1d0] ss:$8 sps:$4 sm:$0xff]   ;;  %vm8376_vm5 = vcmask 1044480  }
  0x66   : > { %1692 = vmatprep.subr.bf16.mxu1 %v10582_v17  ;;  %v10622_v44 = vld [vmem:[#allocation3 + $0xc4] ss:$8 sps:$4 sm:$0xff]   ;;  %v10626_v46 = vld [vmem:[#allocation3 + $0xc0] ss:$8 sps:$4 sm:$0xff]   ;;  %v10628_v50 = vld [vmem:[#allocation3 + $0xb4] ss:$8 sps:$4 sm:$0xff]  }
  0x67   : > { %s11630_s26 = scalar_lea.vmem %s14197_s0, %s10467_s10  ;;  %v10624_v45 = vld [vmem:[#allocation3 + $0x1c4] ss:$8 sps:$4 sm:$0xff]   ;;  %v10627_v47 = vld [vmem:[#allocation3 + $0x1c0] ss:$8 sps:$4 sm:$0xff]   ;;  %v10630_v51 = vld [vmem:[#allocation3 + $0x1b4] ss:$8 sps:$4 sm:$0xff]  }
  0x68   : > { %696 = vmatpush1.bf16.msra.mxu0 %v10584_v18  ;;  %v10654_v48 = vld [vmem:[%s11630_s26 + $0x4] ss:$8 sps:$4 sm:$0xff]   ;;  %v11634_v49 = vld [vmem:[%s11630_s26 + $0x14] ss:$8 sps:$4 sm:$0xff]   ;;  %vm1191_vm0 = vsmask.f32 7424 }
  0x69   : > { %1693 = vmatpush1.bf16.msra.mxu1 %v10585_v19  ;;  %697 = vmatprep.subr.bf16.mxu0 %v10586_v20  ;;  %v1205_v52 = vshrl.u32 %v10654_v48, 16  ;;  %v1207_v53 = vshll.u32 %v10654_v48, 16  ;;  %v1212_v54 = vshll.u32 %v11634_v49, 16  ;;  %v10632_v55 = vld [vmem:[#allocation3 + $0xb0] ss:$8 sps:$4 sm:$0xff]   ;;  %v1224_v14 = vshrl.u32 %v11634_v49, 16 }
  0x6a   : > { %1694 = vmatprep.subr.bf16.mxu1 %v10588_v21  ;;  %719 = vmatprep.mubr.bf16.mxu0 %v10654_v48  ;;  %v10633_v56 = vld [vmem:[#allocation3 + $0x1b0] ss:$8 sps:$4 sm:$0xff]   ;;  %v10634_v58 = vld [vmem:[#allocation3 + $0xa4] ss:$8 sps:$4 sm:$0xff]   ;;  %v10652_v59 = vld [vmem:[%s11630_s26] ss:$8 sps:$4 sm:$0xff]  }
  0x6b   : > { %v1209_v57 = vrot.slane %v1207_v53, 1  ;;  %v1214_v60 = vrot.slane %v1212_v54, 1  ;;  %v10636_v61 = vld [vmem:[#allocation3 + $0x1a4] ss:$8 sps:$4 sm:$0xff]   ;;  %v10638_v63 = vld [vmem:[#allocation3 + $0xa0] ss:$8 sps:$4 sm:$0xff]  }
  0x6c   : > { %698 = vmatpush1.bf16.msra.mxu0 %v10590_v22  ;;  %v10639_v0 = vld [vmem:[#allocation3 + $0x1a0] ss:$8 sps:$4 sm:$0xff]   ;;  %v10640_v2 = vld [vmem:[#allocation3 + $0x94] ss:$8 sps:$4 sm:$0xff]   ;;  %v11640_v3 = vld [vmem:[%s11630_s26 + $0x10] ss:$8 sps:$4 sm:$0xff]  }
  0x6d   : > { %1695 = vmatpush1.bf16.msra.mxu1 %v10591_v23  ;;  %699 = vmatprep.subr.bf16.mxu0 %v10592_v24  ;;  %v1210_v62 = vor.u32 %v1209_v57, %v1205_v52  ;;  %v1195_v4 = vshll.u32 %v10652_v59, 16  ;;  %v10642_v5 = vld [vmem:[#allocation3 + $0x194] ss:$8 sps:$4 sm:$0xff]   ;;  %v11643_v6 = vld [vmem:[%s11630_s26 + $0x24] ss:$8 sps:$4 sm:$0xff]   ;;  %v1193_v9 = vshrl.u32 %v10652_v59, 16  ;;  %v1226_v23 = vor.u32 %v1224_v14, %v1214_v60 }
  0x6e   : > { %1696 = vmatprep.subr.bf16.mxu1 %v10594_v25  ;;  %v10644_v7 = vld [vmem:[#allocation3 + $0x90] ss:$8 sps:$4 sm:$0xff]   ;;  %v1200_v11 = vshll.u32 %v11640_v3, 16  ;;  %v10646_v12 = vld [vmem:[#allocation3 + $0x84] ss:$8 sps:$4 sm:$0xff]   ;;  %v1228_v15 = vshll.u32 %v11643_v6, 16 }
  0x6f   : > { %v1215_v1 = vsel %vm1191_vm0, %v1210_v62, %v1214_v60  ;;  %v10645_v8 = vld [vmem:[#allocation3 + $0x190] ss:$8 sps:$4 sm:$0xff]   ;;  %v1197_v10 = vrot.slane %v1195_v4, 1  ;;  %v10648_v13 = vld [vmem:[#allocation3 + $0x184] ss:$8 sps:$4 sm:$0xff]   ;;  %s270_s6 = sand.u32 1, %s11464_s19  }
  0x70   : > { %700 = vmatpush1.bf16.msra.mxu0 %v10596_v26  ;;  %1716 = vmatprep.mubr.bf16.mxu1 %v1215_v1  ;;  %v10650_v16 = vld [vmem:[#allocation3 + $0x80] ss:$8 sps:$4 sm:$0xff]   ;;  %v10660_v18 = vld [vmem:[#allocation3 + $0x274] ss:$8 sps:$4 sm:$0xff]   ;;  %v1202_v20 = vrot.slane %v1200_v11, 1  ;;  %v1230_v24 = vrot.slane %v1228_v15, 1 }
  0x71   : > { %1697 = vmatpush1.bf16.msra.mxu1 %v10597_v27  ;;  %701 = vmatprep.subr.bf16.mxu0 %v10598_v28  ;;  %v10651_v17 = vld [vmem:[#allocation3 + $0x180] ss:$8 sps:$4 sm:$0xff]   ;;  %v1198_v19 = vor.u32 %v1197_v10, %v1193_v9  ;;  %v11652_v22 = vld [vmem:[%s11630_s26 + $0x34] ss:$8 sps:$4 sm:$0xff]   ;;  %v10658_v26 = vld [vmem:[#allocation3 + $0x270] ss:$8 sps:$4 sm:$0xff]  }
  0x72   : > { %1698 = vmatprep.subr.bf16.mxu1 %v10600_v29  ;;  %v11649_v21 = vld [vmem:[%s11630_s26 + $0x20] ss:$8 sps:$4 sm:$0xff]   ;;  %v1216_v27 = vshrl.u32 %v11640_v3, 16  ;;  %v10666_v29 = vld [vmem:[#allocation3 + $0x264] ss:$8 sps:$4 sm:$0xff]   ;;  %s10466_s7 = smul.u32 288, %s270_s6 }
  0x73   : > { %v1203_v25 = vsel %vm1191_vm0, %v1198_v19, %v1202_v20  ;;  %v1220_v28 = vshll.u32 %v11649_v21, 16  ;;  %v10678_v48 = vld [vmem:[#allocation3 + $0x244] ss:$8 sps:$4 sm:$0xff]   ;;  %v11679_v53 = vld [vmem:[%s11630_s26 + $0x54] ss:$8 sps:$4 sm:$0xff]   ;;  %s10468_s11 = smul.u32 4608, %s11537_s22 }
  0x74   : > { %702 = vmatpush1.bf16.msra.mxu0 %v10602_v30  ;;  %v1240_v30 = vshrl.u32 %v11643_v6, 16  ;;  %v10718_v57 = vld [vmem:[#allocation3 + $0x370] ss:$8 sps:$4 sm:$0xff]   ;;  %v10688_v10 = vld [vmem:[#allocation3 + $0x220] ss:$8 sps:$4 sm:$0xff]   ;;  %s14073_s8 = scalar_lea.vmem [#allocation11], %s10466_s7 }
  0x75   : > { %1699 = vmatpush1.bf16.msra.mxu1 %v10603_v31  ;;  %703 = vmatprep.subr.bf16.mxu0 %v10604_v32  ;;  %v1244_v31 = vshll.u32 %v11652_v22, 16  ;;  %v1231_v32 = vsel %vm1191_vm0, %v1226_v23, %v1230_v24  ;;  %v11688_v4 = vld [vmem:[%s11630_s26 + $0x50] ss:$8 sps:$4 sm:$0xff]   ;;  %v10696_v14 = vld [vmem:[#allocation3 + $0x214] ss:$8 sps:$4 sm:$0xff]   ;;  %s9702_s13 = sshll.u32 %s14073_s8, 4  ;;  %s14149_s15 = scalar_lea.hbm %s14202_s5, %s10468_s11  ;;  %s14151_s13 = int_to_ptr.vmem [resolvable:$true] %s9702_s13 }
  0x76   : > { %1700 = vmatprep.subr.bf16.mxu1 %v10606_v33  ;;  %v10664_v33 = vld [vmem:[#allocation3 + $0x260] ss:$8 sps:$4 sm:$0xff]   ;;  %v10735_v15 = vld [vmem:[#allocation3 + $0x344] ss:$8 sps:$4 sm:$0xff]   ;;  %v10694_v19 = vld [vmem:[#allocation3 + $0x210] ss:$8 sps:$4 sm:$0xff]  }
  0x77   : > { %v10733_v23 = vld [vmem:[#allocation3 + $0x340] ss:$8 sps:$4 sm:$0xff]   ;;  %vm4169_vm2 = vsmask.f32 6400  ;;  %vm7191_vm4 = vsmask.f32 5376 }
  0x78   : > { %704 = vmatpush2.bf16.msra.mxu0 %v10608_v34  ;;  %v11661_v34 = vld [vmem:[%s11630_s26 + $0x30] ss:$8 sps:$4 sm:$0xff]   ;;  %s14157_s22 = scalar_lea.sflag [#allocation5], %s270_s6  ;;  %s11400_s16 = scalar_lea.vmem %s14151_s13, 4608 }
  0x79   : > { %1701 = vmatpush2.bf16.msra.mxu1 %v10609_v35  ;;  %705 = vmatprep.subr.bf16.mxu0 %v10610_v36  ;;  %v1218_v35 = vor.u32 %v1216_v27, %v1202_v20  ;;  %v1222_v36 = vrot.slane %v1220_v28, 1  ;;  %p11401_p8 = scmp.ne.s32.totalorder %s14151_s13, %s11400_s16  ;;  %p14652_p11 = scmp.ne.s32.totalorder %s14220_s28, 0 }
  0x7a   : > { %1702 = vmatprep.subr.bf16.mxu1 %v10612_v37  ;;  %v10672_v37 = vld [vmem:[#allocation3 + $0x254] ss:$8 sps:$4 sm:$0xff]   ;;  %s11483_s17 = smov [#allocation11]  }
  0x7b   : > { %p11402_p0 = pnand %p11401_p8, %p14652_p11  ;;  %s11404_s23 = sshll.u32 %s11483_s17, 4  ;;  %s11405_s23 = int_to_ptr.vmem [resolvable:$false] %s11404_s23 }
  0x7c   : > { %706 = vmatpush2.bf16.msra.mxu0 %v10614_v38  ;;  %v1242_v38 = vor.u32 %v1240_v30, %v1230_v24  ;;  %v10704_v24 = vld [vmem:[#allocation3 + $0x204] ss:$8 sps:$4 sm:$0xff]   ;;  %s11406_s30 = scalar_lea.vmem %s11405_s23, 9216  ;;  %p11407_p2 = scmp.lt.s32.totalorder %s14151_s13, %s11405_s23 }
  0x7d   : > { %1703 = vmatpush2.bf16.msra.mxu1 %v10615_v39  ;;  %707 = vmatprep.subr.bf16.mxu0 %v10616_v40  ;;  %v1246_v39 = vrot.slane %v1244_v31, 1  ;;  %v11665_v40 = vld [vmem:[%s11630_s26 + $0x44] ss:$8 sps:$4 sm:$0xff]   ;;  %p11403_p1 = pneg %p11402_p0  ;;  %p11408_p9 = scmp.lt.s32.totalorder %s11406_s30, %s11400_s16 }
  0x7e   : > { %1704 = vmatprep.subr.bf16.mxu1 %v10618_v41  ;;  %v1223_v41 = vsel %vm1191_vm0, %v1218_v35, %v1222_v36  ;;  %v1272_v1 = vshrl.u32 %v11665_v40, 16  ;;  %v10711_v35 = vld [vmem:[#allocation3 + $0x2f4] ss:$8 sps:$4 sm:$0xff]  }
  0x7f   : > { %p11409_p3 = por %p11408_p9, %p11407_p2 }
  0x80   : > { %708 = vmatpush2.bf16.msra.mxu0 %v10620_v42  ;;  %v1232_v42 = vshrl.u32 %v11649_v21, 16 }
  0x81   : > { %1705 = vmatpush2.bf16.msra.mxu1 %v10621_v43  ;;  %709 = vmatprep.subr.bf16.mxu0 %v10622_v44  ;;  %v1236_v43 = vshll.u32 %v11661_v34, 16  ;;  %v1247_v44 = vsel %vm1191_vm0, %v1242_v38, %v1246_v39  ;;  %p11410_p4 = pnand %p11409_p3, %p11403_p1 }
  0x82   : > { %1706 = vmatprep.subr.bf16.mxu1 %v10624_v45  ;;  %v10670_v45 = vld [vmem:[#allocation3 + $0x250] ss:$8 sps:$4 sm:$0xff]  }
  0x83   : > { %v1238_v52 = vrot.slane %v1236_v43, 1  ;;  %v10745_v43 = vld [vmem:[#allocation3 + $0x320] ss:$8 sps:$4 sm:$0xff]  }
  0x84   : > { %710 = vmatpush2.bf16.msra.mxu0 %v10626_v46  ;;  %v1256_v46 = vshrl.u32 %v11652_v22, 16 }
  0x85   : > { %1707 = vmatpush2.bf16.msra.mxu1 %v10627_v47  ;;  %711 = vmatprep.subr.bf16.mxu0 %v10628_v50  ;;  %v1260_v47 = vshll.u32 %v11665_v40, 16  ;;  %v10676_v50 = vld [vmem:[#allocation3 + $0x240] ss:$8 sps:$4 sm:$0xff]  }
  0x86   : > { %1708 = vmatprep.subr.bf16.mxu1 %v10630_v51  ;;  %v1234_v51 = vor.u32 %v1232_v42, %v1222_v36  ;;  %v1258_v54 = vor.u32 %v1256_v46, %v1246_v39  ;;  %v10709_v42 = vld [vmem:[#allocation3 + $0x2f0] ss:$8 sps:$4 sm:$0xff]  }
  0x87   : > { %v11717_v46 = vld [vmem:[%s11630_s26 + $0x70] ss:$8 sps:$4 sm:$0xff]  }
  0x88   : > { %712 = vmatpush2.bf16.msra.mxu0 %v10632_v55  ;;  %v1262_v55 = vrot.slane %v1260_v47, 1  ;;  %v1239_v60 = vsel %vm1191_vm0, %v1234_v51, %v1238_v52  ;;  %v11721_v51 = vld [vmem:[%s11630_s26 + $0x84] ss:$8 sps:$4 sm:$0xff]  }
  0x89   : > { %1709 = vmatpush2.bf16.msra.mxu1 %v10633_v56  ;;  %713 = vmatprep.subr.bf16.mxu0 %v10634_v58  ;;  %v10684_v56 = vld [vmem:[#allocation3 + $0x234] ss:$8 sps:$4 sm:$0xff]  }
  0x8a   : > { %1710 = vmatprep.subr.bf16.mxu1 %v10636_v61  ;;  %v10720_v58 = vld [vmem:[#allocation3 + $0x374] ss:$8 sps:$4 sm:$0xff]   ;;  %v1248_v61 = vshrl.u32 %v11661_v34, 16  ;;  %v1274_v11 = vor.u32 %v1272_v1, %v1262_v55 }
  0x8b   : > { %v10765_v1 = vld [vmem:[#allocation3 + $0x3f4] ss:$8 sps:$4 sm:$0xff]  }
  0x8c   : > { %714 = vmatpush2.bf16.msra.mxu0 %v10638_v63  ;;  %v10682_v63 = vld [vmem:[#allocation3 + $0x230] ss:$8 sps:$4 sm:$0xff]  }
  0x8d   : > { %1711 = vmatpush2.bf16.msra.mxu1 %v10639_v0  ;;  %715 = vmatprep.subr.bf16.mxu0 %v10640_v2  ;;  %v1263_v0 = vsel %vm1191_vm0, %v1258_v54, %v1262_v55  ;;  %v1276_v2 = vshll.u32 %v11679_v53, 16  ;;  %v10715_v54 = vld [vmem:[#allocation3 + $0x2e0] ss:$8 sps:$4 sm:$0xff]   ;;  %v10729_v55 = vld [vmem:[#allocation3 + $0x2d4] ss:$8 sps:$4 sm:$0xff]  }
  0x8e   : > { %1712 = vmatprep.subr.bf16.mxu1 %v10642_v5  ;;  %v10690_v5 = vld [vmem:[#allocation3 + $0x224] ss:$8 sps:$4 sm:$0xff]  }
  0x90   : > { %716 = vmatpush2.bf16.msra.mxu0 %v10644_v7  ;;  %v10732_v7 = vld [vmem:[#allocation3 + $0x354] ss:$8 sps:$4 sm:$0xff]  }
  0x91   : > { %1713 = vmatpush2.bf16.msra.mxu1 %v10645_v8  ;;  %717 = vmatprep.subr.bf16.mxu0 %v10646_v12  ;;  %v1250_v8 = vor.u32 %v1248_v61, %v1238_v52  ;;  %v1278_v12 = vrot.slane %v1276_v2, 1  ;;  %v11731_v2 = vld [vmem:[%s11630_s26 + $0x80] ss:$8 sps:$4 sm:$0xff]  }
  0x92   : > { %1714 = vmatprep.subr.bf16.mxu1 %v10648_v13  ;;  %v10730_v13 = vld [vmem:[#allocation3 + $0x350] ss:$8 sps:$4 sm:$0xff]  }
  0x93   : > { %v1279_v20 = vsel %vm1191_vm0, %v1274_v11, %v1278_v12  ;;  %v10756_v11 = vld [vmem:[#allocation3 + $0x2b4] ss:$8 sps:$4 sm:$0xff]  }
  0x94   : > { %718 = vmatpush2.bf16.msra.mxu0 %v10650_v16 }
  0x95   : > { %1715 = vmatpush2.bf16.msra.mxu1 %v10651_v17  ;;  %2603 = vmatprep.subr.bf16.mxu0 %v10660_v18  ;;  %v1268_v18 = vshll.u32 %v11688_v4, 16 }
  0x96   : > { %3521 = vmatprep.subr.bf16.mxu1 %v10720_v58  ;;  %v1300_v58 = vshll.u32 %v11717_v46, 16 }
  0x97   : > { %720 = vmatmul.mubr.bf16.vlgmr.msra.gmra.mxu0 %v10652_v59  ;;  %v10723_v59 = vld [vmem:[#allocation3 + $0x364] ss:$8 sps:$4 sm:$0xff]   ;;  %v1270_v28 = vrot.slane %v1268_v18, 1 }
  0x98   : > { %1717 = vmatmul.mubr.bf16.vlgmr.msra.gmra.mxu1 %v1203_v25  ;;  %2604 = vmatpush1.bf16.msra.mxu0 %v10658_v26  ;;  %v10741_v25 = vld [vmem:[#allocation3 + $0x334] ss:$8 sps:$4 sm:$0xff]   ;;  %v11703_v26 = vld [vmem:[%s11630_s26 + $0x60] ss:$8 sps:$4 sm:$0xff]  }
  0x99   : > { %729 = vmatprep.mubr.bf16.mxu0 %v11634_v49  ;;  %1726 = vmatprep.mubr.bf16.mxu1 %v1231_v32  ;;  %v11675_v49 = vld [vmem:[%s11630_s26 + $0x40] ss:$8 sps:$4 sm:$0xff]   ;;  %v1284_v38 = vshll.u32 %v11703_v26, 16 }
  0x9a   : > { %2605 = vmatprep.subr.bf16.mxu0 %v10666_v29  ;;  %v1252_v62 = vshll.u32 %v11675_v49, 16  ;;  %3522 = vmatpush1.bf16.msra.mxu1 %v10718_v57  ;;  %v1264_v17 = vshrl.u32 %v11675_v49, 16  ;;  %v11707_v29 = vld [vmem:[%s11630_s26 + $0x74] ss:$8 sps:$4 sm:$0xff]   ;;  %v10702_v32 = vld [vmem:[#allocation3 + $0x200] ss:$8 sps:$4 sm:$0xff]  }
  0x9b   : > { %3523 = vmatprep.subr.bf16.mxu1 %v10723_v59  ;;  %v1308_v39 = vshll.u32 %v11707_v29, 16  ;;  %v1320_v59 = vshrl.u32 %v11707_v29, 16 }
  0x9c   : > { %2606 = vmatpush1.bf16.msra.mxu0 %v10664_v33  ;;  %v1254_v9 = vrot.slane %v1252_v62, 1  ;;  %v10739_v33 = vld [vmem:[#allocation3 + $0x330] ss:$8 sps:$4 sm:$0xff]   ;;  %v1324_v62 = vshll.u32 %v11721_v51, 16 }
  0x9d   : > { %2607 = vmatprep.subr.bf16.mxu0 %v10672_v37  ;;  %v1280_v37 = vshrl.u32 %v11688_v4, 16 }
  0x9e   : > { %v1255_v16 = vsel %vm1191_vm0, %v1250_v8, %v1254_v9  ;;  %v1266_v27 = vor.u32 %v1264_v17, %v1254_v9  ;;  %v10742_v8 = vld [vmem:[#allocation3 + $0x2c0] ss:$8 sps:$4 sm:$0xff]  }
  0x9f   : > { %730 = vmatmul.mubr.bf16.gmra.mxu0 %v11640_v3  ;;  %v10721_v3 = vld [vmem:[#allocation3 + $0x360] ss:$8 sps:$4 sm:$0xff]   ;;  %v1282_v47 = vor.u32 %v1280_v37, %v1270_v28 }
  0xa0   : > { %1727 = vmatmul.mubr.bf16.gmra.mxu1 %v1223_v41  ;;  %739 = vmatprep.mubr.bf16.mxu0 %v11643_v6  ;;  %v11692_v6 = vld [vmem:[%s11630_s26 + $0x64] ss:$8 sps:$4 sm:$0xff]   ;;  %v1271_v36 = vsel %vm1191_vm0, %v1266_v27, %v1270_v28  ;;  %v10766_v27 = vld [vmem:[#allocation3 + $0x2a0] ss:$8 sps:$4 sm:$0xff]  }
  0xa1   : > { %1736 = vmatprep.mubr.bf16.mxu1 %v1247_v44  ;;  %2608 = vmatpush1.bf16.msra.mxu0 %v10670_v45  ;;  %v1304_v41 = vshrl.u32 %v11692_v6, 16  ;;  %v10717_v44 = vld [vmem:[#allocation3 + $0x2e4] ss:$8 sps:$4 sm:$0xff]   ;;  %v10753_v45 = vld [vmem:[#allocation3 + $0x314] ss:$8 sps:$4 sm:$0xff]  }
  0xa2   : > { %2609 = vmatprep.subr.bf16.mxu0 %v10678_v48  ;;  %3524 = vmatpush1.bf16.msra.mxu1 %v10721_v3  ;;  %v1286_v48 = vrot.slane %v1284_v38, 1 }
  0xa3   : > { %3525 = vmatprep.subr.bf16.mxu1 %v10732_v7  ;;  %v11735_v7 = vld [vmem:[%s11630_s26 + $0x94] ss:$8 sps:$4 sm:$0xff]  }
  0xa4   : > { %v1287_v57 = vsel %vm1191_vm0, %v1282_v47, %v1286_v48  ;;  %v1340_v18 = vshll.u32 %v11735_v7, 16 }
  0xa5   : > { %2610 = vmatpush1.bf16.msra.mxu0 %v10676_v50  ;;  %v1310_v50 = vrot.slane %v1308_v39, 1  ;;  %v10781_v39 = vld [vmem:[#allocation3 + $0x3c0] ss:$8 sps:$4 sm:$0xff]  }
  0xa6   : > { %2611 = vmatprep.subr.bf16.mxu0 %v10684_v56  ;;  %3526 = vmatpush1.bf16.msra.mxu1 %v10730_v13  ;;  %v10751_v56 = vld [vmem:[#allocation3 + $0x310] ss:$8 sps:$4 sm:$0xff]   ;;  %v1316_v13 = vshll.u32 %v11731_v2, 16 }
  0xa7   : > { %740 = vmatmul.mubr.bf16.gmra.mxu0 %v11649_v21  ;;  %v1288_v21 = vshrl.u32 %v11679_v53, 16  ;;  %3527 = vmatprep.subr.bf16.mxu1 %v10735_v15  ;;  %v1322_v9 = vor.u32 %v1320_v59, %v1310_v50  ;;  %v1336_v15 = vshrl.u32 %v11721_v51, 16  ;;  %v10800_v59 = vld [vmem:[#allocation3 + $0x394] ss:$8 sps:$4 sm:$0xff]  }
  0xa8   : > { %1737 = vmatmul.mubr.bf16.gmra.mxu1 %v1239_v60  ;;  %749 = vmatprep.mubr.bf16.mxu0 %v11652_v22  ;;  %v1292_v22 = vshll.u32 %v11692_v6, 16  ;;  %v10727_v60 = vld [vmem:[#allocation3 + $0x2d0] ss:$8 sps:$4 sm:$0xff]  }
  0xa9   : > { %1746 = vmatprep.mubr.bf16.mxu1 %v1263_v0  ;;  %2612 = vmatpush1.bf16.msra.mxu0 %v10682_v63  ;;  %v1290_v30 = vor.u32 %v1288_v21, %v1278_v12  ;;  %v10744_v63 = vld [vmem:[#allocation3 + $0x2c4] ss:$8 sps:$4 sm:$0xff]   ;;  %v10757_v0 = vld [vmem:[#allocation3 + $0x300] ss:$8 sps:$4 sm:$0xff]   ;;  %v10763_v12 = vld [vmem:[#allocation3 + $0x3f0] ss:$8 sps:$4 sm:$0xff]  }
  0xaa   : > { %2613 = vmatprep.subr.bf16.mxu0 %v10690_v5  ;;  %v1294_v31 = vrot.slane %v1292_v22, 1  ;;  %3528 = vmatpush1.bf16.msra.mxu1 %v10733_v23  ;;  %v1302_v5 = vrot.slane %v1300_v58, 1  ;;  %v10777_v21 = vld [vmem:[#allocation3 + $0x3d4] ss:$8 sps:$4 sm:$0xff]   ;;  %v1318_v22 = vrot.slane %v1316_v13, 1 }
  0xab   : > { %3529 = vmatprep.subr.bf16.mxu1 %v10741_v25  ;;  %v11745_v23 = vld [vmem:[%s11630_s26 + $0x90] ss:$8 sps:$4 sm:$0xff]   ;;  %v11749_v25 = vld [vmem:[%s11630_s26 + $0xa4] ss:$8 sps:$4 sm:$0xff]   ;;  %v10790_v58 = vld [vmem:[#allocation3 + $0x3a0] ss:$8 sps:$4 sm:$0xff]  }
  0xac   : > { %v1306_v52 = vor.u32 %v1304_v41, %v1294_v31  ;;  %v1356_v38 = vshll.u32 %v11749_v25, 16  ;;  %v10796_v41 = vld [vmem:[#allocation3 + $0x284] ss:$8 sps:$4 sm:$0xff]   ;;  %v10736_v13 = vld [vmem:[%s11630_s26 + $0xd4] ss:$8 sps:$4 sm:$0xff]  }
  0xad   : > { %2614 = vmatpush1.bf16.msra.mxu0 %v10688_v10  ;;  %v1326_v10 = vrot.slane %v1324_v62, 1  ;;  %v10714_v62 = vld [vmem:[%s11630_s26 + $0xb0] ss:$8 sps:$4 sm:$0xff]  }
  0xae   : > { %2615 = vmatprep.subr.bf16.mxu0 %v10696_v14  ;;  %3530 = vmatpush1.bf16.msra.mxu1 %v10739_v33  ;;  %v1311_v61 = vsel %vm1191_vm0, %v1306_v52, %v1310_v50  ;;  %v10787_v50 = vld [vmem:[#allocation3 + $0x3b0] ss:$8 sps:$4 sm:$0xff]   ;;  %v10794_v52 = vld [vmem:[#allocation3 + $0x280] ss:$8 sps:$4 sm:$0xff]  }
  0xaf   : > { %750 = vmatmul.mubr.bf16.gmra.mxu0 %v11661_v34  ;;  %v10747_v34 = vld [vmem:[#allocation3 + $0x324] ss:$8 sps:$4 sm:$0xff]   ;;  %v1327_v17 = vsel %vm1191_vm0, %v1322_v9, %v1326_v10  ;;  %v1338_v28 = vor.u32 %v1336_v15, %v1326_v10  ;;  %v1364_v9 = vshll.u32 %v10714_v62, 16 }
  0xb0   : > { %1747 = vmatmul.mubr.bf16.gmra.mxu1 %v1255_v16  ;;  %759 = vmatprep.mubr.bf16.mxu0 %v11665_v40  ;;  %v1295_v40 = vsel %vm1191_vm0, %v1290_v30, %v1294_v31  ;;  %v10754_v16 = vld [vmem:[#allocation3 + $0x2b0] ss:$8 sps:$4 sm:$0xff]   ;;  %v1342_v30 = vrot.slane %v1340_v18, 1  ;;  %v1376_v18 = vshrl.u32 %v10714_v62, 16 }
  0xb1   : > { %1756 = vmatprep.mubr.bf16.mxu1 %v1279_v20  ;;  %2616 = vmatpush1.bf16.msra.mxu0 %v10694_v19  ;;  %v10768_v19 = vld [vmem:[#allocation3 + $0x2a4] ss:$8 sps:$4 sm:$0xff]   ;;  %v10769_v20 = vld [vmem:[#allocation3 + $0x3e0] ss:$8 sps:$4 sm:$0xff]   ;;  %v10775_v31 = vld [vmem:[#allocation3 + $0x3d0] ss:$8 sps:$4 sm:$0xff]  }
  0xb2   : > { %2617 = vmatprep.subr.bf16.mxu0 %v10704_v24  ;;  %3531 = vmatprep.subr.bf16.mxu1 %v10747_v34  ;;  %v1352_v34 = vshrl.u32 %v11735_v7, 16  ;;  %v1343_v37 = vsel %vm1191_vm0, %v1338_v28, %v1342_v30 }
  0xb3   : > { %3532 = vmatpush1.bf16.msra.mxu1 %v10745_v43 }
  0xb4   : > { %3533 = vmatprep.subr.bf16.mxu1 %v10753_v45  ;;  %v11763_v45 = vld [vmem:[%s11630_s26 + $0xb4] ss:$8 sps:$4 sm:$0xff]   ;;  %v1354_v47 = vor.u32 %v1352_v34, %v1342_v30 }
  0xb5   : > { %2618 = vmatpush1.bf16.msra.mxu0 %v10702_v32  ;;  %v10780_v32 = vld [vmem:[#allocation3 + $0x294] ss:$8 sps:$4 sm:$0xff]   ;;  %v1384_v10 = vshrl.u32 %v11763_v45, 16 }
  0xb6   : > { %2619 = vmatprep.subr.bf16.mxu0 %v10711_v35  ;;  %v1328_v35 = vshrl.u32 %v11731_v2, 16 }
  0xb7   : > { %760 = vmatmul.mubr.bf16.gmra.mxu0 %v11675_v49  ;;  %v10759_v49 = vld [vmem:[#allocation3 + $0x304] ss:$8 sps:$4 sm:$0xff]   ;;  %3534 = vmatpush1.bf16.msra.mxu1 %v10751_v56  ;;  %v1344_v56 = vshrl.u32 %v11745_v23, 16 }
  0xb8   : > { %1757 = vmatmul.mubr.bf16.gmra.mxu1 %v1271_v36  ;;  %769 = vmatprep.mubr.bf16.mxu0 %v11679_v53  ;;  %v1296_v53 = vshrl.u32 %v11703_v26, 16  ;;  %v10778_v36 = vld [vmem:[#allocation3 + $0x290] ss:$8 sps:$4 sm:$0xff]   ;;  %v1330_v43 = vor.u32 %v1328_v35, %v1318_v22  ;;  %v1416_v35 = vshrl.u32 %v10736_v13, 16 }
  0xb9   : > { %1766 = vmatprep.mubr.bf16.mxu1 %v1295_v40  ;;  %2620 = vmatpush2.bf16.msra.mxu0 %v10709_v42  ;;  %v10789_v40 = vld [vmem:[#allocation3 + $0x3b4] ss:$8 sps:$4 sm:$0xff]   ;;  %v11759_v42 = vld [vmem:[%s11630_s26 + $0xa0] ss:$8 sps:$4 sm:$0xff]  }
  0xba   : > { %2621 = vmatprep.subr.bf16.mxu0 %v10717_v44  ;;  %3535 = vmatprep.subr.bf16.mxu1 %v10759_v49  ;;  %v1298_v3 = vor.u32 %v1296_v53, %v1286_v48  ;;  %v1358_v48 = vrot.slane %v1356_v38, 1  ;;  %v1372_v53 = vshll.u32 %v11763_v45, 16  ;;  %v10760_v38 = vld [vmem:[%s11630_s26 + $0xf4] ss:$8 sps:$4 sm:$0xff]  }
  0xbb   : > { %3536 = vmatpush1.bf16.msra.mxu1 %v10757_v0 }
  0xbc   : > { %3537 = vmatprep.subr.bf16.mxu1 %v10765_v1  ;;  %v1303_v14 = vsel %vm1191_vm0, %v1298_v3, %v1302_v5  ;;  %v1359_v49 = vsel %vm1191_vm0, %v1354_v47, %v1358_v48  ;;  %v1374_v0 = vrot.slane %v1372_v53, 1  ;;  %v10724_v1 = vld [vmem:[%s11630_s26 + $0xc4] ss:$8 sps:$4 sm:$0xff]   ;;  %v10798_v3 = vld [vmem:[#allocation3 + $0x390] ss:$8 sps:$4 sm:$0xff]   ;;  %v1436_v47 = vshll.u32 %v10760_v38, 16 }
  0xbd   : > { %2622 = vmatpush2.bf16.msra.mxu0 %v10715_v54  ;;  %v10792_v54 = vld [vmem:[#allocation3 + $0x3a4] ss:$8 sps:$4 sm:$0xff]  }
  0xbe   : > { %2623 = vmatprep.subr.bf16.mxu0 %v10729_v55  ;;  %v1386_v15 = vor.u32 %v1384_v10, %v1374_v0 }
  0xbf   : > { %770 = vmatmul.mubr.bf16.gmra.mxu0 %v11688_v4  ;;  %v10771_v4 = vld [vmem:[#allocation3 + $0x3e4] ss:$8 sps:$4 sm:$0xff]   ;;  %3538 = vmatpush2.bf16.msra.mxu1 %v10763_v12  ;;  %v10801_v12 = vld [vmem:[#allocation3 + $0x380] ss:$8 sps:$4 sm:$0xff]  }
  0xc0   : > { %1767 = vmatmul.mubr.bf16.gmra.mxu1 %v1287_v57  ;;  %779 = vmatprep.mubr.bf16.mxu0 %v11692_v6  ;;  %v1312_v6 = vshrl.u32 %v11717_v46, 16  ;;  %v1368_v57 = vshrl.u32 %v11749_v25, 16 }
  0xc1   : > { %1776 = vmatprep.mubr.bf16.mxu1 %v1311_v61  ;;  %2624 = vmatpush2.bf16.msra.mxu0 %v10727_v60 }
  0xc2   : > { %2625 = vmatprep.subr.bf16.mxu0 %v10744_v63  ;;  %3539 = vmatprep.subr.bf16.mxu1 %v10771_v4  ;;  %v1314_v24 = vor.u32 %v1312_v6, %v1302_v5  ;;  %v1370_v63 = vor.u32 %v1368_v57, %v1358_v48  ;;  %v10803_v5 = vld [vmem:[#allocation3 + $0x384] ss:$8 sps:$4 sm:$0xff]   ;;  %v10726_v4 = vld [vmem:[%s11630_s26 + $0xc0] ss:$8 sps:$4 sm:$0xff]   ;;  %v1366_v6 = vrot.slane %v1364_v9, 1 }
  0xc3   : > { %3540 = vmatpush2.bf16.msra.mxu1 %v10769_v20  ;;  %v10876_v48 = vld [vmem:[#allocation3 + $0x574] ss:$8 sps:$4 sm:$0xff]  }
  0xc4   : > { %3541 = vmatprep.subr.bf16.mxu1 %v10777_v21  ;;  %v1319_v33 = vsel %vm1191_vm0, %v1314_v24, %v1318_v22  ;;  %v1400_v21 = vshrl.u32 %v10724_v1, 16  ;;  %v1404_v22 = vshll.u32 %v10736_v13, 16  ;;  %v10748_v24 = vld [vmem:[%s11630_s26 + $0xe4] ss:$8 sps:$4 sm:$0xff]  }
  0xc5   : > { %2626 = vmatpush2.bf16.msra.mxu0 %v10742_v8 }
  0xc6   : > { %2627 = vmatprep.subr.bf16.mxu0 %v10756_v11  ;;  %v1388_v11 = vshll.u32 %v10724_v1, 16  ;;  %v1406_v30 = vrot.slane %v1404_v22, 1  ;;  %v2116_v22 = vld [vmem:[%s11630_s26 + $0x18] sm:$0xff] }
  0xc7   : > { %780 = vmatmul.mubr.bf16.gmra.mxu0 %v11703_v26  ;;  %v10783_v26 = vld [vmem:[#allocation3 + $0x3c4] ss:$8 sps:$4 sm:$0xff]   ;;  %3542 = vmatpush2.bf16.msra.mxu1 %v10775_v31 }
  0xc8   : > { %1777 = vmatmul.mubr.bf16.gmra.mxu1 %v1303_v14  ;;  %789 = vmatprep.mubr.bf16.mxu0 %v11707_v29  ;;  %v1332_v29 = vshll.u32 %v11745_v23, 16 }
  0xc9   : > { %1786 = vmatprep.mubr.bf16.mxu1 %v1327_v17  ;;  %2628 = vmatpush2.bf16.msra.mxu0 %v10754_v16  ;;  %v1390_v16 = vrot.slane %v1388_v11, 1 }
  0xca   : > { %2629 = vmatprep.subr.bf16.mxu0 %v10768_v19  ;;  %3543 = vmatprep.subr.bf16.mxu1 %v10783_v26  ;;  %v1334_v44 = vrot.slane %v1332_v29, 1  ;;  %v1380_v19 = vshll.u32 %v10726_v4, 16  ;;  %v1420_v29 = vshll.u32 %v10748_v24, 16 }
  0xcb   : > { %3544 = vmatpush2.bf16.msra.mxu1 %v10781_v39  ;;  %v1391_v20 = vsel %vm1191_vm0, %v1386_v15, %v1390_v16  ;;  %v1402_v28 = vor.u32 %v1400_v21, %v1390_v16  ;;  %v1418_v39 = vor.u32 %v1416_v35, %v1406_v30  ;;  %v2115_v21 = vld [vmem:[%s11630_s26 + $0x10] sm:$0xff] }
  0xcc   : > { %3545 = vmatprep.subr.bf16.mxu1 %v10789_v40  ;;  %v1335_v55 = vsel %vm1191_vm0, %v1330_v43, %v1334_v44  ;;  %v1346_v60 = vor.u32 %v1344_v56, %v1334_v44  ;;  %v1422_v40 = vrot.slane %v1420_v29, 1  ;;  %v1438_v56 = vrot.slane %v1436_v47, 1 }
  0xcd   : > { %2630 = vmatpush2.bf16.msra.mxu0 %v10766_v27  ;;  %v1382_v27 = vrot.slane %v1380_v19, 1  ;;  %v9959_v35 = vcombine.high %v2115_v21, %v2116_v22 }
  0xce   : > { %2631 = vmatprep.subr.bf16.mxu0 %v10780_v32  ;;  %v1392_v32 = vshrl.u32 %v10726_v4, 16  ;;  %v1423_v44 = vsel %vm1191_vm0, %v1418_v39, %v1422_v40 }
  0xcf   : > { %790 = vmatmul.mubr.bf16.gmra.mxu0 %v11717_v46  ;;  %v10811_v46 = vld [vmem:[#allocation3 + $0x474] ss:$8 sps:$4 sm:$0xff]   ;;  %3546 = vmatpush2.bf16.msra.mxu1 %v10787_v50  ;;  %v2337_v39 = vrot.slane %v9959_v35, 1 }
  0xd0   : > { %1787 = vmatmul.mubr.bf16.gmra.mxu1 %v1319_v33  ;;  %799 = vmatprep.mubr.bf16.mxu0 %v11721_v51  ;;  %v1348_v51 = vshll.u32 %v11759_v42, 16  ;;  %v1407_v33 = vsel %vm1191_vm0, %v1402_v28, %v1406_v30  ;;  %v1394_v34 = vor.u32 %v1392_v32, %v1382_v27  ;;  %v10852_v35 = vld [vmem:[#allocation3 + $0x414] ss:$8 sps:$4 sm:$0xff]  }
  0xd1   : > { %1796 = vmatprep.mubr.bf16.mxu1 %v1343_v37  ;;  %2632 = vmatpush2.bf16.msra.mxu0 %v10778_v36  ;;  %v10750_v37 = vld [vmem:[%s11630_s26 + $0xe0] ss:$8 sps:$4 sm:$0xff]  }
  0xd2   : > { %2633 = vmatprep.subr.bf16.mxu0 %v10796_v41  ;;  %3547 = vmatprep.subr.bf16.mxu1 %v10792_v54  ;;  %v1350_v61 = vrot.slane %v1348_v51, 1  ;;  %v1412_v43 = vshll.u32 %v10750_v37, 16  ;;  %v10762_v54 = vld [vmem:[%s11630_s26 + $0xf0] ss:$8 sps:$4 sm:$0xff]  }
  0xd3   : > { %3548 = vmatpush2.bf16.msra.mxu1 %v10790_v58  ;;  %v1428_v57 = vshll.u32 %v10762_v54, 16  ;;  %v1448_v58 = vshrl.u32 %v10760_v38, 16 }
  0xd4   : > { %3549 = vmatprep.subr.bf16.mxu1 %v10800_v59  ;;  %v1351_v8 = vsel %vm1191_vm0, %v1346_v60, %v1350_v61  ;;  %v10774_v60 = vld [vmem:[%s11630_s26 + $0x100] ss:$8 sps:$4 sm:$0xff]  }
  0xd5   : > { %2634 = vmatpush2.bf16.msra.mxu0 %v10794_v52  ;;  %v1414_v52 = vrot.slane %v1412_v43, 1  ;;  %v1456_v16 = vshrl.u32 %v10774_v60, 16 }
  0xd6   : > { %4706 = vmatprep.subr.bf16.mxu0 %v10811_v46  ;;  %v10772_v46 = vld [vmem:[%s11630_s26 + $0x104] ss:$8 sps:$4 sm:$0xff]  }
  0xd7   : > { %800 = vmatmul.mubr.bf16.gmra.mxu0 %v11731_v2  ;;  %v1360_v2 = vshrl.u32 %v11759_v42, 16  ;;  %3550 = vmatpush2.bf16.msra.mxu1 %v10798_v3  ;;  %v1452_v59 = vshll.u32 %v10772_v46, 16 }
  0xd8   : > { %1797 = vmatmul.mubr.bf16.gmra.mxu1 %v1335_v55  ;;  %809 = vmatprep.mubr.bf16.mxu0 %v11735_v7  ;;  %v1375_v7 = vsel %vm1191_vm0, %v1370_v63, %v1374_v0  ;;  %v10784_v63 = vld [vmem:[%s11630_s26 + $0x114] ss:$8 sps:$4 sm:$0xff]   ;;  %v1450_v0 = vor.u32 %v1448_v58, %v1438_v56 }
  0xd9   : > { %1806 = vmatprep.mubr.bf16.mxu1 %v1359_v49  ;;  %3551 = vmatprep.subr.bf16.mxu1 %v10803_v5  ;;  %v1362_v14 = vor.u32 %v1360_v2, %v1350_v61  ;;  %v1424_v49 = vshrl.u32 %v10750_v37, 16  ;;  %v1440_v5 = vshrl.u32 %v10762_v54, 16  ;;  %v1008_v2 = vld [vmem:[%s11630_s26 + $0x120] sm:$0x11]  ;;  %v1468_v10 = vshll.u32 %v10784_v63, 16 }
  0xda   : > { %v1480_v19 = vshrl.u32 %v10784_v63, 16 }
  0xdb   : > { %3552 = vmatpush2.bf16.msra.mxu1 %v10801_v12  ;;  %v1367_v17 = vsel %vm1191_vm0, %v1362_v14, %v1366_v6  ;;  %v1426_v61 = vor.u32 %v1424_v49, %v1414_v52  ;;  %v1470_v14 = vrot.slane %v1468_v10, 1 }
  0xdc   : > { %5625 = vmatprep.subr.bf16.mxu1 %v10876_v48  ;;  %v10814_v48 = vld [vmem:[%s11630_s26 + $0x20] ss:$8 sps:$4 sm:$0xff]  }
  0xdd   : > { %v1482_v28 = vor.u32 %v1480_v19, %v1470_v14  ;;  %v10832_v19 = vld [vmem:[#allocation3 + $0x440] ss:$8 sps:$4 sm:$0xff]  }
  0xdf   : > { %810 = vmatmul.mubr.bf16.gmra.mxu0 %v11745_v23  ;;  %v10738_v23 = vld [vmem:[%s11630_s26 + $0xd0] ss:$8 sps:$4 sm:$0xff]  }
  0xe0   : > { %1807 = vmatmul.mubr.bf16.gmra.mxu1 %v1351_v8  ;;  %819 = vmatprep.mubr.bf16.mxu0 %v11749_v25  ;;  %v1378_v25 = vor.u32 %v1376_v18, %v1366_v6  ;;  %v1396_v26 = vshll.u32 %v10738_v23, 16  ;;  %v1444_v8 = vshll.u32 %v10774_v60, 16  ;;  %v9923_v6 = vcombine.high %v1008_v2, %v1008_v2 }
  0xe1   : > { %1816 = vmatprep.mubr.bf16.mxu1 %v1375_v7  ;;  %v1464_v7 = vshrl.u32 %v10772_v46, 16 }
  0xe2   : > { %v1383_v31 = vsel %vm1191_vm0, %v1378_v25, %v1382_v27  ;;  %v1398_v36 = vrot.slane %v1396_v26, 1  ;;  %v1446_v12 = vrot.slane %v1444_v8, 1  ;;  %v9922_v25 = vcombine.low %v1008_v2, %v1008_v2  ;;  %v3032_v27 = vld [vmem:[%s11630_s26 + $0x10] sm:$0xee] }
  0xe3   : > { %v10026_v47 = vcombine.low %v3032_v27, %v2116_v22  ;;  %v10828_v8 = vld [vmem:[#allocation3 + $0x454] ss:$8 sps:$4 sm:$0xff]  }
  0xe4   : > { %v1399_v41 = vsel %vm1191_vm0, %v1394_v34, %v1398_v36  ;;  %v1476_v26 = vshll.u32 %v9922_v25, 16  ;;  %v10027_v34 = vcombine.high %v3032_v27, %v2116_v22  ;;  %v10838_v25 = vld [vmem:[#allocation3 + $0x430] ss:$8 sps:$4 sm:$0xff]   ;;  %v10846_v27 = vld [vmem:[#allocation3 + $0x424] ss:$8 sps:$4 sm:$0xff]  }
  0xe7   : > { %820 = vmatmul.mubr.bf16.gmra.mxu0 %v11759_v42  ;;  %v1408_v42 = vshrl.u32 %v10738_v23, 16 }
  0xe8   : > { %1817 = vmatmul.mubr.bf16.gmra.mxu1 %v1367_v17  ;;  %829 = vmatprep.mubr.bf16.mxu0 %v11763_v45  ;;  %v1432_v45 = vshrl.u32 %v10748_v24, 16 }
  0xe9   : > { %1826 = vmatprep.mubr.bf16.mxu1 %v1391_v20  ;;  %v1410_v50 = vor.u32 %v1408_v42, %v1398_v36  ;;  %v1484_v20 = vshll.u32 %v9923_v6, 16  ;;  %v10816_v36 = vld [vmem:[%s11630_s26 + $0x24] ss:$8 sps:$4 sm:$0xff]  }
  0xea   : > { %v1434_v55 = vor.u32 %v1432_v45, %v1422_v40  ;;  %v3255_v42 = vrot.slane %v10816_v36, 1  ;;  %v9958_v45 = vcombine.low %v2115_v21, %v2116_v22  ;;  %v10834_v6 = vld [vmem:[#allocation3 + $0x444] ss:$8 sps:$4 sm:$0xff]   ;;  %v10840_v21 = vld [vmem:[#allocation3 + $0x434] ss:$8 sps:$4 sm:$0xff]  }
  0xeb   : > { %v1415_v51 = vsel %vm1191_vm0, %v1410_v50, %v1414_v52  ;;  %v1486_v30 = vrot.slane %v1484_v20, 1  ;;  %v11832_v20 = vld [vmem:[%s11630_s26 + $0x50] ss:$8 sps:$4 sm:$0xff]   ;;  %v10889_v22 = vld [vmem:[#allocation3 + $0x540] ss:$8 sps:$4 sm:$0xff]  }
  0xec   : > { %v1439_v53 = vsel %vm1191_vm0, %v1434_v55, %v1438_v56  ;;  %v2334_v55 = vrot.slane %v9958_v45, 1  ;;  %v3251_v56 = vrot.slane %v10026_v47, 1  ;;  %v11839_v36 = vld [vmem:[%s11630_s26 + $0x60] ss:$8 sps:$4 sm:$0xff]  }
  0xed   : > { %v1487_v29 = vsel %vm1191_vm0, %v1482_v28, %v1486_v30  ;;  %v10897_v30 = vld [vmem:[#allocation3 + $0x534] ss:$8 sps:$4 sm:$0xff]   ;;  %v3269_v45 = vrot.slane %v11839_v36, 1  ;;  %v10856_v47 = vld [vmem:[#allocation3 + $0x400] ss:$8 sps:$4 sm:$0xff]  }
  0xef   : > { %830 = vmatmul.mubr.bf16.gmra.mxu0 %v10714_v62  ;;  %v1430_v62 = vrot.slane %v1428_v57, 1  ;;  %v10809_v57 = vld [vmem:[#allocation3 + $0x470] ss:$8 sps:$4 sm:$0xff]  }
  0xf0   : > { %1827 = vmatmul.mubr.bf16.gmra.mxu1 %v1383_v31  ;;  %839 = vmatprep.mubr.bf16.mxu0 %v10724_v1  ;;  %v1454_v1 = vrot.slane %v1452_v59, 1 }
  0xf1   : > { %1836 = vmatprep.mubr.bf16.mxu1 %v1407_v33  ;;  %v1431_v3 = vsel %vm1191_vm0, %v1426_v61, %v1430_v62  ;;  %v1442_v11 = vor.u32 %v1440_v5, %v1430_v62  ;;  %v10806_v33 = vld [vmem:[%s11630_s26 + $0x4] ss:$8 sps:$4 sm:$0xfe]   ;;  %v2342_v62 = vsel %vm2332_vm1, %v2337_v39, %v3255_v42 }
  0xf2   : > { %v1455_v9 = vsel %vm1191_vm0, %v1450_v0, %v1454_v1  ;;  %v2336_v40 = vrot.slane %v10806_v33, 1  ;;  %v10823_v61 = vld [vmem:[%s11630_s26 + $0x44] ss:$8 sps:$4 sm:$0xff]   ;;  %v10874_v0 = vld [vmem:[#allocation3 + $0x570] ss:$8 sps:$4 sm:$0xff]  }
  0xf3   : > { %v1447_v15 = vsel %vm1191_vm0, %v1442_v11, %v1446_v12  ;;  %v3263_v2 = vrot.slane %v10823_v61, 1  ;;  %v10825_v11 = vld [vmem:[%s11630_s26 + $0x40] ss:$8 sps:$4 sm:$0xff]  }
  0xf4   : > { %v2338_v50 = vsel %vm2332_vm1, %v2336_v40, %v2337_v39  ;;  %v10844_v33 = vld [vmem:[#allocation3 + $0x420] ss:$8 sps:$4 sm:$0xff]   ;;  %v10909_v39 = vld [vmem:[#allocation3 + $0x514] ss:$8 sps:$4 sm:$0xff]  }
  0xf7   : > { %840 = vmatmul.mubr.bf16.gmra.mxu0 %v10726_v4  ;;  %v10786_v4 = vld [vmem:[%s11630_s26 + $0x110] ss:$8 sps:$4 sm:$0xff]  }
  0xf8   : > { %1837 = vmatmul.mubr.bf16.gmra.mxu1 %v1399_v41  ;;  %849 = vmatprep.mubr.bf16.mxu0 %v10736_v13  ;;  %v1466_v13 = vor.u32 %v1464_v7, %v1454_v1  ;;  %v1460_v17 = vshll.u32 %v10786_v4, 16  ;;  %v1472_v32 = vshrl.u32 %v10786_v4, 16  ;;  %v3254_v41 = vrot.slane %v10027_v34, 1  ;;  %v10879_v1 = vld [vmem:[#allocation3 + $0x564] ss:$8 sps:$4 sm:$0xff]  }
  0xf9   : > { %1846 = vmatprep.mubr.bf16.mxu1 %v1423_v44  ;;  %v10804_v44 = vld [vmem:[%s11630_s26] ss:$8 sps:$4 sm:$0xfe]  }
  0xfa   : > { %v1471_v18 = vsel %vm1191_vm0, %v1466_v13, %v1470_v14  ;;  %v3256_v52 = vsel %vm2332_vm1, %v3254_v41, %v3255_v42  ;;  %v10888_v14 = vld [vmem:[#allocation3 + $0x554] ss:$8 sps:$4 sm:$0xff]   ;;  %v10858_v41 = vld [vmem:[#allocation3 + $0x404] ss:$8 sps:$4 sm:$0xff]  }
  0xff   : > { %850 = vmatmul.mubr.bf16.gmra.mxu0 %v10738_v23  ;;  %v1458_v23 = vor.u32 %v1456_v16, %v1446_v12  ;;  %v10826_v12 = vld [vmem:[#allocation3 + $0x450] ss:$8 sps:$4 sm:$0xff]   ;;  %v10891_v16 = vld [vmem:[#allocation3 + $0x544] ss:$8 sps:$4 sm:$0xff]  }
 0x100   : > { %1847 = vmatmul.mubr.bf16.gmra.mxu1 %v1415_v51  ;;  %859 = vmatprep.mubr.bf16.mxu0 %v10748_v24  ;;  %v1462_v24 = vrot.slane %v1460_v17, 1  ;;  %v3252_v51 = vrot.slane %v10814_v48, 1  ;;  %v3261_v17 = vrot.slane %v10825_v11, 1  ;;  %v10864_v48 = vld [vmem:[#allocation3 + $0x4f4] ss:$8 sps:$4 sm:$0xff]  }
 0x101   : > { %1856 = vmatprep.mubr.bf16.mxu1 %v1439_v53  ;;  %v10821_v53 = vld [vmem:[#allocation3 + $0x464] ss:$8 sps:$4 sm:$0xff]   ;;  %v10898_v11 = vld [vmem:[#allocation3 + $0x4c0] ss:$8 sps:$4 sm:$0xff]  }
 0x102   : > { %v1463_v31 = vsel %vm1191_vm0, %v1458_v23, %v1462_v24  ;;  %v3253_v59 = vsel %vm2332_vm1, %v3251_v56, %v3252_v51  ;;  %v2340_v7 = vsel %vm2332_vm1, %v2334_v55, %v3252_v51  ;;  %v10835_v23 = vld [vmem:[%s11630_s26 + $0x64] ss:$8 sps:$4 sm:$0xff]   ;;  %v10921_v56 = vld [vmem:[#allocation3 + $0x5f4] ss:$8 sps:$4 sm:$0xff]  }
 0x103   : > { %v3271_v34 = vrot.slane %v10835_v23, 1 }
 0x107   : > { %860 = vmatmul.mubr.bf16.gmra.mxu0 %v10750_v37  ;;  %v1474_v37 = vor.u32 %v1472_v32, %v1462_v24  ;;  %v10903_v32 = vld [vmem:[#allocation3 + $0x524] ss:$8 sps:$4 sm:$0xff]  }
 0x108   : > { %1857 = vmatmul.mubr.bf16.gmra.mxu1 %v1431_v3  ;;  %869 = vmatprep.mubr.bf16.mxu0 %v10760_v38  ;;  %v1478_v38 = vrot.slane %v1476_v26, 1  ;;  %v10819_v3 = vld [vmem:[#allocation3 + $0x460] ss:$8 sps:$4 sm:$0xff]   ;;  %v3265_v26 = vrot.slane %v11832_v20, 1  ;;  %v10945_v20 = vld [vmem:[#allocation3 + $0x5b4] ss:$8 sps:$4 sm:$0xff]  }
 0x109   : > { %1866 = vmatprep.mubr.bf16.mxu1 %v1455_v9  ;;  %v10877_v9 = vld [vmem:[#allocation3 + $0x560] ss:$8 sps:$4 sm:$0xff]  }
 0x10a   : > { %v1479_v43 = vsel %vm1191_vm0, %v1474_v37, %v1478_v38  ;;  %v10841_v37 = vld [vmem:[%s11630_s26 + $0x74] ss:$8 sps:$4 sm:$0xff]   ;;  %v10850_v38 = vld [vmem:[#allocation3 + $0x410] ss:$8 sps:$4 sm:$0xff]   ;;  %v3266_v40 = vsel %vm2332_vm1, %v3261_v17, %v3265_v26 }
 0x10f   : > { %870 = vmatmul.mubr.bf16.gmra.mxu0 %v10762_v54  ;;  %v10817_v54 = vld [vmem:[%s11630_s26 + $0x34] ss:$8 sps:$4 sm:$0xff]  }
 0x110   : > { %1867 = vmatmul.mubr.bf16.gmra.mxu1 %v1447_v15  ;;  %879 = vmatprep.mubr.bf16.mxu0 %v10772_v46  ;;  %v2333_v46 = vrot.slane %v10804_v44, 1  ;;  %v3259_v49 = vrot.slane %v10817_v54, 1  ;;  %v10886_v15 = vld [vmem:[#allocation3 + $0x550] ss:$8 sps:$4 sm:$0xff]   ;;  %v10915_v44 = vld [vmem:[#allocation3 + $0x504] ss:$8 sps:$4 sm:$0xff]  }
 0x111   : > { %1876 = vmatprep.mubr.bf16.mxu1 %v1471_v18  ;;  %v10843_v54 = vld [vmem:[%s11630_s26 + $0x70] ss:$8 sps:$4 sm:$0xff]  }
 0x112   : > { %v2335_v58 = vsel %vm2332_vm1, %v2333_v46, %v2334_v55  ;;  %v3264_v13 = vsel %vm2332_vm1, %v3259_v49, %v3263_v2  ;;  %v10847_v46 = vld [vmem:[%s11630_s26 + $0x84] ss:$8 sps:$4 sm:$0xff]   ;;  %v10862_v55 = vld [vmem:[#allocation3 + $0x4f0] ss:$8 sps:$4 sm:$0xff]  }
 0x113   : > { %v3279_v61 = vrot.slane %v10847_v46, 1  ;;  %v10950_v46 = vld [vmem:[#allocation3 + $0x480] ss:$8 sps:$4 sm:$0xff]  }
 0x117   : > { %880 = vmatmul.mubr.bf16.gmra.mxu0 %v10774_v60  ;;  %v10822_v60 = vld [vmem:[%s11630_s26 + $0x30] ss:$8 sps:$4 sm:$0xff]  }
 0x118   : > { %1877 = vmatmul.mubr.bf16.gmra.mxu1 %v1463_v31  ;;  %889 = vmatprep.mubr.bf16.mxu0 %v10784_v63  ;;  %v3260_v63 = vsel %vm2332_vm1, %v3255_v42, %v3259_v49  ;;  %v3257_v5 = vrot.slane %v10822_v60, 1  ;;  %v10895_v31 = vld [vmem:[#allocation3 + $0x530] ss:$8 sps:$4 sm:$0xff]   ;;  %v10872_v49 = vld [vmem:[#allocation3 + $0x4e4] ss:$8 sps:$4 sm:$0xff]   ;;  %v3273_v60 = vrot.slane %v10843_v54, 1 }
 0x119   : > { %1886 = vmatprep.mubr.bf16.mxu1 %v1487_v29  ;;  %v10901_v29 = vld [vmem:[#allocation3 + $0x520] ss:$8 sps:$4 sm:$0xff]  }
 0x11a   : > { %v3258_v10 = vsel %vm2332_vm1, %v3252_v51, %v3257_v5  ;;  %v3262_v24 = vsel %vm2332_vm1, %v3257_v5, %v3261_v17  ;;  %v3270_v51 = vsel %vm2332_vm1, %v3265_v26, %v3269_v45  ;;  %v10933_v5 = vld [vmem:[#allocation3 + $0x5d4] ss:$8 sps:$4 sm:$0xff]  }
 0x11f   : > { %890 = vmatmul.mubr.bf16.gmra.mxu0 %v10786_v4  ;;  %v10829_v4 = vld [vmem:[%s11630_s26 + $0x54] ss:$8 sps:$4 sm:$0xff]  }
 0x120   : > { %1887 = vmatmul.mubr.bf16.gmra.mxu1 %v1479_v43  ;;  %2635 = vmatprep.mubr.bf16.mxu0 %v2338_v50  ;;  %v3267_v18 = vrot.slane %v10829_v4, 1  ;;  %v10907_v43 = vld [vmem:[#allocation3 + $0x510] ss:$8 sps:$4 sm:$0xff]   ;;  %v10913_v50 = vld [vmem:[#allocation3 + $0x500] ss:$8 sps:$4 sm:$0xff]  }
 0x121   : > { %3553 = vmatprep.mubr.bf16.mxu1 %v3256_v52  ;;  %v3275_v52 = vrot.slane %v10841_v37, 1  ;;  %v11877_v37 = vld [vmem:[%s11630_s26 + $0xb4] ss:$8 sps:$4 sm:$0xff]  }
 0x122   : > { %v3268_v28 = vsel %vm2332_vm1, %v3263_v2, %v3267_v18  ;;  %v3272_v42 = vsel %vm2332_vm1, %v3267_v18, %v3271_v34  ;;  %v10900_v2 = vld [vmem:[#allocation3 + $0x4c4] ss:$8 sps:$4 sm:$0xff]  }
 0x123   : > { %v10924_v18 = vld [vmem:[#allocation3 + $0x4a4] ss:$8 sps:$4 sm:$0xff]  }
 0x127   : > { %2636 = vmatmul.mubr.bf16.vlgmr.msra.gmra.mxu0 %v2335_v58  ;;  %v10927_v58 = vld [vmem:[#allocation3 + $0x5e4] ss:$8 sps:$4 sm:$0xff]  }
 0x128   : > { %3554 = vmatmul.mubr.bf16.vlgmr.msra.gmra.mxu1 %v3253_v59  ;;  %4707 = vmatpush1.bf16.msra.mxu0 %v10809_v57  ;;  %v3276_v57 = vsel %vm2332_vm1, %v3271_v34, %v3275_v52  ;;  %v10870_v59 = vld [vmem:[#allocation3 + $0x4e0] ss:$8 sps:$4 sm:$0xff]  }
 0x129   : > { %2645 = vmatprep.mubr.bf16.mxu0 %v2342_v62  ;;  %3563 = vmatprep.mubr.bf16.mxu1 %v3260_v63  ;;  %v11850_v62 = vld [vmem:[%s11630_s26 + $0x80] ss:$8 sps:$4 sm:$0xff]  }
 0x12a   : > { %4708 = vmatprep.subr.bf16.mxu0 %v10821_v53  ;;  %5626 = vmatpush1.bf16.msra.mxu1 %v10874_v0  ;;  %v10919_v53 = vld [vmem:[#allocation3 + $0x5f0] ss:$8 sps:$4 sm:$0xff]   ;;  %v10925_v0 = vld [vmem:[#allocation3 + $0x5e0] ss:$8 sps:$4 sm:$0xff]  }
 0x12b   : > { %5627 = vmatprep.subr.bf16.mxu1 %v10879_v1  ;;  %v11853_v1 = vld [vmem:[%s11630_s26 + $0x94] ss:$8 sps:$4 sm:$0xff]  }
 0x12c   : > { %4709 = vmatpush1.bf16.msra.mxu0 %v10819_v3  ;;  %v10883_v3 = vld [vmem:[#allocation3 + $0x4d0] ss:$8 sps:$4 sm:$0xff]   ;;  %v3283_v4 = vrot.slane %v11853_v1, 1 }
 0x12d   : > { %4710 = vmatprep.subr.bf16.mxu0 %v10828_v8  ;;  %v3274_v8 = vsel %vm2332_vm1, %v3269_v45, %v3273_v60 }
 0x12e   : > { %5628 = vmatpush1.bf16.msra.mxu1 %v10877_v9  ;;  %v3280_v9 = vsel %vm2332_vm1, %v3275_v52, %v3279_v61 }
 0x12f   : > { %2646 = vmatmul.mubr.bf16.gmra.mxu0 %v2340_v7  ;;  %5629 = vmatprep.subr.bf16.mxu1 %v10888_v14  ;;  %v10931_v7 = vld [vmem:[#allocation3 + $0x5d0] ss:$8 sps:$4 sm:$0xff]   ;;  %v10912_v14 = vld [vmem:[#allocation3 + $0x4b4] ss:$8 sps:$4 sm:$0xff]  }
 0x130   : > { %3564 = vmatmul.mubr.bf16.gmra.mxu1 %v3258_v10  ;;  %2655 = vmatprep.mubr.bf16.mxu0 %v3260_v63  ;;  %v10885_v63 = vld [vmem:[#allocation3 + $0x4d4] ss:$8 sps:$4 sm:$0xff]  }
 0x131   : > { %3573 = vmatprep.mubr.bf16.mxu1 %v3264_v13  ;;  %4711 = vmatpush1.bf16.msra.mxu0 %v10826_v12  ;;  %v3277_v12 = vrot.slane %v11850_v62, 1 }
 0x132   : > { %4712 = vmatprep.subr.bf16.mxu0 %v10834_v6  ;;  %5630 = vmatpush1.bf16.msra.mxu1 %v10886_v15  ;;  %v10937_v6 = vld [vmem:[#allocation3 + $0x5c0] ss:$8 sps:$4 sm:$0xff]   ;;  %v11863_v15 = vld [vmem:[%s11630_s26 + $0xa4] ss:$8 sps:$4 sm:$0xff]  }
 0x133   : > { %5631 = vmatprep.subr.bf16.mxu1 %v10891_v16  ;;  %v10910_v16 = vld [vmem:[#allocation3 + $0x4b0] ss:$8 sps:$4 sm:$0xff]   ;;  %v3278_v17 = vsel %vm2332_vm1, %v3273_v60, %v3277_v12  ;;  %v3287_v26 = vrot.slane %v11863_v15, 1 }
 0x135   : > { %4713 = vmatpush1.bf16.msra.mxu0 %v10832_v19  ;;  %v3284_v19 = vsel %vm2332_vm1, %v3279_v61, %v3283_v4  ;;  %v3288_v45 = vsel %vm2332_vm1, %v3283_v4, %v3287_v26 }
 0x136   : > { %4714 = vmatprep.subr.bf16.mxu0 %v10840_v21  ;;  %5632 = vmatpush1.bf16.msra.mxu1 %v10889_v22  ;;  %v10943_v21 = vld [vmem:[#allocation3 + $0x5b0] ss:$8 sps:$4 sm:$0xff]  }
 0x137   : > { %2656 = vmatmul.mubr.bf16.gmra.mxu0 %v3258_v10  ;;  %5633 = vmatprep.subr.bf16.mxu1 %v10897_v30  ;;  %v10939_v10 = vld [vmem:[#allocation3 + $0x5c4] ss:$8 sps:$4 sm:$0xff]   ;;  %v10936_v30 = vld [vmem:[#allocation3 + $0x494] ss:$8 sps:$4 sm:$0xff]  }
 0x138   : > { %3574 = vmatmul.mubr.bf16.gmra.mxu1 %v3262_v24  ;;  %2665 = vmatprep.mubr.bf16.mxu0 %v3264_v13  ;;  %v11860_v13 = vld [vmem:[%s11630_s26 + $0x90] ss:$8 sps:$4 sm:$0xff]  }
 0x139   : > { %3583 = vmatprep.mubr.bf16.mxu1 %v3268_v28  ;;  %4715 = vmatpush1.bf16.msra.mxu0 %v10838_v25  ;;  %v10948_v25 = vld [vmem:[#allocation3 + $0x5a4] ss:$8 sps:$4 sm:$0xff]  }
 0x13a   : > { %4716 = vmatprep.subr.bf16.mxu0 %v10846_v27  ;;  %5634 = vmatpush1.bf16.msra.mxu1 %v10895_v31 }
 0x13b   : > { %5635 = vmatprep.subr.bf16.mxu1 %v10903_v32 }
 0x13d   : > { %4717 = vmatpush1.bf16.msra.mxu0 %v10844_v33 }
 0x13e   : > { %4718 = vmatprep.subr.bf16.mxu0 %v10852_v35  ;;  %5636 = vmatpush1.bf16.msra.mxu1 %v10901_v29  ;;  %v11874_v35 = vld [vmem:[%s11630_s26 + $0xa0] ss:$8 sps:$4 sm:$0xff]  }
 0x13f   : > { %2666 = vmatmul.mubr.bf16.gmra.mxu0 %v3262_v24  ;;  %5637 = vmatprep.subr.bf16.mxu1 %v10909_v39  ;;  %v10922_v24 = vld [vmem:[#allocation3 + $0x4a0] ss:$8 sps:$4 sm:$0xff]  }
 0x140   : > { %3584 = vmatmul.mubr.bf16.gmra.mxu1 %v3266_v40  ;;  %2675 = vmatprep.mubr.bf16.mxu0 %v3268_v28  ;;  %v3281_v28 = vrot.slane %v11860_v13, 1  ;;  %v10946_v29 = vld [vmem:[#allocation3 + $0x5a0] ss:$8 sps:$4 sm:$0xff]  }
 0x141   : > { %3593 = vmatprep.mubr.bf16.mxu1 %v3272_v42  ;;  %4719 = vmatpush1.bf16.msra.mxu0 %v10850_v38  ;;  %v10934_v38 = vld [vmem:[#allocation3 + $0x490] ss:$8 sps:$4 sm:$0xff]  }
 0x142   : > { %4720 = vmatprep.subr.bf16.mxu0 %v10858_v41  ;;  %5638 = vmatpush1.bf16.msra.mxu1 %v10907_v43  ;;  %v10952_v41 = vld [vmem:[#allocation3 + $0x484] ss:$8 sps:$4 sm:$0xff]  }
 0x143   : > { %5639 = vmatprep.subr.bf16.mxu1 %v10915_v44 }
 0x145   : > { %4721 = vmatpush1.bf16.msra.mxu0 %v10856_v47  ;;  %v10956_v47 = vld [vmem:[#allocation3 + $0x590] ss:$8 sps:$4 sm:$0xff]  }
 0x146   : > { %4722 = vmatprep.subr.bf16.mxu0 %v10864_v48  ;;  %5640 = vmatpush1.bf16.msra.mxu1 %v10913_v50  ;;  %v10961_v50 = vld [vmem:[#allocation3 + $0x584] ss:$8 sps:$4 sm:$0xff]  }
 0x147   : > { %2676 = vmatmul.mubr.bf16.gmra.mxu0 %v3266_v40  ;;  %5641 = vmatprep.subr.bf16.mxu1 %v10921_v56  ;;  %v3282_v40 = vsel %vm2332_vm1, %v3277_v12, %v3281_v28  ;;  %v3285_v56 = vrot.slane %v11874_v35, 1 }
 0x148   : > { %3594 = vmatmul.mubr.bf16.gmra.mxu1 %v3270_v51  ;;  %2685 = vmatprep.mubr.bf16.mxu0 %v3272_v42  ;;  %v10958_v42 = vld [vmem:[#allocation3 + $0x594] ss:$8 sps:$4 sm:$0xff]  }
 0x149   : > { %3603 = vmatprep.mubr.bf16.mxu1 %v3276_v57  ;;  %4723 = vmatpush2.bf16.msra.mxu0 %v10862_v55 }
 0x14a   : > { %4724 = vmatprep.subr.bf16.mxu0 %v10872_v49  ;;  %5642 = vmatpush2.bf16.msra.mxu1 %v10919_v53  ;;  %v10959_v53 = vld [vmem:[#allocation3 + $0x580] ss:$8 sps:$4 sm:$0xff]  }
 0x14b   : > { %5643 = vmatprep.subr.bf16.mxu1 %v10927_v58 }
 0x14d   : > { %4725 = vmatpush2.bf16.msra.mxu0 %v10870_v59  ;;  %v10969_v59 = vld [vmem:[#allocation3 + $0x674] ss:$8 sps:$4 sm:$0xff]  }
 0x14e   : > { %4726 = vmatprep.subr.bf16.mxu0 %v10885_v63  ;;  %5644 = vmatpush2.bf16.msra.mxu1 %v10925_v0  ;;  %v3286_v63 = vsel %vm2332_vm1, %v3281_v28, %v3285_v56  ;;  %v10867_v0 = vld [vmem:[%s11630_s26 + $0xb0] ss:$8 sps:$4 sm:$0xff]  }
 0x14f   : > { %2686 = vmatmul.mubr.bf16.gmra.mxu0 %v3270_v51  ;;  %5645 = vmatprep.subr.bf16.mxu1 %v10933_v5 }
 0x150   : > { %3604 = vmatmul.mubr.bf16.gmra.mxu1 %v3274_v8  ;;  %2695 = vmatprep.mubr.bf16.mxu0 %v3276_v57  ;;  %v3291_v57 = vrot.slane %v11877_v37, 1 }
 0x151   : > { %3613 = vmatprep.mubr.bf16.mxu1 %v3280_v9  ;;  %4727 = vmatpush2.bf16.msra.mxu0 %v10883_v3 }
 0x152   : > { %4728 = vmatprep.subr.bf16.mxu0 %v10900_v2  ;;  %5646 = vmatpush2.bf16.msra.mxu1 %v10931_v7  ;;  %v3292_v5 = vsel %vm2332_vm1, %v3287_v26, %v3291_v57 }
 0x153   : > { %5647 = vmatprep.subr.bf16.mxu1 %v10939_v10 }
 0x155   : > { %4729 = vmatpush2.bf16.msra.mxu0 %v10898_v11  ;;  %v3289_v11 = vrot.slane %v10867_v0, 1 }
 0x156   : > { %4730 = vmatprep.subr.bf16.mxu0 %v10912_v14  ;;  %5648 = vmatpush2.bf16.msra.mxu1 %v10937_v6 }
 0x157   : > { %v721_v22 = vpop.f32.mrf.mxu0  ;;  %2696 = vmatmul.mubr.bf16.gmra.mxu0 %v3274_v8  ;;  %5649 = vmatprep.subr.bf16.mxu1 %v10945_v20  ;;  %v10868_v8 = vld [vmem:[%s11630_s26 + $0xc4] ss:$8 sps:$4 sm:$0xff]  }
 0x158   : > { %v1718_v23 = vpop.f32.mrf.mxu1  ;;  %3614 = vmatmul.mubr.bf16.gmra.mxu1 %v3278_v17  ;;  %2705 = vmatprep.mubr.bf16.mxu0 %v3280_v9  ;;  %v3295_v13 = vrot.slane %v10868_v8, 1 }
 0x159   : > { %v11867_v27 = vadd.f32 %v1718_v23, %v721_v22  ;;  %3623 = vmatprep.mubr.bf16.mxu1 %v3284_v19  ;;  %v723_v31 = vpop.f32.mrf.mxu0  ;;  %4731 = vmatpush2.bf16.msra.mxu0 %v10910_v16  ;;  %v10880_v22 = vld [vmem:[%s11630_s26 + $0xd4] ss:$8 sps:$4 sm:$0xff]  }
 0x15a   : > { %v1720_v32 = vpop.f32.mrf.mxu1  ;;  %4732 = vmatprep.subr.bf16.mxu0 %v10924_v18  ;;  %5650 = vmatpush2.bf16.msra.mxu1 %v10943_v21  ;;  %v10873_v18 = vld [vmem:[%s11630_s26 + $0xc0] ss:$8 sps:$4 sm:$0xff]   ;;  %v3296_v21 = vsel %vm2332_vm1, %v3291_v57, %v3295_v13  ;;  %v3299_v26 = vrot.slane %v10880_v22, 1 }
 0x15b   : > { %v11871_v33 = vadd.f32 %v1720_v32, %v723_v31  ;;  %v725_v34 = vpop.f32.mrf.mxu0  ;;  %5651 = vmatprep.subr.bf16.mxu1 %v10948_v25 }
 0x15c   : > { %v1722_v36 = vpop.f32.mrf.mxu1 }
 0x15d   : > { %v11879_v39 = vadd.f32 %v1722_v36, %v725_v34  ;;  %v727_v43 = vpop.f32.mrf.mxu0  ;;  %4733 = vmatpush2.bf16.msra.mxu0 %v10922_v24 }
 0x15e   : > { %v1724_v44 = vpop.f32.mrf.mxu1  ;;  %4734 = vmatprep.subr.bf16.mxu0 %v10936_v30  ;;  %5652 = vmatpush2.bf16.msra.mxu1 %v10946_v29  ;;  %v3293_v30 = vrot.slane %v10873_v18, 1 }
 0x15f   : > { %v11883_v48 = vadd.f32 %v1724_v44, %v727_v43  ;;  %v731_v52 = vpop.f32.mrf.mxu0  ;;  %2706 = vmatmul.mubr.bf16.gmra.mxu0 %v3278_v17  ;;  %5653 = vmatprep.subr.bf16.mxu1 %v10958_v42  ;;  %v3290_v17 = vsel %vm2332_vm1, %v3285_v56, %v3289_v11  ;;  %v3300_v42 = vsel %vm2332_vm1, %v3295_v13, %v3299_v26  ;;  %v10892_v43 = vld [vmem:[%s11630_s26 + $0xe4] ss:$8 sps:$4 sm:$0xff]  }
 0x160   : > { %v1728_v54 = vpop.f32.mrf.mxu1  ;;  %3624 = vmatmul.mubr.bf16.gmra.mxu1 %v3282_v40  ;;  %2715 = vmatprep.mubr.bf16.mxu0 %v3284_v19  ;;  %v3294_v37 = vsel %vm2332_vm1, %v3289_v11, %v3293_v30  ;;  %v3303_v56 = vrot.slane %v10892_v43, 1 }
 0x161   : > { %v11885_v55 = vadd.f32 %v1728_v54, %v731_v52  ;;  %3633 = vmatprep.mubr.bf16.mxu1 %v3288_v45  ;;  %v733_v51 = vpop.f32.mrf.mxu0  ;;  %4735 = vmatpush2.bf16.msra.mxu0 %v10934_v38  ;;  %v10882_v38 = vld [vmem:[%s11630_s26 + $0xd0] ss:$8 sps:$4 sm:$0xff]  }
 0x162   : > { %v1730_v49 = vpop.f32.mrf.mxu1  ;;  %4736 = vmatprep.subr.bf16.mxu0 %v10952_v41  ;;  %5654 = vmatpush2.bf16.msra.mxu1 %v10956_v47  ;;  %v3297_v52 = vrot.slane %v10882_v38, 1  ;;  %v3304_v0 = vsel %vm2332_vm1, %v3299_v26, %v3303_v56 }
 0x163   : > { %v11889_v58 = vadd.f32 %v1730_v49, %v733_v51  ;;  %v735_v60 = vpop.f32.mrf.mxu0  ;;  %5655 = vmatprep.subr.bf16.mxu1 %v10961_v50 }
 0x164   : > { %v1732_v61 = vpop.f32.mrf.mxu1 }
 0x165   : > { %v11891_v62 = vadd.f32 %v1732_v61, %v735_v60  ;;  %v737_v1 = vpop.f32.mrf.mxu0  ;;  %4737 = vmatpush2.bf16.msra.mxu0 %v10950_v46  ;;  %v10894_v60 = vld [vmem:[%s11630_s26 + $0xe0] ss:$8 sps:$4 sm:$0xff]  }
 0x166   : > { %v1734_v3 = vpop.f32.mrf.mxu1  ;;  %5656 = vmatpush2.bf16.msra.mxu1 %v10959_v53  ;;  %6543 = vmatprep.subr.bf16.mxu0 %v10969_v59  ;;  %v3298_v59 = vsel %vm2332_vm1, %v3293_v30, %v3297_v52 }
 0x167   : > { %v11897_v2 = vadd.f32 %v1734_v3, %v737_v1  ;;  %v741_v9 = vpop.f32.mrf.mxu0  ;;  %2716 = vmatmul.mubr.bf16.gmra.mxu0 %v3282_v40  ;;  %v10904_v1 = vld [vmem:[%s11630_s26 + $0xf4] ss:$8 sps:$4 sm:$0xff]  }
 0x168   : > { %v1738_v7 = vpop.f32.mrf.mxu1  ;;  %3634 = vmatmul.mubr.bf16.gmra.mxu1 %v3286_v63  ;;  %2725 = vmatprep.mubr.bf16.mxu0 %v3288_v45 }
 0x169   : > { %v11899_v10 = vadd.f32 %v1738_v7, %v741_v9  ;;  %3643 = vmatprep.mubr.bf16.mxu1 %v3292_v5  ;;  %v743_v12 = vpop.f32.mrf.mxu0  ;;  %v3301_v7 = vrot.slane %v10894_v60, 1 }
 0x16a   : > { %v1740_v4 = vpop.f32.mrf.mxu1 }
 0x16b   : > { %v11901_v14 = vadd.f32 %v1740_v4, %v743_v12  ;;  %v745_v6 = vpop.f32.mrf.mxu0  ;;  %v3307_v4 = vrot.slane %v10904_v1, 1  ;;  %v3302_v18 = vsel %vm2332_vm1, %v3297_v52, %v3301_v7 }
 0x16c   : > { %v1742_v15 = vpop.f32.mrf.mxu1 }
 0x16d   : > { %v11903_v16 = vadd.f32 %v1742_v15, %v745_v6  ;;  %v747_v19 = vpop.f32.mrf.mxu0  ;;  %v3308_v22 = vsel %vm2332_vm1, %v3303_v56, %v3307_v4  ;;  %v10928_v56 = vld [vmem:[%s11630_s26 + $0x114] ss:$8 sps:$4 sm:$0xff]  }
 0x16e   : > { %v1744_v20 = vpop.f32.mrf.mxu1  ;;  %v11961_v1 = vrot.slane %v10928_v56, 1 }
 0x16f   : > { %v11909_v23 = vadd.f32 %v1744_v20, %v747_v19  ;;  %v751_v24 = vpop.f32.mrf.mxu0  ;;  %2726 = vmatmul.mubr.bf16.gmra.mxu0 %v3286_v63  ;;  %v10906_v19 = vld [vmem:[%s11630_s26 + $0xf0] ss:$8 sps:$4 sm:$0xff]  }
 0x170   : > { %v1748_v25 = vpop.f32.mrf.mxu1  ;;  %3644 = vmatmul.mubr.bf16.gmra.mxu1 %v3290_v17  ;;  %2735 = vmatprep.mubr.bf16.mxu0 %v3292_v5 }
 0x171   : > { %v11911_v28 = vadd.f32 %v1748_v25, %v751_v24  ;;  %3653 = vmatprep.mubr.bf16.mxu1 %v3296_v21  ;;  %v753_v31 = vpop.f32.mrf.mxu0  ;;  %v10916_v24 = vld [vmem:[%s11630_s26 + $0x104] ss:$8 sps:$4 sm:$0xff]  }
 0x172   : > { %v1750_v32 = vpop.f32.mrf.mxu1  ;;  %v3311_v38 = vrot.slane %v10916_v24, 1 }
 0x173   : > { %v11913_v35 = vadd.f32 %v1750_v32, %v753_v31  ;;  %v755_v29 = vpop.f32.mrf.mxu0  ;;  %v11031_v32 = vld [vmem:[#allocation3 + $0x774] ss:$8 sps:$4 sm:$0xff]  }
 0x174   : > { %v1752_v34 = vpop.f32.mrf.mxu1  ;;  %7728 = vmatprep.subr.bf16.mxu1 %v11031_v32 }
 0x175   : > { %v11915_v36 = vadd.f32 %v1752_v34, %v755_v29  ;;  %v757_v40 = vpop.f32.mrf.mxu0  ;;  %v3305_v29 = vrot.slane %v10906_v19, 1  ;;  %v11972_v19 = vld [vmem:[%s11630_s26 + $0x124] ss:$8 sps:$4 sm:$0xff]  }
 0x176   : > { %v1754_v41 = vpop.f32.mrf.mxu1 }
 0x177   : > { %v11921_v44 = vadd.f32 %v1754_v41, %v757_v40  ;;  %v761_v45 = vpop.f32.mrf.mxu0  ;;  %2736 = vmatmul.mubr.bf16.gmra.mxu0 %v3290_v17 }
 0x178   : > { %v1758_v47 = vpop.f32.mrf.mxu1  ;;  %3654 = vmatmul.mubr.bf16.gmra.mxu1 %v3294_v37  ;;  %2745 = vmatprep.mubr.bf16.mxu0 %v3296_v21 }
 0x179   : > { %v11923_v50 = vadd.f32 %v1758_v47, %v761_v45  ;;  %3663 = vmatprep.mubr.bf16.mxu1 %v3300_v42  ;;  %v763_v54 = vpop.f32.mrf.mxu0  ;;  %v3306_v45 = vsel %vm2332_vm1, %v3301_v7, %v3305_v29  ;;  %v10918_v47 = vld [vmem:[%s11630_s26 + $0x100] ss:$8 sps:$4 sm:$0xff]  }
 0x17a   : > { %v1760_v46 = vpop.f32.mrf.mxu1 }
 0x17b   : > { %v11925_v51 = vadd.f32 %v1760_v46, %v763_v54  ;;  %v765_v49 = vpop.f32.mrf.mxu0  ;;  %v3312_v46 = vsel %vm2332_vm1, %v3307_v4, %v3311_v38  ;;  %v10930_v4 = vld [vmem:[%s11630_s26 + $0x110] ss:$8 sps:$4 sm:$0xff]  }
 0x17c   : > { %v1762_v57 = vpop.f32.mrf.mxu1 }
 0x17d   : > { %v11927_v53 = vadd.f32 %v1762_v57, %v765_v49  ;;  %v767_v61 = vpop.f32.mrf.mxu0 }
 0x17e   : > { %v1764_v63 = vpop.f32.mrf.mxu1 }
 0x17f   : > { %v11933_v3 = vadd.f32 %v1764_v63, %v767_v61  ;;  %v771_v5 = vpop.f32.mrf.mxu0  ;;  %2746 = vmatmul.mubr.bf16.gmra.mxu0 %v3294_v37  ;;  %v3309_v61 = vrot.slane %v10918_v47, 1 }
 0x180   : > { %v1768_v8 = vpop.f32.mrf.mxu1  ;;  %3664 = vmatmul.mubr.bf16.gmra.mxu1 %v3298_v59  ;;  %2755 = vmatprep.mubr.bf16.mxu0 %v3300_v42 }
 0x181   : > { %v11935_v9 = vadd.f32 %v1768_v8, %v771_v5  ;;  %3673 = vmatprep.mubr.bf16.mxu1 %v3304_v0  ;;  %v773_v11 = vpop.f32.mrf.mxu0 }
 0x182   : > { %v1770_v12 = vpop.f32.mrf.mxu1 }
 0x183   : > { %v11937_v13 = vadd.f32 %v1770_v12, %v773_v11  ;;  %v775_v6 = vpop.f32.mrf.mxu0  ;;  %v3310_v12 = vsel %vm2332_vm1, %v3305_v29, %v3309_v61  ;;  %v3319_v29 = vrot.slane %v11972_v19, 1 }
 0x184   : > { %v1772_v15 = vpop.f32.mrf.mxu1 }
 0x185   : > { %v11939_v17 = vadd.f32 %v1772_v15, %v775_v6  ;;  %v777_v20 = vpop.f32.mrf.mxu0 }
 0x186   : > { %v1774_v21 = vpop.f32.mrf.mxu1 }
 0x187   : > { %v11945_v25 = vadd.f32 %v1774_v21, %v777_v20  ;;  %v781_v30 = vpop.f32.mrf.mxu0  ;;  %2756 = vmatmul.mubr.bf16.gmra.mxu0 %v3298_v59 }
 0x188   : > { %v1778_v31 = vpop.f32.mrf.mxu1  ;;  %3674 = vmatmul.mubr.bf16.gmra.mxu1 %v3302_v18  ;;  %2765 = vmatprep.mubr.bf16.mxu0 %v3304_v0 }
 0x189   : > { %v11947_v26 = vadd.f32 %v1778_v31, %v781_v30  ;;  %3683 = vmatprep.mubr.bf16.mxu1 %v3308_v22  ;;  %v783_v34 = vpop.f32.mrf.mxu0  ;;  %v11978_v30 = vrot.slane %v10930_v4, 1 }
 0x18a   : > { %v1780_v37 = vpop.f32.mrf.mxu1 }
 0x18b   : > { %v11949_v40 = vadd.f32 %v1780_v37, %v783_v34  ;;  %v785_v41 = vpop.f32.mrf.mxu0  ;;  %v3950_v34 = vld [vmem:[%s11630_s26 + $0x10] sm:$0xee]  ;;  %v11983_v37 = vld [vmem:[%s11630_s26 + $0x18] sm:$0xff] }
 0x18c   : > { %v1782_v42 = vpop.f32.mrf.mxu1  ;;  %v10097_v56 = vcombine.high %v3950_v34, %v11983_v37 }
 0x18d   : > { %v11951_v43 = vadd.f32 %v1782_v42, %v785_v41  ;;  %v787_v52 = vpop.f32.mrf.mxu0  ;;  %v2149_v41 = vld [vmem:[%s11630_s26 + $0x120] sm:$0x11]  ;;  %v3068_v42 = vld [vmem:[%s11630_s26 + $0x130] sm:$0x11] }
 0x18e   : > { %v1784_v54 = vpop.f32.mrf.mxu1 }
 0x18f   : > { %v11957_v49 = vadd.f32 %v1784_v54, %v787_v52  ;;  %v791_v57 = vpop.f32.mrf.mxu0  ;;  %2766 = vmatmul.mubr.bf16.gmra.mxu0 %v3302_v18  ;;  %v3316_v18 = vsel %vm2332_vm1, %v3311_v38, %v11961_v1  ;;  %v11990_v52 = vld [vmem:[%s11630_s26 + $0x120] ss:$8 sps:$4 sm:$0xff]  }
 0x190   : > { %v1788_v59 = vpop.f32.mrf.mxu1  ;;  %3684 = vmatmul.mubr.bf16.gmra.mxu1 %v3306_v45  ;;  %2775 = vmatprep.mubr.bf16.mxu0 %v3308_v22 }
 0x191   : > { %v11959_v60 = vadd.f32 %v1788_v59, %v791_v57  ;;  %3693 = vmatprep.mubr.bf16.mxu1 %v3312_v46  ;;  %v793_v63 = vpop.f32.mrf.mxu0 }
 0x192   : > { %v1790_v0 = vpop.f32.mrf.mxu1 }
 0x193   : > { %14231 = vst [vmem:[#allocation16_spill] sm:$0xff] %v11959_v60  ;;  %v11963_v5 = vadd.f32 %v1790_v0, %v793_v63  ;;  %v795_v8 = vpop.f32.mrf.mxu0  ;;  %v3320_v63 = vsel %vm2332_vm1, %v11961_v1, %v3319_v29  ;;  %v9993_v0 = vcombine.high %v2149_v41, %v2149_v41 }
 0x194   : > { %v1792_v7 = vpop.f32.mrf.mxu1 }
 0x195   : > { %14232 = vst [vmem:[#allocation17_spill] sm:$0xff] %v11963_v5  ;;  %v11965_v11 = vadd.f32 %v1792_v7, %v795_v8  ;;  %v797_v6 = vpop.f32.mrf.mxu0  ;;  %v10063_v8 = vcombine.high %v3068_v42, %v3068_v42  ;;  %v12000_v7 = vld [vmem:[%s11630_s26 + $0x24] ss:$8 sps:$4 sm:$0xff]  }
 0x196   : > { %v1794_v15 = vpop.f32.mrf.mxu1 }
 0x197   : > { %14233 = vst [vmem:[#allocation18_spill] sm:$0xff] %v11965_v11  ;;  %v11974_v20 = vadd.f32 %v1794_v15, %v797_v6  ;;  %v801_v21 = vpop.f32.mrf.mxu0  ;;  %2776 = vmatmul.mubr.bf16.gmra.mxu0 %v3306_v45 }
 0x198   : > { %v1798_v22 = vpop.f32.mrf.mxu1  ;;  %3694 = vmatmul.mubr.bf16.gmra.mxu1 %v3310_v12  ;;  %2785 = vmatprep.mubr.bf16.mxu0 %v3312_v46  ;;  %v3314_v46 = vsel %vm2332_vm1, %v3309_v61, %v11978_v30  ;;  %v3317_v61 = vrot.slane %v11990_v52, 1  ;;  %v9992_v52 = vcombine.low %v2149_v41, %v2149_v41 }
 0x199   : > { %14234 = vst [vmem:[#allocation19_spill] sm:$0xff] %v11974_v20  ;;  %v11976_v24 = vadd.f32 %v1798_v22, %v801_v21  ;;  %3703 = vmatprep.mubr.bf16.mxu1 %v3316_v18  ;;  %v803_v31 = vpop.f32.mrf.mxu0  ;;  %v4188_v21 = vshrl.u32 %v10097_v56, 16  ;;  %v4191_v22 = vshll.u32 %v10097_v56, 16  ;;  %v10062_v56 = vcombine.low %v3068_v42, %v3068_v42  ;;  %v12028_v20 = vld [vmem:[%s11630_s26 + $0x34] ss:$8 sps:$4 sm:$0xff]  }
 0x19a   : > { %v1800_v32 = vpop.f32.mrf.mxu1 }
 0x19b   : > { %14235 = vst [vmem:[#allocation20_spill] sm:$0xff] %v11976_v24  ;;  %v11985_v38 = vadd.f32 %v1800_v32, %v803_v31  ;;  %v805_v45 = vpop.f32.mrf.mxu0 }
 0x19c   : > { %v1802_v47 = vpop.f32.mrf.mxu1 }
 0x19d   : > { %14236 = vst [vmem:[#allocation21_spill] sm:$0xff] %v11985_v38  ;;  %v11992_v54 = vadd.f32 %v1802_v47, %v805_v45  ;;  %v807_v57 = vpop.f32.mrf.mxu0  ;;  %v2405_v45 = vrot.slane %v9993_v0, 1  ;;  %v3323_v47 = vrot.slane %v10063_v8, 1  ;;  %v12018_v0 = vld [vmem:[%s11630_s26 + $0x20] ss:$8 sps:$4 sm:$0xff]  }
 0x19e   : > { %v1804_v59 = vpop.f32.mrf.mxu1  ;;  %v4179_v5 = vshrl.u32 %v12018_v0, 16 }
 0x19f   : > { %14237 = vst [vmem:[#allocation22_spill] sm:$0xff] %v11992_v54  ;;  %v12002_v4 = vadd.f32 %v1804_v59, %v807_v57  ;;  %v811_v6 = vpop.f32.mrf.mxu0  ;;  %2786 = vmatmul.mubr.bf16.gmra.mxu0 %v3310_v12  ;;  %v4196_v57 = vshrl.u32 %v12000_v7, 16  ;;  %v4199_v59 = vshll.u32 %v12000_v7, 16  ;;  %v4193_v54 = vrot.slane %v4191_v22, 2 }
 0x1a0   : > { %v1808_v15 = vpop.f32.mrf.mxu1  ;;  %3704 = vmatmul.mubr.bf16.gmra.mxu1 %v3314_v46  ;;  %2795 = vmatprep.mubr.bf16.mxu0 %v3316_v18  ;;  %v3324_v38 = vsel %vm2332_vm1, %v3319_v29, %v3323_v47  ;;  %v3321_v22 = vrot.slane %v10062_v56, 1 }
 0x1a1   : > { %14238 = vst [vmem:[#allocation23_spill] sm:$0xff] %v12002_v4  ;;  %v12005_v19 = vadd.f32 %v1808_v15, %v811_v6  ;;  %3713 = vmatprep.mubr.bf16.mxu1 %v3320_v63  ;;  %v813_v31 = vpop.f32.mrf.mxu0  ;;  %v12010_v4 = vld [vmem:[%s11630_s26 + $0x10] sm:$0xcc]  ;;  %v3318_v63 = vsel %vm2332_vm1, %v11978_v30, %v3317_v61  ;;  %v10096_v15 = vcombine.low %v3950_v34, %v11983_v37  ;;  %v4198_v24 = vrot.slane %v4196_v57, 1 }
 0x1a2   : > { %v1810_v32 = vpop.f32.mrf.mxu1  ;;  %v4201_v42 = vrot.slane %v4199_v59, 2 }
 0x1a3   : > { %14239 = vst [vmem:[#allocation24_spill] sm:$0xff] %v12005_v19  ;;  %v12012_v12 = vadd.f32 %v1810_v32, %v813_v31  ;;  %v815_v6 = vpop.f32.mrf.mxu0  ;;  %v4190_v19 = vrot.slane %v4188_v21, 1  ;;  %v10167_v31 = vcombine.high %v12010_v4, %v11983_v37  ;;  %v4174_v11 = vshll.u32 %v10096_v15, 16 }
 0x1a4   : > { %v1812_v18 = vpop.f32.mrf.mxu1  ;;  %v4202_v59 = vor.u32 %v4201_v42, %v4198_v24 }
 0x1a5   : > { %14240 = vst [vmem:[#allocation25_spill] sm:$0xff] %v12012_v12  ;;  %v12020_v8 = vadd.f32 %v1812_v18, %v815_v6  ;;  %v817_v32 = vpop.f32.mrf.mxu0  ;;  %v2406_v12 = vsel %vm2332_vm1, %v11961_v1, %v2405_v45  ;;  %v2403_v6 = vrot.slane %v9992_v52, 1  ;;  %v4182_v1 = vshll.u32 %v12018_v0, 16 }
 0x1a6   : > { %v1814_v41 = vpop.f32.mrf.mxu1  ;;  %v4194_v29 = vor.u32 %v4193_v54, %v4190_v19  ;;  %v5358_v45 = vrot.slane %v10167_v31, 2  ;;  %v4214_v52 = vshrl.u32 %v12028_v20, 16  ;;  %v3322_v19 = vsel %vm2332_vm1, %v3317_v61, %v3321_v22  ;;  %v12045_v31 = vld [vmem:[%s11630_s26 + $0x30] ss:$8 sps:$4 sm:$0xff]  }
 0x1a7   : > { %14241 = vst [vmem:[#allocation26_spill] sm:$0xff] %v12020_v8  ;;  %v12030_v34 = vadd.f32 %v1814_v41, %v817_v32  ;;  %v821_v18 = vpop.f32.mrf.mxu0  ;;  %2796 = vmatmul.mubr.bf16.gmra.mxu0 %v3314_v46  ;;  %v4171_v8 = vshrl.u32 %v10096_v15, 16  ;;  %v14206_v46 = vrot.slane %v12000_v7, 2  ;;  %v2404_v54 = vsel %vm2332_vm1, %v11978_v30, %v2403_v6 }
 0x1a8   : > { %v1818_v21 = vpop.f32.mrf.mxu1  ;;  %3714 = vmatmul.mubr.bf16.gmra.mxu1 %v3318_v63  ;;  %2805 = vmatprep.mubr.bf16.mxu0 %v2406_v12  ;;  %v4217_v63 = vshll.u32 %v12028_v20, 16  ;;  %v4176_v24 = vrot.slane %v4174_v11, 2  ;;  %v4181_v41 = vrot.slane %v4179_v5, 1  ;;  %v4184_v42 = vrot.slane %v4182_v1, 2  ;;  %v12056_v11 = vld [vmem:[%s11630_s26 + $0x44] ss:$8 sps:$4 sm:$0xff]  }
 0x1a9   : > { %v12033_v60 = vadd.f32 %v1818_v21, %v821_v18  ;;  %3723 = vmatprep.mubr.bf16.mxu1 %v3324_v38  ;;  %v823_v47 = vpop.f32.mrf.mxu0  ;;  %v4173_v15 = vrot.slane %v4171_v8, 1  ;;  %v10166_v18 = vcombine.low %v12010_v4, %v11983_v37  ;;  %v5360_v30 = vsel %vm5354_vm3, %v5358_v45, %v14206_v46 }
 0x1aa   : > { %v1820_v57 = vpop.f32.mrf.mxu1  ;;  %v4216_v61 = vrot.slane %v4214_v52, 1  ;;  %v4219_v8 = vrot.slane %v4217_v63, 2  ;;  %v4205_v37 = vshrl.u32 %v12045_v31, 16  ;;  %v4208_v4 = vshll.u32 %v12045_v31, 16 }
 0x1ab   : > { %v12039_v56 = vadd.f32 %v1820_v57, %v823_v47  ;;  %v825_v12 = vpop.f32.mrf.mxu0  ;;  %v4203_v57 = vsel %vm4169_vm2, %v4194_v29, %v4202_v59  ;;  %v4177_v1 = vor.u32 %v4176_v24, %v4173_v15  ;;  %v4185_v45 = vor.u32 %v4184_v42, %v4181_v41 }
 0x1ac   : > { %v1822_v38 = vpop.f32.mrf.mxu1  ;;  %v5355_v52 = vrot.slane %v10166_v18, 2  ;;  %v5356_v63 = vrot.slane %v12018_v0, 2  ;;  %v5363_v24 = vrot.slane %v12028_v20, 2  ;;  %v4207_v41 = vrot.slane %v4205_v37, 1  ;;  %v12073_v18 = vld [vmem:[%s11630_s26 + $0x40] ss:$8 sps:$4 sm:$0xff]  }
 0x1ad   : > { %14242 = vst [vmem:[#allocation27_spill] sm:$0xff] %v12039_v56  ;;  %v12047_v32 = vadd.f32 %v1822_v38, %v825_v12  ;;  %v827_v21 = vpop.f32.mrf.mxu0  ;;  %v4210_v42 = vrot.slane %v4208_v4, 2 }
 0x1ae   : > { %v1824_v47 = vpop.f32.mrf.mxu1 }
 0x1af   : > { %14243 = vst [vmem:[#allocation28_spill] sm:$0xff] %v12047_v32  ;;  %v12058_v6 = vadd.f32 %v1824_v47, %v827_v21  ;;  %v831_v22 = vpop.f32.mrf.mxu0  ;;  %2806 = vmatmul.mubr.bf16.gmra.mxu0 %v2404_v54  ;;  %v12065_v21 = vor.u32 %v4219_v8, %v4216_v61  ;;  %v4232_v54 = vshrl.u32 %v12056_v11, 16  ;;  %v10967_v61 = vld [vmem:[#allocation3 + $0x670] ss:$8 sps:$4 sm:$0xff]   ;;  %v5357_v8 = vsel %vm5354_vm3, %v5355_v52, %v5356_v63 }
 0x1b0   : > { %v1828_v5 = vpop.f32.mrf.mxu1  ;;  %3724 = vmatmul.mubr.bf16.gmra.mxu1 %v3322_v19  ;;  %4738 = vmatprep.mubr.bf16.mxu0 %v4203_v57  ;;  %v4235_v19 = vshll.u32 %v12056_v11, 16  ;;  %v12089_v52 = vor.u32 %v4210_v42, %v4207_v41 }
 0x1b1   : > { %14244 = vst [vmem:[#allocation29_spill] sm:$0xff] %v12058_v6  ;;  %v12062_v29 = vadd.f32 %v1828_v5, %v831_v22  ;;  %5657 = vmatprep.mubr.bf16.mxu1 %v5360_v30  ;;  %v833_v12 = vpop.f32.mrf.mxu0  ;;  %v4186_v30 = vsel %vm4169_vm2, %v4177_v1, %v4185_v45  ;;  %v12080_v22 = vld [vmem:[%s11630_s26 + $0x54] ss:$8 sps:$4 sm:$0xff]   ;;  %v4221_v20 = vsel %vm4169_vm2, %v4202_v59, %v12065_v21  ;;  %v4234_v46 = vrot.slane %v4232_v54, 1  ;;  %v11029_v1 = vld [vmem:[#allocation3 + $0x770] ss:$8 sps:$4 sm:$0xff]  }
 0x1b2   : > { %v1830_v38 = vpop.f32.mrf.mxu1  ;;  %v4237_v37 = vrot.slane %v4235_v19, 2  ;;  %v4223_v59 = vshrl.u32 %v12073_v18, 16  ;;  %v11034_v6 = vld [vmem:[#allocation3 + $0x764] ss:$8 sps:$4 sm:$0xff]   ;;  %v10975_v19 = vld [vmem:[#allocation3 + $0x660] ss:$8 sps:$4 sm:$0xff]  }
 0x1b3   : > { %14245 = vst [vmem:[#allocation30_spill] sm:$0xff] %v12062_v29  ;;  %v12069_v15 = vadd.f32 %v1830_v38, %v833_v12  ;;  %v835_v47 = vpop.f32.mrf.mxu0  ;;  %v10977_v38 = vld [vmem:[#allocation3 + $0x664] ss:$8 sps:$4 sm:$0xff]   ;;  %v4212_v29 = vsel %vm4169_vm2, %v4185_v45, %v12089_v52 }
 0x1b4   : > { %v1832_v57 = vpop.f32.mrf.mxu1  ;;  %v12098_v42 = vor.u32 %v4237_v37, %v4234_v46  ;;  %v12109_v46 = vld [vmem:[%s11630_s26 + $0x50] ss:$8 sps:$4 sm:$0xff]  }
 0x1b5   : > { %14246 = vst [vmem:[#allocation31_spill] sm:$0xff] %v12069_v15  ;;  %v12075_v0 = vadd.f32 %v1832_v57, %v835_v47  ;;  %v837_v5 = vpop.f32.mrf.mxu0  ;;  %v14249_v47 = vrot.slane %v12000_v7, 2  ;;  %v4226_v7 = vshll.u32 %v12073_v18, 16 }
 0x1b6   : > { %v1834_v12 = vpop.f32.mrf.mxu1  ;;  %v4239_v45 = vsel %vm4169_vm2, %v12065_v21, %v12098_v42  ;;  %v4241_v21 = vshrl.u32 %v12109_v46, 16 }
 0x1b7   : > { %14247 = vst [vmem:[#allocation32_spill] sm:$0xff] %v12075_v0  ;;  %v12084_v4 = vadd.f32 %v1834_v12, %v837_v5  ;;  %v5364_v57 = vsel %vm5354_vm3, %v14249_v47, %v5363_v24  ;;  %v841_v0 = vpop.f32.mrf.mxu0  ;;  %4739 = vmatmul.mubr.bf16.vlgmr.msra.gmra.mxu0 %v4186_v30  ;;  %v4250_v5 = vshrl.u32 %v12080_v22, 16  ;;  %v4253_v12 = vshll.u32 %v12080_v22, 16 }
 0x1b8   : > { %v1838_v15 = vpop.f32.mrf.mxu1  ;;  %5658 = vmatmul.mubr.bf16.vlgmr.msra.gmra.mxu1 %v5357_v8  ;;  %6544 = vmatpush1.bf16.msra.mxu0 %v10967_v61  ;;  %v11032_v61 = vld [vmem:[#allocation3 + $0x760] ss:$8 sps:$4 sm:$0xff]  }
 0x1b9   : > { %14248 = vst [vmem:[#allocation33_spill] sm:$0xff] %v12084_v4  ;;  %v12093_v54 = vadd.f32 %v1838_v15, %v841_v0  ;;  %4748 = vmatprep.mubr.bf16.mxu0 %v4221_v20  ;;  %v843_v30 = vpop.f32.mrf.mxu0  ;;  %5667 = vmatprep.mubr.bf16.mxu1 %v5364_v57  ;;  %v10983_v15 = vld [vmem:[#allocation3 + $0x654] ss:$8 sps:$4 sm:$0xff]   ;;  %v14254_v4 = vrot.slane %v12056_v11, 2 }
 0x1ba   : > { %v1840_v41 = vpop.f32.mrf.mxu1  ;;  %6545 = vmatprep.subr.bf16.mxu0 %v10977_v38  ;;  %7729 = vmatpush1.bf16.msra.mxu1 %v11029_v1  ;;  %v4225_v38 = vrot.slane %v4223_v59, 1  ;;  %v4252_v1 = vrot.slane %v4250_v5, 1  ;;  %v10981_v59 = vld [vmem:[#allocation3 + $0x650] ss:$8 sps:$4 sm:$0xff]  }
 0x1bb   : > { %14250 = vst [vmem:[#allocation34_spill] sm:$0xff] %v12093_v54  ;;  %v12101_v0 = vadd.f32 %v1840_v41, %v843_v30  ;;  %v845_v20 = vpop.f32.mrf.mxu0  ;;  %v14252_v54 = vrot.slane %v12045_v31, 2  ;;  %7730 = vmatprep.subr.bf16.mxu1 %v11034_v6  ;;  %v4228_v30 = vrot.slane %v4226_v7, 2  ;;  %v4255_v41 = vrot.slane %v4253_v12, 2  ;;  %v11043_v6 = vld [vmem:[#allocation3 + $0x754] ss:$8 sps:$4 sm:$0xff]  }
 0x1bc   : > { %v1842_v47 = vpop.f32.mrf.mxu1  ;;  %6546 = vmatpush1.bf16.msra.mxu0 %v10975_v19  ;;  %v10989_v19 = vld [vmem:[#allocation3 + $0x644] ss:$8 sps:$4 sm:$0xff]   ;;  %v11041_v7 = vld [vmem:[#allocation3 + $0x750] ss:$8 sps:$4 sm:$0xff]  }
 0x1bd   : > { %14251 = vst [vmem:[#allocation35_spill] sm:$0xff] %v12101_v0  ;;  %v5362_v57 = vsel %vm5354_vm3, %v5356_v63, %v14252_v54  ;;  %v12111_v37 = vadd.f32 %v1842_v47, %v845_v20  ;;  %v847_v8 = vpop.f32.mrf.mxu0  ;;  %v5368_v63 = vsel %vm5354_vm3, %v5363_v24, %v14254_v4  ;;  %6547 = vmatprep.subr.bf16.mxu0 %v10983_v15  ;;  %v12120_v54 = vld [vmem:[%s11630_s26 + $0x64] ss:$8 sps:$4 sm:$0xff]   ;;  %v4244_v47 = vshll.u32 %v12109_v46, 16 }
 0x1be   : > { %v1844_v0 = vpop.f32.mrf.mxu1  ;;  %7731 = vmatpush1.bf16.msra.mxu1 %v11032_v61  ;;  %v12128_v4 = vor.u32 %v4228_v30, %v4225_v38  ;;  %v12131_v61 = vor.u32 %v4255_v41, %v4252_v1  ;;  %v10995_v30 = vld [vmem:[#allocation3 + $0x634] ss:$8 sps:$4 sm:$0xff]   ;;  %v12139_v41 = vld [vmem:[%s11630_s26 + $0x60] ss:$8 sps:$4 sm:$0xff]  }
 0x1bf   : > { %14253 = vst [vmem:[#allocation36_spill] sm:$0xff] %v12111_v37  ;;  %v12122_v20 = vadd.f32 %v1844_v0, %v847_v8  ;;  %v851_v5 = vpop.f32.mrf.mxu0  ;;  %4749 = vmatmul.mubr.bf16.gmra.mxu0 %v4212_v29  ;;  %v11046_v37 = vld [vmem:[#allocation3 + $0x744] ss:$8 sps:$4 sm:$0xff]   ;;  %7732 = vmatprep.subr.bf16.mxu1 %v11043_v6  ;;  %v4246_v1 = vrot.slane %v4244_v47, 2  ;;  %v14259_v6 = vrot.slane %v12073_v18, 2  ;;  %v14261_v47 = vrot.slane %v12080_v22, 2 }
 0x1c0   : > { %v1848_v12 = vpop.f32.mrf.mxu1  ;;  %5668 = vmatmul.mubr.bf16.gmra.mxu1 %v5362_v57  ;;  %4758 = vmatprep.mubr.bf16.mxu0 %v4239_v45  ;;  %v10987_v57 = vld [vmem:[#allocation3 + $0x640] ss:$8 sps:$4 sm:$0xff]   ;;  %v4230_v8 = vsel %vm4169_vm2, %v12089_v52, %v12128_v4 }
 0x1c1   : > { %14255 = vst [vmem:[#allocation37_spill] sm:$0xff] %v12122_v20  ;;  %v12126_v24 = vadd.f32 %v1848_v12, %v851_v5  ;;  %5677 = vmatprep.mubr.bf16.mxu1 %v5368_v63  ;;  %v853_v15 = vpop.f32.mrf.mxu0  ;;  %6548 = vmatpush1.bf16.msra.mxu0 %v10981_v59  ;;  %v4268_v20 = vshrl.u32 %v12120_v54, 16  ;;  %v4271_v5 = vshll.u32 %v12120_v54, 16  ;;  %v11044_v45 = vld [vmem:[#allocation3 + $0x740] ss:$8 sps:$4 sm:$0xff]   ;;  %v4243_v12 = vrot.slane %v4241_v21, 1 }
 0x1c2   : > { %v1850_v0 = vpop.f32.mrf.mxu1  ;;  %6549 = vmatprep.subr.bf16.mxu0 %v10989_v19  ;;  %7733 = vmatpush1.bf16.msra.mxu1 %v11041_v7  ;;  %v14260_v19 = vrot.slane %v12045_v31, 2  ;;  %v10993_v31 = vld [vmem:[#allocation3 + $0x630] ss:$8 sps:$4 sm:$0xff]  }
 0x1c3   : > { %14256 = vst [vmem:[#allocation38_spill] sm:$0xff] %v12126_v24  ;;  %v12136_v38 = vadd.f32 %v1850_v0, %v853_v15  ;;  %v855_v63 = vpop.f32.mrf.mxu0  ;;  %7734 = vmatprep.subr.bf16.mxu1 %v11046_v37  ;;  %v12152_v15 = vld [vmem:[%s11630_s26 + $0x74] ss:$8 sps:$4 sm:$0xff]   ;;  %v4257_v37 = vsel %vm4169_vm2, %v12098_v42, %v12131_v61  ;;  %v11050_v24 = vld [vmem:[#allocation3 + $0x730] ss:$8 sps:$4 sm:$0xff]   ;;  %v12164_v42 = vor.u32 %v4246_v1, %v4243_v12 }
 0x1c4   : > { %v1852_v59 = vpop.f32.mrf.mxu1  ;;  %v5366_v7 = vsel %vm5354_vm3, %v14260_v19, %v14259_v6  ;;  %v11001_v19 = vld [vmem:[#allocation3 + $0x624] ss:$8 sps:$4 sm:$0xff]  }
 0x1c5   : > { %14257 = vst [vmem:[#allocation39_spill] sm:$0xff] %v12136_v38  ;;  %v12141_v29 = vadd.f32 %v1852_v59, %v855_v63  ;;  %v857_v0 = vpop.f32.mrf.mxu0  ;;  %v14262_v63 = vrot.slane %v12056_v11, 2  ;;  %6550 = vmatpush1.bf16.msra.mxu0 %v10987_v57  ;;  %v4270_v59 = vrot.slane %v4268_v20, 1  ;;  %v11052_v38 = vld [vmem:[#allocation3 + $0x734] ss:$8 sps:$4 sm:$0xff]   ;;  %v14207_v11 = vrot.slane %v12109_v46, 2 }
 0x1c6   : > { %v1854_v21 = vpop.f32.mrf.mxu1  ;;  %6551 = vmatprep.subr.bf16.mxu0 %v10995_v30  ;;  %7735 = vmatpush1.bf16.msra.mxu1 %v11044_v45  ;;  %v4259_v57 = vshrl.u32 %v12139_v41, 16  ;;  %v11058_v20 = vld [vmem:[#allocation3 + $0x724] ss:$8 sps:$4 sm:$0xff]   ;;  %v4262_v30 = vshll.u32 %v12139_v41, 16  ;;  %v4286_v45 = vshrl.u32 %v12152_v15, 16 }
 0x1c7   : > { %14258 = vst [vmem:[#allocation40_spill] sm:$0xff] %v12141_v29  ;;  %v5372_v52 = vsel %vm5354_vm3, %v14262_v63, %v14261_v47  ;;  %v4273_v29 = vrot.slane %v4271_v5, 2  ;;  %v12162_v6 = vadd.f32 %v1854_v21, %v857_v0  ;;  %v861_v32 = vpop.f32.mrf.mxu0  ;;  %4759 = vmatmul.mubr.bf16.gmra.mxu0 %v4230_v8  ;;  %v4289_v0 = vshll.u32 %v12152_v15, 16  ;;  %7736 = vmatprep.subr.bf16.mxu1 %v11052_v38 }
 0x1c8   : > { %v1858_v56 = vpop.f32.mrf.mxu1  ;;  %5678 = vmatmul.mubr.bf16.gmra.mxu1 %v5366_v7  ;;  %4768 = vmatprep.mubr.bf16.mxu0 %v4257_v37  ;;  %v10999_v7 = vld [vmem:[#allocation3 + $0x620] ss:$8 sps:$4 sm:$0xff]   ;;  %v4261_v38 = vrot.slane %v4259_v57, 1 }
 0x1c9   : > { %14263 = vst [vmem:[#allocation41_spill] sm:$0xff] %v12162_v6  ;;  %v12168_v5 = vadd.f32 %v1858_v56, %v861_v32  ;;  %5687 = vmatprep.mubr.bf16.mxu1 %v5372_v52  ;;  %v863_v21 = vpop.f32.mrf.mxu0  ;;  %v12173_v12 = vor.u32 %v4273_v29, %v4270_v59  ;;  %6552 = vmatpush1.bf16.msra.mxu0 %v10993_v31  ;;  %v11007_v32 = vld [vmem:[#allocation3 + $0x614] ss:$8 sps:$4 sm:$0xff]   ;;  %v11056_v37 = vld [vmem:[#allocation3 + $0x720] ss:$8 sps:$4 sm:$0xff]   ;;  %v14266_v29 = vrot.slane %v12073_v18, 2 }
 0x1ca   : > { %v1860_v8 = vpop.f32.mrf.mxu1  ;;  %6553 = vmatprep.subr.bf16.mxu0 %v11001_v19  ;;  %7737 = vmatpush1.bf16.msra.mxu1 %v11050_v24  ;;  %v4248_v52 = vsel %vm4169_vm2, %v12128_v4, %v12164_v42  ;;  %v12187_v31 = vld [vmem:[%s11630_s26 + $0x70] ss:$8 sps:$4 sm:$0xff]   ;;  %v4264_v24 = vrot.slane %v4262_v30, 2  ;;  %v14269_v18 = vrot.slane %v12080_v22, 2 }
 0x1cb   : > { %14264 = vst [vmem:[#allocation42_spill] sm:$0xff] %v12168_v5  ;;  %v12176_v56 = vadd.f32 %v1860_v8, %v863_v21  ;;  %v865_v47 = vpop.f32.mrf.mxu0  ;;  %v5370_v59 = vsel %vm5354_vm3, %v14266_v29, %v14207_v11  ;;  %7738 = vmatprep.subr.bf16.mxu1 %v11058_v20  ;;  %v4288_v21 = vrot.slane %v4286_v45, 1  ;;  %v4291_v8 = vrot.slane %v4289_v0, 2  ;;  %v12200_v29 = vld [vmem:[%s11630_s26 + $0x84] ss:$8 sps:$4 sm:$0xff]  }
 0x1cc   : > { %v1862_v63 = vpop.f32.mrf.mxu1  ;;  %v4275_v4 = vsel %vm4169_vm2, %v12131_v61, %v12173_v12  ;;  %v14268_v5 = vrot.slane %v12120_v54, 2  ;;  %v11005_v20 = vld [vmem:[#allocation3 + $0x610] ss:$8 sps:$4 sm:$0xff]   ;;  %v11015_v45 = vld [vmem:[#allocation3 + $0x604] ss:$8 sps:$4 sm:$0xff]   ;;  %v4277_v61 = vshrl.u32 %v12187_v31, 16 }
 0x1cd   : > { %14265 = vst [vmem:[#allocation43_spill] sm:$0xff] %v12176_v56  ;;  %v12189_v19 = vadd.f32 %v1862_v63, %v865_v47  ;;  %v867_v1 = vpop.f32.mrf.mxu0  ;;  %6554 = vmatpush1.bf16.msra.mxu0 %v10999_v7  ;;  %v11064_v47 = vld [vmem:[#allocation3 + $0x714] ss:$8 sps:$4 sm:$0xff]   ;;  %v11062_v0 = vld [vmem:[#allocation3 + $0x710] ss:$8 sps:$4 sm:$0xff]   ;;  %v4280_v22 = vshll.u32 %v12187_v31, 16 }
 0x1ce   : > { %v1864_v56 = vpop.f32.mrf.mxu1  ;;  %v5376_v57 = vsel %vm5354_vm3, %v14269_v18, %v14268_v5  ;;  %6555 = vmatprep.subr.bf16.mxu0 %v11007_v32  ;;  %7739 = vmatpush1.bf16.msra.mxu1 %v11056_v37  ;;  %v11070_v5 = vld [vmem:[#allocation3 + $0x704] ss:$8 sps:$4 sm:$0xff]   ;;  %v12208_v18 = vor.u32 %v4264_v24, %v4261_v38  ;;  %v12211_v37 = vor.u32 %v4291_v8, %v4288_v21  ;;  %v11022_v24 = vld [vmem:[#allocation3 + $0x6f4] ss:$8 sps:$4 sm:$0xff]   ;;  %v4279_v8 = vrot.slane %v4277_v61, 1 }
 0x1cf   : > { %14267 = vst [vmem:[#allocation44_spill] sm:$0xff] %v12189_v19  ;;  %v12202_v30 = vadd.f32 %v1864_v56, %v867_v1  ;;  %v871_v63 = vpop.f32.mrf.mxu0  ;;  %4769 = vmatmul.mubr.bf16.gmra.mxu0 %v4248_v52  ;;  %7740 = vmatprep.subr.bf16.mxu1 %v11064_v47  ;;  %v12219_v1 = vld [vmem:[%s11630_s26 + $0x80] ss:$8 sps:$4 sm:$0xff]   ;;  %v14274_v47 = vrot.slane %v12139_v41, 2 }
 0x1d0   : > { %v1868_v11 = vpop.f32.mrf.mxu1  ;;  %5688 = vmatmul.mubr.bf16.gmra.mxu1 %v5370_v59  ;;  %4778 = vmatprep.mubr.bf16.mxu0 %v4275_v4  ;;  %v4304_v59 = vshrl.u32 %v12200_v29, 16  ;;  %v11068_v4 = vld [vmem:[#allocation3 + $0x700] ss:$8 sps:$4 sm:$0xff]  }
 0x1d1   : > { %14270 = vst [vmem:[#allocation45_spill] sm:$0xff] %v12202_v30  ;;  %v12206_v7 = vadd.f32 %v1868_v11, %v871_v63  ;;  %5697 = vmatprep.mubr.bf16.mxu1 %v5376_v57  ;;  %v873_v56 = vpop.f32.mrf.mxu0  ;;  %v4307_v30 = vshll.u32 %v12200_v29, 16  ;;  %6556 = vmatpush1.bf16.msra.mxu0 %v11005_v20  ;;  %v11013_v11 = vld [vmem:[#allocation3 + $0x600] ss:$8 sps:$4 sm:$0xff]   ;;  %v4282_v63 = vrot.slane %v4280_v22, 2  ;;  %v4266_v20 = vsel %vm4169_vm2, %v12164_v42, %v12208_v18 }
 0x1d2   : > { %v1870_v32 = vpop.f32.mrf.mxu1  ;;  %6557 = vmatprep.subr.bf16.mxu0 %v11015_v45  ;;  %7741 = vmatpush1.bf16.msra.mxu1 %v11062_v0  ;;  %v14275_v45 = vrot.slane %v12109_v46, 2  ;;  %v4293_v22 = vsel %vm4169_vm2, %v12173_v12, %v12211_v37  ;;  %v11020_v46 = vld [vmem:[#allocation3 + $0x6f0] ss:$8 sps:$4 sm:$0xff]  }
 0x1d3   : > { %14271 = vst [vmem:[#allocation46_spill] sm:$0xff] %v12206_v7  ;;  %v12216_v38 = vadd.f32 %v1870_v32, %v873_v56  ;;  %v875_v57 = vpop.f32.mrf.mxu0  ;;  %7742 = vmatprep.subr.bf16.mxu1 %v11070_v5  ;;  %v12232_v56 = vld [vmem:[%s11630_s26 + $0x94] ss:$8 sps:$4 sm:$0xff]   ;;  %v14276_v5 = vrot.slane %v12152_v15, 2  ;;  %v11074_v7 = vld [vmem:[#allocation3 + $0x7f0] ss:$8 sps:$4 sm:$0xff]   ;;  %v12244_v12 = vor.u32 %v4282_v63, %v4279_v8 }
 0x1d4   : > { %v1872_v21 = vpop.f32.mrf.mxu1  ;;  %v5374_v0 = vsel %vm5354_vm3, %v14275_v45, %v14274_v47  ;;  %v11028_v45 = vld [vmem:[#allocation3 + $0x6e4] ss:$8 sps:$4 sm:$0xff]  }
 0x1d5   : > { %14272 = vst [vmem:[#allocation47_spill] sm:$0xff] %v12216_v38  ;;  %v12221_v52 = vadd.f32 %v1872_v21, %v875_v57  ;;  %v877_v32 = vpop.f32.mrf.mxu0  ;;  %v14277_v57 = vrot.slane %v12120_v54, 2  ;;  %v4306_v21 = vrot.slane %v4304_v59, 1  ;;  %6558 = vmatpush1.bf16.msra.mxu0 %v11013_v11  ;;  %v11076_v38 = vld [vmem:[#allocation3 + $0x7f4] ss:$8 sps:$4 sm:$0xff]   ;;  %v14208_v54 = vrot.slane %v12187_v31, 2 }
 0x1d6   : > { %v1874_v61 = vpop.f32.mrf.mxu1  ;;  %6559 = vmatprep.subr.bf16.mxu0 %v11022_v24  ;;  %7743 = vmatpush1.bf16.msra.mxu1 %v11068_v4  ;;  %v4295_v59 = vshrl.u32 %v12219_v1, 16  ;;  %v4298_v24 = vshll.u32 %v12219_v1, 16  ;;  %v4322_v4 = vshrl.u32 %v12232_v56, 16 }
 0x1d7   : > { %14273 = vst [vmem:[#allocation48_spill] sm:$0xff] %v12221_v52  ;;  %v5380_v42 = vsel %vm5354_vm3, %v14277_v57, %v14276_v5  ;;  %v4309_v52 = vrot.slane %v4307_v30, 2  ;;  %v12242_v47 = vadd.f32 %v1874_v61, %v877_v32  ;;  %v881_v19 = vpop.f32.mrf.mxu0  ;;  %4779 = vmatmul.mubr.bf16.gmra.mxu0 %v4266_v20  ;;  %v11082_v30 = vld [vmem:[#allocation3 + $0x7e4] ss:$8 sps:$4 sm:$0xff]   ;;  %v4325_v32 = vshll.u32 %v12232_v56, 16  ;;  %7744 = vmatprep.subr.bf16.mxu1 %v11076_v38 }
 0x1d8   : > { %v1878_v6 = vpop.f32.mrf.mxu1  ;;  %5698 = vmatmul.mubr.bf16.gmra.mxu1 %v5374_v0  ;;  %4788 = vmatprep.mubr.bf16.mxu0 %v4293_v22  ;;  %v11026_v0 = vld [vmem:[#allocation3 + $0x6e0] ss:$8 sps:$4 sm:$0xff]   ;;  %v4297_v38 = vrot.slane %v4295_v59, 1 }
 0x1d9   : > { %14278 = vst [vmem:[#allocation49_spill] sm:$0xff] %v12242_v47  ;;  %v12248_v11 = vadd.f32 %v1878_v6, %v881_v19  ;;  %5707 = vmatprep.mubr.bf16.mxu1 %v5380_v42  ;;  %v883_v61 = vpop.f32.mrf.mxu0  ;;  %v12253_v8 = vor.u32 %v4309_v52, %v4306_v21  ;;  %6560 = vmatpush2.bf16.msra.mxu0 %v11020_v46  ;;  %v11040_v19 = vld [vmem:[#allocation3 + $0x6d4] ss:$8 sps:$4 sm:$0xff]   ;;  %v11080_v22 = vld [vmem:[#allocation3 + $0x7e0] ss:$8 sps:$4 sm:$0xff]   ;;  %v14281_v52 = vrot.slane %v12139_v41, 2 }
 0x1da   : > { %v1880_v20 = vpop.f32.mrf.mxu1  ;;  %6561 = vmatprep.subr.bf16.mxu0 %v11028_v45  ;;  %7745 = vmatpush2.bf16.msra.mxu1 %v11074_v7  ;;  %v4284_v42 = vsel %vm4169_vm2, %v12208_v18, %v12244_v12  ;;  %v12267_v46 = vld [vmem:[%s11630_s26 + $0x90] ss:$8 sps:$4 sm:$0xff]   ;;  %v4300_v7 = vrot.slane %v4298_v24, 2  ;;  %v14284_v41 = vrot.slane %v12152_v15, 2 }
 0x1db   : > { %14279 = vst [vmem:[#allocation50_spill] sm:$0xff] %v12248_v11  ;;  %v12256_v6 = vadd.f32 %v1880_v20, %v883_v61  ;;  %v885_v5 = vpop.f32.mrf.mxu0  ;;  %v5378_v21 = vsel %vm5354_vm3, %v14281_v52, %v14208_v54  ;;  %7746 = vmatprep.subr.bf16.mxu1 %v11082_v30  ;;  %v4324_v61 = vrot.slane %v4322_v4, 1  ;;  %v4327_v20 = vrot.slane %v4325_v32, 2  ;;  %v12280_v52 = vld [vmem:[%s11630_s26 + $0xa4] ss:$8 sps:$4 sm:$0xff]  }
 0x1dc   : > { %v1882_v57 = vpop.f32.mrf.mxu1  ;;  %v4311_v18 = vsel %vm4169_vm2, %v12211_v37, %v12253_v8  ;;  %v14283_v11 = vrot.slane %v12200_v29, 2  ;;  %v11038_v30 = vld [vmem:[#allocation3 + $0x6d0] ss:$8 sps:$4 sm:$0xff]   ;;  %v11055_v4 = vld [vmem:[#allocation3 + $0x6c4] ss:$8 sps:$4 sm:$0xff]   ;;  %v4313_v37 = vshrl.u32 %v12267_v46, 16 }
 0x1dd   : > { %14280 = vst [vmem:[#allocation51_spill] sm:$0xff] %v12256_v6  ;;  %v12269_v45 = vadd.f32 %v1882_v57, %v885_v5  ;;  %v887_v63 = vpop.f32.mrf.mxu0  ;;  %6562 = vmatpush2.bf16.msra.mxu0 %v11026_v0  ;;  %v11088_v5 = vld [vmem:[#allocation3 + $0x7d4] ss:$8 sps:$4 sm:$0xff]   ;;  %v11086_v32 = vld [vmem:[#allocation3 + $0x7d0] ss:$8 sps:$4 sm:$0xff]   ;;  %v4316_v15 = vshll.u32 %v12267_v46, 16  ;;  %v12288_v0 = vor.u32 %v4300_v7, %v4297_v38 }
 0x1de   : > { %v1884_v6 = vpop.f32.mrf.mxu1  ;;  %v5384_v59 = vsel %vm5354_vm3, %v14284_v41, %v14283_v11  ;;  %6563 = vmatprep.subr.bf16.mxu0 %v11040_v19  ;;  %7747 = vmatpush2.bf16.msra.mxu1 %v11080_v22  ;;  %v11094_v11 = vld [vmem:[#allocation3 + $0x7c4] ss:$8 sps:$4 sm:$0xff]   ;;  %v12291_v22 = vor.u32 %v4327_v20, %v4324_v61  ;;  %v11067_v7 = vld [vmem:[#allocation3 + $0x6b4] ss:$8 sps:$4 sm:$0xff]   ;;  %v4315_v20 = vrot.slane %v4313_v37, 1 }
 0x1df   : > { %14282 = vst [vmem:[#allocation52_spill] sm:$0xff] %v12269_v45  ;;  %v12282_v24 = vadd.f32 %v1884_v6, %v887_v63  ;;  %v891_v57 = vpop.f32.mrf.mxu0  ;;  %4789 = vmatmul.mubr.bf16.gmra.mxu0 %v4284_v42  ;;  %7748 = vmatprep.subr.bf16.mxu1 %v11088_v5  ;;  %v12299_v63 = vld [vmem:[%s11630_s26 + $0xa0] ss:$8 sps:$4 sm:$0xff]   ;;  %v14289_v5 = vrot.slane %v12219_v1, 2 }
 0x1e0   : > { %v1888_v54 = vpop.f32.mrf.mxu1  ;;  %5708 = vmatmul.mubr.bf16.gmra.mxu1 %v5378_v21  ;;  %4798 = vmatprep.mubr.bf16.mxu0 %v4311_v18  ;;  %v4340_v21 = vshrl.u32 %v12280_v52, 16  ;;  %v11092_v18 = vld [vmem:[#allocation3 + $0x7c0] ss:$8 sps:$4 sm:$0xff]  }
 0x1e1   : > { %14285 = vst [vmem:[#allocation53_spill] sm:$0xff] %v12282_v24  ;;  %v12286_v41 = vadd.f32 %v1888_v54, %v891_v57  ;;  %5717 = vmatprep.mubr.bf16.mxu1 %v5384_v59  ;;  %v893_v6 = vpop.f32.mrf.mxu0  ;;  %v4343_v24 = vshll.u32 %v12280_v52, 16  ;;  %6564 = vmatpush2.bf16.msra.mxu0 %v11038_v30  ;;  %v11053_v54 = vld [vmem:[#allocation3 + $0x6c0] ss:$8 sps:$4 sm:$0xff]   ;;  %v4318_v57 = vrot.slane %v4316_v15, 2  ;;  %v4302_v30 = vsel %vm4169_vm2, %v12244_v12, %v12288_v0 }
 0x1e2   : > { %v1890_v19 = vpop.f32.mrf.mxu1  ;;  %6565 = vmatprep.subr.bf16.mxu0 %v11055_v4  ;;  %7749 = vmatpush2.bf16.msra.mxu1 %v11086_v32  ;;  %v14290_v4 = vrot.slane %v12187_v31, 2  ;;  %v4329_v15 = vsel %vm4169_vm2, %v12253_v8, %v12291_v22  ;;  %v11065_v31 = vld [vmem:[#allocation3 + $0x6b0] ss:$8 sps:$4 sm:$0xff]  }
 0x1e3   : > { %14286 = vst [vmem:[#allocation54_spill] sm:$0xff] %v12286_v41  ;;  %v12296_v38 = vadd.f32 %v1890_v19, %v893_v6  ;;  %v895_v59 = vpop.f32.mrf.mxu0  ;;  %7750 = vmatprep.subr.bf16.mxu1 %v11094_v11  ;;  %v12312_v6 = vld [vmem:[%s11630_s26 + $0xb4] ss:$8 sps:$4 sm:$0xff]   ;;  %v14291_v11 = vrot.slane %v12232_v56, 2  ;;  %v11098_v41 = vld [vmem:[#allocation3 + $0x7b0] ss:$8 sps:$4 sm:$0xff]   ;;  %v12324_v47 = vor.u32 %v4318_v57, %v4315_v20 }
 0x1e4   : > { %v1892_v61 = vpop.f32.mrf.mxu1  ;;  %v5382_v32 = vsel %vm5354_vm3, %v14290_v4, %v14289_v5  ;;  %v11079_v4 = vld [vmem:[#allocation3 + $0x6a4] ss:$8 sps:$4 sm:$0xff]   ;;  %v11077_v57 = vld [vmem:[#allocation3 + $0x6a0] ss:$8 sps:$4 sm:$0xff]  }
 0x1e5   : > { %14287 = vst [vmem:[#allocation55_spill] sm:$0xff] %v12296_v38  ;;  %v12301_v42 = vadd.f32 %v1892_v61, %v895_v59  ;;  %v897_v19 = vpop.f32.mrf.mxu0  ;;  %v14292_v59 = vrot.slane %v12200_v29, 2  ;;  %v4342_v61 = vrot.slane %v4340_v21, 1  ;;  %6566 = vmatpush2.bf16.msra.mxu0 %v11053_v54  ;;  %v11100_v38 = vld [vmem:[#allocation3 + $0x7b4] ss:$8 sps:$4 sm:$0xff]   ;;  %v14209_v29 = vrot.slane %v12267_v46, 2 }
 0x1e6   : > { %v1894_v37 = vpop.f32.mrf.mxu1  ;;  %6567 = vmatprep.subr.bf16.mxu0 %v11067_v7  ;;  %7751 = vmatpush2.bf16.msra.mxu1 %v11092_v18  ;;  %v4331_v21 = vshrl.u32 %v12299_v63, 16  ;;  %v11103_v54 = vld [vmem:[#allocation3 + $0x7a4] ss:$8 sps:$4 sm:$0xff]   ;;  %v4358_v7 = vshrl.u32 %v12312_v6, 16  ;;  %v4361_v18 = vshll.u32 %v12312_v6, 16 }
 0x1e7   : > { %14288 = vst [vmem:[#allocation56_spill] sm:$0xff] %v12301_v42  ;;  %v5388_v12 = vsel %vm5354_vm3, %v14292_v59, %v14291_v11  ;;  %v4345_v42 = vrot.slane %v4343_v24, 2  ;;  %v12322_v5 = vadd.f32 %v1894_v37, %v897_v19  ;;  %v2637_v45 = vpop.f32.mrf.mxu0  ;;  %4799 = vmatmul.mubr.bf16.gmra.mxu0 %v4302_v30  ;;  %v4334_v24 = vshll.u32 %v12299_v63, 16  ;;  %7752 = vmatprep.subr.bf16.mxu1 %v11100_v38 }
 0x1e8   : > { %v3555_v8 = vpop.f32.mrf.mxu1  ;;  %5718 = vmatmul.mubr.bf16.gmra.mxu1 %v5382_v32  ;;  %v2888_v19 = vadd.f32 %v2637_v45, %v11867_v27  ;;  %4808 = vmatprep.mubr.bf16.mxu0 %v4329_v15  ;;  %v11091_v27 = vld [vmem:[#allocation3 + $0x694] ss:$8 sps:$4 sm:$0xff]   ;;  %v11101_v45 = vld [vmem:[#allocation3 + $0x7a0] ss:$8 sps:$4 sm:$0xff]  }
 0x1e9   : > { %5727 = vmatprep.mubr.bf16.mxu1 %v5388_v12  ;;  %v2639_v30 = vpop.f32.mrf.mxu0  ;;  %v12332_v32 = vor.u32 %v4345_v42, %v4342_v61  ;;  %6568 = vmatpush2.bf16.msra.mxu0 %v11065_v31  ;;  %v4320_v42 = vsel %vm4169_vm2, %v12288_v0, %v12324_v47  ;;  %v14294_v61 = vrot.slane %v12219_v1, 2  ;;  %v4336_v31 = vrot.slane %v4334_v24, 2 }
 0x1ea   : > { %v3557_v37 = vpop.f32.mrf.mxu1  ;;  %v2889_v11 = vadd.f32 %v2639_v30, %v11871_v33  ;;  %v12336_v59 = vadd.f32 %v3555_v8, %v2888_v19  ;;  %6569 = vmatprep.subr.bf16.mxu0 %v11079_v4  ;;  %7753 = vmatpush2.bf16.msra.mxu1 %v11098_v41  ;;  %v4333_v33 = vrot.slane %v4331_v21, 1  ;;  %v12347_v8 = vld [vmem:[%s11630_s26 + $0xb0] ss:$8 sps:$4 sm:$0xff]   ;;  %v4360_v19 = vrot.slane %v4358_v7, 1 }
 0x1eb   : > { %v2641_v15 = vpop.f32.mrf.mxu0  ;;  %v5386_v38 = vsel %vm5354_vm3, %v14294_v61, %v14209_v29  ;;  %7754 = vmatprep.subr.bf16.mxu1 %v11103_v54  ;;  %v4363_v30 = vrot.slane %v4361_v18, 2  ;;  %v4347_v0 = vsel %vm4169_vm2, %v12291_v22, %v12332_v32  ;;  %v14295_v1 = vrot.slane %v12280_v52, 2  ;;  %v12361_v61 = vld [vmem:[%s11630_s26 + $0xc4] ss:$8 sps:$4 sm:$0xff]   ;;  %v11113_v54 = vld [vmem:[#allocation3 + $0x794] ss:$8 sps:$4 sm:$0xff]  }
 0x1ec   : > { %14293 = vst [vmem:[#allocation57_spill] sm:$0xff] %v12336_v59  ;;  %v3559_v12 = vpop.f32.mrf.mxu1  ;;  %v2890_v41 = vadd.f32 %v2641_v15, %v11879_v39  ;;  %v12350_v4 = vadd.f32 %v3557_v37, %v2889_v11  ;;  %v14296_v21 = vrot.slane %v12232_v56, 2  ;;  %v11089_v39 = vld [vmem:[#allocation3 + $0x690] ss:$8 sps:$4 sm:$0xff]   ;;  %v11107_v37 = vld [vmem:[#allocation3 + $0x684] ss:$8 sps:$4 sm:$0xff]  }
 0x1ed   : > { %v2643_v20 = vpop.f32.mrf.mxu0  ;;  %6570 = vmatpush2.bf16.msra.mxu0 %v11077_v57  ;;  %v11111_v11 = vld [vmem:[#allocation3 + $0x790] ss:$8 sps:$4 sm:$0xff]   ;;  %v4349_v56 = vshrl.u32 %v12347_v8, 16 }
 0x1ee   : > { %v3561_v59 = vpop.f32.mrf.mxu1  ;;  %v5392_v24 = vsel %vm5354_vm3, %v14296_v21, %v14295_v1  ;;  %v2891_v7 = vadd.f32 %v2643_v20, %v11883_v48  ;;  %v12364_v18 = vadd.f32 %v3559_v12, %v2890_v41  ;;  %6571 = vmatprep.subr.bf16.mxu0 %v11091_v27  ;;  %7755 = vmatpush2.bf16.msra.mxu1 %v11101_v45  ;;  %v4352_v1 = vshll.u32 %v12347_v8, 16  ;;  %v11116_v21 = vld [vmem:[#allocation3 + $0x784] ss:$8 sps:$4 sm:$0xff]  }
 0x1ef   : > { %v2647_v22 = vpop.f32.mrf.mxu0  ;;  %4809 = vmatmul.mubr.bf16.gmra.mxu0 %v4320_v42  ;;  %v12371_v48 = vor.u32 %v4336_v31, %v4333_v33  ;;  %v5389_v20 = vrot.slane %v12299_v63, 2  ;;  %v12374_v12 = vor.u32 %v4363_v30, %v4360_v19  ;;  %v5395_v42 = vrot.slane %v12312_v6, 2  ;;  %7756 = vmatprep.subr.bf16.mxu1 %v11113_v54  ;;  %v11114_v63 = vld [vmem:[#allocation3 + $0x780] ss:$8 sps:$4 sm:$0xff]   ;;  %v11124_v31 = vld [vmem:[#allocation3 + $0x874] ss:$8 sps:$4 sm:$0xff]  }
 0x1f0   : > { %v3565_v15 = vpop.f32.mrf.mxu1  ;;  %5728 = vmatmul.mubr.bf16.gmra.mxu1 %v5386_v38  ;;  %v2892_v57 = vadd.f32 %v2647_v22, %v11885_v55  ;;  %v12369_v29 = vadd.f32 %v3561_v59, %v2891_v7  ;;  %4818 = vmatprep.mubr.bf16.mxu0 %v4347_v0  ;;  %v4376_v38 = vshrl.u32 %v12361_v61, 16  ;;  %v4379_v41 = vshll.u32 %v12361_v61, 16  ;;  %v11105_v55 = vld [vmem:[#allocation3 + $0x680] ss:$8 sps:$4 sm:$0xff]  }
 0x1f1   : > { %5737 = vmatprep.mubr.bf16.mxu1 %v5392_v24  ;;  %v2649_v27 = vpop.f32.mrf.mxu0  ;;  %6572 = vmatpush2.bf16.msra.mxu0 %v11089_v39  ;;  %v4351_v0 = vrot.slane %v4349_v56, 1  ;;  %v4354_v24 = vrot.slane %v4352_v1, 2  ;;  %v14297_v54 = vrot.slane %v12267_v46, 2  ;;  %v4365_v56 = vsel %vm4169_vm2, %v12332_v32, %v12374_v12 }
 0x1f2   : > { %v3567_v45 = vpop.f32.mrf.mxu1  ;;  %v2893_v59 = vadd.f32 %v2649_v27, %v11889_v58  ;;  %v12380_v33 = vadd.f32 %v3565_v15, %v2892_v57  ;;  %6573 = vmatprep.subr.bf16.mxu0 %v11107_v37  ;;  %7757 = vmatpush2.bf16.msra.mxu1 %v11111_v11  ;;  %v4338_v58 = vsel %vm4169_vm2, %v12324_v47, %v12371_v48  ;;  %v12392_v11 = vld [vmem:[%s11630_s26 + $0xc0] ss:$8 sps:$4 sm:$0xff]   ;;  %v4381_v47 = vrot.slane %v4379_v41, 2  ;;  %v12403_v57 = vld [vmem:[%s11630_s26 + $0xd4] ss:$8 sps:$4 sm:$0xff]  }
 0x1f3   : > { %v2651_v19 = vpop.f32.mrf.mxu0  ;;  %7758 = vmatprep.subr.bf16.mxu1 %v11116_v21  ;;  %v5390_v37 = vsel %vm5354_vm3, %v14297_v54, %v5389_v20  ;;  %v4378_v21 = vrot.slane %v4376_v38, 1  ;;  %v4370_v41 = vshll.u32 %v12392_v11, 16 }
 0x1f4   : > { %v3569_v30 = vpop.f32.mrf.mxu1  ;;  %v2894_v7 = vadd.f32 %v2651_v19, %v11891_v62  ;;  %v12383_v39 = vadd.f32 %v3567_v45, %v2893_v59  ;;  %v14298_v62 = vrot.slane %v12280_v52, 2  ;;  %v4355_v59 = vor.u32 %v4354_v24, %v4351_v0 }
 0x1f5   : > { %v2653_v22 = vpop.f32.mrf.mxu0  ;;  %6574 = vmatpush2.bf16.msra.mxu0 %v11105_v55  ;;  %v5393_v52 = vrot.slane %v12347_v8, 2  ;;  %v4394_v0 = vshrl.u32 %v12403_v57, 16  ;;  %v4397_v8 = vshll.u32 %v12403_v57, 16 }
 0x1f6   : > { %v3571_v15 = vpop.f32.mrf.mxu1  ;;  %v5396_v1 = vsel %vm5354_vm3, %v14298_v62, %v5395_v42  ;;  %v2895_v46 = vadd.f32 %v2653_v22, %v11897_v2  ;;  %v12406_v27 = vadd.f32 %v3569_v30, %v2894_v7  ;;  %7759 = vmatpush2.bf16.msra.mxu1 %v11114_v63  ;;  %8647 = vmatprep.subr.bf16.mxu0 %v11124_v31  ;;  %v4367_v2 = vshrl.u32 %v12392_v11, 16  ;;  %v12424_v22 = vld [vmem:[%s11630_s26 + $0xd0] ss:$8 sps:$4 sm:$0xff]  }
 0x1f7   : > { %v2657_v45 = vpop.f32.mrf.mxu0  ;;  %4819 = vmatmul.mubr.bf16.gmra.mxu0 %v4338_v58  ;;  %v4382_v31 = vor.u32 %v4381_v47, %v4378_v21  ;;  %v5399_v30 = vrot.slane %v12361_v61, 2  ;;  %v4356_v54 = vsel %vm4169_vm2, %v12371_v48, %v4355_v59  ;;  %v4372_v62 = vrot.slane %v4370_v41, 2 }
 0x1f8   : > { %v3575_v32 = vpop.f32.mrf.mxu1  ;;  %5738 = vmatmul.mubr.bf16.gmra.mxu1 %v5390_v37  ;;  %v2896_v19 = vadd.f32 %v2657_v45, %v11899_v10  ;;  %v12410_v38 = vadd.f32 %v3571_v15, %v2895_v46  ;;  %4828 = vmatprep.mubr.bf16.mxu0 %v4365_v56  ;;  %v5394_v37 = vsel %vm5354_vm3, %v5389_v20, %v5393_v52  ;;  %v4369_v56 = vrot.slane %v4367_v2, 1  ;;  %v12435_v20 = vld [vmem:[%s11630_s26 + $0xe4] ss:$8 sps:$4 sm:$0xff]  }
 0x1f9   : > { %5747 = vmatprep.mubr.bf16.mxu1 %v5396_v1  ;;  %v2659_v55 = vpop.f32.mrf.mxu0  ;;  %v4383_v21 = vsel %vm4169_vm2, %v12374_v12, %v4382_v31  ;;  %v5400_v47 = vsel %vm5354_vm3, %v5395_v42, %v5399_v30  ;;  %v4396_v48 = vrot.slane %v4394_v0, 1  ;;  %v4399_v46 = vrot.slane %v4397_v8, 2 }
 0x1fa   : > { %v3577_v63 = vpop.f32.mrf.mxu1  ;;  %v2897_v10 = vadd.f32 %v2659_v55, %v11901_v14  ;;  %v12418_v24 = vadd.f32 %v3575_v32, %v2896_v19  ;;  %v4385_v2 = vshrl.u32 %v12424_v22, 16  ;;  %v4388_v12 = vshll.u32 %v12424_v22, 16 }
 0x1fb   : > { %v2661_v7 = vpop.f32.mrf.mxu0  ;;  %v4373_v42 = vor.u32 %v4372_v62, %v4369_v56  ;;  %v5397_v55 = vrot.slane %v12392_v11, 2  ;;  %v4400_v0 = vor.u32 %v4399_v46, %v4396_v48  ;;  %v5403_v8 = vrot.slane %v12403_v57, 2 }
 0x1fc   : > { %v3579_v58 = vpop.f32.mrf.mxu1  ;;  %v2898_v61 = vadd.f32 %v2661_v7, %v11903_v16  ;;  %v12427_v15 = vadd.f32 %v3577_v63, %v2897_v10  ;;  %v4412_v10 = vshrl.u32 %v12435_v20, 16  ;;  %v4415_v7 = vshll.u32 %v12435_v20, 16 }
 0x1fd   : > { %v2663_v1 = vpop.f32.mrf.mxu0  ;;  %v4390_v56 = vrot.slane %v4388_v12, 2  ;;  %v5398_v57 = vsel %vm5354_vm3, %v5393_v52, %v5397_v55  ;;  %v5404_v48 = vsel %vm5354_vm3, %v5399_v30, %v5403_v8  ;;  %v5401_v12 = vrot.slane %v12424_v22, 2 }
 0x1fe   : > { %v3581_v14 = vpop.f32.mrf.mxu1  ;;  %v2899_v45 = vadd.f32 %v2663_v1, %v11909_v23  ;;  %v12438_v16 = vadd.f32 %v3579_v58, %v2898_v61  ;;  %v4387_v61 = vrot.slane %v4385_v2, 1  ;;  %v4374_v1 = vsel %vm4169_vm2, %v4355_v59, %v4373_v42 }
 0x1ff   : > { %v2667_v32 = vpop.f32.mrf.mxu0  ;;  %4829 = vmatmul.mubr.bf16.gmra.mxu0 %v4356_v54  ;;  %v4414_v46 = vrot.slane %v4412_v10, 1 }
 0x200   : > { %v3585_v19 = vpop.f32.mrf.mxu1  ;;  %5748 = vmatmul.mubr.bf16.gmra.mxu1 %v5394_v37  ;;  %v2900_v6 = vadd.f32 %v2667_v32, %v11911_v28  ;;  %v12443_v41 = vadd.f32 %v3581_v14, %v2899_v45  ;;  %4838 = vmatprep.mubr.bf16.mxu0 %v4383_v21  ;;  %v12458_v14 = vld [vmem:[%s11630_s26 + $0xe0] ss:$8 sps:$4 sm:$0xff]   ;;  %v4417_v45 = vrot.slane %v4415_v7, 2  ;;  %v12463_v32 = vld [vmem:[%s11630_s26 + $0xf4] ss:$8 sps:$4 sm:$0xff]   ;;  %v4391_v52 = vor.u32 %v4390_v56, %v4387_v61 }
 0x201   : > { %5757 = vmatprep.mubr.bf16.mxu1 %v5400_v47  ;;  %v2669_v23 = vpop.f32.mrf.mxu0  ;;  %v4403_v30 = vshrl.u32 %v12458_v14, 16  ;;  %v5407_v7 = vrot.slane %v12435_v20, 2  ;;  %v4433_v22 = vshll.u32 %v12463_v32, 16 }
 0x202   : > { %v3587_v63 = vpop.f32.mrf.mxu1  ;;  %v2901_v58 = vadd.f32 %v2669_v23, %v11913_v35  ;;  %v12450_v28 = vadd.f32 %v3585_v19, %v2900_v6  ;;  %v4401_v35 = vsel %vm4169_vm2, %v4382_v31, %v4400_v0  ;;  %v4418_v10 = vor.u32 %v4417_v45, %v4414_v46 }
 0x203   : > { %v2671_v54 = vpop.f32.mrf.mxu0  ;;  %v4392_v56 = vsel %vm4169_vm2, %v4373_v42, %v4391_v52  ;;  %v5408_v46 = vsel %vm5354_vm3, %v5403_v8, %v5407_v7 }
 0x204   : > { %v3589_v37 = vpop.f32.mrf.mxu1  ;;  %v2902_v11 = vadd.f32 %v2671_v54, %v11915_v36  ;;  %v12453_v62 = vadd.f32 %v3587_v63, %v2901_v58  ;;  %v4430_v58 = vshrl.u32 %v12463_v32, 16 }
 0x205   : > { %v2673_v21 = vpop.f32.mrf.mxu0 }
 0x206   : > { %v3591_v47 = vpop.f32.mrf.mxu1  ;;  %v2903_v36 = vadd.f32 %v2673_v21, %v11921_v44  ;;  %v12466_v19 = vadd.f32 %v3589_v37, %v2902_v11  ;;  %v4406_v44 = vshll.u32 %v12458_v14, 16  ;;  %v5402_v11 = vsel %vm5354_vm3, %v5397_v55, %v5401_v12 }
 0x207   : > { %v2677_v2 = vpop.f32.mrf.mxu0  ;;  %4839 = vmatmul.mubr.bf16.gmra.mxu0 %v4374_v1  ;;  %v12483_v1 = vld [vmem:[%s11630_s26 + $0xf0] ss:$8 sps:$4 sm:$0xff]   ;;  %v4405_v21 = vrot.slane %v4403_v30, 1  ;;  %v4432_v45 = vrot.slane %v4430_v58, 1 }
 0x208   : > { %v3595_v59 = vpop.f32.mrf.mxu1  ;;  %5758 = vmatmul.mubr.bf16.gmra.mxu1 %v5398_v57  ;;  %v2904_v6 = vadd.f32 %v2677_v2, %v11923_v50  ;;  %v12470_v31 = vadd.f32 %v3591_v47, %v2903_v36  ;;  %4848 = vmatprep.mubr.bf16.mxu0 %v4401_v35  ;;  %v4408_v47 = vrot.slane %v4406_v44, 2  ;;  %v4435_v36 = vrot.slane %v4433_v22, 2  ;;  %v12491_v2 = vld [vmem:[%s11630_s26 + $0x104] ss:$8 sps:$4 sm:$0xff]  }
 0x209   : > { %5767 = vmatprep.mubr.bf16.mxu1 %v5404_v48  ;;  %v2679_v23 = vpop.f32.mrf.mxu0  ;;  %v4424_v30 = vshll.u32 %v12483_v1, 16  ;;  %v5411_v22 = vrot.slane %v12463_v32, 2 }
 0x20a   : > { %v3597_v63 = vpop.f32.mrf.mxu1  ;;  %v2905_v50 = vadd.f32 %v2679_v23, %v11925_v51  ;;  %v12478_v54 = vadd.f32 %v3595_v59, %v2904_v6  ;;  %v4419_v51 = vsel %vm4169_vm2, %v4400_v0, %v4418_v10  ;;  %v4421_v6 = vshrl.u32 %v12483_v1, 16 }
 0x20b   : > { %v2681_v37 = vpop.f32.mrf.mxu0  ;;  %v4409_v44 = vor.u32 %v4408_v47, %v4405_v21  ;;  %v4436_v58 = vor.u32 %v4435_v36, %v4432_v45  ;;  %v5412_v36 = vsel %vm5354_vm3, %v5407_v7, %v5411_v22 }
 0x20c   : > { %v3599_v61 = vpop.f32.mrf.mxu1  ;;  %v2906_v57 = vadd.f32 %v2681_v37, %v11927_v53  ;;  %v12486_v20 = vadd.f32 %v3597_v63, %v2905_v50  ;;  %v4448_v50 = vshrl.u32 %v12491_v2, 16  ;;  %v4451_v37 = vshll.u32 %v12491_v2, 16 }
 0x20d   : > { %v2683_v35 = vpop.f32.mrf.mxu0  ;;  %v4423_v21 = vrot.slane %v4421_v6, 1  ;;  %v4410_v32 = vsel %vm4169_vm2, %v4391_v52, %v4409_v44  ;;  %v4437_v45 = vsel %vm4169_vm2, %v4418_v10, %v4436_v58 }
 0x20e   : > { %v3601_v48 = vpop.f32.mrf.mxu1  ;;  %v2907_v42 = vadd.f32 %v2683_v35, %v11933_v3  ;;  %v12494_v55 = vadd.f32 %v3599_v61, %v2906_v57  ;;  %v5405_v3 = vrot.slane %v12458_v14, 2  ;;  %v4426_v14 = vrot.slane %v4424_v30, 2 }
 0x20f   : > { %v2687_v59 = vpop.f32.mrf.mxu0  ;;  %4849 = vmatmul.mubr.bf16.gmra.mxu0 %v4392_v56  ;;  %v12509_v56 = vld [vmem:[%s11630_s26 + $0x100] ss:$8 sps:$4 sm:$0xff]  }
 0x210   : > { %v3605_v53 = vpop.f32.mrf.mxu1  ;;  %5768 = vmatmul.mubr.bf16.gmra.mxu1 %v5402_v11  ;;  %v2908_v0 = vadd.f32 %v2687_v59, %v11935_v9  ;;  %v12499_v8 = vadd.f32 %v3601_v48, %v2907_v42  ;;  %4858 = vmatprep.mubr.bf16.mxu0 %v4419_v51  ;;  %v5406_v48 = vsel %vm5354_vm3, %v5401_v12, %v5405_v3  ;;  %v12517_v51 = vld [vmem:[%s11630_s26 + $0x114] ss:$8 sps:$4 sm:$0xff]   ;;  %v4450_v42 = vrot.slane %v4448_v50, 1 }
 0x211   : > { %5777 = vmatprep.mubr.bf16.mxu1 %v5408_v46  ;;  %v2689_v23 = vpop.f32.mrf.mxu0  ;;  %v4453_v59 = vrot.slane %v4451_v37, 2  ;;  %v4442_v52 = vshll.u32 %v12509_v56, 16 }
 0x212   : > { %v3607_v63 = vpop.f32.mrf.mxu1  ;;  %v2909_v61 = vadd.f32 %v2689_v23, %v11937_v13  ;;  %v12506_v9 = vadd.f32 %v3605_v53, %v2908_v0  ;;  %v4427_v0 = vor.u32 %v4426_v14, %v4423_v21  ;;  %v5409_v23 = vrot.slane %v12483_v1, 2 }
 0x213   : > { %v2691_v11 = vpop.f32.mrf.mxu0  ;;  %v4444_v1 = vrot.slane %v4442_v52, 2 }
 0x214   : > { %v3609_v57 = vpop.f32.mrf.mxu1  ;;  %v2910_v47 = vadd.f32 %v2691_v11, %v11939_v17  ;;  %v12512_v35 = vadd.f32 %v3607_v63, %v2909_v61  ;;  %v4439_v17 = vshrl.u32 %v12509_v56, 16  ;;  %v4469_v63 = vshll.u32 %v12517_v51, 16 }
 0x215   : > { %v2693_v46 = vpop.f32.mrf.mxu0  ;;  %v4454_v61 = vor.u32 %v4453_v59, %v4450_v42  ;;  %v5415_v11 = vrot.slane %v12491_v2, 2 }
 0x216   : > { %v3611_v13 = vpop.f32.mrf.mxu1  ;;  %v2911_v53 = vadd.f32 %v2693_v46, %v11945_v25  ;;  %v12522_v6 = vadd.f32 %v3609_v57, %v2910_v47  ;;  %v4466_v25 = vshrl.u32 %v12517_v51, 16  ;;  %v12539_v46 = vld [vmem:[%s11630_s26 + $0x110] ss:$8 sps:$4 sm:$0xff]  }
 0x217   : > { %v2697_v30 = vpop.f32.mrf.mxu0  ;;  %4859 = vmatmul.mubr.bf16.gmra.mxu0 %v4410_v32  ;;  %v4428_v32 = vsel %vm4169_vm2, %v4409_v44, %v4427_v0  ;;  %v4455_v59 = vsel %vm4169_vm2, %v4436_v58, %v4454_v61  ;;  %v4457_v58 = vshrl.u32 %v12539_v46, 16 }
 0x218   : > { %v3615_v12 = vpop.f32.mrf.mxu1  ;;  %5778 = vmatmul.mubr.bf16.gmra.mxu1 %v5406_v48  ;;  %v2912_v10 = vadd.f32 %v2697_v30, %v11947_v26  ;;  %v12528_v7 = vadd.f32 %v3611_v13, %v2911_v53  ;;  %4868 = vmatprep.mubr.bf16.mxu0 %v4437_v45  ;;  %v4441_v26 = vrot.slane %v4439_v17, 1  ;;  %v5410_v48 = vsel %vm5354_vm3, %v5405_v3, %v5409_v23  ;;  %v12547_v17 = vld [vmem:[%s11630_s26 + $0x124] ss:$8 sps:$4 sm:$0xff]  }
 0x219   : > { %5787 = vmatprep.mubr.bf16.mxu1 %v5412_v36  ;;  %v2699_v50 = vpop.f32.mrf.mxu0  ;;  %v4468_v2 = vrot.slane %v4466_v25, 1  ;;  %v4471_v36 = vrot.slane %v4469_v63, 2  ;;  %v5416_v53 = vsel %vm5354_vm3, %v5411_v22, %v5415_v11  ;;  %v4460_v22 = vshll.u32 %v12539_v46, 16 }
 0x21a   : > { %v3617_v37 = vpop.f32.mrf.mxu1  ;;  %v2913_v57 = vadd.f32 %v2699_v50, %v11949_v40  ;;  %v12534_v21 = vadd.f32 %v3615_v12, %v2912_v10  ;;  %v12552_v52 = vor.u32 %v4444_v1, %v4441_v26  ;;  %v14210_v12 = vrot.slane %v12509_v56, 2  ;;  %v14302_v10 = vld [vmem:[#allocation16_spill] sm:$0xff] }
 0x21b   : > { %v2701_v14 = vpop.f32.mrf.mxu0  ;;  %v4484_v1 = vshrl.u32 %v12547_v17, 16 }
 0x21c   : > { %14299 = vst [vmem:[#allocation58_spill] sm:$0xff] %v12534_v21  ;;  %v3619_v47 = vpop.f32.mrf.mxu1  ;;  %v2914_v13 = vadd.f32 %v2701_v14, %v11951_v43  ;;  %v12542_v45 = vadd.f32 %v3617_v37, %v2913_v57  ;;  %v3986_v37 = vld [vmem:[%s11630_s26 + $0x130] sm:$0x33]  ;;  %v4487_v14 = vshll.u32 %v12547_v17, 16  ;;  %v12634_v21 = vld [vmem:[%s11630_s26 + $0x20] sm:$0xcc] }
 0x21d   : > { %v2703_v40 = vpop.f32.mrf.mxu0 }
 0x21e   : > { %14300 = vst [vmem:[#allocation59_spill] sm:$0xff] %v12542_v45  ;;  %v3621_v42 = vpop.f32.mrf.mxu1  ;;  %v2915_v44 = vadd.f32 %v2703_v40, %v11957_v49  ;;  %v12550_v3 = vadd.f32 %v3619_v47, %v2914_v13  ;;  %v12560_v49 = vor.u32 %v4471_v36, %v4468_v2  ;;  %v12567_v47 = vld [vmem:[%s11630_s26 + $0x120] ss:$8 sps:$4 sm:$0xff]   ;;  %v4446_v40 = vsel %vm4169_vm2, %v4427_v0, %v12552_v52 }
 0x21f   : > { %v2707_v43 = vpop.f32.mrf.mxu0  ;;  %4869 = vmatmul.mubr.bf16.gmra.mxu0 %v4428_v32  ;;  %v14304_v32 = vld [vmem:[#allocation17_spill] sm:$0xff] }
 0x220   : > { %14301 = vst [vmem:[#allocation60_spill] sm:$0xff] %v12550_v3  ;;  %v3625_v30 = vpop.f32.mrf.mxu1  ;;  %5788 = vmatmul.mubr.bf16.gmra.mxu1 %v5410_v48  ;;  %v2916_v25 = vadd.f32 %v2707_v43, %v14302_v10  ;;  %v12558_v63 = vadd.f32 %v3621_v42, %v2915_v44  ;;  %4878 = vmatprep.mubr.bf16.mxu0 %v4455_v59  ;;  %v4459_v59 = vrot.slane %v4457_v58, 1  ;;  %v14306_v43 = vld [vmem:[#allocation18_spill] sm:$0xff]  ;;  %v4478_v58 = vshll.u32 %v12567_v47, 16 }
 0x221   : > { %5797 = vmatprep.mubr.bf16.mxu1 %v5416_v53  ;;  %v2709_v57 = vpop.f32.mrf.mxu0  ;;  %v5414_v42 = vsel %vm5354_vm3, %v5409_v23, %v14210_v12  ;;  %v4462_v53 = vrot.slane %v4460_v22, 2  ;;  %v10133_v44 = vcombine.high %v3986_v37, %v3986_v37  ;;  %v4475_v23 = vshrl.u32 %v12567_v47, 16  ;;  %v14309_v22 = vld [vmem:[#allocation19_spill] sm:$0xff] }
 0x222   : > { %14303 = vst [vmem:[#allocation16_spill] sm:$0xff] %v12558_v63  ;;  %v3627_v26 = vpop.f32.mrf.mxu1  ;;  %v2917_v48 = vadd.f32 %v2709_v57, %v14304_v32  ;;  %v12570_v13 = vadd.f32 %v3625_v30, %v2916_v25  ;;  %v4473_v30 = vsel %vm4169_vm2, %v4454_v61, %v12560_v49  ;;  %v14308_v25 = vrot.slane %v12517_v51, 2 }
 0x223   : > { %v2711_v2 = vpop.f32.mrf.mxu0  ;;  %v4489_v63 = vrot.slane %v4487_v14, 2  ;;  %v14319_v3 = vrot.slane %v12517_v51, 2  ;;  %v14322_v51 = vld [vmem:[#allocation24_spill] sm:$0xff] }
 0x224   : > { %14305 = vst [vmem:[#allocation17_spill] sm:$0xff] %v12570_v13  ;;  %v3629_v36 = vpop.f32.mrf.mxu1  ;;  %v2918_v10 = vadd.f32 %v2711_v2, %v14306_v43  ;;  %v12578_v50 = vadd.f32 %v3627_v26, %v2917_v48  ;;  %v5420_v0 = vsel %vm5354_vm3, %v5415_v11, %v14308_v25  ;;  %v4486_v13 = vrot.slane %v4484_v1, 1  ;;  %v14311_v1 = vld [vmem:[#allocation20_spill] sm:$0xff] }
 0x225   : > { %v2713_v57 = vpop.f32.mrf.mxu0  ;;  %v10132_v26 = vcombine.low %v3986_v37, %v3986_v37  ;;  %v4463_v43 = vor.u32 %v4462_v53, %v4459_v59  ;;  %v4502_v25 = vshrl.u32 %v10133_v44, 16  ;;  %v12596_v59 = vld [vmem:[%s11630_s26 + $0x130] sm:$0x33] }
 0x226   : > { %14307 = vst [vmem:[#allocation18_spill] sm:$0xff] %v12578_v50  ;;  %v3631_v32 = vpop.f32.mrf.mxu1  ;;  %v2919_v12 = vadd.f32 %v2713_v57, %v14309_v22  ;;  %v12588_v2 = vadd.f32 %v3629_v36, %v2918_v10  ;;  %v4505_v36 = vshll.u32 %v10133_v44, 16  ;;  %v4490_v57 = vor.u32 %v4489_v63, %v4486_v13  ;;  %v14313_v53 = vld [vmem:[#allocation21_spill] sm:$0xff] }
 0x227   : > { %v2717_v48 = vpop.f32.mrf.mxu0  ;;  %4879 = vmatmul.mubr.bf16.gmra.mxu0 %v4446_v40  ;;  %v4477_v40 = vrot.slane %v4475_v23, 1  ;;  %v4480_v22 = vrot.slane %v4478_v58, 2  ;;  %v4464_v63 = vsel %vm4169_vm2, %v12552_v52, %v4463_v43  ;;  %v14315_v13 = vrot.slane %v12539_v46, 2 }
 0x228   : > { %14310 = vst [vmem:[#allocation19_spill] sm:$0xff] %v12588_v2  ;;  %v3635_v61 = vpop.f32.mrf.mxu1  ;;  %5798 = vmatmul.mubr.bf16.gmra.mxu1 %v5414_v42  ;;  %v2920_v14 = vadd.f32 %v2717_v48, %v14311_v1  ;;  %v12592_v50 = vadd.f32 %v3631_v32, %v2919_v12  ;;  %4888 = vmatprep.mubr.bf16.mxu0 %v4473_v30  ;;  %v5423_v42 = vrot.slane %v12547_v17, 2  ;;  %v4493_v48 = vshrl.u32 %v10132_v26, 16  ;;  %v12602_v32 = vld [vmem:[%s11630_s26 + $0x28] sm:$0xff]  ;;  %v6972_v30 = vld [vmem:[%s11630_s26 + $0x20] sm:$0xcc] }
 0x229   : > { %5807 = vmatprep.mubr.bf16.mxu1 %v5420_v0  ;;  %v2719_v10 = vpop.f32.mrf.mxu0  ;;  %v4496_v12 = vshll.u32 %v10132_v26, 16  ;;  %v14316_v17 = vrot.slane %v12509_v56, 2  ;;  %v4504_v58 = vrot.slane %v4502_v25, 1  ;;  %v4507_v26 = vrot.slane %v4505_v36, 2 }
 0x22a   : > { %14312 = vst [vmem:[#allocation20_spill] sm:$0xff] %v12592_v50  ;;  %v3637_v37 = vpop.f32.mrf.mxu1  ;;  %v2921_v11 = vadd.f32 %v2719_v10, %v14313_v53  ;;  %v12599_v2 = vadd.f32 %v3635_v61, %v2920_v14  ;;  %v14317_v61 = vld [vmem:[#allocation22_spill] sm:$0xff]  ;;  %v10203_v10 = vcombine.high %v12596_v59, %v12596_v59  ;;  %v4491_v52 = vsel %vm4169_vm2, %v12560_v49, %v4490_v57 }
 0x22b   : > { %v2721_v44 = vpop.f32.mrf.mxu0  ;;  %v5418_v23 = vsel %vm5354_vm3, %v14316_v17, %v14315_v13  ;;  %v4481_v50 = vor.u32 %v4480_v22, %v4477_v40  ;;  %v5424_v56 = vsel %vm5354_vm3, %v14319_v3, %v5423_v42  ;;  %v12623_v13 = vld [vmem:[%s11630_s26 + $0x34] ss:$8 sps:$4 sm:$0xff]   ;;  %v10307_v25 = vcombine.high %v6972_v30, %v12602_v32 }
 0x22c   : > { %14314 = vst [vmem:[#allocation21_spill] sm:$0xff] %v12599_v2  ;;  %v3639_v0 = vpop.f32.mrf.mxu1  ;;  %v2922_v1 = vadd.f32 %v2721_v44, %v14317_v61  ;;  %v12613_v14 = vadd.f32 %v3637_v37, %v2921_v11  ;;  %v14320_v11 = vld [vmem:[#allocation23_spill] sm:$0xff]  ;;  %v4495_v44 = vrot.slane %v4493_v48, 1  ;;  %v4498_v17 = vrot.slane %v4496_v12, 2 }
 0x22d   : > { %v2723_v53 = vpop.f32.mrf.mxu0  ;;  %v14211_v49 = vrot.slane %v12567_v47, 2  ;;  %v4508_v22 = vor.u32 %v4507_v26, %v4504_v58  ;;  %v5427_v45 = vrot.slane %v10203_v10, 2  ;;  %v7210_v48 = vshrl.u32 %v10307_v25, 16 }
 0x22e   : > { %14318 = vst [vmem:[#allocation22_spill] sm:$0xff] %v12613_v14  ;;  %v3641_v2 = vpop.f32.mrf.mxu1  ;;  %v2923_v36 = vadd.f32 %v2723_v53, %v14320_v11  ;;  %v12627_v37 = vadd.f32 %v3639_v0, %v2922_v1  ;;  %v7213_v12 = vshll.u32 %v10307_v25, 16  ;;  %v14324_v53 = vld [vmem:[#allocation25_spill] sm:$0xff]  ;;  %v14326_v10 = vrot.slane %v12539_v46, 2 }
 0x22f   : > { %v2727_v61 = vpop.f32.mrf.mxu0  ;;  %4889 = vmatmul.mubr.bf16.gmra.mxu0 %v4464_v63  ;;  %v7218_v63 = vshrl.u32 %v12623_v13, 16  ;;  %v10202_v25 = vcombine.low %v12596_v59, %v12596_v59  ;;  %v12658_v46 = vld [vmem:[%s11630_s26 + $0x30] ss:$8 sps:$4 sm:$0xff]  }
 0x230   : > { %14321 = vst [vmem:[#allocation23_spill] sm:$0xff] %v12627_v37  ;;  %v3645_v14 = vpop.f32.mrf.mxu1  ;;  %5808 = vmatmul.mubr.bf16.gmra.mxu1 %v5418_v23  ;;  %v2924_v40 = vadd.f32 %v2727_v61, %v14322_v51  ;;  %v12631_v3 = vadd.f32 %v3641_v2, %v2923_v36  ;;  %4898 = vmatprep.mubr.bf16.mxu0 %v4491_v52  ;;  %v7221_v23 = vshll.u32 %v12623_v13, 16  ;;  %v14327_v51 = vld [vmem:[#allocation26_spill] sm:$0xff]  ;;  %v7215_v59 = vrot.slane %v7213_v12, 3 }
 0x231   : > { %5817 = vmatprep.mubr.bf16.mxu1 %v5424_v56  ;;  %v2729_v0 = vpop.f32.mrf.mxu0  ;;  %v4482_v2 = vsel %vm4169_vm2, %v4463_v43, %v4481_v50  ;;  %v4499_v52 = vor.u32 %v4498_v17, %v4495_v44  ;;  %v5422_v56 = vsel %vm5354_vm3, %v14326_v10, %v14211_v49  ;;  %v10237_v36 = vcombine.high %v12634_v21, %v12602_v32 }
 0x232   : > { %14323 = vst [vmem:[#allocation24_spill] sm:$0xff] %v12631_v3  ;;  %v3647_v1 = vpop.f32.mrf.mxu1  ;;  %v2925_v11 = vadd.f32 %v2729_v0, %v14324_v53  ;;  %v12639_v61 = vadd.f32 %v3645_v14, %v2924_v40  ;;  %v10306_v14 = vcombine.low %v6972_v30, %v12602_v32  ;;  %v4509_v17 = vsel %vm4169_vm2, %v4490_v57, %v4508_v22 }
 0x233   : > { %v2731_v58 = vpop.f32.mrf.mxu0  ;;  %v5428_v40 = vsel %vm5354_vm3, %v5423_v42, %v5427_v45  ;;  %v7212_v10 = vrot.slane %v7210_v48, 2  ;;  %v7220_v49 = vrot.slane %v7218_v63, 2  ;;  %v4500_v30 = vsel %vm4169_vm2, %v4481_v50, %v4499_v52 }
 0x234   : > { %14325 = vst [vmem:[#allocation25_spill] sm:$0xff] %v12639_v61  ;;  %v3649_v26 = vpop.f32.mrf.mxu1  ;;  %v2926_v43 = vadd.f32 %v2731_v58, %v14327_v51  ;;  %v12653_v44 = vadd.f32 %v3647_v1, %v2925_v11  ;;  %v7223_v61 = vrot.slane %v7221_v23, 3  ;;  %v12665_v1 = vld [vmem:[%s11630_s26 + $0x44] ss:$8 sps:$4 sm:$0xff]   ;;  %v5425_v45 = vrot.slane %v10202_v25, 2 }
 0x235   : > { %v2733_v0 = vpop.f32.mrf.mxu0  ;;  %v6276_v42 = vrot.slane %v10237_v36, 2  ;;  %v7193_v22 = vshrl.u32 %v10306_v14, 16  ;;  %v7196_v58 = vshll.u32 %v10306_v14, 16  ;;  %v7204_v50 = vshll.u32 %v12658_v46, 16 }
 0x236   : > { %v3651_v53 = vpop.f32.mrf.mxu1  ;;  %v2927_v3 = vadd.f32 %v2733_v0, %v12030_v34  ;;  %v12661_v37 = vadd.f32 %v3649_v26, %v2926_v43  ;;  %v7201_v34 = vshrl.u32 %v12658_v46, 16  ;;  %v7216_v52 = vor.u32 %v7215_v59, %v7212_v10  ;;  %v12686_v0 = vld [vmem:[%s11630_s26 + $0x40] ss:$8 sps:$4 sm:$0xff]  }
 0x237   : > { %v2737_v11 = vpop.f32.mrf.mxu0  ;;  %4899 = vmatmul.mubr.bf16.gmra.mxu0 %v4482_v2  ;;  %v14212_v2 = vrot.slane %v12623_v13, 2  ;;  %v12673_v26 = vor.u32 %v7223_v61, %v7220_v49  ;;  %v7239_v36 = vshll.u32 %v12665_v1, 16  ;;  %v14329_v43 = vrot.slane %v12567_v47, 2 }
 0x238   : > { %v3655_v57 = vpop.f32.mrf.mxu1  ;;  %5818 = vmatmul.mubr.bf16.gmra.mxu1 %v5422_v56  ;;  %v2928_v48 = vadd.f32 %v2737_v11, %v12033_v60  ;;  %v12668_v12 = vadd.f32 %v3651_v53, %v2927_v3  ;;  %4908 = vmatprep.mubr.bf16.mxu0 %v4509_v17  ;;  %v14328_v56 = vld [vmem:[#allocation27_spill] sm:$0xff]  ;;  %v7236_v3 = vshrl.u32 %v12665_v1, 16  ;;  %v7195_v49 = vrot.slane %v7193_v22, 2  ;;  %v14330_v53 = vld [vmem:[#allocation28_spill] sm:$0xff] }
 0x239   : > { %5827 = vmatprep.mubr.bf16.mxu1 %v5428_v40  ;;  %v2739_v63 = vpop.f32.mrf.mxu0  ;;  %v5426_v17 = vsel %vm5354_vm3, %v14329_v43, %v5425_v45  ;;  %v10236_v40 = vcombine.low %v12634_v21, %v12602_v32  ;;  %v7198_v61 = vrot.slane %v7196_v58, 3  ;;  %v7203_v11 = vrot.slane %v7201_v34, 2  ;;  %v12697_v21 = vld [vmem:[%s11630_s26 + $0x54] ss:$8 sps:$4 sm:$0xff]   ;;  %v14331_v32 = vld [vmem:[#allocation29_spill] sm:$0xff] }
 0x23a   : > { %v3657_v23 = vpop.f32.mrf.mxu1  ;;  %v2929_v25 = vadd.f32 %v2739_v63, %v14328_v56  ;;  %v12676_v60 = vadd.f32 %v3655_v57, %v2928_v48  ;;  %v7206_v57 = vrot.slane %v7204_v50, 3  ;;  %v6278_v47 = vsel %vm5354_vm3, %v6276_v42, %v14212_v2 }
 0x23b   : > { %v2741_v14 = vpop.f32.mrf.mxu0  ;;  %v7225_v45 = vsel %vm7191_vm4, %v7216_v52, %v12673_v26  ;;  %v7238_v56 = vrot.slane %v7236_v3, 2  ;;  %v6273_v50 = vrot.slane %v10236_v40, 2  ;;  %v7227_v43 = vshrl.u32 %v12686_v0, 16 }
 0x23c   : > { %v3659_v51 = vpop.f32.mrf.mxu1  ;;  %v2930_v10 = vadd.f32 %v2741_v14, %v14330_v53  ;;  %v12689_v59 = vadd.f32 %v3657_v23, %v2929_v25  ;;  %v7241_v23 = vrot.slane %v7239_v36, 3  ;;  %v7199_v14 = vor.u32 %v7198_v61, %v7195_v49  ;;  %v14333_v53 = vld [vmem:[#allocation30_spill] sm:$0xff]  ;;  %v14335_v49 = vld [vmem:[#allocation31_spill] sm:$0xff] }
 0x23d   : > { %v2743_v48 = vpop.f32.mrf.mxu0  ;;  %v7230_v42 = vshll.u32 %v12686_v0, 16  ;;  %v7207_v3 = vor.u32 %v7206_v57, %v7203_v11  ;;  %v7257_v40 = vshll.u32 %v12697_v21, 16  ;;  %v14337_v11 = vld [vmem:[#allocation32_spill] sm:$0xff] }
 0x23e   : > { %v3661_v63 = vpop.f32.mrf.mxu1  ;;  %v2931_v22 = vadd.f32 %v2743_v48, %v14331_v32  ;;  %v12700_v58 = vadd.f32 %v3659_v51, %v2930_v10  ;;  %v6274_v48 = vrot.slane %v12658_v46, 2 }
 0x23f   : > { %v2747_v25 = vpop.f32.mrf.mxu0  ;;  %4909 = vmatmul.mubr.bf16.gmra.mxu0 %v4500_v30  ;;  %v7208_v30 = vsel %vm7191_vm4, %v7199_v14, %v7207_v3 }
 0x240   : > { %14332 = vst [vmem:[#allocation26_spill] sm:$0xff] %v12700_v58  ;;  %v3665_v34 = vpop.f32.mrf.mxu1  ;;  %5828 = vmatmul.mubr.bf16.gmra.mxu1 %v5426_v17  ;;  %v2932_v52 = vadd.f32 %v2747_v25, %v14333_v53  ;;  %v12705_v2 = vadd.f32 %v3661_v63, %v2931_v22  ;;  %6575 = vmatprep.mubr.bf16.mxu0 %v6278_v47  ;;  %v7254_v17 = vshrl.u32 %v12697_v21, 16  ;;  %v7229_v47 = vrot.slane %v7227_v43, 2  ;;  %v11122_v53 = vld [vmem:[#allocation3 + $0x870] ss:$8 sps:$4 sm:$0xff]  }
 0x241   : > { %7760 = vmatprep.mubr.bf16.mxu1 %v7225_v45  ;;  %v2749_v36 = vpop.f32.mrf.mxu0  ;;  %v7242_v63 = vor.u32 %v7241_v23, %v7238_v56  ;;  %v7232_v45 = vrot.slane %v7230_v42, 3  ;;  %v6275_v25 = vsel %vm5354_vm3, %v6273_v50, %v6274_v48  ;;  %v14339_v56 = vrot.slane %v12665_v1, 2  ;;  %v11132_v42 = vld [vmem:[#allocation3 + $0x864] ss:$8 sps:$4 sm:$0xff]   ;;  %v12946_v58 = vld [vmem:[%s11630_s26 + $0xb4] ss:$8 sps:$4 sm:$0xff]  }
 0x242   : > { %14334 = vst [vmem:[#allocation27_spill] sm:$0xff] %v12705_v2  ;;  %v3667_v51 = vpop.f32.mrf.mxu1  ;;  %v2933_v61 = vadd.f32 %v2749_v36, %v14335_v49  ;;  %v12712_v10 = vadd.f32 %v3665_v34, %v2932_v52  ;;  %v12720_v2 = vld [vmem:[%s11630_s26 + $0x50] ss:$8 sps:$4 sm:$0xff]   ;;  %v14340_v23 = vrot.slane %v12623_v13, 2  ;;  %v7256_v52 = vrot.slane %v7254_v17, 2 }
 0x243   : > { %v2751_v32 = vpop.f32.mrf.mxu0  ;;  %v7259_v49 = vrot.slane %v7257_v40, 3  ;;  %v7243_v14 = vsel %vm7191_vm4, %v12673_v26, %v7242_v63  ;;  %v14213_v13 = vrot.slane %v12686_v0, 2 }
 0x244   : > { %14336 = vst [vmem:[#allocation28_spill] sm:$0xff] %v12712_v10  ;;  %v3669_v46 = vpop.f32.mrf.mxu1  ;;  %v2934_v57 = vadd.f32 %v2751_v32, %v14337_v11  ;;  %v12715_v22 = vadd.f32 %v3667_v51, %v2933_v61  ;;  %v6282_v43 = vsel %vm5354_vm3, %v14340_v23, %v14339_v56  ;;  %v12728_v51 = vld [vmem:[%s11630_s26 + $0x64] ss:$8 sps:$4 sm:$0xff]   ;;  %v12736_v10 = vor.u32 %v7232_v45, %v7229_v47  ;;  %v14343_v56 = vld [vmem:[#allocation34_spill] sm:$0xff]  ;;  %v14345_v23 = vld [vmem:[#allocation35_spill] sm:$0xff] }
 0x245   : > { %v2753_v36 = vpop.f32.mrf.mxu0  ;;  %v14341_v61 = vld [vmem:[#allocation33_spill] sm:$0xff]  ;;  %v12744_v47 = vor.u32 %v7259_v49, %v7256_v52  ;;  %v11138_v45 = vld [vmem:[#allocation3 + $0x854] ss:$8 sps:$4 sm:$0xff]   ;;  %v12757_v52 = vld [vmem:[%s11630_s26 + $0x60] ss:$8 sps:$4 sm:$0xff]  }
 0x246   : > { %14338 = vst [vmem:[#allocation29_spill] sm:$0xff] %v12715_v22  ;;  %v3671_v34 = vpop.f32.mrf.mxu1  ;;  %v2935_v50 = vadd.f32 %v2753_v36, %v14341_v61  ;;  %v12731_v32 = vadd.f32 %v3669_v46, %v2934_v57  ;;  %v11130_v36 = vld [vmem:[#allocation3 + $0x860] ss:$8 sps:$4 sm:$0xff]   ;;  %v7245_v46 = vshrl.u32 %v12720_v2, 16  ;;  %v7248_v57 = vshll.u32 %v12720_v2, 16 }
 0x247   : > { %v2757_v11 = vpop.f32.mrf.mxu0  ;;  %6576 = vmatmul.mubr.bf16.vlgmr.msra.gmra.mxu0 %v6275_v25  ;;  %v14347_v49 = vld [vmem:[#allocation36_spill] sm:$0xff] }
 0x248   : > { %14342 = vst [vmem:[#allocation30_spill] sm:$0xff] %v12731_v32  ;;  %v3675_v22 = vpop.f32.mrf.mxu1  ;;  %7761 = vmatmul.mubr.bf16.vlgmr.msra.gmra.mxu1 %v7208_v30  ;;  %v2936_v17 = vadd.f32 %v2757_v11, %v14343_v56  ;;  %v12739_v40 = vadd.f32 %v3671_v34, %v2935_v50  ;;  %8648 = vmatpush1.bf16.msra.mxu0 %v11122_v53  ;;  %v7272_v34 = vshrl.u32 %v12728_v51, 16  ;;  %v7275_v53 = vshll.u32 %v12728_v51, 16 }
 0x249   : > { %6585 = vmatprep.mubr.bf16.mxu0 %v6282_v43  ;;  %v2759_v26 = vpop.f32.mrf.mxu0  ;;  %7770 = vmatprep.mubr.bf16.mxu1 %v7243_v14  ;;  %v6280_v14 = vsel %vm5354_vm3, %v6274_v48, %v14213_v13  ;;  %v11136_v13 = vld [vmem:[#allocation3 + $0x850] ss:$8 sps:$4 sm:$0xff]  }
 0x24a   : > { %14344 = vst [vmem:[#allocation31_spill] sm:$0xff] %v12739_v40  ;;  %v3677_v25 = vpop.f32.mrf.mxu1  ;;  %8649 = vmatprep.subr.bf16.mxu0 %v11132_v42  ;;  %v2937_v43 = vadd.f32 %v2759_v26, %v14345_v23  ;;  %v12749_v61 = vadd.f32 %v3675_v22, %v2936_v17  ;;  %v7234_v42 = vsel %vm7191_vm4, %v7207_v3, %v12736_v10  ;;  %v7247_v26 = vrot.slane %v7245_v46, 2 }
 0x24b   : > { %v2761_v50 = vpop.f32.mrf.mxu0  ;;  %v7250_v22 = vrot.slane %v7248_v57, 3  ;;  %v14350_v40 = vrot.slane %v12665_v1, 2  ;;  %v7261_v3 = vsel %vm7191_vm4, %v7242_v63, %v12744_v47  ;;  %v7274_v32 = vrot.slane %v7272_v34, 2  ;;  %v14353_v63 = vld [vmem:[#allocation38_spill] sm:$0xff] }
 0x24c   : > { %14346 = vst [vmem:[#allocation32_spill] sm:$0xff] %v12749_v61  ;;  %v3679_v11 = vpop.f32.mrf.mxu1  ;;  %v2938_v56 = vadd.f32 %v2761_v50, %v14347_v49  ;;  %v12760_v30 = vadd.f32 %v3677_v25, %v2937_v43  ;;  %8650 = vmatpush1.bf16.msra.mxu0 %v11130_v36  ;;  %v14349_v61 = vrot.slane %v12697_v21, 2  ;;  %v7277_v50 = vrot.slane %v7275_v53, 3  ;;  %v12770_v25 = vld [vmem:[%s11630_s26 + $0x74] ss:$8 sps:$4 sm:$0xff]   ;;  %v14351_v36 = vld [vmem:[#allocation37_spill] sm:$0xff] }
 0x24d   : > { %v2763_v17 = vpop.f32.mrf.mxu0  ;;  %8651 = vmatprep.subr.bf16.mxu0 %v11138_v45  ;;  %v11144_v43 = vld [vmem:[#allocation3 + $0x844] ss:$8 sps:$4 sm:$0xff]   ;;  %v7263_v1 = vshrl.u32 %v12757_v52, 16  ;;  %v14214_v34 = vrot.slane %v12720_v2, 2  ;;  %v12781_v53 = vor.u32 %v7250_v22, %v7247_v26  ;;  %v11150_v26 = vld [vmem:[#allocation3 + $0x834] ss:$8 sps:$4 sm:$0xff]  }
 0x24e   : > { %14348 = vst [vmem:[#allocation33_spill] sm:$0xff] %v12760_v30  ;;  %v3681_v23 = vpop.f32.mrf.mxu1  ;;  %v6286_v48 = vsel %vm5354_vm3, %v14350_v40, %v14349_v61  ;;  %v2939_v46 = vadd.f32 %v2763_v17, %v14351_v36  ;;  %v12773_v57 = vadd.f32 %v3679_v11, %v2938_v56  ;;  %v7266_v40 = vshll.u32 %v12757_v52, 16  ;;  %v11142_v17 = vld [vmem:[#allocation3 + $0x840] ss:$8 sps:$4 sm:$0xff]  }
 0x24f   : > { %v2767_v49 = vpop.f32.mrf.mxu0  ;;  %6586 = vmatmul.mubr.bf16.gmra.mxu0 %v6280_v14  ;;  %v7290_v36 = vshrl.u32 %v12770_v25, 16  ;;  %v14357_v14 = vld [vmem:[#allocation40_spill] sm:$0xff] }
 0x250   : > { %14352 = vst [vmem:[#allocation34_spill] sm:$0xff] %v12773_v57  ;;  %v3685_v30 = vpop.f32.mrf.mxu1  ;;  %7771 = vmatmul.mubr.bf16.gmra.mxu1 %v7234_v42  ;;  %v2940_v61 = vadd.f32 %v2767_v49, %v14353_v63  ;;  %v12778_v45 = vadd.f32 %v3681_v23, %v2939_v46  ;;  %6595 = vmatprep.mubr.bf16.mxu0 %v6286_v48  ;;  %v7293_v23 = vshll.u32 %v12770_v25, 16  ;;  %v14355_v46 = vld [vmem:[#allocation39_spill] sm:$0xff]  ;;  %v7268_v63 = vrot.slane %v7266_v40, 3 }
 0x251   : > { %7780 = vmatprep.mubr.bf16.mxu1 %v7261_v3  ;;  %v2769_v11 = vpop.f32.mrf.mxu0  ;;  %8652 = vmatpush1.bf16.msra.mxu0 %v11136_v13  ;;  %v12784_v42 = vor.u32 %v7277_v50, %v7274_v32  ;;  %v7265_v13 = vrot.slane %v7263_v1, 2  ;;  %v14360_v1 = vrot.slane %v12728_v51, 2  ;;  %v14361_v40 = vrot.slane %v12697_v21, 2 }
 0x252   : > { %14354 = vst [vmem:[#allocation35_spill] sm:$0xff] %v12778_v45  ;;  %v3687_v56 = vpop.f32.mrf.mxu1  ;;  %v2941_v48 = vadd.f32 %v2769_v11, %v14355_v46  ;;  %v12789_v49 = vadd.f32 %v3685_v30, %v2940_v61  ;;  %8653 = vmatprep.subr.bf16.mxu0 %v11144_v43  ;;  %v14359_v45 = vrot.slane %v12686_v0, 2  ;;  %v7252_v30 = vsel %vm7191_vm4, %v12736_v10, %v12781_v53  ;;  %v12803_v43 = vld [vmem:[%s11630_s26 + $0x70] ss:$8 sps:$4 sm:$0xff]  }
 0x253   : > { %v2771_v22 = vpop.f32.mrf.mxu0  ;;  %v7279_v0 = vsel %vm7191_vm4, %v12744_v47, %v12784_v42  ;;  %v11148_v46 = vld [vmem:[#allocation3 + $0x830] ss:$8 sps:$4 sm:$0xff]  }
 0x254   : > { %14356 = vst [vmem:[#allocation36_spill] sm:$0xff] %v12789_v49  ;;  %v3689_v3 = vpop.f32.mrf.mxu1  ;;  %v2942_v32 = vadd.f32 %v2771_v22, %v14357_v14  ;;  %v12792_v50 = vadd.f32 %v3687_v56, %v2941_v48  ;;  %v6284_v57 = vsel %vm5354_vm3, %v14359_v45, %v14214_v34  ;;  %v6290_v56 = vsel %vm5354_vm3, %v14361_v40, %v14360_v1  ;;  %v12814_v48 = vld [vmem:[%s11630_s26 + $0x84] ss:$8 sps:$4 sm:$0xff]   ;;  %v14364_v47 = vld [vmem:[#allocation42_spill] sm:$0xff] }
 0x255   : > { %v2773_v61 = vpop.f32.mrf.mxu0  ;;  %8654 = vmatpush1.bf16.msra.mxu0 %v11142_v17  ;;  %v7292_v45 = vrot.slane %v7290_v36, 2  ;;  %v7295_v14 = vrot.slane %v7293_v23, 3  ;;  %v14362_v10 = vld [vmem:[#allocation41_spill] sm:$0xff]  ;;  %v14215_v1 = vrot.slane %v12757_v52, 2  ;;  %v12820_v40 = vor.u32 %v7268_v63, %v7265_v13  ;;  %v11154_v63 = vld [vmem:[#allocation3 + $0x820] ss:$8 sps:$4 sm:$0xff]  }
 0x256   : > { %14358 = vst [vmem:[#allocation37_spill] sm:$0xff] %v12792_v50  ;;  %v3691_v11 = vpop.f32.mrf.mxu1  ;;  %v2943_v22 = vadd.f32 %v2773_v61, %v14362_v10  ;;  %v12817_v34 = vadd.f32 %v3689_v3, %v2942_v32  ;;  %8655 = vmatprep.subr.bf16.mxu0 %v11150_v26  ;;  %v11156_v50 = vld [vmem:[#allocation3 + $0x824] ss:$8 sps:$4 sm:$0xff]   ;;  %v7281_v23 = vshrl.u32 %v12803_v43, 16  ;;  %v7284_v3 = vshll.u32 %v12803_v43, 16  ;;  %v14366_v61 = vld [vmem:[#allocation43_spill] sm:$0xff] }
 0x257   : > { %v2777_v49 = vpop.f32.mrf.mxu0  ;;  %6596 = vmatmul.mubr.bf16.gmra.mxu0 %v6284_v57  ;;  %v7308_v13 = vshrl.u32 %v12814_v48, 16 }
 0x258   : > { %14363 = vst [vmem:[#allocation38_spill] sm:$0xff] %v12817_v34  ;;  %v3695_v21 = vpop.f32.mrf.mxu1  ;;  %7781 = vmatmul.mubr.bf16.gmra.mxu1 %v7252_v30  ;;  %v2944_v17 = vadd.f32 %v2777_v49, %v14364_v47  ;;  %v12823_v36 = vadd.f32 %v3691_v11, %v2943_v22  ;;  %6605 = vmatprep.mubr.bf16.mxu0 %v6290_v56  ;;  %v7311_v49 = vshll.u32 %v12814_v48, 16  ;;  %v12844_v47 = vld [vmem:[%s11630_s26 + $0x80] ss:$8 sps:$4 sm:$0xff]  }
 0x259   : > { %7790 = vmatprep.mubr.bf16.mxu1 %v7279_v0  ;;  %v2779_v26 = vpop.f32.mrf.mxu0  ;;  %v12828_v30 = vor.u32 %v7295_v14, %v7292_v45  ;;  %8656 = vmatpush1.bf16.msra.mxu0 %v11148_v46  ;;  %v11162_v0 = vld [vmem:[#allocation3 + $0x814] ss:$8 sps:$4 sm:$0xff]   ;;  %v14368_v45 = vrot.slane %v12720_v2, 2  ;;  %v7270_v46 = vsel %vm7191_vm4, %v12781_v53, %v12820_v40  ;;  %v14372_v2 = vrot.slane %v12728_v51, 2 }
 0x25a   : > { %14365 = vst [vmem:[#allocation39_spill] sm:$0xff] %v12823_v36  ;;  %v3697_v32 = vpop.f32.mrf.mxu1  ;;  %v2945_v11 = vadd.f32 %v2779_v26, %v14366_v61  ;;  %v12833_v56 = vadd.f32 %v3695_v21, %v2944_v17  ;;  %8657 = vmatprep.subr.bf16.mxu0 %v11156_v50  ;;  %v14369_v26 = vld [vmem:[#allocation44_spill] sm:$0xff]  ;;  %v7283_v50 = vrot.slane %v7281_v23, 2  ;;  %v7286_v61 = vrot.slane %v7284_v3, 3  ;;  %v14373_v23 = vld [vmem:[#allocation45_spill] sm:$0xff] }
 0x25b   : > { %v2781_v10 = vpop.f32.mrf.mxu0  ;;  %v6288_v14 = vsel %vm5354_vm3, %v14368_v45, %v14215_v1  ;;  %v14371_v36 = vrot.slane %v12770_v25, 2  ;;  %v7297_v53 = vsel %vm7191_vm4, %v12784_v42, %v12828_v30  ;;  %v7310_v1 = vrot.slane %v7308_v13, 2  ;;  %v14375_v13 = vld [vmem:[#allocation46_spill] sm:$0xff] }
 0x25c   : > { %14367 = vst [vmem:[#allocation40_spill] sm:$0xff] %v12833_v56  ;;  %v3699_v22 = vpop.f32.mrf.mxu1  ;;  %v2946_v21 = vadd.f32 %v2781_v10, %v14369_v26  ;;  %v12847_v17 = vadd.f32 %v3697_v32, %v2945_v11  ;;  %v7313_v34 = vrot.slane %v7311_v49, 3  ;;  %v12858_v10 = vld [vmem:[%s11630_s26 + $0x94] ss:$8 sps:$4 sm:$0xff]   ;;  %v11160_v32 = vld [vmem:[#allocation3 + $0x810] ss:$8 sps:$4 sm:$0xff]  }
 0x25d   : > { %v2783_v57 = vpop.f32.mrf.mxu0  ;;  %v6294_v45 = vsel %vm5354_vm3, %v14372_v2, %v14371_v36  ;;  %8658 = vmatpush1.bf16.msra.mxu0 %v11154_v63  ;;  %v11170_v26 = vld [vmem:[#allocation3 + $0x804] ss:$8 sps:$4 sm:$0xff]   ;;  %v7299_v36 = vshrl.u32 %v12844_v47, 16  ;;  %v7302_v42 = vshll.u32 %v12844_v47, 16 }
 0x25e   : > { %14370 = vst [vmem:[#allocation41_spill] sm:$0xff] %v12847_v17  ;;  %v3701_v56 = vpop.f32.mrf.mxu1  ;;  %v2947_v3 = vadd.f32 %v2783_v57, %v14373_v23  ;;  %v12861_v11 = vadd.f32 %v3699_v22, %v2946_v21  ;;  %8659 = vmatprep.subr.bf16.mxu0 %v11162_v0  ;;  %v12869_v57 = vor.u32 %v7286_v61, %v7283_v50  ;;  %v7329_v23 = vshll.u32 %v12858_v10, 16  ;;  %v11177_v50 = vld [vmem:[#allocation3 + $0x8f4] ss:$8 sps:$4 sm:$0xff]  }
 0x25f   : > { %v2787_v17 = vpop.f32.mrf.mxu0  ;;  %6606 = vmatmul.mubr.bf16.gmra.mxu0 %v6288_v14  ;;  %v12872_v21 = vor.u32 %v7313_v34, %v7310_v1  ;;  %v7304_v14 = vrot.slane %v7302_v42, 3  ;;  %v14379_v34 = vld [vmem:[#allocation48_spill] sm:$0xff]  ;;  %v14384_v42 = vrot.slane %v12770_v25, 2 }
 0x260   : > { %14374 = vst [vmem:[#allocation42_spill] sm:$0xff] %v12861_v11  ;;  %v3705_v51 = vpop.f32.mrf.mxu1  ;;  %7791 = vmatmul.mubr.bf16.gmra.mxu1 %v7270_v46  ;;  %v2948_v49 = vadd.f32 %v2787_v17, %v14375_v13  ;;  %v12866_v63 = vadd.f32 %v3701_v56, %v2947_v3  ;;  %6615 = vmatprep.mubr.bf16.mxu0 %v6294_v45  ;;  %v7326_v46 = vshrl.u32 %v12858_v10, 16  ;;  %v11168_v56 = vld [vmem:[#allocation3 + $0x800] ss:$8 sps:$4 sm:$0xff]   ;;  %v7301_v13 = vrot.slane %v7299_v36, 2 }
 0x261   : > { %7800 = vmatprep.mubr.bf16.mxu1 %v7297_v53  ;;  %v2789_v0 = vpop.f32.mrf.mxu0  ;;  %8660 = vmatpush1.bf16.msra.mxu0 %v11160_v32  ;;  %v14377_v17 = vld [vmem:[#allocation47_spill] sm:$0xff]  ;;  %v14382_v32 = vrot.slane %v12757_v52, 2  ;;  %v14383_v36 = vrot.slane %v12814_v48, 2  ;;  %v7315_v52 = vsel %vm7191_vm4, %v12828_v30, %v12872_v21  ;;  %v14387_v30 = vld [vmem:[#allocation50_spill] sm:$0xff] }
 0x262   : > { %14376 = vst [vmem:[#allocation43_spill] sm:$0xff] %v12866_v63  ;;  %v3707_v22 = vpop.f32.mrf.mxu1  ;;  %v2949_v45 = vadd.f32 %v2789_v0, %v14377_v17  ;;  %v12877_v3 = vadd.f32 %v3705_v51, %v2948_v49  ;;  %8661 = vmatprep.subr.bf16.mxu0 %v11170_v26  ;;  %v14381_v63 = vrot.slane %v12803_v43, 2  ;;  %v7288_v26 = vsel %vm7191_vm4, %v12820_v40, %v12869_v57  ;;  %v12891_v51 = vld [vmem:[%s11630_s26 + $0x90] ss:$8 sps:$4 sm:$0xff]  }
 0x263   : > { %v2791_v61 = vpop.f32.mrf.mxu0  ;;  %v7328_v17 = vrot.slane %v7326_v46, 2  ;;  %v11175_v40 = vld [vmem:[#allocation3 + $0x8f0] ss:$8 sps:$4 sm:$0xff]  }
 0x264   : > { %14378 = vst [vmem:[#allocation44_spill] sm:$0xff] %v12877_v3  ;;  %v3709_v53 = vpop.f32.mrf.mxu1  ;;  %v2950_v1 = vadd.f32 %v2791_v61, %v14379_v34  ;;  %v12880_v2 = vadd.f32 %v3707_v22, %v2949_v45  ;;  %v6292_v11 = vsel %vm5354_vm3, %v14382_v32, %v14381_v63  ;;  %v6298_v22 = vsel %vm5354_vm3, %v14384_v42, %v14383_v36  ;;  %v12902_v45 = vld [vmem:[%s11630_s26 + $0xa4] ss:$8 sps:$4 sm:$0xff]  }
 0x265   : > { %v2793_v49 = vpop.f32.mrf.mxu0  ;;  %v7331_v63 = vrot.slane %v7329_v23, 3  ;;  %8662 = vmatpush1.bf16.msra.mxu0 %v11168_v56  ;;  %v14385_v61 = vld [vmem:[#allocation49_spill] sm:$0xff]  ;;  %v14216_v36 = vrot.slane %v12844_v47, 2  ;;  %v12908_v42 = vor.u32 %v7304_v14, %v7301_v13  ;;  %v7317_v56 = vshrl.u32 %v12891_v51, 16 }
 0x266   : > { %14380 = vst [vmem:[#allocation45_spill] sm:$0xff] %v12880_v2  ;;  %v3711_v0 = vpop.f32.mrf.mxu1  ;;  %v2951_v34 = vadd.f32 %v2793_v49, %v14385_v61  ;;  %v12905_v32 = vadd.f32 %v3709_v53, %v2950_v1  ;;  %8663 = vmatprep.subr.bf16.mxu0 %v11177_v50  ;;  %v11183_v2 = vld [vmem:[#allocation3 + $0x8e4] ss:$8 sps:$4 sm:$0xff]   ;;  %v7320_v53 = vshll.u32 %v12891_v51, 16  ;;  %v7344_v14 = vshrl.u32 %v12902_v45, 16  ;;  %v14389_v49 = vld [vmem:[#allocation51_spill] sm:$0xff] }
 0x267   : > { %v2797_v3 = vpop.f32.mrf.mxu0  ;;  %6616 = vmatmul.mubr.bf16.gmra.mxu0 %v6292_v11  ;;  %v7347_v13 = vshll.u32 %v12902_v45, 16 }
 0x268   : > { %14386 = vst [vmem:[#allocation46_spill] sm:$0xff] %v12905_v32  ;;  %v3715_v25 = vpop.f32.mrf.mxu1  ;;  %7801 = vmatmul.mubr.bf16.gmra.mxu1 %v7288_v26  ;;  %v2952_v46 = vadd.f32 %v2797_v3, %v14387_v30  ;;  %v12911_v23 = vadd.f32 %v3711_v0, %v2951_v34  ;;  %6625 = vmatprep.mubr.bf16.mxu0 %v6298_v22  ;;  %v11181_v3 = vld [vmem:[#allocation3 + $0x8e0] ss:$8 sps:$4 sm:$0xff]  }
 0x269   : > { %7810 = vmatprep.mubr.bf16.mxu1 %v7315_v52  ;;  %v2799_v50 = vpop.f32.mrf.mxu0  ;;  %v12916_v26 = vor.u32 %v7331_v63, %v7328_v17  ;;  %8664 = vmatpush2.bf16.msra.mxu0 %v11175_v40  ;;  %v11189_v52 = vld [vmem:[#allocation3 + $0x8d4] ss:$8 sps:$4 sm:$0xff]   ;;  %v14391_v17 = vrot.slane %v12803_v43, 2  ;;  %v7306_v40 = vsel %vm7191_vm4, %v12869_v57, %v12908_v42  ;;  %v12932_v30 = vld [vmem:[%s11630_s26 + $0xa0] ss:$8 sps:$4 sm:$0xff]   ;;  %v14394_v43 = vrot.slane %v12814_v48, 2 }
 0x26a   : > { %14388 = vst [vmem:[#allocation47_spill] sm:$0xff] %v12911_v23  ;;  %v3717_v1 = vpop.f32.mrf.mxu1  ;;  %v2953_v0 = vadd.f32 %v2799_v50, %v14389_v49  ;;  %v12921_v22 = vadd.f32 %v3715_v25, %v2952_v46  ;;  %8665 = vmatprep.subr.bf16.mxu0 %v11183_v2  ;;  %v14392_v50 = vld [vmem:[#allocation52_spill] sm:$0xff]  ;;  %v7319_v2 = vrot.slane %v7317_v56, 2  ;;  %v7322_v49 = vrot.slane %v7320_v53, 3  ;;  %v14395_v56 = vld [vmem:[#allocation53_spill] sm:$0xff] }
 0x26b   : > { %v2801_v61 = vpop.f32.mrf.mxu0  ;;  %v6296_v63 = vsel %vm5354_vm3, %v14391_v17, %v14216_v36  ;;  %v14393_v23 = vrot.slane %v12858_v10, 2  ;;  %v7333_v57 = vsel %vm7191_vm4, %v12872_v21, %v12916_v26  ;;  %v7346_v36 = vrot.slane %v7344_v14, 2  ;;  %v14397_v14 = vld [vmem:[#allocation54_spill] sm:$0xff] }
 0x26c   : > { %14390 = vst [vmem:[#allocation48_spill] sm:$0xff] %v12921_v22  ;;  %v3719_v34 = vpop.f32.mrf.mxu1  ;;  %v2954_v25 = vadd.f32 %v2801_v61, %v14392_v50  ;;  %v12935_v46 = vadd.f32 %v3717_v1, %v2953_v0  ;;  %v7349_v32 = vrot.slane %v7347_v13, 3  ;;  %v11187_v1 = vld [vmem:[#allocation3 + $0x8d0] ss:$8 sps:$4 sm:$0xff]   ;;  %v11195_v61 = vld [vmem:[#allocation3 + $0x8c4] ss:$8 sps:$4 sm:$0xff]  }
 0x26d   : > { %v2803_v11 = vpop.f32.mrf.mxu0  ;;  %v6302_v17 = vsel %vm5354_vm3, %v14394_v43, %v14393_v23  ;;  %8666 = vmatpush2.bf16.msra.mxu0 %v11181_v3  ;;  %v7335_v23 = vshrl.u32 %v12932_v30, 16  ;;  %v7338_v21 = vshll.u32 %v12932_v30, 16 }
 0x26e   : > { %v3721_v22 = vpop.f32.mrf.mxu1  ;;  %v2955_v53 = vadd.f32 %v2803_v11, %v14395_v56  ;;  %v12949_v0 = vadd.f32 %v3719_v34, %v2954_v25  ;;  %8667 = vmatprep.subr.bf16.mxu0 %v11189_v52  ;;  %v12957_v11 = vor.u32 %v7322_v49, %v7319_v2  ;;  %v12960_v25 = vor.u32 %v7349_v32, %v7346_v36  ;;  %v11201_v2 = vld [vmem:[#allocation3 + $0x8b4] ss:$8 sps:$4 sm:$0xff]   ;;  %v14400_v32 = vld [vmem:[#allocation56_spill] sm:$0xff] }
 0x26f   : > { %v2807_v50 = vpop.f32.mrf.mxu0  ;;  %6626 = vmatmul.mubr.bf16.gmra.mxu0 %v6296_v63  ;;  %v7365_v56 = vshll.u32 %v12946_v58, 16  ;;  %v7340_v63 = vrot.slane %v7338_v21, 3  ;;  %v14405_v21 = vrot.slane %v12858_v10, 2 }
 0x270   : > { %14396 = vst [vmem:[#allocation49_spill] sm:$0xff] %v12949_v0  ;;  %v3725_v48 = vpop.f32.mrf.mxu1  ;;  %7811 = vmatmul.mubr.bf16.gmra.mxu1 %v7306_v40  ;;  %v2956_v13 = vadd.f32 %v2807_v50, %v14397_v14  ;;  %v12954_v43 = vadd.f32 %v3721_v22, %v2955_v53  ;;  %6635 = vmatprep.mubr.bf16.mxu0 %v6302_v17  ;;  %v7362_v40 = vshrl.u32 %v12946_v58, 16  ;;  %v11193_v22 = vld [vmem:[#allocation3 + $0x8c0] ss:$8 sps:$4 sm:$0xff]   ;;  %v7337_v14 = vrot.slane %v7335_v23, 2 }
 0x271   : > { %7820 = vmatprep.mubr.bf16.mxu1 %v7333_v57  ;;  %v2809_v52 = vpop.f32.mrf.mxu0  ;;  %8668 = vmatpush2.bf16.msra.mxu0 %v11187_v1  ;;  %v14399_v53 = vld [vmem:[#allocation55_spill] sm:$0xff]  ;;  %v14403_v1 = vrot.slane %v12844_v47, 2  ;;  %v14404_v23 = vrot.slane %v12902_v45, 2  ;;  %v7351_v47 = vsel %vm7191_vm4, %v12916_v26, %v12960_v25 }
 0x272   : > { %14398 = vst [vmem:[#allocation50_spill] sm:$0xff] %v12954_v43  ;;  %v3727_v34 = vpop.f32.mrf.mxu1  ;;  %v2957_v17 = vadd.f32 %v2809_v52, %v14399_v53  ;;  %v12965_v50 = vadd.f32 %v3725_v48, %v2956_v13  ;;  %8669 = vmatprep.subr.bf16.mxu0 %v11195_v61  ;;  %v14402_v43 = vrot.slane %v12891_v51, 2  ;;  %v7324_v61 = vsel %vm7191_vm4, %v12908_v42, %v12957_v11  ;;  %v12979_v48 = vld [vmem:[%s11630_s26 + $0xb0] ss:$8 sps:$4 sm:$0xff]  }
 0x273   : > { %v2811_v49 = vpop.f32.mrf.mxu0  ;;  %v7364_v53 = vrot.slane %v7362_v40, 2  ;;  %v11199_v42 = vld [vmem:[#allocation3 + $0x8b0] ss:$8 sps:$4 sm:$0xff]  }
 0x274   : > { %v3729_v57 = vpop.f32.mrf.mxu1  ;;  %v2958_v36 = vadd.f32 %v2811_v49, %v14400_v32  ;;  %v12968_v3 = vadd.f32 %v3727_v34, %v2957_v17  ;;  %v6300_v0 = vsel %vm5354_vm3, %v14403_v1, %v14402_v43  ;;  %v6306_v34 = vsel %vm5354_vm3, %v14405_v21, %v14404_v23  ;;  %v12990_v17 = vld [vmem:[%s11630_s26 + $0xc4] ss:$8 sps:$4 sm:$0xff]  }
 0x275   : > { %v2813_v13 = vpop.f32.mrf.mxu0  ;;  %v7367_v43 = vrot.slane %v7365_v56, 3  ;;  %8670 = vmatpush2.bf16.msra.mxu0 %v11193_v22  ;;  %v11207_v1 = vld [vmem:[#allocation3 + $0x8a4] ss:$8 sps:$4 sm:$0xff]   ;;  %v14217_v23 = vrot.slane %v12932_v30, 2  ;;  %v12996_v21 = vor.u32 %v7340_v63, %v7337_v14  ;;  %v7356_v22 = vshll.u32 %v12979_v48, 16 }
 0x276   : > { %14401 = vst [vmem:[#allocation51_spill] sm:$0xff] %v12968_v3  ;;  %v3731_v52 = vpop.f32.mrf.mxu1  ;;  %v2959_v49 = vadd.f32 %v2813_v13, %v12322_v5  ;;  %v12993_v32 = vadd.f32 %v3729_v57, %v2958_v36  ;;  %8671 = vmatprep.subr.bf16.mxu0 %v11201_v2  ;;  %v14407_v40 = vld [vmem:[#allocation57_spill] sm:$0xff]  ;;  %v7353_v5 = vshrl.u32 %v12979_v48, 16  ;;  %v7380_v63 = vshrl.u32 %v12990_v17, 16 }
 0x277   : > { %v4740_v3 = vpop.f32.mrf.mxu0  ;;  %6636 = vmatmul.mubr.bf16.gmra.mxu0 %v6300_v0  ;;  %v6309_v0 = vrot.slane %v12946_v58, 2  ;;  %v13004_v36 = vor.u32 %v7367_v43, %v7364_v53  ;;  %v7383_v14 = vshll.u32 %v12990_v17, 16  ;;  %v14409_v53 = vrot.slane %v12891_v51, 2 }
 0x278   : > { %v5659_v10 = vpop.f32.mrf.mxu1  ;;  %7821 = vmatmul.mubr.bf16.gmra.mxu1 %v7324_v61  ;;  %v12998_v26 = vadd.f32 %v3731_v52, %v2959_v49  ;;  %v4991_v56 = vadd.f32 %v4740_v3, %v14407_v40  ;;  %6645 = vmatprep.mubr.bf16.mxu0 %v6306_v34  ;;  %v11205_v61 = vld [vmem:[#allocation3 + $0x8a0] ss:$8 sps:$4 sm:$0xff]   ;;  %v11213_v52 = vld [vmem:[#allocation3 + $0x894] ss:$8 sps:$4 sm:$0xff]   ;;  %v7358_v40 = vrot.slane %v7356_v22, 3  ;;  %v14410_v51 = vrot.slane %v12902_v45, 2 }
 0x279   : > { %7830 = vmatprep.mubr.bf16.mxu1 %v7351_v47  ;;  %v4742_v2 = vpop.f32.mrf.mxu0  ;;  %8672 = vmatpush2.bf16.msra.mxu0 %v11199_v42  ;;  %v6304_v43 = vsel %vm5354_vm3, %v14409_v53, %v14217_v23  ;;  %v7342_v42 = vsel %vm7191_vm4, %v12957_v11, %v12996_v21  ;;  %v13020_v49 = vld [vmem:[%s11630_s26 + $0xc0] ss:$8 sps:$4 sm:$0xff]   ;;  %v7369_v11 = vsel %vm7191_vm4, %v12960_v25, %v13004_v36  ;;  %v7382_v23 = vrot.slane %v7380_v63, 2 }
 0x27a   : > { %14406 = vst [vmem:[#allocation52_spill] sm:$0xff] %v12998_v26  ;;  %v5661_v57 = vpop.f32.mrf.mxu1  ;;  %v4992_v3 = vadd.f32 %v4742_v2, %v12350_v4  ;;  %v13009_v13 = vadd.f32 %v5659_v10, %v4991_v56  ;;  %8673 = vmatprep.subr.bf16.mxu0 %v11207_v1  ;;  %v7355_v1 = vrot.slane %v7353_v5, 2  ;;  %v6310_v53 = vsel %vm5354_vm3, %v14410_v51, %v6309_v0  ;;  %v13034_v26 = vld [vmem:[%s11630_s26 + $0xd4] ss:$8 sps:$4 sm:$0xff]   ;;  %v11218_v51 = vld [vmem:[#allocation3 + $0x880] ss:$8 sps:$4 sm:$0xff]  }
 0x27b   : > { %v4744_v34 = vpop.f32.mrf.mxu0  ;;  %v7374_v25 = vshll.u32 %v13020_v49, 16  ;;  %v6311_v58 = vrot.slane %v13020_v49, 2 }
 0x27c   : > { %14408 = vst [vmem:[#allocation53_spill] sm:$0xff] %v13009_v13  ;;  %v5663_v47 = vpop.f32.mrf.mxu1  ;;  %v4993_v4 = vadd.f32 %v4744_v34, %v12364_v18  ;;  %v13023_v10 = vadd.f32 %v5661_v57, %v4992_v3  ;;  %v7385_v13 = vrot.slane %v7383_v14, 3  ;;  %v11211_v18 = vld [vmem:[#allocation3 + $0x890] ss:$8 sps:$4 sm:$0xff]   ;;  %v11220_v57 = vld [vmem:[#allocation3 + $0x884] ss:$8 sps:$4 sm:$0xff]  }
 0x27d   : > { %v4746_v56 = vpop.f32.mrf.mxu0  ;;  %8674 = vmatpush2.bf16.msra.mxu0 %v11205_v61  ;;  %v7371_v34 = vshrl.u32 %v13020_v49, 16  ;;  %v6307_v61 = vrot.slane %v12979_v48, 2 }
 0x27e   : > { %v5665_v2 = vpop.f32.mrf.mxu1  ;;  %v4994_v5 = vadd.f32 %v4746_v56, %v12369_v29  ;;  %v13037_v22 = vadd.f32 %v5663_v47, %v4993_v4  ;;  %8675 = vmatprep.subr.bf16.mxu0 %v11213_v52  ;;  %v7359_v29 = vor.u32 %v7358_v40, %v7355_v1  ;;  %v6313_v4 = vrot.slane %v12990_v17, 2 }
 0x27f   : > { %v4750_v3 = vpop.f32.mrf.mxu0  ;;  %6646 = vmatmul.mubr.bf16.gmra.mxu0 %v6304_v43  ;;  %v7386_v43 = vor.u32 %v7385_v13, %v7382_v23  ;;  %v7401_v56 = vshll.u32 %v13034_v26, 16  ;;  %v7373_v40 = vrot.slane %v7371_v34, 2  ;;  %v14411_v13 = vrot.slane %v12932_v30, 2 }
 0x280   : > { %v5669_v45 = vpop.f32.mrf.mxu1  ;;  %7831 = vmatmul.mubr.bf16.gmra.mxu1 %v7342_v42  ;;  %v4995_v63 = vadd.f32 %v4750_v3, %v12380_v33  ;;  %v13042_v14 = vadd.f32 %v5665_v2, %v4994_v5  ;;  %6655 = vmatprep.mubr.bf16.mxu0 %v6310_v53  ;;  %v7398_v42 = vshrl.u32 %v13034_v26, 16  ;;  %v7376_v53 = vrot.slane %v7374_v25, 3  ;;  %v13068_v25 = vld [vmem:[%s11630_s26 + $0xe4] ss:$8 sps:$4 sm:$0xff]  }
 0x281   : > { %7840 = vmatprep.mubr.bf16.mxu1 %v7369_v11  ;;  %v4752_v47 = vpop.f32.mrf.mxu0  ;;  %8676 = vmatpush2.bf16.msra.mxu0 %v11211_v18  ;;  %v6308_v11 = vsel %vm5354_vm3, %v14411_v13, %v6307_v61  ;;  %v7360_v18 = vsel %vm7191_vm4, %v12996_v21, %v7359_v29  ;;  %v6314_v3 = vsel %vm5354_vm3, %v6309_v0, %v6313_v4  ;;  %v7403_v34 = vrot.slane %v7401_v56, 3 }
 0x282   : > { %v5671_v52 = vpop.f32.mrf.mxu1  ;;  %v4996_v33 = vadd.f32 %v4752_v47, %v12383_v39  ;;  %v13049_v2 = vadd.f32 %v5669_v45, %v4995_v63  ;;  %8677 = vmatprep.subr.bf16.mxu0 %v11220_v57  ;;  %v13060_v39 = vld [vmem:[%s11630_s26 + $0xd0] ss:$8 sps:$4 sm:$0xff]   ;;  %v7400_v45 = vrot.slane %v7398_v42, 2  ;;  %v7419_v49 = vshll.u32 %v13068_v25, 16 }
 0x283   : > { %v4754_v48 = vpop.f32.mrf.mxu0  ;;  %v6312_v13 = vsel %vm5354_vm3, %v6307_v61, %v6311_v58 }
 0x284   : > { %v5673_v1 = vpop.f32.mrf.mxu1  ;;  %v4997_v17 = vadd.f32 %v4754_v48, %v12406_v27  ;;  %v13052_v23 = vadd.f32 %v5671_v52, %v4996_v33  ;;  %v7387_v27 = vsel %vm7191_vm4, %v13004_v36, %v7386_v43  ;;  %v7377_v52 = vor.u32 %v7376_v53, %v7373_v40 }
 0x285   : > { %v4756_v5 = vpop.f32.mrf.mxu0  ;;  %8678 = vmatpush2.bf16.msra.mxu0 %v11218_v51  ;;  %v7389_v36 = vshrl.u32 %v13060_v39, 16  ;;  %v6317_v51 = vrot.slane %v13034_v26, 2  ;;  %v7404_v48 = vor.u32 %v7403_v34, %v7400_v45 }
 0x286   : > { %v5675_v57 = vpop.f32.mrf.mxu1  ;;  %v4998_v30 = vadd.f32 %v4756_v5, %v12410_v38  ;;  %v13071_v63 = vadd.f32 %v5673_v1, %v4997_v17  ;;  %v7392_v38 = vshll.u32 %v13060_v39, 16  ;;  %v7416_v1 = vshrl.u32 %v13068_v25, 16 }
 0x287   : > { %v4760_v21 = vpop.f32.mrf.mxu0  ;;  %6656 = vmatmul.mubr.bf16.gmra.mxu0 %v6308_v11  ;;  %v7378_v11 = vsel %vm7191_vm4, %v7359_v29, %v7377_v52  ;;  %v7405_v34 = vsel %vm7191_vm4, %v7386_v43, %v7404_v48  ;;  %v6315_v43 = vrot.slane %v13060_v39, 2 }
 0x288   : > { %v5679_v47 = vpop.f32.mrf.mxu1  ;;  %7841 = vmatmul.mubr.bf16.gmra.mxu1 %v7360_v18  ;;  %v4999_v0 = vadd.f32 %v4760_v21, %v12418_v24  ;;  %v13075_v33 = vadd.f32 %v5675_v57, %v4998_v30  ;;  %6665 = vmatprep.mubr.bf16.mxu0 %v6314_v3  ;;  %v13088_v18 = vld [vmem:[%s11630_s26 + $0xe0] ss:$8 sps:$4 sm:$0xff]   ;;  %v7391_v57 = vrot.slane %v7389_v36, 2  ;;  %v7394_v3 = vrot.slane %v7392_v38, 3 }
 0x289   : > { %7850 = vmatprep.mubr.bf16.mxu1 %v7387_v27  ;;  %v4762_v42 = vpop.f32.mrf.mxu0  ;;  %v7418_v30 = vrot.slane %v7416_v1, 2  ;;  %v7421_v21 = vrot.slane %v7419_v49, 3  ;;  %v7407_v36 = vshrl.u32 %v13088_v18, 16  ;;  %v7410_v38 = vshll.u32 %v13088_v18, 16 }
 0x28a   : > { %v5681_v56 = vpop.f32.mrf.mxu1  ;;  %v5000_v24 = vadd.f32 %v4762_v42, %v12427_v15  ;;  %v13083_v40 = vadd.f32 %v5679_v47, %v4999_v0  ;;  %v6318_v15 = vsel %vm5354_vm3, %v6313_v4, %v6317_v51  ;;  %v13096_v47 = vld [vmem:[%s11630_s26 + $0xf4] ss:$8 sps:$4 sm:$0xff]   ;;  %v6321_v49 = vrot.slane %v13068_v25, 2 }
 0x28b   : > { %v4764_v53 = vpop.f32.mrf.mxu0  ;;  %v7412_v39 = vrot.slane %v7410_v38, 3  ;;  %v6316_v25 = vsel %vm5354_vm3, %v6311_v58, %v6315_v43  ;;  %v6319_v58 = vrot.slane %v13088_v18, 2 }
 0x28c   : > { %v5683_v17 = vpop.f32.mrf.mxu1  ;;  %v5001_v26 = vadd.f32 %v4764_v53, %v12438_v16  ;;  %v13091_v5 = vadd.f32 %v5681_v56, %v5000_v24  ;;  %v7422_v24 = vor.u32 %v7421_v21, %v7418_v30  ;;  %v7434_v53 = vshrl.u32 %v13096_v47, 16 }
 0x28d   : > { %v4766_v27 = vpop.f32.mrf.mxu0 }
 0x28e   : > { %v5685_v45 = vpop.f32.mrf.mxu1  ;;  %v5002_v61 = vadd.f32 %v4766_v27, %v12443_v41  ;;  %v13099_v29 = vadd.f32 %v5683_v17, %v5001_v26  ;;  %v7395_v41 = vor.u32 %v7394_v3, %v7391_v57  ;;  %v7437_v17 = vshll.u32 %v13096_v47, 16 }
 0x28f   : > { %v4770_v0 = vpop.f32.mrf.mxu0  ;;  %6666 = vmatmul.mubr.bf16.gmra.mxu0 %v6312_v13  ;;  %v7409_v27 = vrot.slane %v7407_v36, 2  ;;  %v7423_v21 = vsel %vm7191_vm4, %v7404_v48, %v7422_v24 }
 0x290   : > { %v5689_v16 = vpop.f32.mrf.mxu1  ;;  %7851 = vmatmul.mubr.bf16.gmra.mxu1 %v7378_v11  ;;  %v5003_v4 = vadd.f32 %v4770_v0, %v12450_v28  ;;  %v13104_v42 = vadd.f32 %v5685_v45, %v5002_v61  ;;  %6675 = vmatprep.mubr.bf16.mxu0 %v6318_v15  ;;  %v13114_v45 = vld [vmem:[%s11630_s26 + $0xf0] ss:$8 sps:$4 sm:$0xff]   ;;  %v7396_v15 = vsel %vm7191_vm4, %v7377_v52, %v7395_v41  ;;  %v7436_v61 = vrot.slane %v7434_v53, 2 }
 0x291   : > { %7860 = vmatprep.mubr.bf16.mxu1 %v7405_v34  ;;  %v4772_v56 = vpop.f32.mrf.mxu0  ;;  %v7439_v0 = vrot.slane %v7437_v17, 3  ;;  %v13130_v52 = vor.u32 %v7412_v39, %v7409_v27  ;;  %v14218_v39 = vmov 0  }
 0x292   : > { %v5691_v1 = vpop.f32.mrf.mxu1  ;;  %v5004_v13 = vadd.f32 %v4772_v56, %v12453_v62  ;;  %v13111_v28 = vadd.f32 %v5689_v16, %v5003_v4  ;;  %v6322_v62 = vsel %vm5354_vm3, %v6317_v51, %v6321_v49  ;;  %v13124_v16 = vld [vmem:[%s11630_s26 + $0x104] ss:$8 sps:$4 sm:$0xff]   ;;  %v7425_v51 = vshrl.u32 %v13114_v45, 16  ;;  %9475 = vmatprep.subr.bf16.mxu1 %v14218_v39 }
 0x293   : > { %v4774_v11 = vpop.f32.mrf.mxu0  ;;  %v7455_v27 = vshll.u32 %v13124_v16, 16 }
 0x294   : > { %v5693_v26 = vpop.f32.mrf.mxu1  ;;  %v5005_v57 = vadd.f32 %v4774_v11, %v12466_v19  ;;  %v13117_v3 = vadd.f32 %v5691_v1, %v5004_v13  ;;  %v11254_v1 = vld [vmem:[#allocation8 + $0x38] sm:$0xff]   ;;  %v6325_v13 = vrot.slane %v13096_v47, 2  ;;  %v7440_v11 = vor.u32 %v7439_v0, %v7436_v61 }
 0x295   : > { %v4776_v34 = vpop.f32.mrf.mxu0  ;;  %9476 = vmatpush1.bf16.msra.mxu1 %v11254_v1  ;;  %v6320_v47 = vsel %vm5354_vm3, %v6315_v43, %v6319_v58  ;;  %v13159_v1 = vld [vmem:[%s11630_s26 + $0x114] ss:$8 sps:$4 sm:$0xff]  }
 0x296   : > { %v5695_v30 = vpop.f32.mrf.mxu1  ;;  %v5006_v36 = vadd.f32 %v4776_v34, %v12470_v31  ;;  %v13127_v38 = vadd.f32 %v5693_v26, %v5005_v57  ;;  %v7428_v31 = vshll.u32 %v13114_v45, 16  ;;  %v7452_v26 = vshrl.u32 %v13124_v16, 16  ;;  %9477 = vmatprep.subr.bf16.mxu1 %v14218_v39 }
 0x297   : > { %v4780_v19 = vpop.f32.mrf.mxu0  ;;  %6676 = vmatmul.mubr.bf16.gmra.mxu0 %v6316_v25  ;;  %v7414_v34 = vsel %vm7191_vm4, %v7395_v41, %v13130_v52 }
 0x298   : > { %v5699_v4 = vpop.f32.mrf.mxu1  ;;  %7861 = vmatmul.mubr.bf16.gmra.mxu1 %v7396_v15  ;;  %v5007_v48 = vadd.f32 %v4780_v19, %v12478_v54  ;;  %v13134_v56 = vadd.f32 %v5695_v30, %v5006_v36  ;;  %6685 = vmatprep.mubr.bf16.mxu0 %v6322_v62  ;;  %v13150_v30 = vld [vmem:[%s11630_s26 + $0x100] ss:$8 sps:$4 sm:$0xff]   ;;  %v7430_v61 = vrot.slane %v7428_v31, 3  ;;  %v6326_v19 = vsel %vm5354_vm3, %v6321_v49, %v6325_v13 }
 0x299   : > { %7870 = vmatprep.mubr.bf16.mxu1 %v7423_v21  ;;  %v4782_v53 = vpop.f32.mrf.mxu0  ;;  %v7427_v21 = vrot.slane %v7425_v51, 2  ;;  %v7454_v43 = vrot.slane %v7452_v26, 2  ;;  %v7443_v51 = vshrl.u32 %v13150_v30, 16  ;;  %v7446_v31 = vshll.u32 %v13150_v30, 16 }
 0x29a   : > { %v5701_v17 = vpop.f32.mrf.mxu1  ;;  %v5008_v54 = vadd.f32 %v4782_v53, %v12486_v20  ;;  %v13142_v57 = vadd.f32 %v5699_v4, %v5007_v48  ;;  %v7441_v4 = vsel %vm7191_vm4, %v7422_v24, %v7440_v11  ;;  %v7457_v48 = vrot.slane %v7455_v27, 3 }
 0x29b   : > { %v4784_v25 = vpop.f32.mrf.mxu0  ;;  %v6323_v24 = vrot.slane %v13114_v45, 2  ;;  %v7431_v26 = vor.u32 %v7430_v61, %v7427_v21  ;;  %v7448_v21 = vrot.slane %v7446_v31, 3  ;;  %v14413_v31 = vmov 0  }
 0x29c   : > { %v5703_v15 = vpop.f32.mrf.mxu1  ;;  %v5009_v62 = vadd.f32 %v4784_v25, %v12494_v55  ;;  %v13154_v20 = vadd.f32 %v5701_v17, %v5008_v54  ;;  %v6329_v54 = vrot.slane %v13124_v16, 2  ;;  %v7458_v25 = vor.u32 %v7457_v48, %v7454_v43 }
 0x29d   : > { %v4786_v0 = vpop.f32.mrf.mxu0  ;;  %v6324_v16 = vsel %vm5354_vm3, %v6319_v58, %v6323_v24 }
 0x29e   : > { %v5705_v36 = vpop.f32.mrf.mxu1  ;;  %v5010_v41 = vadd.f32 %v4786_v0, %v12499_v8  ;;  %v13162_v53 = vadd.f32 %v5703_v15, %v5009_v62  ;;  %v7470_v15 = vshrl.u32 %v13159_v1, 16  ;;  %v7445_v0 = vrot.slane %v7443_v51, 2  ;;  %v13190_v51 = vld [vmem:[%s11630_s26 + $0x124] ss:$8 sps:$4 sm:$0xff]  }
 0x29f   : > { %v4790_v39 = vpop.f32.mrf.mxu0  ;;  %6686 = vmatmul.mubr.bf16.gmra.mxu0 %v6320_v47  ;;  %v7473_v47 = vshll.u32 %v13159_v1, 16  ;;  %v6330_v48 = vsel %vm5354_vm3, %v6325_v13, %v6329_v54  ;;  %v14415_v13 = vld [vmem:[#allocation58_spill] sm:$0xff] }
 0x2a0   : > { %v5709_v55 = vpop.f32.mrf.mxu1  ;;  %7871 = vmatmul.mubr.bf16.gmra.mxu1 %v7414_v34  ;;  %v5011_v49 = vadd.f32 %v4790_v39, %v12506_v9  ;;  %v13167_v17 = vadd.f32 %v5705_v36, %v5010_v41  ;;  %6695 = vmatprep.mubr.bf16.mxu0 %v6326_v19  ;;  %v11258_v39 = vld [vmem:[#allocation8 + $0x30] sm:$0xff]   ;;  %v7432_v19 = vsel %vm7191_vm4, %v13130_v52, %v7431_v26 }
 0x2a1   : > { %7880 = vmatprep.mubr.bf16.mxu1 %v7441_v4  ;;  %v4792_v8 = vpop.f32.mrf.mxu0  ;;  %9478 = vmatpush1.bf16.msra.mxu1 %v11258_v39  ;;  %v7459_v41 = vsel %vm7191_vm4, %v7440_v11, %v7458_v25 }
 0x2a2   : > { %v5711_v27 = vpop.f32.mrf.mxu1  ;;  %v5012_v34 = vadd.f32 %v4792_v8, %v12512_v35  ;;  %v13174_v9 = vadd.f32 %v5709_v55, %v5011_v49  ;;  %v13185_v35 = vld [vmem:[%s11630_s26 + $0x110] ss:$8 sps:$4 sm:$0xff]   ;;  %v7472_v55 = vrot.slane %v7470_v15, 2  ;;  %9479 = vmatprep.subr.bf16.mxu1 %v14413_v31  ;;  %v6327_v8 = vrot.slane %v13150_v30, 2 }
 0x2a3   : > { %v4794_v62 = vpop.f32.mrf.mxu0  ;;  %v7488_v30 = vshrl.u32 %v13190_v51, 16 }
 0x2a4   : > { %v5713_v45 = vpop.f32.mrf.mxu1  ;;  %v5013_v61 = vadd.f32 %v4794_v62, %v12522_v6  ;;  %v13177_v36 = vadd.f32 %v5711_v27, %v5012_v34  ;;  %v7475_v6 = vrot.slane %v7473_v47, 3  ;;  %v13197_v27 = vor.u32 %v7448_v21, %v7445_v0  ;;  %v14417_v21 = vld [vmem:[#allocation59_spill] sm:$0xff] }
 0x2a5   : > { %v4796_v4 = vpop.f32.mrf.mxu0  ;;  %v7461_v47 = vshrl.u32 %v13185_v35, 16  ;;  %v6333_v62 = vrot.slane %v13159_v1, 2  ;;  %v7491_v0 = vshll.u32 %v13190_v51, 16  ;;  %v14419_v1 = vld [vmem:[#allocation60_spill] sm:$0xff] }
 0x2a6   : > { %14412 = vst [vmem:[#allocation54_spill] sm:$0xff] %v13177_v36  ;;  %v5715_v43 = vpop.f32.mrf.mxu1  ;;  %v5014_v18 = vadd.f32 %v4796_v4, %v12528_v7  ;;  %v13194_v58 = vadd.f32 %v5713_v45, %v5013_v61  ;;  %v7464_v7 = vshll.u32 %v13185_v35, 16  ;;  %v7476_v45 = vor.u32 %v7475_v6, %v7472_v55 }
 0x2a7   : > { %v4800_v52 = vpop.f32.mrf.mxu0  ;;  %6696 = vmatmul.mubr.bf16.gmra.mxu0 %v6324_v16 }
 0x2a8   : > { %14414 = vst [vmem:[#allocation55_spill] sm:$0xff] %v13194_v58  ;;  %v5719_v49 = vpop.f32.mrf.mxu1  ;;  %7881 = vmatmul.mubr.bf16.gmra.mxu1 %v7432_v19  ;;  %v5015_v11 = vadd.f32 %v4800_v52, %v14415_v13  ;;  %v13200_v15 = vadd.f32 %v5715_v43, %v5014_v18  ;;  %6705 = vmatprep.mubr.bf16.mxu0 %v6330_v48  ;;  %v11262_v19 = vld [vmem:[#allocation8 + $0x28] sm:$0xff]   ;;  %v7463_v52 = vrot.slane %v7461_v47, 2  ;;  %v7466_v13 = vrot.slane %v7464_v7, 3 }
 0x2a9   : > { %7890 = vmatprep.mubr.bf16.mxu1 %v7459_v41  ;;  %v4802_v34 = vpop.f32.mrf.mxu0  ;;  %v6328_v48 = vsel %vm5354_vm3, %v6323_v24, %v6327_v8  ;;  %v7450_v41 = vsel %vm7191_vm4, %v7431_v26, %v13197_v27  ;;  %v13214_v18 = vld [vmem:[%s11630_s26 + $0x120] ss:$8 sps:$4 sm:$0xff]   ;;  %9480 = vmatpush1.bf16.msra.mxu1 %v11262_v19  ;;  %v7493_v24 = vrot.slane %v7491_v0, 3  ;;  %v6331_v7 = vrot.slane %v13185_v35, 2 }
 0x2aa   : > { %14416 = vst [vmem:[#allocation56_spill] sm:$0xff] %v13200_v15  ;;  %v5721_v39 = vpop.f32.mrf.mxu1  ;;  %v5016_v61 = vadd.f32 %v4802_v34, %v14417_v21  ;;  %v13208_v16 = vadd.f32 %v5719_v49, %v5015_v11  ;;  %v6334_v34 = vsel %vm5354_vm3, %v6329_v54, %v6333_v62  ;;  %v7477_v21 = vsel %vm7191_vm4, %v7458_v25, %v7476_v45  ;;  %v13222_v15 = vld [vmem:[%s11630_s26 + $0x134] ss:$8 sps:$4 sm:$0xff]   ;;  %v14421_v26 = vld [vmem:[#allocation16_spill] sm:$0xff] }
 0x2ab   : > { %v4804_v4 = vpop.f32.mrf.mxu0  ;;  %9481 = vmatprep.subr.bf16.mxu1 %v14413_v31  ;;  %v7479_v54 = vshrl.u32 %v13214_v18, 16  ;;  %v7482_v25 = vshll.u32 %v13214_v18, 16  ;;  %v7467_v19 = vor.u32 %v7466_v13, %v7463_v52  ;;  %v7506_v35 = vshrl.u32 %v13222_v15, 16  ;;  %v13243_v13 = vld [vmem:[%s11630_s26 + $0x130] ss:$8 sps:$4 sm:$0xff]  }
 0x2ac   : > { %14418 = vst [vmem:[#allocation57_spill] sm:$0xff] %v13208_v16  ;;  %v5723_v43 = vpop.f32.mrf.mxu1  ;;  %v5017_v55 = vadd.f32 %v4804_v4, %v14419_v1  ;;  %v13217_v6 = vadd.f32 %v5721_v39, %v5016_v61  ;;  %v7490_v16 = vrot.slane %v7488_v30, 2  ;;  %v14423_v30 = vld [vmem:[#allocation17_spill] sm:$0xff] }
 0x2ad   : > { %v4806_v49 = vpop.f32.mrf.mxu0  ;;  %v7484_v52 = vrot.slane %v7482_v25, 3  ;;  %v14428_v25 = vld [vmem:[#allocation20_spill] sm:$0xff] }
 0x2ae   : > { %14420 = vst [vmem:[#allocation58_spill] sm:$0xff] %v13217_v6  ;;  %v5725_v11 = vpop.f32.mrf.mxu1  ;;  %v5018_v58 = vadd.f32 %v4806_v49, %v14421_v26  ;;  %v13226_v4 = vadd.f32 %v5723_v43, %v5017_v55  ;;  %v6337_v43 = vrot.slane %v13190_v51, 2  ;;  %v7509_v55 = vshll.u32 %v13222_v15, 16  ;;  %v14425_v49 = vld [vmem:[#allocation18_spill] sm:$0xff]  ;;  %v14427_v51 = vld [vmem:[#allocation19_spill] sm:$0xff] }
 0x2af   : > { %v4810_v39 = vpop.f32.mrf.mxu0  ;;  %6706 = vmatmul.mubr.bf16.gmra.mxu0 %v6328_v48 }
 0x2b0   : > { %14422 = vst [vmem:[#allocation59_spill] sm:$0xff] %v13226_v4  ;;  %v5729_v47 = vpop.f32.mrf.mxu1  ;;  %7891 = vmatmul.mubr.bf16.gmra.mxu1 %v7450_v41  ;;  %v5019_v0 = vadd.f32 %v4810_v39, %v14423_v30  ;;  %v13232_v61 = vadd.f32 %v5725_v11, %v5018_v58  ;;  %6715 = vmatprep.mubr.bf16.mxu0 %v6334_v34  ;;  %v7008_v39 = vld [vmem:[%s11630_s26 + $0x140] sm:$0x77] }
 0x2b1   : > { %7900 = vmatprep.mubr.bf16.mxu1 %v7477_v21  ;;  %v4812_v48 = vpop.f32.mrf.mxu0  ;;  %v7494_v41 = vor.u32 %v7493_v24, %v7490_v16  ;;  %v6332_v34 = vsel %vm5354_vm3, %v6327_v8, %v6331_v7  ;;  %v7481_v21 = vrot.slane %v7479_v54, 2  ;;  %v7468_v24 = vsel %vm7191_vm4, %v13197_v27, %v7467_v19 }
 0x2b2   : > { %14424 = vst [vmem:[#allocation60_spill] sm:$0xff] %v13232_v61  ;;  %v5731_v1 = vpop.f32.mrf.mxu1  ;;  %v5020_v26 = vadd.f32 %v4812_v48, %v14425_v49  ;;  %v13238_v4 = vadd.f32 %v5729_v47, %v5019_v0  ;;  %v6338_v48 = vsel %vm5354_vm3, %v6333_v62, %v6337_v43  ;;  %v11266_v47 = vld [vmem:[#allocation8 + $0x20] sm:$0xff]   ;;  %v7508_v61 = vrot.slane %v7506_v35, 2  ;;  %v14429_v35 = vld [vmem:[#allocation21_spill] sm:$0xff] }
 0x2b3   : > { %v4814_v58 = vpop.f32.mrf.mxu0  ;;  %v7511_v8 = vrot.slane %v7509_v55, 3  ;;  %v10343_v54 = vcombine.high %v7008_v39, %v7008_v39  ;;  %9482 = vmatpush1.bf16.msra.mxu1 %v11266_v47  ;;  %v6335_v27 = vrot.slane %v13214_v18, 2  ;;  %v7485_v62 = vor.u32 %v7484_v52, %v7481_v21  ;;  %v14431_v18 = vld [vmem:[#allocation22_spill] sm:$0xff] }
 0x2b4   : > { %14426 = vst [vmem:[#allocation16_spill] sm:$0xff] %v13238_v4  ;;  %v5733_v11 = vpop.f32.mrf.mxu1  ;;  %v5021_v30 = vadd.f32 %v4814_v58, %v14427_v51  ;;  %v13246_v16 = vadd.f32 %v5731_v1, %v5020_v26  ;;  %v7495_v4 = vsel %vm7191_vm4, %v7476_v45, %v7494_v41  ;;  %v7497_v58 = vshrl.u32 %v13243_v13, 16  ;;  %9483 = vmatprep.subr.bf16.mxu1 %v14413_v31 }
 0x2b5   : > { %v4816_v0 = vpop.f32.mrf.mxu0  ;;  %v7500_v45 = vshll.u32 %v13243_v13, 16  ;;  %v7512_v47 = vor.u32 %v7511_v8, %v7508_v61 }
 0x2b6   : > { %v5735_v49 = vpop.f32.mrf.mxu1  ;;  %v5022_v6 = vadd.f32 %v4816_v0, %v14428_v25  ;;  %v13253_v36 = vadd.f32 %v5733_v11, %v5021_v30  ;;  %v6341_v11 = vrot.slane %v13222_v15, 2  ;;  %v7527_v0 = vshll.u32 %v10343_v54, 16  ;;  %v13267_v25 = vld [vmem:[%s11630_s26 + $0x140] sm:$0x33] }
 0x2b7   : > { %v4820_v1 = vpop.f32.mrf.mxu0  ;;  %6716 = vmatmul.mubr.bf16.gmra.mxu0 %v6332_v34  ;;  %v7499_v15 = vrot.slane %v7497_v58, 2  ;;  %v14436_v58 = vld [vmem:[#allocation24_spill] sm:$0xff] }
 0x2b8   : > { %v5739_v26 = vpop.f32.mrf.mxu1  ;;  %7901 = vmatmul.mubr.bf16.gmra.mxu1 %v7468_v24  ;;  %v5023_v55 = vadd.f32 %v4820_v1, %v14429_v35  ;;  %v13259_v51 = vadd.f32 %v5735_v49, %v5022_v6  ;;  %6725 = vmatprep.mubr.bf16.mxu0 %v6338_v48  ;;  %v7524_v24 = vshrl.u32 %v10343_v54, 16  ;;  %v6336_v48 = vsel %vm5354_vm3, %v6331_v7, %v6335_v27  ;;  %v14433_v35 = vld [vmem:[#allocation23_spill] sm:$0xff] }
 0x2b9   : > { %7910 = vmatprep.mubr.bf16.mxu1 %v7495_v4  ;;  %v4822_v30 = vpop.f32.mrf.mxu0  ;;  %v7486_v4 = vsel %vm7191_vm4, %v7467_v19, %v7485_v62  ;;  %v7502_v49 = vrot.slane %v7500_v45, 3  ;;  %v6342_v54 = vsel %vm5354_vm3, %v6337_v43, %v6341_v11  ;;  %v10273_v7 = vcombine.high %v13267_v25, %v13267_v25 }
 0x2ba   : > { %14430 = vst [vmem:[#allocation17_spill] sm:$0xff] %v13259_v51  ;;  %v5741_v34 = vpop.f32.mrf.mxu1  ;;  %v5024_v21 = vadd.f32 %v4822_v30, %v14431_v18  ;;  %v13264_v52 = vadd.f32 %v5739_v26, %v5023_v55  ;;  %v10342_v51 = vcombine.low %v7008_v39, %v7008_v39  ;;  %v11270_v30 = vld [vmem:[#allocation8 + $0x18] sm:$0xff]   ;;  %v7513_v18 = vsel %vm7191_vm4, %v7494_v41, %v7512_v47 }
 0x2bb   : > { %v4824_v1 = vpop.f32.mrf.mxu0  ;;  %v7529_v19 = vrot.slane %v7527_v0, 3  ;;  %9484 = vmatpush1.bf16.msra.mxu1 %v11270_v30  ;;  %v6339_v39 = vrot.slane %v13243_v13, 2 }
 0x2bc   : > { %14432 = vst [vmem:[#allocation18_spill] sm:$0xff] %v13264_v52  ;;  %v5743_v6 = vpop.f32.mrf.mxu1  ;;  %v5025_v61 = vadd.f32 %v4824_v1, %v14433_v35  ;;  %v13272_v8 = vadd.f32 %v5741_v34, %v5024_v21  ;;  %v7526_v52 = vrot.slane %v7524_v24, 2  ;;  %v7503_v21 = vor.u32 %v7502_v49, %v7499_v15  ;;  %v14437_v35 = vld [vmem:[#allocation25_spill] sm:$0xff]  ;;  %9485 = vmatprep.subr.bf16.mxu1 %v14413_v31 }
 0x2bd   : > { %v4826_v26 = vpop.f32.mrf.mxu0  ;;  %v7518_v24 = vshll.u32 %v10342_v51, 16  ;;  %v6340_v15 = vsel %vm5354_vm3, %v6335_v27, %v6339_v39  ;;  %v11229_v27 = vld [vmem:[%s11630_s26 + $0x34] ss:$8 sps:$4 sm:$0xff]  }
 0x2be   : > { %14434 = vst [vmem:[#allocation19_spill] sm:$0xff] %v13272_v8  ;;  %v13275_v55 = vpop.f32.mrf.mxu1  ;;  %v13281_v45 = vadd.f32 %v4826_v26, %v14436_v58  ;;  %v13283_v1 = vadd.f32 %v5743_v6, %v5025_v61  ;;  %v6345_v26 = vrot.slane %v10273_v7, 2  ;;  %v7530_v58 = vor.u32 %v7529_v19, %v7526_v52 }
 0x2bf   : > { %14435 = vst [vmem:[#allocation20_spill] sm:$0xff] %v13275_v55  ;;  %v4830_v34 = vpop.f32.mrf.mxu0  ;;  %6726 = vmatmul.mubr.bf16.gmra.mxu0 %v6336_v48  ;;  %v7515_v55 = vshrl.u32 %v10342_v51, 16  ;;  %v7504_v49 = vsel %vm7191_vm4, %v7485_v62, %v7503_v21  ;;  %v10272_v51 = vcombine.low %v13267_v25, %v13267_v25  ;;  %v7520_v30 = vrot.slane %v7518_v24, 3  ;;  %v11274_v25 = vld [vmem:[#allocation8 + $0x10] sm:$0xff]  }
 0x2c0   : > { %v5749_v43 = vpop.f32.mrf.mxu1  ;;  %7911 = vmatmul.mubr.bf16.gmra.mxu1 %v7486_v4  ;;  %v5027_v41 = vadd.f32 %v4830_v34, %v14437_v35  ;;  %6735 = vmatprep.mubr.bf16.mxu0 %v6342_v54  ;;  %v6346_v7 = vsel %vm5354_vm3, %v6341_v11, %v6345_v26  ;;  %v7531_v19 = vsel %vm7191_vm4, %v7512_v47, %v7530_v58  ;;  %v11226_v34 = vld [vmem:[%s11630_s26 + $0x24] ss:$8 sps:$4 sm:$0xf8]  }
 0x2c1   : > { %7920 = vmatprep.mubr.bf16.mxu1 %v7513_v18  ;;  %v4832_v0 = vpop.f32.mrf.mxu0  ;;  %v7517_v54 = vrot.slane %v7515_v55, 2  ;;  %v6343_v35 = vrot.slane %v10272_v51, 2  ;;  %v8380_v24 = vrot.slane %v11226_v34, 3  ;;  %9486 = vmatpush1.bf16.msra.mxu1 %v11274_v25  ;;  %v11224_v51 = vld [vmem:[%s11630_s26 + $0x20] ss:$8 sps:$4 sm:$0xf8]  }
 0x2c2   : > { %v5751_v8 = vpop.f32.mrf.mxu1  ;;  %v5028_v6 = vadd.f32 %v4832_v0, %v12653_v44  ;;  %v13289_v48 = vadd.f32 %v5749_v43, %v5027_v41  ;;  %9487 = vmatprep.subr.bf16.mxu1 %v14413_v31 }
 0x2c3   : > { %v4834_v13 = vpop.f32.mrf.mxu0  ;;  %v7521_v11 = vor.u32 %v7520_v30, %v7517_v54 }
 0x2c4   : > { %v5753_v4 = vpop.f32.mrf.mxu1  ;;  %v5029_v61 = vadd.f32 %v4834_v13, %v12661_v37  ;;  %v13296_v52 = vadd.f32 %v5751_v8, %v5028_v6  ;;  %v14438_v6 = vld [vmem:[#allocation26_spill] sm:$0xff] }
 0x2c5   : > { %v4836_v18 = vpop.f32.mrf.mxu0 }
 0x2c6   : > { %v13298_v44 = vpop.f32.mrf.mxu1  ;;  %v13305_v62 = vadd.f32 %v4836_v18, %v12668_v12  ;;  %v13307_v43 = vadd.f32 %v5753_v4, %v5029_v61  ;;  %v8381_v12 = vrot.slane %v11229_v27, 3  ;;  %v11227_v61 = vld [vmem:[%s11630_s26 + $0x30] ss:$8 sps:$4 sm:$0xff]   ;;  %v11230_v18 = vld [vmem:[%s11630_s26 + $0x44] ss:$8 sps:$4 sm:$0xff]  }
 0x2c7   : > { %v4840_v37 = vpop.f32.mrf.mxu0  ;;  %6736 = vmatmul.mubr.bf16.gmra.mxu0 %v6340_v15  ;;  %v6344_v15 = vsel %vm5354_vm3, %v6339_v39, %v6343_v35  ;;  %v11280_v27 = vld [vmem:[#allocation8 + $0x8] sm:$0xff]  }
 0x2c8   : > { %v5759_v8 = vpop.f32.mrf.mxu1  ;;  %7921 = vmatmul.mubr.bf16.gmra.mxu1 %v7504_v49  ;;  %v5031_v55 = vadd.f32 %v4840_v37, %v12676_v60  ;;  %6745 = vmatprep.mubr.bf16.mxu0 %v6346_v7  ;;  %v7522_v49 = vsel %vm7191_vm4, %v7503_v21, %v7521_v11  ;;  %v14439_v7 = vld [vmem:[#allocation27_spill] sm:$0xff]  ;;  %v14440_v39 = vld [vmem:[#allocation28_spill] sm:$0xff] }
 0x2c9   : > { %7930 = vmatprep.mubr.bf16.mxu1 %v7531_v19  ;;  %v4842_v47 = vpop.f32.mrf.mxu0  ;;  %9488 = vmatpush1.bf16.msra.mxu1 %v11280_v27 }
 0x2ca   : > { %v5761_v41 = vpop.f32.mrf.mxu1  ;;  %v5032_v0 = vadd.f32 %v4842_v47, %v12689_v59  ;;  %v13311_v26 = vadd.f32 %v5759_v8, %v5031_v55  ;;  %v8382_v59 = vsel %vm8376_vm5, %v8380_v24, %v8381_v12  ;;  %v8377_v8 = vrot.slane %v11224_v51, 3  ;;  %9489 = vmatprep.subr.bf16.mxu1 %v14413_v31  ;;  %v11232_v51 = vld [vmem:[%s11630_s26 + $0x40] ss:$8 sps:$4 sm:$0xff]  }
 0x2cb   : > { %v4844_v60 = vpop.f32.mrf.mxu0  ;;  %v8378_v55 = vrot.slane %v11227_v61, 3  ;;  %v8385_v47 = vrot.slane %v11230_v18, 3  ;;  %v11233_v18 = vld [vmem:[%s11630_s26 + $0x54] ss:$8 sps:$4 sm:$0xff]  }
 0x2cc   : > { %v5763_v58 = vpop.f32.mrf.mxu1  ;;  %v5033_v13 = vadd.f32 %v4844_v60, %v14438_v6  ;;  %v13315_v4 = vadd.f32 %v5761_v41, %v5032_v0  ;;  %v14441_v41 = vld [vmem:[#allocation29_spill] sm:$0xff]  ;;  %v14442_v6 = vld [vmem:[#allocation30_spill] sm:$0xff] }
 0x2cd   : > { %v4846_v54 = vpop.f32.mrf.mxu0 }
 0x2ce   : > { %v13321_v30 = vpop.f32.mrf.mxu1  ;;  %v13326_v19 = vadd.f32 %v4846_v54, %v14439_v7  ;;  %v13328_v34 = vadd.f32 %v5763_v58, %v5033_v13  ;;  %v14444_v7 = vld [vmem:[#allocation31_spill] sm:$0xff] }
 0x2cf   : > { %v4850_v25 = vpop.f32.mrf.mxu0  ;;  %6746 = vmatmul.mubr.bf16.gmra.mxu0 %v6344_v15 }
 0x2d0   : > { %v5769_v37 = vpop.f32.mrf.mxu1  ;;  %7931 = vmatmul.mubr.bf16.gmra.mxu1 %v7522_v49  ;;  %v5035_v21 = vadd.f32 %v4850_v25, %v14440_v39  ;;  %8679 = vmatprep.mubr.bf16.mxu0 %v8382_v59  ;;  %v8379_v49 = vsel %vm8376_vm5, %v8377_v8, %v8378_v55  ;;  %v8386_v59 = vsel %vm8376_vm5, %v8381_v12, %v8385_v47  ;;  %v8383_v8 = vrot.slane %v11232_v51, 3  ;;  %v14448_v12 = vld [vmem:[#allocation33_spill] sm:$0xff] }
 0x2d1   : > { %v4852_v35 = vpop.f32.mrf.mxu0 }
 0x2d2   : > { %v5771_v11 = vpop.f32.mrf.mxu1  ;;  %v5036_v24 = vadd.f32 %v4852_v35, %v14441_v41  ;;  %v13333_v0 = vadd.f32 %v5769_v37, %v5035_v21  ;;  %v14447_v21 = vld [vmem:[#allocation32_spill] sm:$0xff]  ;;  %v8384_v51 = vsel %vm8376_vm5, %v8378_v55, %v8383_v8 }
 0x2d3   : > { %v4854_v60 = vpop.f32.mrf.mxu0 }
 0x2d4   : > { %v5773_v58 = vpop.f32.mrf.mxu1  ;;  %v5037_v13 = vadd.f32 %v4854_v60, %v14442_v6  ;;  %v13336_v15 = vadd.f32 %v5771_v11, %v5036_v24  ;;  %v11285_v11 = vld [vmem:[#allocation8] sm:$0xff]   ;;  %v8389_v60 = vrot.slane %v11233_v18, 3 }
 0x2d5   : > { %v4856_v61 = vpop.f32.mrf.mxu0  ;;  %9490 = vmatpush1.bf16.msra.mxu1 %v11285_v11 }
 0x2d6   : > { %v13340_v54 = vpop.f32.mrf.mxu1  ;;  %v13345_v27 = vadd.f32 %v4856_v61, %v14444_v7  ;;  %v13347_v25 = vadd.f32 %v5773_v58, %v5037_v13  ;;  %9491 = vmatprep.subr.bf16.mxu1 %v14413_v31  ;;  %v8390_v18 = vsel %vm8376_vm5, %v8385_v47, %v8389_v60  ;;  %v14456_v47 = vld [vmem:[#allocation37_spill] sm:$0xff] }
 0x2d7   : > { %14443 = vst [vmem:[#allocation21_spill] sm:$0xff] %v13340_v54  ;;  %v4860_v37 = vpop.f32.mrf.mxu0  ;;  %8680 = vmatmul.mubr.bf16.vlgmr.msra.gmra.mxu0 %v8379_v49  ;;  %v14450_v49 = vld [vmem:[#allocation34_spill] sm:$0xff] }
 0x2d8   : > { %14445 = vst [vmem:[#allocation22_spill] sm:$0xff] %v13345_v27  ;;  %14446 = vst [vmem:[#allocation23_spill] sm:$0xff] %v13347_v25  ;;  %v5779_v39 = vpop.f32.mrf.mxu1  ;;  %v5039_v35 = vadd.f32 %v4860_v37, %v14447_v21  ;;  %8689 = vmatprep.mubr.bf16.mxu0 %v8386_v59  ;;  %v11235_v59 = vld [vmem:[%s11630_s26 + $0x50] ss:$8 sps:$4 sm:$0xff]  }
 0x2d9   : > { %v4862_v41 = vpop.f32.mrf.mxu0  ;;  %v8387_v55 = vrot.slane %v11235_v59, 3 }
 0x2da   : > { %v5781_v24 = vpop.f32.mrf.mxu1  ;;  %v5040_v6 = vadd.f32 %v4862_v41, %v14448_v12  ;;  %v13351_v54 = vadd.f32 %v5779_v39, %v5039_v35  ;;  %v11236_v41 = vld [vmem:[%s11630_s26 + $0x64] ss:$8 sps:$4 sm:$0xff]   ;;  %v14453_v39 = vld [vmem:[#allocation35_spill] sm:$0xff] }
 0x2db   : > { %v4864_v58 = vpop.f32.mrf.mxu0  ;;  %v8388_v59 = vsel %vm8376_vm5, %v8383_v8, %v8387_v55 }
 0x2dc   : > { %14449 = vst [vmem:[#allocation24_spill] sm:$0xff] %v13351_v54  ;;  %v5783_v13 = vpop.f32.mrf.mxu1  ;;  %v5041_v61 = vadd.f32 %v4864_v58, %v14450_v49  ;;  %v13355_v7 = vadd.f32 %v5781_v24, %v5040_v6  ;;  %v14455_v58 = vld [vmem:[#allocation36_spill] sm:$0xff]  ;;  %v11288_v6 = vld [vmem:[#allocation8 + $0x78] sm:$0xff]  }
 0x2dd   : > { %v4866_v37 = vpop.f32.mrf.mxu0  ;;  %9492 = vmatpush2.bf16.msra.mxu1 %v11288_v6 }
 0x2de   : > { %14451 = vst [vmem:[#allocation25_spill] sm:$0xff] %v13355_v7  ;;  %v13359_v21 = vpop.f32.mrf.mxu1  ;;  %v13364_v35 = vadd.f32 %v4866_v37, %v14453_v39  ;;  %v13366_v11 = vadd.f32 %v5783_v13, %v5041_v61  ;;  %v8393_v7 = vrot.slane %v11236_v41, 3  ;;  %9493 = vmatprep.subr.bf16.mxu1 %v14413_v31 }
 0x2df   : > { %14452 = vst [vmem:[#allocation26_spill] sm:$0xff] %v13359_v21  ;;  %v4870_v12 = vpop.f32.mrf.mxu0  ;;  %8690 = vmatmul.mubr.bf16.gmra.mxu0 %v8384_v51  ;;  %v14458_v51 = vld [vmem:[#allocation38_spill] sm:$0xff] }
 0x2e0   : > { %14454 = vst [vmem:[#allocation27_spill] sm:$0xff] %v13366_v11  ;;  %v5789_v54 = vpop.f32.mrf.mxu1  ;;  %v5043_v24 = vadd.f32 %v4870_v12, %v14455_v58  ;;  %8699 = vmatprep.mubr.bf16.mxu0 %v8390_v18  ;;  %v11238_v18 = vld [vmem:[%s11630_s26 + $0x60] ss:$8 sps:$4 sm:$0xff]   ;;  %v8394_v41 = vsel %vm8376_vm5, %v8389_v60, %v8393_v7 }
 0x2e1   : > { %v4872_v49 = vpop.f32.mrf.mxu0  ;;  %v8391_v8 = vrot.slane %v11238_v18, 3 }
 0x2e2   : > { %v5791_v21 = vpop.f32.mrf.mxu1  ;;  %v5044_v25 = vadd.f32 %v4872_v49, %v14456_v47  ;;  %v13370_v27 = vadd.f32 %v5789_v54, %v5043_v24  ;;  %v11239_v49 = vld [vmem:[%s11630_s26 + $0x74] ss:$8 sps:$4 sm:$0xff]  }
 0x2e3   : > { %v4874_v13 = vpop.f32.mrf.mxu0  ;;  %v14461_v54 = vld [vmem:[#allocation39_spill] sm:$0xff] }
 0x2e4   : > { %14457 = vst [vmem:[#allocation28_spill] sm:$0xff] %v13370_v27  ;;  %v5793_v61 = vpop.f32.mrf.mxu1  ;;  %v5045_v37 = vadd.f32 %v4874_v13, %v14458_v51  ;;  %v13374_v39 = vadd.f32 %v5791_v21, %v5044_v25  ;;  %v14464_v25 = vld [vmem:[#allocation40_spill] sm:$0xff]  ;;  %v14465_v27 = vld [vmem:[#allocation41_spill] sm:$0xff] }
 0x2e5   : > { %v4876_v12 = vpop.f32.mrf.mxu0 }
 0x2e6   : > { %14459 = vst [vmem:[#allocation29_spill] sm:$0xff] %v13374_v39  ;;  %v13378_v58 = vpop.f32.mrf.mxu1  ;;  %v13383_v24 = vadd.f32 %v4876_v12, %v14461_v54  ;;  %v13385_v6 = vadd.f32 %v5793_v61, %v5045_v37  ;;  %v11289_v12 = vld [vmem:[#allocation8 + $0x70] sm:$0xff]  }
 0x2e7   : > { %14460 = vst [vmem:[#allocation30_spill] sm:$0xff] %v13378_v58  ;;  %v4880_v47 = vpop.f32.mrf.mxu0  ;;  %8700 = vmatmul.mubr.bf16.gmra.mxu0 %v8388_v59  ;;  %v8397_v58 = vrot.slane %v11239_v49, 3  ;;  %v14467_v37 = vld [vmem:[#allocation42_spill] sm:$0xff]  ;;  %9494 = vmatpush2.bf16.msra.mxu1 %v11289_v12 }
 0x2e8   : > { %14462 = vst [vmem:[#allocation31_spill] sm:$0xff] %v13383_v24  ;;  %14463 = vst [vmem:[#allocation32_spill] sm:$0xff] %v13385_v6  ;;  %v5799_v13 = vpop.f32.mrf.mxu1  ;;  %v5047_v21 = vadd.f32 %v4880_v47, %v14464_v25  ;;  %8709 = vmatprep.mubr.bf16.mxu0 %v8394_v41  ;;  %v8392_v24 = vsel %vm8376_vm5, %v8387_v55, %v8391_v8  ;;  %v11241_v47 = vld [vmem:[%s11630_s26 + $0x70] ss:$8 sps:$4 sm:$0xff]   ;;  %v11242_v25 = vld [vmem:[%s11630_s26 + $0x84] ss:$8 sps:$4 sm:$0xff]   ;;  %9495 = vmatprep.subr.bf16.mxu1 %v14413_v31 }
 0x2e9   : > { %v4882_v51 = vpop.f32.mrf.mxu0  ;;  %v8398_v49 = vsel %vm8376_vm5, %v8393_v7, %v8397_v58  ;;  %v14473_v55 = vld [vmem:[#allocation44_spill] sm:$0xff]  ;;  %v8395_v12 = vrot.slane %v11241_v47, 3  ;;  %v8401_v7 = vrot.slane %v11242_v25, 3 }
 0x2ea   : > { %v5801_v39 = vpop.f32.mrf.mxu1  ;;  %v5048_v60 = vadd.f32 %v4882_v51, %v14465_v27  ;;  %v13389_v11 = vadd.f32 %v5799_v13, %v5047_v21  ;;  %v14470_v27 = vld [vmem:[#allocation43_spill] sm:$0xff] }
 0x2eb   : > { %v4884_v54 = vpop.f32.mrf.mxu0  ;;  %v8402_v25 = vsel %vm8376_vm5, %v8397_v58, %v8401_v7 }
 0x2ec   : > { %14466 = vst [vmem:[#allocation33_spill] sm:$0xff] %v13389_v11  ;;  %v5803_v61 = vpop.f32.mrf.mxu1  ;;  %v5049_v6 = vadd.f32 %v4884_v54, %v14467_v37  ;;  %v13392_v59 = vadd.f32 %v5801_v39, %v5048_v60 }
 0x2ed   : > { %v4886_v18 = vpop.f32.mrf.mxu0 }
 0x2ee   : > { %14468 = vst [vmem:[#allocation34_spill] sm:$0xff] %v13392_v59  ;;  %v13396_v41 = vpop.f32.mrf.mxu1  ;;  %v13402_v13 = vadd.f32 %v4886_v18, %v14470_v27  ;;  %v13404_v21 = vadd.f32 %v5803_v61, %v5049_v6  ;;  %v11290_v18 = vld [vmem:[#allocation8 + $0x68] sm:$0xff]   ;;  %v14476_v61 = vld [vmem:[#allocation46_spill] sm:$0xff] }
 0x2ef   : > { %14469 = vst [vmem:[#allocation35_spill] sm:$0xff] %v13396_v41  ;;  %v4890_v51 = vpop.f32.mrf.mxu0  ;;  %8710 = vmatmul.mubr.bf16.gmra.mxu0 %v8392_v24  ;;  %v14474_v41 = vld [vmem:[#allocation45_spill] sm:$0xff]  ;;  %9496 = vmatpush2.bf16.msra.mxu1 %v11290_v18 }
 0x2f0   : > { %14471 = vst [vmem:[#allocation36_spill] sm:$0xff] %v13402_v13  ;;  %14472 = vst [vmem:[#allocation37_spill] sm:$0xff] %v13404_v21  ;;  %v5809_v39 = vpop.f32.mrf.mxu1  ;;  %v5051_v60 = vadd.f32 %v4890_v51, %v14473_v55  ;;  %8719 = vmatprep.mubr.bf16.mxu0 %v8398_v49  ;;  %v8396_v13 = vsel %vm8376_vm5, %v8391_v8, %v8395_v12  ;;  %v11244_v51 = vld [vmem:[%s11630_s26 + $0x80] ss:$8 sps:$4 sm:$0xff]   ;;  %v11245_v55 = vld [vmem:[%s11630_s26 + $0x94] ss:$8 sps:$4 sm:$0xff]   ;;  %9497 = vmatprep.subr.bf16.mxu1 %v14413_v31 }
 0x2f1   : > { %v4892_v54 = vpop.f32.mrf.mxu0  ;;  %v14482_v8 = vld [vmem:[#allocation48_spill] sm:$0xff]  ;;  %v8399_v18 = vrot.slane %v11244_v51, 3  ;;  %v8405_v58 = vrot.slane %v11245_v55, 3 }
 0x2f2   : > { %v5811_v37 = vpop.f32.mrf.mxu1  ;;  %v5052_v59 = vadd.f32 %v4892_v54, %v14474_v41  ;;  %v13408_v11 = vadd.f32 %v5809_v39, %v5051_v60  ;;  %v14479_v41 = vld [vmem:[#allocation47_spill] sm:$0xff]  ;;  %v11248_v55 = vld [vmem:[%s11630_s26 + $0xa4] ss:$8 sps:$4 sm:$0xff]  }
 0x2f3   : > { %v4894_v27 = vpop.f32.mrf.mxu0 }
 0x2f4   : > { %14475 = vst [vmem:[#allocation38_spill] sm:$0xff] %v13408_v11  ;;  %v5813_v6 = vpop.f32.mrf.mxu1  ;;  %v5053_v21 = vadd.f32 %v4894_v27, %v14476_v61  ;;  %v13411_v24 = vadd.f32 %v5811_v37, %v5052_v59  ;;  %v14485_v11 = vld [vmem:[#allocation50_spill] sm:$0xff] }
 0x2f5   : > { %v4896_v47 = vpop.f32.mrf.mxu0 }
 0x2f6   : > { %14477 = vst [vmem:[#allocation39_spill] sm:$0xff] %v13411_v24  ;;  %v13415_v49 = vpop.f32.mrf.mxu1  ;;  %v13421_v39 = vadd.f32 %v4896_v47, %v14479_v41  ;;  %v13423_v60 = vadd.f32 %v5813_v6, %v5053_v21  ;;  %v14483_v21 = vld [vmem:[#allocation49_spill] sm:$0xff] }
 0x2f7   : > { %14478 = vst [vmem:[#allocation40_spill] sm:$0xff] %v13415_v49  ;;  %v4900_v54 = vpop.f32.mrf.mxu0  ;;  %8720 = vmatmul.mubr.bf16.gmra.mxu0 %v8396_v13  ;;  %v8400_v13 = vsel %vm8376_vm5, %v8395_v12, %v8399_v18 }
 0x2f8   : > { %14480 = vst [vmem:[#allocation41_spill] sm:$0xff] %v13421_v39  ;;  %14481 = vst [vmem:[#allocation42_spill] sm:$0xff] %v13423_v60  ;;  %v5819_v59 = vpop.f32.mrf.mxu1  ;;  %v5055_v37 = vadd.f32 %v4900_v54, %v14482_v8  ;;  %8729 = vmatprep.mubr.bf16.mxu0 %v8402_v25  ;;  %v11247_v39 = vld [vmem:[%s11630_s26 + $0x90] ss:$8 sps:$4 sm:$0xff]   ;;  %v11291_v54 = vld [vmem:[#allocation8 + $0x60] sm:$0xff]   ;;  %v8406_v8 = vsel %vm8376_vm5, %v8401_v7, %v8405_v58 }
 0x2f9   : > { %v4902_v27 = vpop.f32.mrf.mxu0  ;;  %9498 = vmatpush2.bf16.msra.mxu1 %v11291_v54 }
 0x2fa   : > { %v5821_v61 = vpop.f32.mrf.mxu1  ;;  %v5056_v49 = vadd.f32 %v4902_v27, %v12935_v46  ;;  %v13427_v24 = vadd.f32 %v5819_v59, %v5055_v37  ;;  %9499 = vmatprep.subr.bf16.mxu1 %v14413_v31  ;;  %v8403_v27 = vrot.slane %v11247_v39, 3 }
 0x2fb   : > { %v4904_v47 = vpop.f32.mrf.mxu0 }
 0x2fc   : > { %v5823_v41 = vpop.f32.mrf.mxu1  ;;  %v5057_v6 = vadd.f32 %v4904_v47, %v14483_v21  ;;  %v13430_v60 = vadd.f32 %v5821_v61, %v5056_v49  ;;  %v8409_v47 = vrot.slane %v11248_v55, 3  ;;  %v14488_v21 = vld [vmem:[#allocation51_spill] sm:$0xff] }
 0x2fd   : > { %v4906_v25 = vpop.f32.mrf.mxu0  ;;  %v11251_v55 = vld [vmem:[%s11630_s26 + $0xb4] ss:$8 sps:$4 sm:$0xff]  }
 0x2fe   : > { %v13434_v51 = vpop.f32.mrf.mxu1  ;;  %v13439_v46 = vadd.f32 %v4906_v25, %v14485_v11  ;;  %v13441_v59 = vadd.f32 %v5823_v41, %v5057_v6 }
 0x2ff   : > { %14484 = vst [vmem:[#allocation43_spill] sm:$0xff] %v13434_v51  ;;  %v4910_v37 = vpop.f32.mrf.mxu0  ;;  %8730 = vmatmul.mubr.bf16.gmra.mxu0 %v8400_v13  ;;  %v11250_v51 = vld [vmem:[%s11630_s26 + $0xa0] ss:$8 sps:$4 sm:$0xff]  }
 0x300   : > { %14486 = vst [vmem:[#allocation44_spill] sm:$0xff] %v13439_v46  ;;  %14487 = vst [vmem:[#allocation45_spill] sm:$0xff] %v13441_v59  ;;  %v5829_v49 = vpop.f32.mrf.mxu1  ;;  %v5059_v12 = vadd.f32 %v4910_v37, %v12965_v50  ;;  %8739 = vmatprep.mubr.bf16.mxu0 %v8406_v8  ;;  %v8404_v59 = vsel %vm8376_vm5, %v8399_v18, %v8403_v27  ;;  %v11292_v50 = vld [vmem:[#allocation8 + $0x58] sm:$0xff]   ;;  %v8410_v37 = vsel %vm8376_vm5, %v8405_v58, %v8409_v47  ;;  %v14489_v46 = vld [vmem:[#allocation52_spill] sm:$0xff] }
 0x301   : > { %v4912_v61 = vpop.f32.mrf.mxu0  ;;  %9500 = vmatpush2.bf16.msra.mxu1 %v11292_v50  ;;  %v14491_v18 = vld [vmem:[#allocation53_spill] sm:$0xff]  ;;  %v8407_v58 = vrot.slane %v11250_v51, 3 }
 0x302   : > { %v5831_v7 = vpop.f32.mrf.mxu1  ;;  %v5060_v11 = vadd.f32 %v4912_v61, %v14488_v21  ;;  %v13446_v25 = vadd.f32 %v5829_v49, %v5059_v12  ;;  %9501 = vmatprep.subr.bf16.mxu1 %v14413_v31  ;;  %v11253_v50 = vld [vmem:[%s11630_s26 + $0xb0] ss:$8 sps:$4 sm:$0xff]   ;;  %v11255_v51 = vld [vmem:[%s11630_s26 + $0xc4] ss:$8 sps:$4 sm:$0xff]  }
 0x303   : > { %v4914_v41 = vpop.f32.mrf.mxu0 }
 0x304   : > { %v5833_v6 = vpop.f32.mrf.mxu1  ;;  %v5061_v13 = vadd.f32 %v4914_v41, %v12993_v32  ;;  %v13449_v54 = vadd.f32 %v5831_v7, %v5060_v11 }
 0x305   : > { %v4916_v8 = vpop.f32.mrf.mxu0 }
 0x306   : > { %v13453_v39 = vpop.f32.mrf.mxu1  ;;  %v13458_v61 = vadd.f32 %v4916_v8, %v14489_v46  ;;  %v13460_v49 = vadd.f32 %v5833_v6, %v5061_v13  ;;  %v8413_v46 = vrot.slane %v11251_v55, 3  ;;  %v8408_v13 = vsel %vm8376_vm5, %v8403_v27, %v8407_v58  ;;  %v11293_v55 = vld [vmem:[#allocation8 + $0x50] sm:$0xff]  }
 0x307   : > { %v6577_v32 = vpop.f32.mrf.mxu0  ;;  %8740 = vmatmul.mubr.bf16.gmra.mxu0 %v8404_v59  ;;  %9502 = vmatpush2.bf16.msra.mxu1 %v11293_v55  ;;  %v11259_v55 = vld [vmem:[%s11630_s26 + $0xd4] ss:$8 sps:$4 sm:$0xff]  }
 0x308   : > { %v13462_v12 = vpop.f32.mrf.mxu1  ;;  %v13466_v7 = vadd.f32 %v6577_v32, %v14491_v18  ;;  %8749 = vmatprep.mubr.bf16.mxu0 %v8410_v37  ;;  %v8414_v37 = vsel %vm8376_vm5, %v8409_v47, %v8413_v46  ;;  %9503 = vmatprep.subr.bf16.mxu1 %v14413_v31 }
 0x309   : > { %14490 = vst [vmem:[#allocation46_spill] sm:$0xff] %v13462_v12  ;;  %v6579_v21 = vpop.f32.mrf.mxu0 }
 0x30a   : > { %v13468_v11 = vpop.f32.mrf.mxu1  ;;  %v13471_v41 = vadd.f32 %v6579_v21, %v13023_v10 }
 0x30b   : > { %v6581_v6 = vpop.f32.mrf.mxu0 }
 0x30c   : > { %v13474_v59 = vadd.f32 %v6581_v6, %v13037_v22  ;;  %v13478_v12 = vpop.f32.mrf.mxu1  ;;  %v8411_v22 = vrot.slane %v11253_v50, 3  ;;  %v8417_v6 = vrot.slane %v11255_v51, 3 }
 0x30d   : > { %v6583_v8 = vpop.f32.mrf.mxu0 }
 0x30e   : > { %v13483_v32 = vadd.f32 %v6583_v8, %v13042_v14  ;;  %v13488_v27 = vpop.f32.mrf.mxu1 }
 0x30f   : > { %v6587_v10 = vpop.f32.mrf.mxu0  ;;  %8750 = vmatmul.mubr.bf16.gmra.mxu0 %v8408_v13  ;;  %v11257_v13 = vld [vmem:[%s11630_s26 + $0xc0] ss:$8 sps:$4 sm:$0xff]  }
 0x310   : > { %v13486_v18 = vadd.f32 %v6587_v10, %v13049_v2  ;;  %8759 = vmatprep.mubr.bf16.mxu0 %v8414_v37  ;;  %v8412_v2 = vsel %vm8376_vm5, %v8407_v58, %v8411_v22  ;;  %v13499_v10 = vpop.f32.mrf.mxu1  ;;  %v8418_v37 = vsel %vm8376_vm5, %v8413_v46, %v8417_v6 }
 0x311   : > { %v6589_v21 = vpop.f32.mrf.mxu0 }
 0x312   : > { %14492 = vst [vmem:[#allocation47_spill] sm:$0xff] %v13486_v18  ;;  %v13492_v14 = vadd.f32 %v6589_v21, %v13052_v23  ;;  %v11294_v18 = vld [vmem:[#allocation8 + $0x48] sm:$0xff]   ;;  %v13509_v58 = vpop.f32.mrf.mxu1 }
 0x313   : > { %v6591_v47 = vpop.f32.mrf.mxu0  ;;  %9504 = vmatpush2.bf16.msra.mxu1 %v11294_v18 }
 0x314   : > { %v13495_v8 = vadd.f32 %v6591_v47, %v13071_v63  ;;  %v8415_v63 = vrot.slane %v11257_v13, 3  ;;  %9505 = vmatprep.subr.bf16.mxu1 %v14413_v31 }
 0x315   : > { %v6593_v50 = vpop.f32.mrf.mxu0 }
 0x316   : > { %14493 = vst [vmem:[#allocation48_spill] sm:$0xff] %v13495_v8  ;;  %v13504_v51 = vadd.f32 %v6593_v50, %v13075_v33  ;;  %v8421_v8 = vrot.slane %v11259_v55, 3 }
 0x317   : > { %v6597_v23 = vpop.f32.mrf.mxu0  ;;  %8760 = vmatmul.mubr.bf16.gmra.mxu0 %v8412_v2  ;;  %v11261_v2 = vld [vmem:[%s11630_s26 + $0xd0] ss:$8 sps:$4 sm:$0xff]  }
 0x318   : > { %v13507_v21 = vadd.f32 %v6597_v23, %v13083_v40  ;;  %8769 = vmatprep.mubr.bf16.mxu0 %v8418_v37  ;;  %v8416_v40 = vsel %vm8376_vm5, %v8411_v22, %v8415_v63  ;;  %v13520_v23 = vpop.f32.mrf.mxu1  ;;  %v8422_v18 = vsel %vm8376_vm5, %v8417_v6, %v8421_v8  ;;  %v11263_v37 = vld [vmem:[%s11630_s26 + $0xe4] ss:$8 sps:$4 sm:$0xff]  }
 0x319   : > { %v6599_v47 = vpop.f32.mrf.mxu0  ;;  %v11295_v6 = vld [vmem:[#allocation8 + $0x40] sm:$0xff]  }
 0x31a   : > { %v13513_v33 = vadd.f32 %v6599_v47, %v13091_v5  ;;  %v13530_v22 = vpop.f32.mrf.mxu1  ;;  %9506 = vmatpush2.bf16.msra.mxu1 %v11295_v6 }
 0x31b   : > { %v6601_v46 = vpop.f32.mrf.mxu0 }
 0x31c   : > { %14494 = vst [vmem:[#allocation49_spill] sm:$0xff] %v13513_v33  ;;  %v13516_v50 = vadd.f32 %v6601_v46, %v13099_v29  ;;  %v8419_v29 = vrot.slane %v11261_v2, 3  ;;  %v8425_v46 = vrot.slane %v11263_v37, 3 }
 0x31d   : > { %v6603_v13 = vpop.f32.mrf.mxu0 }
 0x31e   : > { %14495 = vst [vmem:[#allocation50_spill] sm:$0xff] %v13516_v50  ;;  %v13525_v55 = vadd.f32 %v6603_v13, %v13104_v42  ;;  %v11265_v13 = vld [vmem:[%s11630_s26 + $0xe0] ss:$8 sps:$4 sm:$0xff]   ;;  %v8426_v2 = vsel %vm8376_vm5, %v8421_v8, %v8425_v46 }
 0x31f   : > { %v6607_v31 = vpop.f32.mrf.mxu0  ;;  %8770 = vmatmul.mubr.bf16.gmra.mxu0 %v8416_v40  ;;  %v8420_v40 = vsel %vm8376_vm5, %v8415_v63, %v8419_v29  ;;  %v8423_v63 = vrot.slane %v11265_v13, 3 }
 0x320   : > { %v13528_v5 = vadd.f32 %v6607_v31, %v13111_v28  ;;  %8779 = vmatprep.mubr.bf16.mxu0 %v8422_v18  ;;  %v13540_v28 = vpop.f32.mrf.mxu1  ;;  %v11267_v31 = vld [vmem:[%s11630_s26 + $0xf4] ss:$8 sps:$4 sm:$0xff]  }
 0x321   : > { %v6609_v47 = vpop.f32.mrf.mxu0  ;;  %v8429_v6 = vrot.slane %v11267_v31, 3 }
 0x322   : > { %14496 = vst [vmem:[#allocation51_spill] sm:$0xff] %v13528_v5  ;;  %v13533_v50 = vadd.f32 %v6609_v47, %v13117_v3 }
 0x323   : > { %v6611_v33 = vpop.f32.mrf.mxu0  ;;  %v8430_v13 = vsel %vm8376_vm5, %v8425_v46, %v8429_v6 }
 0x324   : > { %14497 = vst [vmem:[#allocation52_spill] sm:$0xff] %v13533_v50  ;;  %v13536_v42 = vadd.f32 %v6611_v33, %v13127_v38  ;;  %v13550_v33 = vpop.f32.mrf.mxu1 }
 0x325   : > { %v6613_v18 = vpop.f32.mrf.mxu0 }
 0x326   : > { %14498 = vst [vmem:[#allocation53_spill] sm:$0xff] %v13536_v42  ;;  %v13545_v37 = vadd.f32 %v6613_v18, %v13134_v56  ;;  %v8424_v56 = vsel %vm8376_vm5, %v8419_v29, %v8423_v63  ;;  %v11269_v18 = vld [vmem:[%s11630_s26 + $0xf0] ss:$8 sps:$4 sm:$0xff]  }
 0x327   : > { %v6617_v3 = vpop.f32.mrf.mxu0  ;;  %8780 = vmatmul.mubr.bf16.gmra.mxu0 %v8420_v40  ;;  %v13560_v40 = vpop.f32.mrf.mxu1 }
 0x328   : > { %14499 = vst [vmem:[#allocation61_spill] sm:$0xff] %v13545_v37  ;;  %v13548_v38 = vadd.f32 %v6617_v3, %v13142_v57  ;;  %8789 = vmatprep.mubr.bf16.mxu0 %v8426_v2  ;;  %v11271_v2 = vld [vmem:[%s11630_s26 + $0x104] ss:$8 sps:$4 sm:$0xff]  }
 0x329   : > { %v6619_v47 = vpop.f32.mrf.mxu0  ;;  %v13570_v29 = vpop.f32.mrf.mxu1 }
 0x32a   : > { %14500 = vst [vmem:[#allocation62_spill] sm:$0xff] %v13548_v38  ;;  %v13553_v42 = vadd.f32 %v6619_v47, %v13154_v20  ;;  %v14507_v38 = vld [vmem:[#allocation55_spill] sm:$0xff] }
 0x32b   : > { %v6621_v8 = vpop.f32.mrf.mxu0 }
 0x32c   : > { %14501 = vst [vmem:[#allocation63_spill] sm:$0xff] %v13553_v42  ;;  %v13556_v50 = vadd.f32 %v6621_v8, %v13162_v53  ;;  %v8427_v53 = vrot.slane %v11269_v18, 3  ;;  %v8433_v8 = vrot.slane %v11271_v2, 3 }
 0x32d   : > { %v6623_v57 = vpop.f32.mrf.mxu0 }
 0x32e   : > { %14502 = vst [vmem:[#allocation64_spill] sm:$0xff] %v13556_v50  ;;  %v13565_v3 = vadd.f32 %v6623_v57, %v13167_v17  ;;  %v14505_v50 = vld [vmem:[#allocation54_spill] sm:$0xff]  ;;  %v8428_v17 = vsel %vm8376_vm5, %v8423_v63, %v8427_v53  ;;  %v11273_v57 = vld [vmem:[%s11630_s26 + $0x100] ss:$8 sps:$4 sm:$0xff]   ;;  %v8434_v18 = vsel %vm8376_vm5, %v8429_v6, %v8433_v8 }
 0x32f   : > { %v6627_v31 = vpop.f32.mrf.mxu0  ;;  %8790 = vmatmul.mubr.bf16.gmra.mxu0 %v8424_v56  ;;  %v13580_v56 = vpop.f32.mrf.mxu1 }
 0x330   : > { %14503 = vst [vmem:[#allocation65_spill] sm:$0xff] %v13565_v3  ;;  %v13568_v20 = vadd.f32 %v6627_v31, %v13174_v9  ;;  %8799 = vmatprep.mubr.bf16.mxu0 %v8430_v13  ;;  %14509 = vst [vmem:[#allocation67_spill] sm:$0xff] %v13580_v56  ;;  %v11275_v13 = vld [vmem:[%s11630_s26 + $0x114] ss:$8 sps:$4 sm:$0xff]   ;;  %v14510_v31 = vld [vmem:[#allocation56_spill] sm:$0xff] }
 0x331   : > { %v6629_v47 = vpop.f32.mrf.mxu0  ;;  %v13590_v63 = vpop.f32.mrf.mxu1  ;;  %v14516_v56 = vld [vmem:[#allocation59_spill] sm:$0xff] }
 0x332   : > { %14504 = vst [vmem:[#allocation66_spill] sm:$0xff] %v13568_v20  ;;  %v13573_v42 = vadd.f32 %v6629_v47, %v14505_v50  ;;  %v14512_v50 = vld [vmem:[#allocation57_spill] sm:$0xff] }
 0x333   : > { %v6631_v46 = vpop.f32.mrf.mxu0 }
 0x334   : > { %14506 = vst [vmem:[#allocation54_spill] sm:$0xff] %v13573_v42  ;;  %v13576_v37 = vadd.f32 %v6631_v46, %v14507_v38  ;;  %v8431_v38 = vrot.slane %v11273_v57, 3  ;;  %v14514_v42 = vld [vmem:[#allocation58_spill] sm:$0xff] }
 0x335   : > { %v6633_v9 = vpop.f32.mrf.mxu0 }
 0x336   : > { %14508 = vst [vmem:[#allocation55_spill] sm:$0xff] %v13576_v37  ;;  %v13585_v20 = vadd.f32 %v6633_v9, %v14510_v31  ;;  %v8437_v37 = vrot.slane %v11275_v13, 3  ;;  %v8432_v9 = vsel %vm8376_vm5, %v8427_v53, %v8431_v38  ;;  %v11277_v31 = vld [vmem:[%s11630_s26 + $0x110] ss:$8 sps:$4 sm:$0xff]  }
 0x337   : > { %v6637_v2 = vpop.f32.mrf.mxu0  ;;  %8800 = vmatmul.mubr.bf16.gmra.mxu0 %v8428_v17  ;;  %v13600_v17 = vpop.f32.mrf.mxu1 }
 0x338   : > { %14511 = vst [vmem:[#allocation56_spill] sm:$0xff] %v13585_v20  ;;  %v13588_v47 = vadd.f32 %v6637_v2, %v14512_v50  ;;  %8809 = vmatprep.mubr.bf16.mxu0 %v8434_v18  ;;  %v8438_v57 = vsel %vm8376_vm5, %v8433_v8, %v8437_v37  ;;  %v11278_v18 = vld [vmem:[%s11630_s26 + $0x124] ss:$8 sps:$4 sm:$0xff]  }
 0x339   : > { %v6639_v46 = vpop.f32.mrf.mxu0  ;;  %v14518_v50 = vld [vmem:[#allocation60_spill] sm:$0xff]  ;;  %v13610_v53 = vpop.f32.mrf.mxu1 }
 0x33a   : > { %14513 = vst [vmem:[#allocation57_spill] sm:$0xff] %v13588_v47  ;;  %v13593_v3 = vadd.f32 %v6639_v46, %v14514_v42  ;;  %v14520_v42 = vld [vmem:[#allocation16_spill] sm:$0xff]  ;;  %14522 = vst [vmem:[#allocation68_spill] sm:$0xff] %v13610_v53 }
 0x33b   : > { %v6641_v6 = vpop.f32.mrf.mxu0  ;;  %v14530_v53 = vld [vmem:[#allocation20_spill] sm:$0xff] }
 0x33c   : > { %14515 = vst [vmem:[#allocation58_spill] sm:$0xff] %v13593_v3  ;;  %v13596_v5 = vadd.f32 %v6641_v6, %v14516_v56  ;;  %v8435_v56 = vrot.slane %v11277_v31, 3 }
 0x33d   : > { %v6643_v2 = vpop.f32.mrf.mxu0 }
 0x33e   : > { %14517 = vst [vmem:[#allocation59_spill] sm:$0xff] %v13596_v5  ;;  %v13605_v47 = vadd.f32 %v6643_v2, %v14518_v50  ;;  %v8441_v5 = vrot.slane %v11278_v18, 3  ;;  %v8436_v2 = vsel %vm8376_vm5, %v8431_v38, %v8435_v56  ;;  %v13620_v50 = vpop.f32.mrf.mxu1 }
 0x33f   : > { %v6647_v13 = vpop.f32.mrf.mxu0  ;;  %8810 = vmatmul.mubr.bf16.gmra.mxu0 %v8432_v9  ;;  %v11281_v9 = vld [vmem:[%s11630_s26 + $0x120] ss:$8 sps:$4 sm:$0xff]   ;;  %14525 = vst [vmem:[#allocation71_spill] sm:$0xff] %v13620_v50 }
 0x340   : > { %14519 = vst [vmem:[#allocation60_spill] sm:$0xff] %v13605_v47  ;;  %v13608_v46 = vadd.f32 %v6647_v13, %v14520_v42  ;;  %8819 = vmatprep.mubr.bf16.mxu0 %v8438_v57  ;;  %v8442_v31 = vsel %vm8376_vm5, %v8437_v37, %v8441_v5  ;;  %v11282_v57 = vld [vmem:[%s11630_s26 + $0x134] ss:$8 sps:$4 sm:$0xff]   ;;  %v14526_v42 = vld [vmem:[#allocation17_spill] sm:$0xff]  ;;  %v13630_v38 = vpop.f32.mrf.mxu1  ;;  %v8193_v37 = vld [vmem:[%s11630_s26 + $0x140] sm:$0x77] }
 0x341   : > { %v6649_v6 = vpop.f32.mrf.mxu0 }
 0x342   : > { %14521 = vst [vmem:[#allocation16_spill] sm:$0xff] %v13608_v46  ;;  %v13613_v3 = vadd.f32 %v6649_v6, %v13246_v16  ;;  %v14527_v6 = vld [vmem:[#allocation18_spill] sm:$0xff]  ;;  %v14529_v46 = vld [vmem:[#allocation19_spill] sm:$0xff] }
 0x343   : > { %v6651_v8 = vpop.f32.mrf.mxu0 }
 0x344   : > { %14523 = vst [vmem:[#allocation69_spill] sm:$0xff] %v13613_v3  ;;  %v13616_v20 = vadd.f32 %v6651_v8, %v13253_v36  ;;  %v8439_v36 = vrot.slane %v11281_v9, 3 }
 0x345   : > { %v6653_v13 = vpop.f32.mrf.mxu0 }
 0x346   : > { %14524 = vst [vmem:[#allocation70_spill] sm:$0xff] %v13616_v20  ;;  %v13625_v18 = vadd.f32 %v6653_v13, %v14526_v42  ;;  %v8445_v20 = vrot.slane %v11282_v57, 3  ;;  %v5945_v13 = vadd.f32 %v14530_v53, %v13281_v45  ;;  %v10413_v57 = vcombine.high %v8193_v37, %v8193_v37 }
 0x347   : > { %v6657_v16 = vpop.f32.mrf.mxu0  ;;  %8820 = vmatmul.mubr.bf16.gmra.mxu0 %v8436_v2  ;;  %v8440_v2 = vsel %vm8376_vm5, %v8435_v56, %v8439_v36 }
 0x348   : > { %v13628_v3 = vadd.f32 %v6657_v16, %v14527_v6  ;;  %8829 = vmatprep.mubr.bf16.mxu0 %v8442_v31  ;;  %v11284_v16 = vld [vmem:[%s11630_s26 + $0x130] ss:$8 sps:$4 sm:$0xff]   ;;  %v13643_v31 = vpop.f32.mrf.mxu1  ;;  %v8446_v6 = vsel %vm8376_vm5, %v8441_v5, %v8445_v20  ;;  %v8449_v56 = vrot.slane %v10413_v57, 3  ;;  %v5949_v5 = vadd.f32 %v13298_v44, %v13305_v62 }
 0x349   : > { %v6659_v8 = vpop.f32.mrf.mxu0  ;;  %v8443_v45 = vrot.slane %v11284_v16, 3 }
 0x34a   : > { %14528 = vst [vmem:[#allocation17_spill] sm:$0xff] %v13628_v3  ;;  %v13633_v47 = vadd.f32 %v6659_v8, %v14529_v46 }
 0x34b   : > { %v6661_v50 = vpop.f32.mrf.mxu0 }
 0x34c   : > { %v13639_v42 = vadd.f32 %v6661_v50, %v13283_v1  ;;  %v13651_v1 = vpop.f32.mrf.mxu1 }
 0x34d   : > { %v6663_v9 = vpop.f32.mrf.mxu0 }
 0x34e   : > { %14531 = vst [vmem:[#allocation18_spill] sm:$0xff] %v13639_v42  ;;  %v13646_v3 = vadd.f32 %v6663_v9, %v5945_v13  ;;  %v13662_v9 = vpop.f32.mrf.mxu1 }
 0x34f   : > { %v6667_v46 = vpop.f32.mrf.mxu0  ;;  %8830 = vmatmul.mubr.bf16.gmra.mxu0 %v8440_v2  ;;  %v8444_v2 = vsel %vm8376_vm5, %v8439_v36, %v8443_v45 }
 0x350   : > { %v13649_v8 = vadd.f32 %v6667_v46, %v13289_v48  ;;  %8839 = vmatprep.mubr.bf16.mxu0 %v8446_v6  ;;  %v10412_v48 = vcombine.low %v8193_v37, %v8193_v37  ;;  %v8450_v6 = vsel %vm8376_vm5, %v8445_v20, %v8449_v56  ;;  %v13670_v62 = vpop.f32.mrf.mxu1 }
 0x351   : > { %v6669_v53 = vpop.f32.mrf.mxu0 }
 0x352   : > { %v13654_v50 = vadd.f32 %v6669_v53, %v13296_v52  ;;  %v8447_v44 = vrot.slane %v10412_v48, 3  ;;  %v13681_v56 = vpop.f32.mrf.mxu1 }
 0x353   : > { %v6671_v42 = vpop.f32.mrf.mxu0 }
 0x354   : > { %v13659_v13 = vadd.f32 %v6671_v42, %v13307_v43  ;;  %v5953_v42 = vadd.f32 %v13321_v30, %v13326_v19  ;;  %v8448_v53 = vsel %vm8376_vm5, %v8443_v45, %v8447_v44 }
 0x355   : > { %v6673_v16 = vpop.f32.mrf.mxu0 }
 0x356   : > { %14532 = vst [vmem:[#allocation19_spill] sm:$0xff] %v13659_v13  ;;  %v13665_v46 = vadd.f32 %v6673_v16, %v5949_v5 }
 0x357   : > { %v6677_v57 = vpop.f32.mrf.mxu0  ;;  %8840 = vmatmul.mubr.bf16.gmra.mxu0 %v8444_v2 }
 0x358   : > { %14533 = vst [vmem:[#allocation20_spill] sm:$0xff] %v13665_v46  ;;  %v13668_v52 = vadd.f32 %v6677_v57, %v13311_v26  ;;  %8849 = vmatprep.mubr.bf16.mxu0 %v8450_v6  ;;  %v14541_v6 = vld [vmem:[#allocation21_spill] sm:$0xff]  ;;  %v14542_v57 = vld [vmem:[#allocation23_spill] sm:$0xff] }
 0x359   : > { %v6679_v43 = vpop.f32.mrf.mxu0 }
 0x35a   : > { %14534 = vst [vmem:[#allocation72_spill] sm:$0xff] %v13668_v52  ;;  %v13673_v36 = vadd.f32 %v6679_v43, %v13315_v4  ;;  %v13688_v4 = vpop.f32.mrf.mxu1 }
 0x35b   : > { %v6681_v37 = vpop.f32.mrf.mxu0 }
 0x35c   : > { %14535 = vst [vmem:[#allocation73_spill] sm:$0xff] %v13673_v36  ;;  %v13678_v20 = vadd.f32 %v6681_v37, %v13328_v34  ;;  %v14540_v34 = vld [vmem:[#allocation22_spill] sm:$0xff]  ;;  %v13698_v43 = vpop.f32.mrf.mxu1 }
 0x35d   : > { %v6683_v26 = vpop.f32.mrf.mxu0  ;;  %v5957_v45 = vadd.f32 %v14541_v6, %v14540_v34  ;;  %v14549_v34 = vld [vmem:[#allocation26_spill] sm:$0xff]  ;;  %v14550_v6 = vld [vmem:[#allocation27_spill] sm:$0xff] }
 0x35e   : > { %14536 = vst [vmem:[#allocation74_spill] sm:$0xff] %v13678_v20  ;;  %v13683_v5 = vadd.f32 %v6683_v26, %v5953_v42 }
 0x35f   : > { %v6687_v2 = vpop.f32.mrf.mxu0  ;;  %8850 = vmatmul.mubr.bf16.gmra.mxu0 %v8448_v53  ;;  %v14545_v53 = vld [vmem:[#allocation24_spill] sm:$0xff] }
 0x360   : > { %14537 = vst [vmem:[#allocation75_spill] sm:$0xff] %v13683_v5  ;;  %v13686_v48 = vadd.f32 %v6687_v2, %v13333_v0  ;;  %v13705_v2 = vpop.f32.mrf.mxu1 }
 0x361   : > { %v6689_v16 = vpop.f32.mrf.mxu0 }
 0x362   : > { %14538 = vst [vmem:[#allocation76_spill] sm:$0xff] %v13686_v48  ;;  %v13691_v30 = vadd.f32 %v6689_v16, %v13336_v15  ;;  %v14547_v16 = vld [vmem:[#allocation25_spill] sm:$0xff] }
 0x363   : > { %v6691_v19 = vpop.f32.mrf.mxu0 }
 0x364   : > { %14539 = vst [vmem:[#allocation77_spill] sm:$0xff] %v13691_v30  ;;  %v13696_v44 = vadd.f32 %v6691_v19, %v14542_v57  ;;  %v5961_v19 = vadd.f32 %v14549_v34, %v13364_v35  ;;  %v14557_v35 = vld [vmem:[#allocation31_spill] sm:$0xff]  ;;  %v14558_v34 = vld [vmem:[#allocation30_spill] sm:$0xff] }
 0x365   : > { %v6693_v37 = vpop.f32.mrf.mxu0 }
 0x366   : > { %14543 = vst [vmem:[#allocation22_spill] sm:$0xff] %v13696_v44  ;;  %v13700_v42 = vadd.f32 %v6693_v37, %v5957_v45  ;;  %v13715_v44 = vpop.f32.mrf.mxu1 }
 0x367   : > { %v6697_v0 = vpop.f32.mrf.mxu0 }
 0x368   : > { %14544 = vst [vmem:[#allocation21_spill] sm:$0xff] %v13700_v42  ;;  %v13703_v26 = vadd.f32 %v6697_v0, %v14545_v53  ;;  %v14553_v53 = vld [vmem:[#allocation28_spill] sm:$0xff]  ;;  %v13722_v42 = vpop.f32.mrf.mxu1 }
 0x369   : > { %v6699_v15 = vpop.f32.mrf.mxu0 }
 0x36a   : > { %14546 = vst [vmem:[#allocation23_spill] sm:$0xff] %v13703_v26  ;;  %v13708_v30 = vadd.f32 %v6699_v15, %v14547_v16  ;;  %v14555_v16 = vld [vmem:[#allocation29_spill] sm:$0xff]  ;;  %v13732_v20 = vpop.f32.mrf.mxu1 }
 0x36b   : > { %v6701_v48 = vpop.f32.mrf.mxu0 }
 0x36c   : > { %14548 = vst [vmem:[#allocation24_spill] sm:$0xff] %v13708_v30  ;;  %v13713_v57 = vadd.f32 %v6701_v48, %v14550_v6  ;;  %v5965_v48 = vadd.f32 %v14558_v34, %v14557_v35  ;;  %v14559_v6 = vld [vmem:[#allocation32_spill] sm:$0xff]  ;;  %v14567_v34 = vld [vmem:[#allocation35_spill] sm:$0xff] }
 0x36d   : > { %v6703_v45 = vpop.f32.mrf.mxu0  ;;  %v14566_v35 = vld [vmem:[#allocation36_spill] sm:$0xff] }
 0x36e   : > { %14551 = vst [vmem:[#allocation25_spill] sm:$0xff] %v13713_v57  ;;  %v13717_v37 = vadd.f32 %v6703_v45, %v5961_v19 }
 0x36f   : > { %v6707_v0 = vpop.f32.mrf.mxu0 }
 0x370   : > { %14552 = vst [vmem:[#allocation26_spill] sm:$0xff] %v13717_v37  ;;  %v13720_v26 = vadd.f32 %v6707_v0, %v14553_v53  ;;  %v14562_v53 = vld [vmem:[#allocation33_spill] sm:$0xff]  ;;  %v13739_v37 = vpop.f32.mrf.mxu1 }
 0x371   : > { %v6709_v15 = vpop.f32.mrf.mxu0 }
 0x372   : > { %14554 = vst [vmem:[#allocation27_spill] sm:$0xff] %v13720_v26  ;;  %v13725_v30 = vadd.f32 %v6709_v15, %v14555_v16  ;;  %v14564_v16 = vld [vmem:[#allocation34_spill] sm:$0xff]  ;;  %v13749_v52 = vpop.f32.mrf.mxu1 }
 0x373   : > { %v6711_v5 = vpop.f32.mrf.mxu0 }
 0x374   : > { %14556 = vst [vmem:[#allocation28_spill] sm:$0xff] %v13725_v30  ;;  %v13730_v57 = vadd.f32 %v6711_v5, %v14559_v6  ;;  %v5969_v5 = vadd.f32 %v14567_v34, %v14566_v35  ;;  %v14568_v6 = vld [vmem:[#allocation37_spill] sm:$0xff]  ;;  %v14576_v34 = vld [vmem:[#allocation40_spill] sm:$0xff] }
 0x375   : > { %v6713_v19 = vpop.f32.mrf.mxu0  ;;  %v14575_v35 = vld [vmem:[#allocation41_spill] sm:$0xff] }
 0x376   : > { %14560 = vst [vmem:[#allocation29_spill] sm:$0xff] %v13730_v57  ;;  %v13734_v45 = vadd.f32 %v6713_v19, %v5965_v48 }
 0x377   : > { %v6717_v0 = vpop.f32.mrf.mxu0 }
 0x378   : > { %14561 = vst [vmem:[#allocation31_spill] sm:$0xff] %v13734_v45  ;;  %v13737_v26 = vadd.f32 %v6717_v0, %v14562_v53  ;;  %v14571_v53 = vld [vmem:[#allocation38_spill] sm:$0xff]  ;;  %v13756_v45 = vpop.f32.mrf.mxu1 }
 0x379   : > { %v6719_v15 = vpop.f32.mrf.mxu0 }
 0x37a   : > { %14563 = vst [vmem:[#allocation30_spill] sm:$0xff] %v13737_v26  ;;  %v13742_v30 = vadd.f32 %v6719_v15, %v14564_v16  ;;  %v14573_v16 = vld [vmem:[#allocation39_spill] sm:$0xff]  ;;  %v13766_v13 = vpop.f32.mrf.mxu1 }
 0x37b   : > { %v6721_v36 = vpop.f32.mrf.mxu0 }
 0x37c   : > { %14565 = vst [vmem:[#allocation32_spill] sm:$0xff] %v13742_v30  ;;  %v13747_v57 = vadd.f32 %v6721_v36, %v14568_v6  ;;  %v5973_v36 = vadd.f32 %v14576_v34, %v14575_v35  ;;  %v14577_v6 = vld [vmem:[#allocation42_spill] sm:$0xff]  ;;  %v14582_v35 = vld [vmem:[#allocation44_spill] sm:$0xff]  ;;  %v14583_v34 = vld [vmem:[#allocation43_spill] sm:$0xff] }
 0x37d   : > { %v6723_v48 = vpop.f32.mrf.mxu0 }
 0x37e   : > { %14569 = vst [vmem:[#allocation33_spill] sm:$0xff] %v13747_v57  ;;  %v13751_v19 = vadd.f32 %v6723_v48, %v5969_v5 }
 0x37f   : > { %v6727_v0 = vpop.f32.mrf.mxu0 }
 0x380   : > { %14570 = vst [vmem:[#allocation34_spill] sm:$0xff] %v13751_v19  ;;  %v13754_v26 = vadd.f32 %v6727_v0, %v14571_v53  ;;  %v9150_v19 = vlaneseq }
 0x381   : > { %v6729_v15 = vpop.f32.mrf.mxu0 }
 0x382   : > { %14572 = vst [vmem:[#allocation36_spill] sm:$0xff] %v13754_v26  ;;  %v13759_v30 = vadd.f32 %v6729_v15, %v14573_v16  ;;  %v13773_v26 = vpop.f32.mrf.mxu1 }
 0x383   : > { %v6731_v46 = vpop.f32.mrf.mxu0 }
 0x384   : > { %14574 = vst [vmem:[#allocation35_spill] sm:$0xff] %v13759_v30  ;;  %v13764_v57 = vadd.f32 %v6731_v46, %v14577_v6  ;;  %v5977_v46 = vadd.f32 %v14583_v34, %v14582_v35  ;;  %v14584_v6 = vld [vmem:[#allocation45_spill] sm:$0xff] }
 0x385   : > { %v6733_v5 = vpop.f32.mrf.mxu0 }
 0x386   : > { %14578 = vst [vmem:[#allocation37_spill] sm:$0xff] %v13764_v57  ;;  %v13768_v48 = vadd.f32 %v6733_v5, %v5973_v36  ;;  %v13783_v36 = vpop.f32.mrf.mxu1 }
 0x387   : > { %v6737_v0 = vpop.f32.mrf.mxu0 }
 0x388   : > { %14579 = vst [vmem:[#allocation38_spill] sm:$0xff] %v13768_v48  ;;  %v13771_v53 = vadd.f32 %v6737_v0, %v13427_v24 }
 0x389   : > { %v6739_v15 = vpop.f32.mrf.mxu0 }
 0x38a   : > { %14580 = vst [vmem:[#allocation39_spill] sm:$0xff] %v13771_v53  ;;  %v13776_v16 = vadd.f32 %v6739_v15, %v13430_v60  ;;  %v9151_v53 = vshrl.u32 %v9150_v19, 7  ;;  %v13790_v60 = vpop.f32.mrf.mxu1  ;;  %v14590_v19 = vld [vmem:[#allocation46_spill] sm:$0xff] }
 0x38b   : > { %v6741_v30 = vpop.f32.mrf.mxu0 }
 0x38c   : > { %14581 = vst [vmem:[#allocation41_spill] sm:$0xff] %v13776_v16  ;;  %v13781_v57 = vadd.f32 %v6741_v30, %v14584_v6  ;;  %v5981_v30 = vadd.f32 %v13453_v39, %v13458_v61  ;;  %v13800_v6 = vpop.f32.mrf.mxu1 }
 0x38d   : > { %v6743_v5 = vpop.f32.mrf.mxu0 }
 0x38e   : > { %14585 = vst [vmem:[#allocation40_spill] sm:$0xff] %v13781_v57  ;;  %v13785_v48 = vadd.f32 %v6743_v5, %v5977_v46  ;;  %v9152_v46 = vsub.s32 0, %v9151_v53  ;;  %v13810_v61 = vpop.f32.mrf.mxu1 }
 0x38f   : > { %v6747_v24 = vpop.f32.mrf.mxu0 }
 0x390   : > { %14586 = vst [vmem:[#allocation42_spill] sm:$0xff] %v13785_v48  ;;  %v13788_v0 = vadd.f32 %v6747_v24, %v13446_v25  ;;  %v9148_v25 = vld [vmem:[#allocation6] sm:$0x3]  ;;  %v8013_v24 = vadd.f32 %v14590_v19, %v13466_v7  ;;  %v9156_v48 = vsub.s32 1, %v9151_v53  ;;  %v8016_v53 = vadd.f32 %v13488_v27, %v13483_v32 }
 0x391   : > { %v6749_v15 = vpop.f32.mrf.mxu0  ;;  %v13808_v39 = vrot.slane %v9148_v25, %v9152_v46  ;;  %v14591_v46 = vld [vmem:[#allocation47_spill] sm:$0xff] }
 0x392   : > { %14587 = vst [vmem:[#allocation44_spill] sm:$0xff] %v13788_v0  ;;  %v13793_v16 = vadd.f32 %v6749_v15, %v13449_v54  ;;  %v8014_v15 = vadd.f32 %v13468_v11, %v13471_v41  ;;  %v13814_v57 = vrot.slane %v9148_v25, %v9156_v48  ;;  %v13819_v11 = vpop.f32.mrf.mxu1  ;;  %v8017_v19 = vadd.f32 %v13499_v10, %v14591_v46 }
 0x393   : > { %v6751_v35 = vpop.f32.mrf.mxu0  ;;  %v8018_v48 = vadd.f32 %v13509_v58, %v13492_v14  ;;  %v8020_v14 = vadd.f32 %v13530_v22, %v13504_v51 }
 0x394   : > { %14588 = vst [vmem:[#allocation43_spill] sm:$0xff] %v13793_v16  ;;  %v13798_v34 = vadd.f32 %v6751_v35, %v13460_v49  ;;  %v8015_v35 = vadd.f32 %v13478_v12, %v13474_v59 }
 0x395   : > { %v6753_v5 = vpop.f32.mrf.mxu0 }
 0x396   : > { %14589 = vst [vmem:[#allocation45_spill] sm:$0xff] %v13798_v34  ;;  %v13804_v0 = vadd.f32 %v6753_v5, %v5981_v30 }
 0x397   : > { %v8681_v54 = vpop.f32.mrf.mxu0 }
 0x398   : > { %v8932_v16 = vadd.f32 %v8681_v54, %v8013_v24 }
 0x399   : > { %v8683_v49 = vpop.f32.mrf.mxu0 }
 0x39a   : > { %v8933_v34 = vadd.f32 %v8683_v49, %v8014_v15  ;;  %v9160_v30 = vadd.f32 %v13808_v39, %v8932_v16  ;;  %v14592_v15 = vld [vmem:[#allocation48_spill] sm:$0xff] }
 0x39b   : > { %v8685_v7 = vpop.f32.mrf.mxu0  ;;  %v8019_v49 = vadd.f32 %v13520_v23, %v14592_v15  ;;  %v8021_v23 = vadd.f32 %v13540_v28, %v13507_v21  ;;  %v14594_v15 = vld [vmem:[#allocation50_spill] sm:$0xff] }
 0x39c   : > { %v8934_v5 = vadd.f32 %v8685_v7, %v8015_v35  ;;  %v9161_v24 = vadd.f32 %v13814_v57, %v8933_v34  ;;  %v9232_v54 = vmax.f32 %v9160_v30, 0.0  ;;  %v13830_v35 = vpop.f32.mrf.mxu1 }
 0x39d   : > { %v8687_v41 = vpop.f32.mrf.mxu0 }
 0x39e   : > { %v9162_v12 = vadd.f32 %v13808_v39, %v8934_v5  ;;  %v8935_v59 = vadd.f32 %v8687_v41, %v8016_v53  ;;  %v9233_v7 = vmax.f32 %v9161_v24, 0.0 }
 0x39f   : > { %v8691_v25 = vpop.f32.mrf.mxu0 }
 0x3a0   : > { %v9234_v32 = vmax.f32 %v9162_v12, 0.0  ;;  %v9163_v27 = vadd.f32 %v13814_v57, %v8935_v59  ;;  %v8936_v16 = vadd.f32 %v8691_v25, %v8017_v19  ;;  %v13835_v12 = vpop.f32.mrf.mxu1 }
 0x3a1   : > { %v8693_v10 = vpop.f32.mrf.mxu0 }
 0x3a2   : > { %v9304_v34 = vpack.c.bf16 %v9234_v32, %v9232_v54  ;;  %v9235_v46 = vmax.f32 %v9163_v27, 0.0  ;;  %v8937_v5 = vadd.f32 %v8693_v10, %v8018_v48  ;;  %v9164_v58 = vadd.f32 %v13808_v39, %v8936_v16  ;;  %v14593_v48 = vld [vmem:[#allocation49_spill] sm:$0xff]  ;;  %v13846_v21 = vpop.f32.mrf.mxu1 }
 0x3a3   : > { %v8695_v53 = vpop.f32.mrf.mxu0  ;;  %v8022_v54 = vadd.f32 %v13550_v33, %v14593_v48  ;;  %v8024_v33 = vadd.f32 %v13570_v29, %v13525_v55  ;;  %v14597_v48 = vld [vmem:[#allocation52_spill] sm:$0xff] }
 0x3a4   : > { %v8938_v30 = vadd.f32 %v8695_v53, %v8019_v49  ;;  %v9305_v41 = vpack.c.bf16 %v9235_v46, %v9233_v7  ;;  %v9165_v59 = vadd.f32 %v13814_v57, %v8937_v5  ;;  %v9236_v22 = vmax.f32 %v9164_v58, 0.0 }
 0x3a5   : > { %v8697_v19 = vpop.f32.mrf.mxu0  ;;  %v8023_v49 = vadd.f32 %v13560_v40, %v14594_v15  ;;  %v14596_v40 = vld [vmem:[#allocation67_spill] sm:$0xff] }
 0x3a6   : > { %v9166_v24 = vadd.f32 %v13808_v39, %v8938_v30  ;;  %v8939_v25 = vadd.f32 %v8697_v19, %v8020_v14  ;;  %9507 = vmatprep.mubr.bf16.mxu1 %v9305_v41  ;;  %v9237_v10 = vmax.f32 %v9165_v59, 0.0  ;;  %v13851_v30 = vpop.f32.mrf.mxu1  ;;  %v14595_v19 = vld [vmem:[#allocation51_spill] sm:$0xff] }
 0x3a7   : > { %v8701_v51 = vpop.f32.mrf.mxu0  ;;  %9508 = vmatmul.mubr.bf16.vlgmr.msra.gmra.mxu1 %v9304_v34 }
 0x3a8   : > { %v9238_v32 = vmax.f32 %v9166_v24, 0.0  ;;  %v9167_v27 = vadd.f32 %v13814_v57, %v8939_v25  ;;  %v8940_v16 = vadd.f32 %v8701_v51, %v8021_v23  ;;  %v8025_v23 = vadd.f32 %v14596_v40, %v14595_v19  ;;  %v13862_v15 = vpop.f32.mrf.mxu1  ;;  %v14601_v40 = vld [vmem:[#allocation62_spill] sm:$0xff] }
 0x3a9   : > { %v8703_v28 = vpop.f32.mrf.mxu0 }
 0x3aa   : > { %v9306_v7 = vpack.c.bf16 %v9238_v32, %v9236_v22  ;;  %v9239_v46 = vmax.f32 %v9167_v27, 0.0  ;;  %v8941_v5 = vadd.f32 %v8703_v28, %v8022_v54  ;;  %v9168_v34 = vadd.f32 %v13808_v39, %v8940_v16  ;;  %v14598_v27 = vld [vmem:[#allocation53_spill] sm:$0xff] }
 0x3ab   : > { %v8705_v53 = vpop.f32.mrf.mxu0  ;;  %v8026_v54 = vadd.f32 %v13590_v63, %v14597_v48  ;;  %v8027_v16 = vadd.f32 %v13600_v17, %v14598_v27  ;;  %v14600_v63 = vld [vmem:[#allocation68_spill] sm:$0xff]  ;;  %v14602_v17 = vld [vmem:[#allocation71_spill] sm:$0xff] }
 0x3ac   : > { %v8942_v14 = vadd.f32 %v8705_v53, %v8023_v49  ;;  %v9307_v58 = vpack.c.bf16 %v9239_v46, %v9237_v10  ;;  %v9169_v24 = vadd.f32 %v13814_v57, %v8941_v5  ;;  %v9240_v29 = vmax.f32 %v9168_v34, 0.0  ;;  %v14603_v48 = vld [vmem:[#allocation63_spill] sm:$0xff]  ;;  %v14604_v27 = vld [vmem:[#allocation64_spill] sm:$0xff] }
 0x3ad   : > { %v8707_v41 = vpop.f32.mrf.mxu0 }
 0x3ae   : > { %v9170_v59 = vadd.f32 %v13808_v39, %v8942_v14  ;;  %v8943_v25 = vadd.f32 %v8707_v41, %v8024_v33  ;;  %9515 = vmatprep.mubr.bf16.mxu1 %v9307_v58  ;;  %v9241_v28 = vmax.f32 %v9169_v24, 0.0  ;;  %v14599_v33 = vld [vmem:[#allocation61_spill] sm:$0xff]  ;;  %v13867_v41 = vpop.f32.mrf.mxu1 }
 0x3af   : > { %v8711_v55 = vpop.f32.mrf.mxu0  ;;  %9516 = vmatmul.mubr.bf16.gmra.mxu1 %v9306_v7  ;;  %v8028_v14 = vadd.f32 %v14600_v63, %v14599_v33 }
 0x3b0   : > { %v9242_v51 = vmax.f32 %v9170_v59, 0.0  ;;  %v9171_v22 = vadd.f32 %v13814_v57, %v8943_v25  ;;  %v8944_v32 = vadd.f32 %v8711_v55, %v8025_v23  ;;  %v8029_v23 = vadd.f32 %v14602_v17, %v14601_v40  ;;  %v14606_v40 = vld [vmem:[#allocation66_spill] sm:$0xff] }
 0x3b1   : > { %v8713_v49 = vpop.f32.mrf.mxu0 }
 0x3b2   : > { %v9308_v10 = vpack.c.bf16 %v9242_v51, %v9240_v29  ;;  %v9243_v46 = vmax.f32 %v9171_v22, 0.0  ;;  %v8945_v5 = vadd.f32 %v8713_v49, %v8026_v54  ;;  %v9172_v7 = vadd.f32 %v13808_v39, %v8944_v32  ;;  %v13878_v49 = vpop.f32.mrf.mxu1 }
 0x3b3   : > { %v8715_v53 = vpop.f32.mrf.mxu0  ;;  %v8030_v54 = vadd.f32 %v13630_v38, %v14603_v48 }
 0x3b4   : > { %v8946_v34 = vadd.f32 %v8715_v53, %v8027_v16  ;;  %v9309_v58 = vpack.c.bf16 %v9243_v46, %v9241_v28  ;;  %v9173_v59 = vadd.f32 %v13814_v57, %v8945_v5  ;;  %v9244_v29 = vmax.f32 %v9172_v7, 0.0 }
 0x3b5   : > { %v8717_v19 = vpop.f32.mrf.mxu0  ;;  %v8031_v16 = vadd.f32 %v13643_v31, %v14604_v27  ;;  %v8033_v31 = vadd.f32 %v13662_v9, %v14606_v40 }
 0x3b6   : > { %v9174_v24 = vadd.f32 %v13808_v39, %v8946_v34  ;;  %v8947_v25 = vadd.f32 %v8717_v19, %v8028_v14  ;;  %9523 = vmatprep.mubr.bf16.mxu1 %v9309_v58  ;;  %v9245_v46 = vmax.f32 %v9173_v59, 0.0  ;;  %v14605_v14 = vld [vmem:[#allocation65_spill] sm:$0xff]  ;;  %v13883_v58 = vpop.f32.mrf.mxu1 }
 0x3b7   : > { %v8721_v55 = vpop.f32.mrf.mxu0  ;;  %9524 = vmatmul.mubr.bf16.gmra.mxu1 %v9308_v10  ;;  %v8032_v38 = vadd.f32 %v13651_v1, %v14605_v14 }
 0x3b8   : > { %v9246_v51 = vmax.f32 %v9174_v24, 0.0  ;;  %v9175_v22 = vadd.f32 %v13814_v57, %v8947_v25  ;;  %v8948_v32 = vadd.f32 %v8721_v55, %v8029_v23  ;;  %v14607_v24 = vld [vmem:[#allocation54_spill] sm:$0xff]  ;;  %v13894_v9 = vpop.f32.mrf.mxu1 }
 0x3b9   : > { %v8723_v28 = vpop.f32.mrf.mxu0  ;;  %v8034_v25 = vadd.f32 %v13670_v62, %v14607_v24 }
 0x3ba   : > { %v9310_v5 = vpack.c.bf16 %v9246_v51, %v9244_v29  ;;  %v9247_v53 = vmax.f32 %v9175_v22, 0.0  ;;  %v8949_v33 = vadd.f32 %v8723_v28, %v8030_v54  ;;  %v9176_v10 = vadd.f32 %v13808_v39, %v8948_v32  ;;  %v14608_v51 = vld [vmem:[#allocation55_spill] sm:$0xff] }
 0x3bb   : > { %v8725_v63 = vpop.f32.mrf.mxu0  ;;  %v8035_v22 = vadd.f32 %v13681_v56, %v14608_v51 }
 0x3bc   : > { %v8950_v7 = vadd.f32 %v8725_v63, %v8031_v16  ;;  %v9311_v34 = vpack.c.bf16 %v9247_v53, %v9245_v46  ;;  %v9177_v17 = vadd.f32 %v13814_v57, %v8949_v33  ;;  %v9248_v48 = vmax.f32 %v9176_v10, 0.0  ;;  %v14609_v33 = vld [vmem:[#allocation56_spill] sm:$0xff] }
 0x3bd   : > { %v8727_v19 = vpop.f32.mrf.mxu0  ;;  %v8036_v62 = vadd.f32 %v13688_v4, %v14609_v33 }
 0x3be   : > { %v9178_v23 = vadd.f32 %v13808_v39, %v8950_v7  ;;  %v8951_v59 = vadd.f32 %v8727_v19, %v8032_v38  ;;  %9531 = vmatprep.mubr.bf16.mxu1 %v9311_v34  ;;  %v9249_v27 = vmax.f32 %v9177_v17, 0.0  ;;  %v13899_v38 = vpop.f32.mrf.mxu1  ;;  %v14610_v7 = vld [vmem:[#allocation57_spill] sm:$0xff] }
 0x3bf   : > { %v8731_v1 = vpop.f32.mrf.mxu0  ;;  %9532 = vmatmul.mubr.bf16.gmra.mxu1 %v9310_v5  ;;  %v8037_v56 = vadd.f32 %v13698_v43, %v14610_v7 }
 0x3c0   : > { %v9250_v54 = vmax.f32 %v9178_v23, 0.0  ;;  %v9179_v55 = vadd.f32 %v13814_v57, %v8951_v59  ;;  %v8952_v29 = vadd.f32 %v8731_v1, %v8033_v31  ;;  %v14611_v31 = vld [vmem:[#allocation58_spill] sm:$0xff]  ;;  %v14612_v1 = vld [vmem:[#allocation59_spill] sm:$0xff]  ;;  %v13910_v43 = vpop.f32.mrf.mxu1 }
 0x3c1   : > { %v8733_v32 = vpop.f32.mrf.mxu0  ;;  %v8038_v17 = vadd.f32 %v13705_v2, %v14611_v31  ;;  %v14616_v31 = vld [vmem:[#allocation70_spill] sm:$0xff] }
 0x3c2   : > { %v9312_v16 = vpack.c.bf16 %v9250_v54, %v9248_v48  ;;  %v9251_v28 = vmax.f32 %v9179_v55, 0.0  ;;  %v8953_v46 = vadd.f32 %v8733_v32, %v8034_v25  ;;  %v9180_v5 = vadd.f32 %v13808_v39, %v8952_v29 }
 0x3c3   : > { %v8735_v53 = vpop.f32.mrf.mxu0  ;;  %v8039_v48 = vadd.f32 %v13715_v44, %v14612_v1 }
 0x3c4   : > { %v8954_v63 = vadd.f32 %v8735_v53, %v8035_v22  ;;  %v9313_v14 = vpack.c.bf16 %v9251_v28, %v9249_v27  ;;  %v9181_v34 = vadd.f32 %v13814_v57, %v8953_v46  ;;  %v9252_v23 = vmax.f32 %v9180_v5, 0.0  ;;  %v14613_v27 = vld [vmem:[#allocation60_spill] sm:$0xff]  ;;  %v13915_v53 = vpop.f32.mrf.mxu1 }
 0x3c5   : > { %v8737_v10 = vpop.f32.mrf.mxu0  ;;  %v8040_v2 = vadd.f32 %v13722_v42, %v14613_v27 }
 0x3c6   : > { %v9182_v19 = vadd.f32 %v13808_v39, %v8954_v63  ;;  %v8955_v40 = vadd.f32 %v8737_v10, %v8036_v62  ;;  %9539 = vmatprep.mubr.bf16.mxu1 %v9313_v14  ;;  %v9253_v55 = vmax.f32 %v9181_v34, 0.0  ;;  %v14614_v62 = vld [vmem:[#allocation16_spill] sm:$0xff]  ;;  %v14615_v10 = vld [vmem:[#allocation69_spill] sm:$0xff] }
 0x3c7   : > { %v8741_v4 = vpop.f32.mrf.mxu0  ;;  %9540 = vmatmul.mubr.bf16.gmra.mxu1 %v9312_v16  ;;  %v8041_v44 = vadd.f32 %v13732_v20, %v14614_v62  ;;  %v8042_v7 = vadd.f32 %v13739_v37, %v14615_v10  ;;  %v13926_v20 = vpop.f32.mrf.mxu1  ;;  %v8044_v37 = vadd.f32 %v13756_v45, %v13625_v18  ;;  %v14618_v62 = vld [vmem:[#allocation18_spill] sm:$0xff] }
 0x3c8   : > { %v9254_v59 = vmax.f32 %v9182_v19, 0.0  ;;  %v9183_v24 = vadd.f32 %v13814_v57, %v8955_v40  ;;  %v8956_v25 = vadd.f32 %v8741_v4, %v8037_v56 }
 0x3c9   : > { %v8743_v54 = vpop.f32.mrf.mxu0 }
 0x3ca   : > { %v9314_v29 = vpack.c.bf16 %v9254_v59, %v9252_v23  ;;  %v9255_v51 = vmax.f32 %v9183_v24, 0.0  ;;  %v8957_v22 = vadd.f32 %v8743_v54, %v8038_v17  ;;  %v9184_v16 = vadd.f32 %v13808_v39, %v8956_v25 }
 0x3cb   : > { %v8745_v32 = vpop.f32.mrf.mxu0  ;;  %v8043_v17 = vadd.f32 %v13749_v52, %v14616_v31 }
 0x3cc   : > { %v8958_v28 = vadd.f32 %v8745_v32, %v8039_v48  ;;  %v9315_v46 = vpack.c.bf16 %v9255_v51, %v9253_v55  ;;  %v9185_v5 = vadd.f32 %v13814_v57, %v8957_v22  ;;  %v9256_v56 = vmax.f32 %v9184_v16, 0.0  ;;  %v14617_v22 = vld [vmem:[#allocation17_spill] sm:$0xff] }
 0x3cd   : > { %v8747_v33 = vpop.f32.mrf.mxu0  ;;  %v8045_v52 = vadd.f32 %v13766_v13, %v14617_v22  ;;  %v8046_v16 = vadd.f32 %v13773_v26, %v13633_v47  ;;  %v8048_v47 = vadd.f32 %v13790_v60, %v13646_v3 }
 0x3ce   : > { %v9186_v63 = vadd.f32 %v13808_v39, %v8958_v28  ;;  %v8959_v14 = vadd.f32 %v8747_v33, %v8040_v2  ;;  %9547 = vmatprep.mubr.bf16.mxu1 %v9315_v46  ;;  %v9257_v23 = vmax.f32 %v9185_v5, 0.0 }
 0x3cf   : > { %v8751_v42 = vpop.f32.mrf.mxu0  ;;  %9548 = vmatmul.mubr.bf16.gmra.mxu1 %v9314_v29  ;;  %v13931_v29 = vpop.f32.mrf.mxu1 }
 0x3d0   : > { %v9258_v34 = vmax.f32 %v9186_v63, 0.0  ;;  %v9187_v19 = vadd.f32 %v13814_v57, %v8959_v14  ;;  %v8960_v40 = vadd.f32 %v8751_v42, %v8041_v44  ;;  %v8047_v44 = vadd.f32 %v13783_v36, %v14618_v62 }
 0x3d1   : > { %v8753_v4 = vpop.f32.mrf.mxu0  ;;  %v13942_v13 = vpop.f32.mrf.mxu1  ;;  %v8049_v36 = vadd.f32 %v13800_v6, %v13649_v8 }
 0x3d2   : > { %v9316_v59 = vpack.c.bf16 %v9258_v34, %v9256_v56  ;;  %v9259_v24 = vmax.f32 %v9187_v19, 0.0  ;;  %v8961_v25 = vadd.f32 %v8753_v4, %v8042_v7  ;;  %v9188_v48 = vadd.f32 %v13808_v39, %v8960_v40 }
 0x3d3   : > { %v8755_v1 = vpop.f32.mrf.mxu0  ;;  %v13947_v19 = vpop.f32.mrf.mxu1 }
 0x3d4   : > { %v8962_v54 = vadd.f32 %v8755_v1, %v8043_v17  ;;  %v9317_v55 = vpack.c.bf16 %v9259_v24, %v9257_v23  ;;  %v9189_v32 = vadd.f32 %v13814_v57, %v8961_v25  ;;  %v9260_v45 = vmax.f32 %v9188_v48, 0.0  ;;  %v14619_v1 = vld [vmem:[#allocation19_spill] sm:$0xff] }
 0x3d5   : > { %v8757_v51 = vpop.f32.mrf.mxu0  ;;  %v8050_v23 = vadd.f32 %v13810_v61, %v13654_v50  ;;  %v13958_v8 = vpop.f32.mrf.mxu1 }
 0x3d6   : > { %v9190_v27 = vadd.f32 %v13808_v39, %v8962_v54  ;;  %v8963_v2 = vadd.f32 %v8757_v51, %v8044_v37  ;;  %9555 = vmatprep.mubr.bf16.mxu1 %v9317_v55  ;;  %v9261_v63 = vmax.f32 %v9189_v32, 0.0  ;;  %v8051_v37 = vadd.f32 %v13819_v11, %v14619_v1  ;;  %v14626_v1 = vld [vmem:[#allocation77_spill] sm:$0xff] }
 0x3d7   : > { %v8761_v18 = vpop.f32.mrf.mxu0  ;;  %9556 = vmatmul.mubr.bf16.gmra.mxu1 %v9316_v59 }
 0x3d8   : > { %v9262_v28 = vmax.f32 %v9190_v27, 0.0  ;;  %v9191_v46 = vadd.f32 %v13814_v57, %v8963_v2  ;;  %v8964_v33 = vadd.f32 %v8761_v18, %v8045_v52  ;;  %v14620_v52 = vld [vmem:[#allocation20_spill] sm:$0xff]  ;;  %v13963_v2 = vpop.f32.mrf.mxu1 }
 0x3d9   : > { %v8763_v5 = vpop.f32.mrf.mxu0  ;;  %v8052_v50 = vadd.f32 %v13830_v35, %v14620_v52  ;;  %v14621_v18 = vld [vmem:[#allocation72_spill] sm:$0xff] }
 0x3da   : > { %v9318_v14 = vpack.c.bf16 %v9262_v28, %v9260_v45  ;;  %v9263_v10 = vmax.f32 %v9191_v46, 0.0  ;;  %v8965_v7 = vadd.f32 %v8763_v5, %v8046_v16  ;;  %v9192_v26 = vadd.f32 %v13808_v39, %v8964_v33  ;;  %v14622_v33 = vld [vmem:[#allocation73_spill] sm:$0xff] }
 0x3db   : > { %v8765_v42 = vpop.f32.mrf.mxu0  ;;  %v8053_v11 = vadd.f32 %v13835_v12, %v14621_v18  ;;  %v8054_v62 = vadd.f32 %v13846_v21, %v14622_v33  ;;  %v13974_v12 = vpop.f32.mrf.mxu1  ;;  %v14628_v18 = vld [vmem:[#allocation21_spill] sm:$0xff] }
 0x3dc   : > { %v8966_v56 = vadd.f32 %v8765_v42, %v8047_v44  ;;  %v9319_v34 = vpack.c.bf16 %v9263_v10, %v9261_v63  ;;  %v9193_v31 = vadd.f32 %v13814_v57, %v8965_v7  ;;  %v9264_v60 = vmax.f32 %v9192_v26, 0.0  ;;  %v14623_v10 = vld [vmem:[#allocation74_spill] sm:$0xff] }
 0x3dd   : > { %v8767_v40 = vpop.f32.mrf.mxu0  ;;  %v8055_v7 = vadd.f32 %v13851_v30, %v14623_v10 }
 0x3de   : > { %v9194_v17 = vadd.f32 %v13808_v39, %v8966_v56  ;;  %v8967_v4 = vadd.f32 %v8767_v40, %v8048_v47  ;;  %9563 = vmatprep.mubr.bf16.mxu1 %v9319_v34  ;;  %v9265_v48 = vmax.f32 %v9193_v31, 0.0 }
 0x3df   : > { %v8771_v3 = vpop.f32.mrf.mxu0  ;;  %9564 = vmatmul.mubr.bf16.gmra.mxu1 %v9318_v14 }
 0x3e0   : > { %v9266_v59 = vmax.f32 %v9194_v17, 0.0  ;;  %v9195_v24 = vadd.f32 %v13814_v57, %v8967_v4  ;;  %v8968_v25 = vadd.f32 %v8771_v3, %v8049_v36  ;;  %v14624_v36 = vld [vmem:[#allocation75_spill] sm:$0xff] }
 0x3e1   : > { %v8773_v6 = vpop.f32.mrf.mxu0  ;;  %v8056_v21 = vadd.f32 %v13862_v15, %v14624_v36 }
 0x3e2   : > { %v9320_v54 = vpack.c.bf16 %v9266_v59, %v9264_v60  ;;  %v9267_v55 = vmax.f32 %v9195_v24, 0.0  ;;  %v8969_v51 = vadd.f32 %v8773_v6, %v8050_v23  ;;  %v9196_v61 = vadd.f32 %v13808_v39, %v8968_v25  ;;  %v13979_v23 = vpop.f32.mrf.mxu1  ;;  %v14625_v60 = vld [vmem:[#allocation76_spill] sm:$0xff] }
 0x3e3   : > { %v8775_v22 = vpop.f32.mrf.mxu0  ;;  %v8057_v30 = vadd.f32 %v13867_v41, %v14625_v60 }
 0x3e4   : > { %v8970_v32 = vadd.f32 %v8775_v22, %v8051_v37  ;;  %v9321_v27 = vpack.c.bf16 %v9267_v55, %v9265_v48  ;;  %v9197_v45 = vadd.f32 %v13814_v57, %v8969_v51  ;;  %v9268_v44 = vmax.f32 %v9196_v61, 0.0  ;;  %v14627_v51 = vld [vmem:[#allocation22_spill] sm:$0xff]  ;;  %v13990_v41 = vpop.f32.mrf.mxu1 }
 0x3e5   : > { %v8777_v16 = vpop.f32.mrf.mxu0  ;;  %v8058_v37 = vadd.f32 %v13878_v49, %v14626_v1  ;;  %v8059_v22 = vadd.f32 %v13883_v58, %v14627_v51  ;;  %v8060_v49 = vadd.f32 %v13894_v9, %v14628_v18 }
 0x3e6   : > { %v9198_v28 = vadd.f32 %v13808_v39, %v8970_v32  ;;  %v8971_v46 = vadd.f32 %v8777_v16, %v8052_v50  ;;  %9571 = vmatprep.mubr.bf16.mxu1 %v9321_v27  ;;  %v9269_v47 = vmax.f32 %v9197_v45, 0.0 }
 0x3e7   : > { %v8781_v35 = vpop.f32.mrf.mxu0  ;;  %9572 = vmatmul.mubr.bf16.gmra.mxu1 %v9320_v54 }
 0x3e8   : > { %v9270_v5 = vmax.f32 %v9198_v28, 0.0  ;;  %v9199_v63 = vadd.f32 %v13814_v57, %v8971_v46  ;;  %v8972_v14 = vadd.f32 %v8781_v35, %v8053_v11  ;;  %v13995_v46 = vpop.f32.mrf.mxu1 }
 0x3e9   : > { %v8783_v42 = vpop.f32.mrf.mxu0 }
 0x3ea   : > { %v9322_v26 = vpack.c.bf16 %v9270_v5, %v9268_v44  ;;  %v9271_v56 = vmax.f32 %v9199_v63, 0.0  ;;  %v8973_v34 = vadd.f32 %v8783_v42, %v8054_v62  ;;  %v9200_v31 = vadd.f32 %v13808_v39, %v8972_v14  ;;  %v14629_v62 = vld [vmem:[#allocation23_spill] sm:$0xff]  ;;  %v14630_v63 = vld [vmem:[#allocation24_spill] sm:$0xff] }
 0x3eb   : > { %v8785_v40 = vpop.f32.mrf.mxu0  ;;  %v8061_v58 = vadd.f32 %v13899_v38, %v14629_v62  ;;  %v8062_v14 = vadd.f32 %v13910_v43, %v14630_v63  ;;  %v14006_v38 = vpop.f32.mrf.mxu1 }
 0x3ec   : > { %v8974_v17 = vadd.f32 %v8785_v40, %v8055_v7  ;;  %v9323_v4 = vpack.c.bf16 %v9271_v56, %v9269_v47  ;;  %v9201_v59 = vadd.f32 %v13814_v57, %v8973_v34  ;;  %v9272_v6 = vmax.f32 %v9200_v31, 0.0 }
 0x3ed   : > { %v8787_v3 = vpop.f32.mrf.mxu0 }
 0x3ee   : > { %v9202_v24 = vadd.f32 %v13808_v39, %v8974_v17  ;;  %v8975_v25 = vadd.f32 %v8787_v3, %v8056_v21  ;;  %9579 = vmatprep.mubr.bf16.mxu1 %v9323_v4  ;;  %v9273_v50 = vmax.f32 %v9201_v59, 0.0  ;;  %v14632_v4 = vld [vmem:[#allocation26_spill] sm:$0xff]  ;;  %v14011_v59 = vpop.f32.mrf.mxu1 }
 0x3ef   : > { %v8791_v15 = vpop.f32.mrf.mxu0  ;;  %9580 = vmatmul.mubr.bf16.gmra.mxu1 %v9322_v26  ;;  %v14631_v26 = vld [vmem:[#allocation25_spill] sm:$0xff]  ;;  %v8064_v43 = vadd.f32 %v13926_v20, %v14632_v4  ;;  %v14640_v4 = vld [vmem:[#allocation34_spill] sm:$0xff] }
 0x3f0   : > { %v9274_v48 = vmax.f32 %v9202_v24, 0.0  ;;  %v9203_v54 = vadd.f32 %v13814_v57, %v8975_v25  ;;  %v8976_v55 = vadd.f32 %v8791_v15, %v8057_v30  ;;  %v8063_v56 = vadd.f32 %v13915_v53, %v14631_v26  ;;  %v14633_v25 = vld [vmem:[#allocation27_spill] sm:$0xff]  ;;  %v14639_v26 = vld [vmem:[#allocation33_spill] sm:$0xff] }
 0x3f1   : > { %v8793_v52 = vpop.f32.mrf.mxu0  ;;  %v8065_v53 = vadd.f32 %v13931_v29, %v14633_v25  ;;  %v7918_v29 = vpop.f32.mrf.mxu1  ;;  %v14641_v25 = vld [vmem:[#allocation36_spill] sm:$0xff] }
 0x3f2   : > { %v9324_v61 = vpack.c.bf16 %v9274_v48, %v9272_v6  ;;  %v9275_v32 = vmax.f32 %v9203_v54, 0.0  ;;  %v8977_v27 = vadd.f32 %v8793_v52, %v8058_v37  ;;  %v9204_v11 = vadd.f32 %v13808_v39, %v8976_v55  ;;  %v14634_v6 = vld [vmem:[#allocation28_spill] sm:$0xff]  ;;  %v14635_v52 = vld [vmem:[#allocation29_spill] sm:$0xff] }
 0x3f3   : > { %v8795_v16 = vpop.f32.mrf.mxu0  ;;  %v8066_v48 = vadd.f32 %v13942_v13, %v14634_v6  ;;  %v7922_v62 = vpop.f32.mrf.mxu1 }
 0x3f4   : > { %v8978_v45 = vadd.f32 %v8795_v16, %v8059_v22  ;;  %v9325_v28 = vpack.c.bf16 %v9275_v32, %v9273_v50  ;;  %v9205_v35 = vadd.f32 %v13814_v57, %v8977_v27  ;;  %v9276_v10 = vmax.f32 %v9204_v11, 0.0  ;;  %v14636_v11 = vld [vmem:[#allocation31_spill] sm:$0xff] }
 0x3f5   : > { %v8797_v33 = vpop.f32.mrf.mxu0  ;;  %v8067_v50 = vadd.f32 %v13947_v19, %v14635_v52  ;;  %v8068_v13 = vadd.f32 %v13958_v8, %v14636_v11 }
 0x3f6   : > { %v9206_v44 = vadd.f32 %v13808_v39, %v8978_v45  ;;  %v8979_v5 = vadd.f32 %v8797_v33, %v8060_v49  ;;  %9587 = vmatprep.mubr.bf16.mxu1 %v9325_v28  ;;  %v9277_v40 = vmax.f32 %v9205_v35, 0.0  ;;  %v14637_v35 = vld [vmem:[#allocation30_spill] sm:$0xff] }
 0x3f7   : > { %v8801_v9 = vpop.f32.mrf.mxu0  ;;  %9588 = vmatmul.mubr.bf16.gmra.mxu1 %v9324_v61 }
 0x3f8   : > { %v9278_v7 = vmax.f32 %v9206_v44, 0.0  ;;  %v9207_v42 = vadd.f32 %v13814_v57, %v8979_v5  ;;  %v8980_v47 = vadd.f32 %v8801_v9, %v8061_v58  ;;  %v8069_v44 = vadd.f32 %v13963_v2, %v14637_v35  ;;  %v7924_v2 = vpop.f32.mrf.mxu1 }
 0x3f9   : > { %v8803_v34 = vpop.f32.mrf.mxu0 }
 0x3fa   : > { %v9326_v36 = vpack.c.bf16 %v9278_v7, %v9276_v10  ;;  %v9279_v21 = vmax.f32 %v9207_v42, 0.0  ;;  %v8981_v31 = vadd.f32 %v8803_v34, %v8062_v14  ;;  %v9208_v3 = vadd.f32 %v13808_v39, %v8980_v47  ;;  %v14638_v14 = vld [vmem:[#allocation32_spill] sm:$0xff] }
 0x3fb   : > { %v8805_v17 = vpop.f32.mrf.mxu0  ;;  %v8070_v9 = vadd.f32 %v13974_v12, %v14638_v14  ;;  %v8072_v12 = vadd.f32 %v13990_v41, %v14640_v4 }
 0x3fc   : > { %v8982_v60 = vadd.f32 %v8805_v17, %v8063_v56  ;;  %v9327_v30 = vpack.c.bf16 %v9279_v21, %v9277_v40  ;;  %v9209_v1 = vadd.f32 %v13814_v57, %v8981_v31  ;;  %v9280_v54 = vmax.f32 %v9208_v3, 0.0 }
 0x3fd   : > { %v8807_v24 = vpop.f32.mrf.mxu0  ;;  %v8071_v56 = vadd.f32 %v13979_v23, %v14639_v26 }
 0x3fe   : > { %v9210_v37 = vadd.f32 %v13808_v39, %v8982_v60  ;;  %v8983_v15 = vadd.f32 %v8807_v24, %v8064_v43  ;;  %9595 = vmatprep.mubr.bf16.mxu1 %v9327_v30  ;;  %v9281_v32 = vmax.f32 %v9209_v1, 0.0  ;;  %v7926_v30 = vpop.f32.mrf.mxu1 }
 0x3ff   : > { %v8811_v20 = vpop.f32.mrf.mxu0  ;;  %9596 = vmatmul.mubr.bf16.gmra.mxu1 %v9326_v36 }
 0x400   : > { %v9282_v55 = vmax.f32 %v9210_v37, 0.0  ;;  %v9211_v51 = vadd.f32 %v13814_v57, %v8983_v15  ;;  %v8984_v22 = vadd.f32 %v8811_v20, %v8065_v53  ;;  %v8073_v53 = vadd.f32 %v13995_v46, %v14641_v25  ;;  %v14642_v15 = vld [vmem:[#allocation35_spill] sm:$0xff]  ;;  %v7928_v46 = vpop.f32.mrf.mxu1 }
 0x401   : > { %v8813_v61 = vpop.f32.mrf.mxu0  ;;  %v8074_v6 = vadd.f32 %v14006_v38, %v14642_v15  ;;  %v14650_v25 = vld [vmem:[#allocation43_spill] sm:$0xff] }
 0x402   : > { %v9328_v27 = vpack.c.bf16 %v9282_v55, %v9280_v54  ;;  %v9283_v16 = vmax.f32 %v9211_v51, 0.0  ;;  %v8985_v18 = vadd.f32 %v8813_v61, %v8066_v48  ;;  %v9212_v45 = vadd.f32 %v13808_v39, %v8984_v22  ;;  %v14643_v51 = vld [vmem:[#allocation37_spill] sm:$0xff] }
 0x403   : > { %v8815_v49 = vpop.f32.mrf.mxu0  ;;  %v8075_v22 = vadd.f32 %v14011_v59, %v14643_v51 }
 0x404   : > { %v8986_v28 = vadd.f32 %v8815_v49, %v8067_v50  ;;  %v9329_v33 = vpack.c.bf16 %v9283_v16, %v9281_v32  ;;  %v9213_v19 = vadd.f32 %v13814_v57, %v8985_v18  ;;  %v9284_v8 = vmax.f32 %v9212_v45, 0.0  ;;  %v14644_v18 = vld [vmem:[#allocation38_spill] sm:$0xff]  ;;  %v7932_v45 = vpop.f32.mrf.mxu1 }
 0x405   : > { %v8817_v58 = vpop.f32.mrf.mxu0  ;;  %v8076_v49 = vadd.f32 %v7918_v29, %v14644_v18 }
 0x406   : > { %v9214_v5 = vadd.f32 %v13808_v39, %v8986_v28  ;;  %v8987_v63 = vadd.f32 %v8817_v58, %v8068_v13  ;;  %9603 = vmatprep.mubr.bf16.mxu1 %v9329_v33  ;;  %v9285_v40 = vmax.f32 %v9213_v19, 0.0  ;;  %v14645_v33 = vld [vmem:[#allocation39_spill] sm:$0xff]  ;;  %v14646_v19 = vld [vmem:[#allocation41_spill] sm:$0xff] }
 0x407   : > { %v8821_v10 = vpop.f32.mrf.mxu0  ;;  %9604 = vmatmul.mubr.bf16.gmra.mxu1 %v9328_v27  ;;  %v8077_v58 = vadd.f32 %v7922_v62, %v14645_v33 }
 0x408   : > { %v9286_v7 = vmax.f32 %v9214_v5, 0.0  ;;  %v9215_v42 = vadd.f32 %v13814_v57, %v8987_v63  ;;  %v8988_v47 = vadd.f32 %v8821_v10, %v8069_v44  ;;  %v8078_v5 = vadd.f32 %v7924_v2, %v14646_v19 }
 0x409   : > { %v8823_v34 = vpop.f32.mrf.mxu0 }
 0x40a   : > { %v9330_v36 = vpack.c.bf16 %v9286_v7, %v9284_v8  ;;  %v9287_v21 = vmax.f32 %v9215_v42, 0.0  ;;  %v8989_v31 = vadd.f32 %v8823_v34, %v8070_v9  ;;  %v9216_v43 = vadd.f32 %v13808_v39, %v8988_v47  ;;  %v14647_v8 = vld [vmem:[#allocation40_spill] sm:$0xff]  ;;  %v7934_v42 = vpop.f32.mrf.mxu1 }
 0x40b   : > { %v8825_v17 = vpop.f32.mrf.mxu0  ;;  %v8079_v7 = vadd.f32 %v7926_v30, %v14647_v8 }
 0x40c   : > { %v8990_v3 = vadd.f32 %v8825_v17, %v8071_v56  ;;  %v9331_v60 = vpack.c.bf16 %v9287_v21, %v9285_v40  ;;  %v9217_v23 = vadd.f32 %v13814_v57, %v8989_v31  ;;  %v9288_v41 = vmax.f32 %v9216_v43, 0.0  ;;  %v7936_v4 = vpop.f32.mrf.mxu1  ;;  %v14649_v43 = vld [vmem:[#allocation44_spill] sm:$0xff] }
 0x40d   : > { %v8827_v24 = vpop.f32.mrf.mxu0 }
 0x40e   : > { %v9218_v1 = vadd.f32 %v13808_v39, %v8990_v3  ;;  %v8991_v37 = vadd.f32 %v8827_v24, %v8072_v12  ;;  %9611 = vmatprep.mubr.bf16.mxu1 %v9331_v60  ;;  %v9289_v50 = vmax.f32 %v9217_v23, 0.0  ;;  %v8081_v3 = vadd.f32 %v7932_v45, %v14649_v43 }
 0x40f   : > { %v8831_v48 = vpop.f32.mrf.mxu0  ;;  %9612 = vmatmul.mubr.bf16.gmra.mxu1 %v9330_v36  ;;  %v14648_v36 = vld [vmem:[#allocation42_spill] sm:$0xff] }
 0x410   : > { %v9290_v20 = vmax.f32 %v9218_v1, 0.0  ;;  %v9219_v54 = vadd.f32 %v13814_v57, %v8991_v37  ;;  %v8992_v55 = vadd.f32 %v8831_v48, %v8073_v53  ;;  %v8080_v21 = vadd.f32 %v7928_v46, %v14648_v36  ;;  %v14651_v48 = vld [vmem:[#allocation45_spill] sm:$0xff] }
 0x411   : > { %v8833_v52 = vpop.f32.mrf.mxu0  ;;  %v8082_v53 = vadd.f32 %v7934_v42, %v14650_v25 }
 0x412   : > { %v9332_v61 = vpack.c.bf16 %v9290_v20, %v9288_v41  ;;  %v9291_v32 = vmax.f32 %v9219_v54, 0.0  ;;  %v8993_v27 = vadd.f32 %v8833_v52, %v8074_v6  ;;  %v9220_v38 = vadd.f32 %v13808_v39, %v8992_v55  ;;  %v7938_v20 = vpop.f32.mrf.mxu1 }
 0x413   : > { %v8835_v16 = vpop.f32.mrf.mxu0  ;;  %v8083_v41 = vadd.f32 %v7936_v4, %v14651_v48 }
 0x414   : > { %v8994_v11 = vadd.f32 %v8835_v16, %v8075_v22  ;;  %v9333_v13 = vpack.c.bf16 %v9291_v32, %v9289_v50  ;;  %v9221_v35 = vadd.f32 %v13814_v57, %v8993_v27  ;;  %v9292_v14 = vmax.f32 %v9220_v38, 0.0 }
 0x415   : > { %v8837_v28 = vpop.f32.mrf.mxu0  ;;  %v8084_v50 = vadd.f32 %v7938_v20, %v13804_v0 }
 0x416   : > { %v9222_v59 = vadd.f32 %v13808_v39, %v8994_v11  ;;  %v8995_v44 = vadd.f32 %v8837_v28, %v8076_v49  ;;  %9619 = vmatprep.mubr.bf16.mxu1 %v9333_v13  ;;  %v9293_v62 = vmax.f32 %v9221_v35, 0.0  ;;  %v14070_v35 = vld [vmem:[#allocation9] ss:$0 sm:$0xff] }
 0x417   : > { %v8841_v63 = vpop.f32.mrf.mxu0  ;;  %9620 = vmatmul.mubr.bf16.gmra.mxu1 %v9332_v61 }
 0x418   : > { %v9294_v29 = vmax.f32 %v9222_v59, 0.0  ;;  %v9223_v9 = vadd.f32 %v13814_v57, %v8995_v44  ;;  %v8996_v10 = vadd.f32 %v8841_v63, %v8077_v58 }
 0x419   : > { %v8843_v47 = vpop.f32.mrf.mxu0 }
 0x41a   : > { %v9334_v26 = vpack.c.bf16 %v9294_v29, %v9292_v14  ;;  %v9295_v56 = vmax.f32 %v9223_v9, 0.0  ;;  %v8997_v34 = vadd.f32 %v8843_v47, %v8078_v5  ;;  %v9224_v2 = vadd.f32 %v13808_v39, %v8996_v10 }
 0x41b   : > { %v8845_v40 = vpop.f32.mrf.mxu0 }
 0x41c   : > { %v8998_v31 = vadd.f32 %v8845_v40, %v8079_v7  ;;  %v9335_v17 = vpack.c.bf16 %v9295_v56, %v9293_v62  ;;  %v9225_v60 = vadd.f32 %v13814_v57, %v8997_v34  ;;  %v9296_v1 = vmax.f32 %v9224_v2, 0.0 }
 0x41d   : > { %v8847_v12 = vpop.f32.mrf.mxu0 }
 0x41e   : > { %v9226_v30 = vadd.f32 %v13808_v39, %v8998_v31  ;;  %v8999_v24 = vadd.f32 %v8847_v12, %v8080_v21  ;;  %9627 = vmatprep.mubr.bf16.mxu1 %v9335_v17  ;;  %v9297_v55 = vmax.f32 %v9225_v60, 0.0 }
 0x41f   : > { %v8851_v23 = vpop.f32.mrf.mxu0  ;;  %9628 = vmatmul.mubr.bf16.gmra.mxu1 %v9334_v26 }
 0x420   : > { %v9298_v37 = vmax.f32 %v9226_v30, 0.0  ;;  %v9227_v15 = vadd.f32 %v13814_v57, %v8999_v24  ;;  %v9000_v6 = vadd.f32 %v8851_v23, %v8081_v3 }
 0x421   : > { %v8853_v54 = vpop.f32.mrf.mxu0 }
 0x422   : > { %v9336_v51 = vpack.c.bf16 %v9298_v37, %v9296_v1  ;;  %v9299_v22 = vmax.f32 %v9227_v15, 0.0  ;;  %v9001_v46 = vadd.f32 %v8853_v54, %v8082_v53  ;;  %v9228_v61 = vadd.f32 %v13808_v39, %v9000_v6 }
 0x423   : > { %v8855_v52 = vpop.f32.mrf.mxu0 }
 0x424   : > { %v9002_v32 = vadd.f32 %v8855_v52, %v8083_v41  ;;  %v9337_v27 = vpack.c.bf16 %v9299_v22, %v9297_v55  ;;  %v9229_v18 = vadd.f32 %v13814_v57, %v9001_v46  ;;  %v9300_v11 = vmax.f32 %v9228_v61, 0.0 }
 0x425   : > { %v8857_v16 = vpop.f32.mrf.mxu0 }
 0x426   : > { %v9230_v49 = vadd.f32 %v13808_v39, %v9002_v32  ;;  %v9003_v38 = vadd.f32 %v8857_v16, %v8084_v50  ;;  %9635 = vmatprep.mubr.bf16.mxu1 %v9337_v27  ;;  %v9301_v28 = vmax.f32 %v9229_v18, 0.0 }
 0x427   : > { %9636 = vmatmul.mubr.bf16.gmra.mxu1 %v9336_v51 }
 0x428   : > { %v9302_v13 = vmax.f32 %v9230_v49, 0.0  ;;  %v9231_v45 = vadd.f32 %v13814_v57, %v9003_v38 }
 0x42a   : > { %v9338_v0 = vpack.c.bf16 %v9302_v13, %v9300_v11  ;;  %v9303_v33 = vmax.f32 %v9231_v45, 0.0 }
 0x42c   : > { %v9339_v58 = vpack.c.bf16 %v9303_v33, %v9301_v28 }
 0x42e   : > { %9643 = vmatprep.mubr.bf16.mxu1 %v9339_v58 }
 0x42f   : > { %9644 = vmatmul.mubr.bf16.gmra.mxu1 %v9338_v0 }
 0x467   : > { %v9509_v59 = vpop.f32.mrf.mxu1 }
 0x468   : > { %v9510_v39 = vadd.f32 %v14070_v35, %v9509_v59 }
 0x469   : > { %v9511_v44 = vpop.f32.mrf.mxu1 }
 0x46a   : > { %9652 = vst [vmem:[%s14073_s8] sm:$0xff] %v9510_v39 }
 0x46b   : > { %v9512_v57 = vpop.f32.mrf.mxu1 }
 0x46c   : > { %v9513_v19 = vadd.f32 %v14070_v35, %v9512_v57 }
 0x46d   : > { %v9514_v5 = vpop.f32.mrf.mxu1 }
 0x46e   : > { %9653 = vst [vmem:[%s14073_s8 + $0x8] sm:$0xff] %v9513_v19 }
 0x46f   : > { %v9517_v63 = vpop.f32.mrf.mxu1 }
 0x470   : > { %v9518_v14 = vadd.f32 %v14070_v35, %v9517_v63 }
 0x471   : > { %v9519_v29 = vpop.f32.mrf.mxu1 }
 0x472   : > { %9654 = vst [vmem:[%s14073_s8 + $0x10] sm:$0xff] %v9518_v14 }
 0x473   : > { %v9520_v9 = vpop.f32.mrf.mxu1 }
 0x474   : > { %v9521_v10 = vadd.f32 %v14070_v35, %v9520_v9 }
 0x475   : > { %v9522_v8 = vpop.f32.mrf.mxu1 }
 0x476   : > { %9655 = vst [vmem:[%s14073_s8 + $0x18] sm:$0xff] %v9521_v10 }
 0x477   : > { %v9525_v7 = vpop.f32.mrf.mxu1 }
 0x478   : > { %v9526_v42 = vadd.f32 %v14070_v35, %v9525_v7 }
 0x479   : > { %v9527_v47 = vpop.f32.mrf.mxu1 }
 0x47a   : > { %9656 = vst [vmem:[%s14073_s8 + $0x20] sm:$0xff] %v9526_v42 }
 0x47b   : > { %v9528_v62 = vpop.f32.mrf.mxu1 }
 0x47c   : > { %v9529_v26 = vadd.f32 %v14070_v35, %v9528_v62 }
 0x47d   : > { %v9530_v56 = vpop.f32.mrf.mxu1 }
 0x47e   : > { %9657 = vst [vmem:[%s14073_s8 + $0x28] sm:$0xff] %v9529_v26 }
 0x47f   : > { %v9533_v34 = vpop.f32.mrf.mxu1 }
 0x480   : > { %v9534_v40 = vadd.f32 %v14070_v35, %v9533_v34 }
 0x481   : > { %v9535_v36 = vpop.f32.mrf.mxu1 }
 0x482   : > { %9658 = vst [vmem:[%s14073_s8 + $0x30] sm:$0xff] %v9534_v40 }
 0x483   : > { %v9536_v21 = vpop.f32.mrf.mxu1 }
 0x484   : > { %v9537_v2 = vadd.f32 %v14070_v35, %v9536_v21 }
 0x485   : > { %v9538_v31 = vpop.f32.mrf.mxu1 }
 0x486   : > { %9659 = vst [vmem:[%s14073_s8 + $0x38] sm:$0xff] %v9537_v2 }
 0x487   : > { %v9541_v17 = vpop.f32.mrf.mxu1 }
 0x488   : > { %v9542_v4 = vadd.f32 %v14070_v35, %v9541_v17 }
 0x489   : > { %v9543_v12 = vpop.f32.mrf.mxu1 }
 0x48a   : > { %9660 = vst [vmem:[%s14073_s8 + $0x40] sm:$0xff] %v9542_v4 }
 0x48b   : > { %v9544_v43 = vpop.f32.mrf.mxu1 }
 0x48c   : > { %v9545_v3 = vadd.f32 %v14070_v35, %v9544_v43 }
 0x48d   : > { %v9546_v60 = vpop.f32.mrf.mxu1 }
 0x48e   : > { %9661 = vst [vmem:[%s14073_s8 + $0x48] sm:$0xff] %v9545_v3 }
 0x48f   : > { %v9549_v30 = vpop.f32.mrf.mxu1 }
 0x490   : > { %v9550_v24 = vadd.f32 %v14070_v35, %v9549_v30 }
 0x491   : > { %v9551_v25 = vpop.f32.mrf.mxu1 }
 0x492   : > { %9662 = vst [vmem:[%s14073_s8 + $0x50] sm:$0xff] %v9550_v24 }
 0x493   : > { %v9552_v53 = vpop.f32.mrf.mxu1 }
 0x494   : > { %v9553_v23 = vadd.f32 %v14070_v35, %v9552_v53 }
 0x495   : > { %v9554_v1 = vpop.f32.mrf.mxu1 }
 0x496   : > { %9663 = vst [vmem:[%s14073_s8 + $0x58] sm:$0xff] %v9553_v23 }
 0x497   : > { %v9557_v37 = vpop.f32.mrf.mxu1 }
 0x498   : > { %v9558_v15 = vadd.f32 %v14070_v35, %v9557_v37 }
 0x499   : > { %v9559_v6 = vpop.f32.mrf.mxu1 }
 0x49a   : > { %9664 = vst [vmem:[%s14073_s8 + $0x60] sm:$0xff] %v9558_v15 }
 0x49b   : > { %v9560_v48 = vpop.f32.mrf.mxu1 }
 0x49c   : > { %v9561_v41 = vadd.f32 %v14070_v35, %v9560_v48 }
 0x49d   : > { %v9562_v20 = vpop.f32.mrf.mxu1 }
 0x49e   : > { %9665 = vst [vmem:[%s14073_s8 + $0x68] sm:$0xff] %v9561_v41 }
 0x49f   : > { %v9565_v54 = vpop.f32.mrf.mxu1 }
 0x4a0   : > { %v9566_v55 = vadd.f32 %v14070_v35, %v9565_v54 }
 0x4a1   : > { %v9567_v51 = vpop.f32.mrf.mxu1 }
 0x4a2   : > { %9666 = vst [vmem:[%s14073_s8 + $0x70] sm:$0xff] %v9566_v55 }
 0x4a3   : > { %v9568_v22 = vpop.f32.mrf.mxu1 }
 0x4a4   : > { %v9569_v46 = vadd.f32 %v14070_v35, %v9568_v22 }
 0x4a5   : > { %v9570_v52 = vpop.f32.mrf.mxu1 }
 0x4a6   : > { %9667 = vst [vmem:[%s14073_s8 + $0x78] sm:$0xff] %v9569_v46 }
 0x4a7   : > { %v9573_v50 = vpop.f32.mrf.mxu1 }
 0x4a8   : > { %v9574_v61 = vadd.f32 %v14070_v35, %v9573_v50 }
 0x4a9   : > { %v9575_v32 = vpop.f32.mrf.mxu1 }
 0x4aa   : > { %9668 = vst [vmem:[%s14073_s8 + $0x80] sm:$0xff] %v9574_v61 }
 0x4ab   : > { %v9576_v27 = vpop.f32.mrf.mxu1 }
 0x4ac   : > { %v9577_v16 = vadd.f32 %v14070_v35, %v9576_v27 }
 0x4ad   : > { %v9578_v18 = vpop.f32.mrf.mxu1 }
 0x4ae   : > { %9669 = vst [vmem:[%s14073_s8 + $0x88] sm:$0xff] %v9577_v16 }
 0x4af   : > { %v9581_v49 = vpop.f32.mrf.mxu1 }
 0x4b0   : > { %v9582_v38 = vadd.f32 %v14070_v35, %v9581_v49 }
 0x4b1   : > { %v9583_v11 = vpop.f32.mrf.mxu1 }
 0x4b2   : > { %9670 = vst [vmem:[%s14073_s8 + $0x90] sm:$0xff] %v9582_v38 }
 0x4b3   : > { %v9584_v13 = vpop.f32.mrf.mxu1 }
 0x4b4   : > { %v9585_v45 = vadd.f32 %v14070_v35, %v9584_v13 }
 0x4b5   : > { %v9586_v28 = vpop.f32.mrf.mxu1 }
 0x4b6   : > { %9671 = vst [vmem:[%s14073_s8 + $0x98] sm:$0xff] %v9585_v45 }
 0x4b7   : > { %v9589_v0 = vpop.f32.mrf.mxu1 }
 0x4b8   : > { %v9590_v33 = vadd.f32 %v14070_v35, %v9589_v0 }
 0x4b9   : > { %v9591_v58 = vpop.f32.mrf.mxu1 }
 0x4ba   : > { %9672 = vst [vmem:[%s14073_s8 + $0xa0] sm:$0xff] %v9590_v33 }
 0x4bb   : > { %v9592_v59 = vpop.f32.mrf.mxu1 }
 0x4bc   : > { %v9593_v39 = vadd.f32 %v14070_v35, %v9592_v59 }
 0x4bd   : > { %v9594_v44 = vpop.f32.mrf.mxu1 }
 0x4be   : > { %9673 = vst [vmem:[%s14073_s8 + $0xa8] sm:$0xff] %v9593_v39 }
 0x4bf   : > { %v9597_v57 = vpop.f32.mrf.mxu1 }
 0x4c0   : > { %v9598_v19 = vadd.f32 %v14070_v35, %v9597_v57 }
 0x4c1   : > { %v9599_v5 = vpop.f32.mrf.mxu1 }
 0x4c2   : > { %9674 = vst [vmem:[%s14073_s8 + $0xb0] sm:$0xff] %v9598_v19 }
 0x4c3   : > { %v9600_v63 = vpop.f32.mrf.mxu1 }
 0x4c4   : > { %v9601_v14 = vadd.f32 %v14070_v35, %v9600_v63 }
 0x4c5   : > { %v9602_v29 = vpop.f32.mrf.mxu1 }
 0x4c6   : > { %9675 = vst [vmem:[%s14073_s8 + $0xb8] sm:$0xff] %v9601_v14 }
 0x4c7   : > { %v9605_v9 = vpop.f32.mrf.mxu1 }
 0x4c8   : > { %v9606_v10 = vadd.f32 %v14070_v35, %v9605_v9 }
 0x4c9   : > { %v9607_v8 = vpop.f32.mrf.mxu1 }
 0x4ca   : > { %9676 = vst [vmem:[%s14073_s8 + $0xc0] sm:$0xff] %v9606_v10 }
 0x4cb   : > { %v9608_v7 = vpop.f32.mrf.mxu1 }
 0x4cc   : > { %v9609_v42 = vadd.f32 %v14070_v35, %v9608_v7 }
 0x4cd   : > { %v9610_v47 = vpop.f32.mrf.mxu1 }
 0x4ce   : > { %9677 = vst [vmem:[%s14073_s8 + $0xc8] sm:$0xff] %v9609_v42 }
 0x4cf   : > { %v9613_v62 = vpop.f32.mrf.mxu1 }
 0x4d0   : > { %v9614_v26 = vadd.f32 %v14070_v35, %v9613_v62 }
 0x4d1   : > { %v9615_v56 = vpop.f32.mrf.mxu1 }
 0x4d2   : > { %9678 = vst [vmem:[%s14073_s8 + $0xd0] sm:$0xff] %v9614_v26 }
 0x4d3   : > { %v9616_v34 = vpop.f32.mrf.mxu1 }
 0x4d4   : > { %v9617_v40 = vadd.f32 %v14070_v35, %v9616_v34 }
 0x4d5   : > { %v9618_v36 = vpop.f32.mrf.mxu1 }
 0x4d6   : > { %9679 = vst [vmem:[%s14073_s8 + $0xd8] sm:$0xff] %v9617_v40 }
 0x4d7   : > { %v9621_v21 = vpop.f32.mrf.mxu1 }
 0x4d8   : > { %v9622_v2 = vadd.f32 %v14070_v35, %v9621_v21 }
 0x4d9   : > { %v9623_v31 = vpop.f32.mrf.mxu1 }
 0x4da   : > { %9680 = vst [vmem:[%s14073_s8 + $0xe0] sm:$0xff] %v9622_v2 }
 0x4db   : > { %v9624_v17 = vpop.f32.mrf.mxu1 }
 0x4dc   : > { %v9625_v4 = vadd.f32 %v14070_v35, %v9624_v17 }
 0x4dd   : > { %v9626_v12 = vpop.f32.mrf.mxu1 }
 0x4de   : > { %9681 = vst [vmem:[%s14073_s8 + $0xe8] sm:$0xff] %v9625_v4 }
 0x4df   : > { %v9629_v43 = vpop.f32.mrf.mxu1 }
 0x4e0   : > { %v9630_v3 = vadd.f32 %v14070_v35, %v9629_v43 }
 0x4e1   : > { %v9631_v60 = vpop.f32.mrf.mxu1 }
 0x4e2   : > { %9682 = vst [vmem:[%s14073_s8 + $0xf0] sm:$0xff] %v9630_v3 }
 0x4e3   : > { %v9632_v30 = vpop.f32.mrf.mxu1 }
 0x4e4   : > { %v9633_v24 = vadd.f32 %v14070_v35, %v9632_v30 }
 0x4e5   : > { %v9634_v25 = vpop.f32.mrf.mxu1 }
 0x4e6   : > { %9683 = vst [vmem:[%s14073_s8 + $0xf8] sm:$0xff] %v9633_v24 }
 0x4e7   : > { %v9637_v53 = vpop.f32.mrf.mxu1 }
 0x4e8   : > { %v9638_v23 = vadd.f32 %v14070_v35, %v9637_v53 }
 0x4e9   : > { %v9639_v1 = vpop.f32.mrf.mxu1 }
 0x4ea   : > { %9684 = vst [vmem:[%s14073_s8 + $0x100] sm:$0xff] %v9638_v23 }
 0x4eb   : > { %v9640_v37 = vpop.f32.mrf.mxu1 }
 0x4ec   : > { %v9641_v15 = vadd.f32 %v14070_v35, %v9640_v37 }
 0x4ed   : > { %v9642_v6 = vpop.f32.mrf.mxu1 }
 0x4ee   : > { %9685 = vst [vmem:[%s14073_s8 + $0x108] sm:$0xff] %v9641_v15 }
 0x4ef   : > { %v9645_v48 = vpop.f32.mrf.mxu1 }
 0x4f0   : > { %v9646_v41 = vadd.f32 %v14070_v35, %v9645_v48 }
 0x4f1   : > { %v9647_v20 = vpop.f32.mrf.mxu1 }
 0x4f2   : > { %9686 = vst [vmem:[%s14073_s8 + $0x110] sm:$0xff] %v9646_v41 }
 0x4f3   : > { %v9648_v54 = vpop.f32.mrf.mxu1 }
 0x4f4   : > { %v9649_v55 = vadd.f32 %v14070_v35, %v9648_v54 }
 0x4f5   : > { %v9650_v51 = vpop.f32.mrf.mxu1 }
 0x4f6   : > { %9687 = vst [vmem:[%s14073_s8 + $0x118] sm:$0xff] %v9649_v55 }
 0x4f7   : > { %11413 = shalt.err (!%p11410_p4)
}
 0x4f8   : > { %s11414_s10 = scalar_lea.hbm %s14149_s15, 4608  ;;  %s11418_s26 = scalar_lea.hbm %s14202_s5, 9216 }
 0x4f9   : > { %p11415_p13 = scmp.ne.s32.totalorder %s14149_s15, %s11414_s10  ;;  %p11419_p6 = scmp.lt.s32.totalorder %s14149_s15, %s14202_s5 }
 0x4fa   : > { %p11420_p12 = scmp.lt.s32.totalorder %s11418_s26, %s11414_s10 }
 0x4fb   : > { %p11416_p7 = pnand %p11415_p13, %p14652_p11 }
 0x4fc   : > { %p11421_p10 = por %p11420_p12, %p11419_p6 }
 0x4fd   : > { %p11417_p5 = pneg %p11416_p7 }
 0x4ff   : > { %p11422_p8 = pnand %p11421_p10, %p11417_p5 }
 0x501   : > { %11425 = shalt.err (!%p11422_p8)
}
 0x502   : > { %s11484_s8 = smov 128   ;;  %s11485_s11 = smov 8  }
 0x503   : > { %10485 = dma.vmem_to_hbm [thread:$0]  (%p14652_p11), %s14151_s13, 4608, %s14149_s15, %s14157_s22, %s11484_s8, %s11484_s8, %s11485_s11  }
 0x504 PF: > { %p10512_p0 = scmp.ge.s32.totalorder %s11472_s21, 2  ;;  %s9717_s9 = sand.u32 1, %s11460_s18  }
 0x505   : > { %p14653_p1 = scmp.ne.s32.totalorder %s14221_s29, 0  ;;  %s9718_s14 = scalar_lea.sflag [#allocation5], %s9717_s9 }
 0x507   : > { %p10501_p2 = pnand %p10512_p0, %p14653_p1 }
 0x509   : > { %p10502_p9 = pneg %p10501_p2 }
 0x50b   : > { %11455 = dma.done.wait (%p10502_p9), %s9718_s14, 4608  }
 0x50c   : > { %11457 = vsyncadd (%p10502_p9), %s9718_s14, 4294962688  ;;  %p18_p3 = scmp.ge.s32.totalorder %s11541_s24, 4   ;;  %s14654_s18 = smov %s11464_s19 }
 0x50d   : > { %s14655_s19 = smov %s11468_s20  ;;  %s14656_s20 = smov %s11552_s27 }
 0x50e   : > { %s14657_s21 = smov %s11541_s24  ;;  %20 = sbr.rel (!%p18_p3) target bundleno = 6 (0x6), region = 100 }
 0x513   :  { %9723 = vsyncpa [#allocation4], 1 }
 0x514   :  { %9725 = vsyncpa [#allocation4 + $0x1], 1 }
 0x515   :  { %9726 = vsyncpa [#allocation7], 1 }
 0x516   :  { %9727 = vsyncpa [#allocation10], 1 }
 0x517   :  { %9728 = vsyncpa [#allocation5], 1 }
 0x518   :  { %9730 = vsyncpa [#allocation5 + $0x1], 1 }

</bundles_post_ra>
